<compile_context>
chip_gen: v7x
topology: tpu7x:2x2x1
jax: 0.10.0
libtpu: 0.0.40
codegen_flags: <defaults>
</compile_context>

<pallas_src>
from functools import partial

import jax
import jax.numpy as jnp
from jax.experimental import pallas as pl
from jax.experimental.pallas import tpu as pltpu


# ---------------------------------------------------------------------------
# Kernel 1: conv1 as a lane-dense matmul with fused bias + ReLU.
#   out[8, M_tile] = relu(W[8, 162] @ cols[162, M_tile] + b[8, 1])
# ---------------------------------------------------------------------------
def _conv1_kernel(w_ref, x_ref, b_ref, o_ref):
    acc = jnp.dot(w_ref[...], x_ref[...], preferred_element_type=jnp.float32)
    acc = jnp.maximum(acc + b_ref[...], 0.0)
    o_ref[...] = acc.astype(o_ref.dtype)


def _round_up(x, m):
    return ((x + m - 1) // m) * m


def _pick_tm(M):
    # Exactly 2 grid steps: even per-core block count on v7x megacore, >=2 steps
    # so the pipeline overlaps on single-TC v5e/v6e, and the double-buffered
    # (162, TM) bf16 cols block stays ~6 MB (well under default scoped VMEM).
    return max(128, _round_up(pl.cdiv(M, 2), 128))


def conv1_matmul(w8, cols, b8):
    """w8: (8, 162) bf16, cols: (162, M) bf16, b8: (8, 1) f32 -> (8, M) bf16."""
    c8, K = w8.shape
    Kc, M = cols.shape
    assert K == Kc
    TM = _pick_tm(M)
    grid = (pl.cdiv(M, TM),)
    # NOTE (review): the last block is ragged (its cols block reads past M).
    # That is safe because every output column depends only on the same input
    # column and the OOB output lanes are masked on store.  Do NOT add any
    # cross-column (over-M) reduction to this kernel without revisiting this.
    return pl.pallas_call(
        _conv1_kernel,
        out_shape=jax.ShapeDtypeStruct((c8, M), jnp.bfloat16),
        grid=grid,
        in_specs=[
            pl.BlockSpec((c8, K), lambda i: (0, 0)),   # full weight (tiny)
            pl.BlockSpec((K, TM), lambda i: (0, i)),   # lane-dense cols tile
            pl.BlockSpec((c8, 1), lambda i: (0, 0)),   # bias column
        ],
        out_specs=pl.BlockSpec((c8, TM), lambda i: (0, i)),
        compiler_params=pltpu.CompilerParams(dimension_semantics=("parallel",)),
    )(w8, cols, b8)


# ---------------------------------------------------------------------------
# Kernel 2: fused conv2 + conv3 + fc1 + fc2 + log_softmax (single grid step,
# everything VMEM-resident, batched tail).
#   cols23_ref: (27, 162, N*125) bf16 — axis 0 = conv3 tap, axis 1 = conv2 K.
# ---------------------------------------------------------------------------
def _tail_kernel(cols23_ref, w2_ref, b2_ref, w3_ref, b3_ref,
                 w1t_ref, b1_ref, w2t_ref, b2fc_ref, o_ref, *, n_batch):
    n_pix = 125
    m = n_batch * n_pix
    acc = jnp.zeros((1, m), jnp.float32)
    # conv2 + conv3 fused: for each conv3 tap, run conv2 (one MXU pass) on
    # exactly the spatial positions that tap needs and accumulate its
    # contribution to conv3.  27 static iterations, each 2 small matmuls.
    for t in range(27):
        slab = cols23_ref[t]                                  # (162, N*125) bf16
        y = jnp.dot(w2_ref[...], slab, preferred_element_type=jnp.float32)
        y = jnp.maximum(y + b2_ref[...], 0.0)                 # conv2 + ReLU (8, N*125)
        acc = acc + jnp.dot(w3_ref[t], y,                     # (1,8)@(8,N*125)
                            preferred_element_type=jnp.float32)
    vrow = jnp.maximum(acc + b3_ref[...], 0.0)                # conv3 + ReLU (1, N*125)
    # (1, N*125) -> (N, 125): per-batch contiguous lane slices stacked on sublanes.
    view = jnp.concatenate(
        [vrow[:, n * n_pix:(n + 1) * n_pix] for n in range(n_batch)], axis=0)
    h1 = jnp.dot(view, w1t_ref[...], preferred_element_type=jnp.float32)
    h1 = jnp.maximum(h1 + b1_ref[...], 0.0)                   # fc1 + ReLU (N, 50)
    h2 = jnp.dot(h1, w2t_ref[...], preferred_element_type=jnp.float32)
    h2 = h2 + b2fc_ref[...]                                   # fc2 (N, 4)
    mx = jnp.max(h2, axis=-1, keepdims=True)
    lse = mx + jnp.log(jnp.sum(jnp.exp(h2 - mx), axis=-1, keepdims=True))
    o_ref[...] = (h2 - lse).astype(o_ref.dtype)               # log_softmax


# ---------------------------------------------------------------------------
# XLA-side glue: channel-major im2col (stack + reshape only, no transposes
# after the initial NCDHW -> channel-major one).
# ---------------------------------------------------------------------------
def _im2col_cm(a, out_size, stride):
    """a: (C, N, Dp, Hp, Wp), already padded.  Returns (C, 27, N, o, o, o)."""
    pats = []
    for kd in range(3):
        for kh in range(3):
            for kw in range(3):
                pats.append(a[:, :,
                              kd:kd + stride * out_size:stride,
                              kh:kh + stride * out_size:stride,
                              kw:kw + stride * out_size:stride])
    return jnp.stack(pats, axis=1)


def _conv1(x, params):
    """x: (N, 6, 41, 41, 41) f32 -> conv1+ReLU output (6, N, 21, 21, 21) bf16."""
    N = x.shape[0]
    a = jnp.transpose(x, (1, 0, 2, 3, 4)).astype(jnp.bfloat16)   # channel-major
    a = jnp.pad(a, ((0, 0), (0, 0), (1, 1), (1, 1), (1, 1)))     # padding=1
    cols = _im2col_cm(a, 21, 2).reshape(6 * 27, N * 21 ** 3)     # (162, M)
    w8 = jnp.zeros((8, 162), jnp.bfloat16).at[:6].set(
        params["conv1_w"].reshape(6, -1).astype(jnp.bfloat16))   # C_out padded 6->8
    b8 = jnp.zeros((8, 1), jnp.float32).at[:6, 0].set(params["conv1_b"])
    y = conv1_matmul(w8, cols, b8)                               # (8, M) bf16
    return y[:6].reshape(6, N, 21, 21, 21)


def _tail(a1, params):
    """a1: (6, N, 21, 21, 21) bf16 -> (N, 4) f32 log-probs (one fused pallas_call)."""
    N = a1.shape[1]
    a1p = jnp.pad(a1, ((0, 0), (0, 0), (1, 1), (1, 1), (1, 1)))  # conv2 padding=1
    cols2 = _im2col_cm(a1p, 11, 2)                               # (6, 27, N, 11, 11, 11)
    # Second-level im2col: conv3 taps (stride 2, no pad) over conv2's output grid.
    pats = []
    for kd in range(3):
        for kh in range(3):
            for kw in range(3):
                pats.append(cols2[:, :, :,
                                  kd:kd + 10:2, kh:kh + 10:2, kw:kw + 10:2])
    cols23 = jnp.stack(pats, axis=0).reshape(27, 162, N * 125)   # bf16, ~2.2 MB

    w2 = jnp.zeros((8, 162), jnp.bfloat16).at[:6].set(
        params["conv2_w"].reshape(6, -1).astype(jnp.bfloat16))
    b2 = jnp.zeros((8, 1), jnp.float32).at[:6, 0].set(params["conv2_b"])
    # per-conv3-tap weight rows, padded to the 8-channel conv2 output
    w3 = jnp.zeros((27, 1, 8), jnp.float32).at[:, :, :6].set(
        jnp.transpose(params["conv3_w"], (2, 3, 4, 0, 1)).reshape(27, 1, 6))
    b3 = params["conv3_b"].reshape(1, 1).astype(jnp.float32)
    w1t = params["fc1_w"].T.astype(jnp.float32)                  # (125, 50)
    b1 = params["fc1_b"].reshape(1, -1).astype(jnp.float32)      # (1, 50)
    w2t = params["fc2_w"].T.astype(jnp.float32)                  # (50, 4)
    b2fc = params["fc2_b"].reshape(1, -1).astype(jnp.float32)    # (1, 4)

    return pl.pallas_call(
        partial(_tail_kernel, n_batch=N),
        out_shape=jax.ShapeDtypeStruct((N, 4), jnp.float32),
    )(cols23, w2, b2, w3, b3, w1t, b1, w2t, b2fc)


# ---------------------------------------------------------------------------
# Parameter init (deterministic, PyTorch-default-style uniform(-1/sqrt(fan_in),.))
# ---------------------------------------------------------------------------
def init_params(key):
    def uinit(k, shape, fan_in):
        bound = 1.0 / jnp.sqrt(fan_in)
        return jax.random.uniform(k, shape, jnp.float32, -bound, bound)

    ks = jax.random.split(key, 10)
    return dict(
        conv1_w=uinit(ks[0], (6, 6, 3, 3, 3), 6 * 27),
        conv1_b=uinit(ks[1], (6,), 6 * 27),
        conv2_w=uinit(ks[2], (6, 6, 3, 3, 3), 6 * 27),
        conv2_b=uinit(ks[3], (6,), 6 * 27),
        conv3_w=uinit(ks[4], (1, 6, 3, 3, 3), 6 * 27),
        conv3_b=uinit(ks[5], (1,), 6 * 27),
        fc1_w=uinit(ks[6], (50, 125), 125),   # PyTorch Linear stores (out, in)
        fc1_b=uinit(ks[7], (50,), 125),
        fc2_w=uinit(ks[8], (4, 50), 50),
        fc2_b=uinit(ks[9], (4,), 50),
    )


# ---------------------------------------------------------------------------
# Forward pass (matches torch Net.forward semantics)
# ---------------------------------------------------------------------------
@jax.jit
def net_forward(x, params):
    a1 = _conv1(x, params)      # pallas_call 1: conv1 + ReLU
    return _tail(a1, params)    # pallas_call 2: conv2..log_softmax fused


if __name__ == "__main__":
    key = jax.random.PRNGKey(0)
    pkey, xkey = jax.random.split(key)
    params = init_params(pkey)

    # Smallest spatial size consistent with fc1 = Linear(5*5*5, 50):
    # 41 -> conv1(s2,p1) -> 21 -> conv2(s2,p1) -> 11 -> conv3(s2,p0) -> 5
    x = jax.random.normal(xkey, (2, 6, 41, 41, 41), dtype=jnp.float32)

    out = jax.block_until_ready(net_forward(x, params))
    assert out.shape == (2, 4), out.shape
    # log_softmax rows must exponentiate-sum to 1
    assert jnp.allclose(jnp.sum(jnp.exp(out), axis=1), 1.0, atol=1e-4)
    print("KERNEL_OK")
</pallas_src>

<mosaic_0001>
module attributes {stable_mosaic.version = 11 : i64} {
  func.func @_conv1_kernel(%arg0: i32, %arg1: memref<8x162xbf16, #tpu.memory_space<vmem>>, %arg2: memref<162x9344xbf16, #tpu.memory_space<vmem>>, %arg3: memref<8x1xf32, #tpu.memory_space<vmem>>, %arg4: memref<8x9344xbf16, #tpu.memory_space<vmem>>) attributes {dimension_semantics = [#tpu.dimension_semantics<parallel>], iteration_bounds = array<i64: 2>, scalar_prefetch = 0 : i64, scratch_operands = 0 : i64, tpu.core_type = #tpu.core_type<tc>, window_params = [{pipeline_mode = #tpu.pipeline_mode<synchronous>, transform_indices = @transform_0, window_bounds = array<i64: 8, 162>}, {transform_indices = @transform_1, window_bounds = array<i64: 162, 9344>}, {pipeline_mode = #tpu.pipeline_mode<synchronous>, transform_indices = @transform_2, window_bounds = array<i64: 8, 1>}, {transform_indices = @transform_3, window_bounds = array<i64: 8, 9344>}]} {
    %c0 = arith.constant 0 : index
    %c0_0 = arith.constant 0 : index
    %0 = vector.load %arg1[%c0, %c0_0] : memref<8x162xbf16, #tpu.memory_space<vmem>>, vector<8x162xbf16>
    %c0_1 = arith.constant 0 : index
    %c0_2 = arith.constant 0 : index
    %1 = vector.load %arg2[%c0_1, %c0_2] : memref<162x9344xbf16, #tpu.memory_space<vmem>>, vector<162x9344xbf16>
    %cst = arith.constant dense<0.000000e+00> : vector<8x9344xf32>
    %2 = tpu.matmul %0, %1, %cst {dimension_numbers = #tpu.dot_dimension_numbers<[1], [0], [0], [1], [0, 0, 1, 1], [], []>} : vector<8x162xbf16>, vector<162x9344xbf16>, vector<8x9344xf32> -> vector<8x9344xf32>
    %c0_3 = arith.constant 0 : index
    %c0_4 = arith.constant 0 : index
    %3 = vector.load %arg3[%c0_3, %c0_4] : memref<8x1xf32, #tpu.memory_space<vmem>>, vector<8x1xf32>
    %4 = vector.broadcast %3 : vector<8x1xf32> to vector<8x9344xf32>
    %5 = arith.addf %2, %4 : vector<8x9344xf32>
    %cst_5 = arith.constant 0.000000e+00 : f32
    %6 = vector.broadcast %cst_5 : f32 to vector<8x9344xf32>
    %7 = arith.maximumf %5, %6 : vector<8x9344xf32>
    %8 = arith.truncf %7 : vector<8x9344xf32> to vector<8x9344xbf16>
    %c0_6 = arith.constant 0 : index
    %c0_7 = arith.constant 0 : index
    %9 = vector.load %arg4[%c0_6, %c0_7] : memref<8x9344xbf16, #tpu.memory_space<vmem>>, vector<8x9344xbf16>
    tpu.vector_store %arg4[%c0_6, %c0_7], %8 {strides = array<i32>} : memref<8x9344xbf16, #tpu.memory_space<vmem>>, vector<8x9344xbf16>,
    return
  }
  func.func @transform_0(%arg0: i32) -> (i32, i32) {
    %c0_i32 = arith.constant 0 : i32
    %c0_i32_0 = arith.constant 0 : i32
    %c0_i32_1 = arith.constant 0 : i32
    return %c0_i32, %c0_i32_0 : i32, i32
  }
  func.func @transform_1(%arg0: i32) -> (i32, i32) {
    %c0_i32 = arith.constant 0 : i32
    %c0_i32_0 = arith.constant 0 : i32
    return %c0_i32, %arg0 : i32, i32
  }
  func.func @transform_2(%arg0: i32) -> (i32, i32) {
    %c0_i32 = arith.constant 0 : i32
    %c0_i32_0 = arith.constant 0 : i32
    %c0_i32_1 = arith.constant 0 : i32
    return %c0_i32, %c0_i32_0 : i32, i32
  }
  func.func @transform_3(%arg0: i32) -> (i32, i32) {
    %c0_i32 = arith.constant 0 : i32
    %c0_i32_0 = arith.constant 0 : i32
    return %c0_i32, %arg0 : i32, i32
  }
}

module attributes {stable_mosaic.version = 11 : i64} {
  func.func @_tail_kernel(%arg0: memref<27x162x250xbf16, #tpu.memory_space<vmem>>, %arg1: memref<8x162xbf16, #tpu.memory_space<vmem>>, %arg2: memref<8x1xf32, #tpu.memory_space<vmem>>, %arg3: memref<27x1x8xf32, #tpu.memory_space<vmem>>, %arg4: memref<1x1xf32, #tpu.memory_space<vmem>>, %arg5: memref<125x50xf32, #tpu.memory_space<vmem>>, %arg6: memref<1x50xf32, #tpu.memory_space<vmem>>, %arg7: memref<50x4xf32, #tpu.memory_space<vmem>>, %arg8: memref<1x4xf32, #tpu.memory_space<vmem>>, %arg9: memref<2x4xf32, #tpu.memory_space<vmem>>) attributes {dimension_semantics = [], scalar_prefetch = 0 : i64, scratch_operands = 0 : i64, tpu.core_type = #tpu.core_type<tc>} {
    %cst = arith.constant 0.000000e+00 : f32
    %0 = vector.broadcast %cst : f32 to vector<1x250xf32>
    %c0 = arith.constant 0 : index
    %c0_0 = arith.constant 0 : index
    %c0_1 = arith.constant 0 : index
    %1 = vector.load %arg0[%c0, %c0_0, %c0_1] : memref<27x162x250xbf16, #tpu.memory_space<vmem>>, vector<1x162x250xbf16>
    %2 = vector.shape_cast %1 : vector<1x162x250xbf16> to vector<162x250xbf16>
    %c0_2 = arith.constant 0 : index
    %c0_3 = arith.constant 0 : index
    %3 = vector.load %arg1[%c0_2, %c0_3] : memref<8x162xbf16, #tpu.memory_space<vmem>>, vector<8x162xbf16>
    %cst_4 = arith.constant dense<0.000000e+00> : vector<8x250xf32>
    %4 = tpu.matmul %3, %2, %cst_4 {dimension_numbers = #tpu.dot_dimension_numbers<[1], [0], [0], [1], [0, 0, 1, 1], [], []>} : vector<8x162xbf16>, vector<162x250xbf16>, vector<8x250xf32> -> vector<8x250xf32>
    %c0_5 = arith.constant 0 : index
    %c0_6 = arith.constant 0 : index
    %5 = vector.load %arg2[%c0_5, %c0_6] : memref<8x1xf32, #tpu.memory_space<vmem>>, vector<8x1xf32>
    %6 = vector.broadcast %5 : vector<8x1xf32> to vector<8x250xf32>
    %7 = arith.addf %4, %6 : vector<8x250xf32>
    %cst_7 = arith.constant 0.000000e+00 : f32
    %8 = vector.broadcast %cst_7 : f32 to vector<8x250xf32>
    %9 = arith.maximumf %7, %8 : vector<8x250xf32>
    %c0_8 = arith.constant 0 : index
    %c0_9 = arith.constant 0 : index
    %c0_10 = arith.constant 0 : index
    %10 = vector.load %arg3[%c0_8, %c0_9, %c0_10] : memref<27x1x8xf32, #tpu.memory_space<vmem>>, vector<1x1x8xf32>
    %11 = vector.shape_cast %10 : vector<1x1x8xf32> to vector<1x8xf32>
    %cst_11 = arith.constant dense<0.000000e+00> : vector<1x250xf32>
    %12 = tpu.matmul %11, %9, %cst_11 {dimension_numbers = #tpu.dot_dimension_numbers<[1], [0], [0], [1], [0, 0, 1, 1], [], []>} : vector<1x8xf32>, vector<8x250xf32>, vector<1x250xf32> -> vector<1x250xf32>
    %13 = arith.addf %0, %12 : vector<1x250xf32>
    %c1 = arith.constant 1 : index
    %c0_12 = arith.constant 0 : index
    %c0_13 = arith.constant 0 : index
    %14 = vector.load %arg0[%c1, %c0_12, %c0_13] : memref<27x162x250xbf16, #tpu.memory_space<vmem>>, vector<1x162x250xbf16>
    %15 = vector.shape_cast %14 : vector<1x162x250xbf16> to vector<162x250xbf16>
    %c0_14 = arith.constant 0 : index
    %c0_15 = arith.constant 0 : index
    %16 = vector.load %arg1[%c0_14, %c0_15] : memref<8x162xbf16, #tpu.memory_space<vmem>>, vector<8x162xbf16>
    %cst_16 = arith.constant dense<0.000000e+00> : vector<8x250xf32>
    %17 = tpu.matmul %16, %15, %cst_16 {dimension_numbers = #tpu.dot_dimension_numbers<[1], [0], [0], [1], [0, 0, 1, 1], [], []>} : vector<8x162xbf16>, vector<162x250xbf16>, vector<8x250xf32> -> vector<8x250xf32>
    %c0_17 = arith.constant 0 : index
    %c0_18 = arith.constant 0 : index
    %18 = vector.load %arg2[%c0_17, %c0_18] : memref<8x1xf32, #tpu.memory_space<vmem>>, vector<8x1xf32>
    %19 = vector.broadcast %18 : vector<8x1xf32> to vector<8x250xf32>
    %20 = arith.addf %17, %19 : vector<8x250xf32>
    %cst_19 = arith.constant 0.000000e+00 : f32
    %21 = vector.broadcast %cst_19 : f32 to vector<8x250xf32>
    %22 = arith.maximumf %20, %21 : vector<8x250xf32>
    %c1_20 = arith.constant 1 : index
    %c0_21 = arith.constant 0 : index
    %c0_22 = arith.constant 0 : index
    %23 = vector.load %arg3[%c1_20, %c0_21, %c0_22] : memref<27x1x8xf32, #tpu.memory_space<vmem>>, vector<1x1x8xf32>
    %24 = vector.shape_cast %23 : vector<1x1x8xf32> to vector<1x8xf32>
    %cst_23 = arith.constant dense<0.000000e+00> : vector<1x250xf32>
    %25 = tpu.matmul %24, %22, %cst_23 {dimension_numbers = #tpu.dot_dimension_numbers<[1], [0], [0], [1], [0, 0, 1, 1], [], []>} : vector<1x8xf32>, vector<8x250xf32>, vector<1x250xf32> -> vector<1x250xf32>
    %26 = arith.addf %13, %25 : vector<1x250xf32>
    %c2 = arith.constant 2 : index
    %c0_24 = arith.constant 0 : index
    %c0_25 = arith.constant 0 : index
    %27 = vector.load %arg0[%c2, %c0_24, %c0_25] : memref<27x162x250xbf16, #tpu.memory_space<vmem>>, vector<1x162x250xbf16>
    %28 = vector.shape_cast %27 : vector<1x162x250xbf16> to vector<162x250xbf16>
    %c0_26 = arith.constant 0 : index
    %c0_27 = arith.constant 0 : index
    %29 = vector.load %arg1[%c0_26, %c0_27] : memref<8x162xbf16, #tpu.memory_space<vmem>>, vector<8x162xbf16>
    %cst_28 = arith.constant dense<0.000000e+00> : vector<8x250xf32>
    %30 = tpu.matmul %29, %28, %cst_28 {dimension_numbers = #tpu.dot_dimension_numbers<[1], [0], [0], [1], [0, 0, 1, 1], [], []>} : vector<8x162xbf16>, vector<162x250xbf16>, vector<8x250xf32> -> vector<8x250xf32>
    %c0_29 = arith.constant 0 : index
    %c0_30 = arith.constant 0 : index
    %31 = vector.load %arg2[%c0_29, %c0_30] : memref<8x1xf32, #tpu.memory_space<vmem>>, vector<8x1xf32>
    %32 = vector.broadcast %31 : vector<8x1xf32> to vector<8x250xf32>
    %33 = arith.addf %30, %32 : vector<8x250xf32>
    %cst_31 = arith.constant 0.000000e+00 : f32
    %34 = vector.broadcast %cst_31 : f32 to vector<8x250xf32>
    %35 = arith.maximumf %33, %34 : vector<8x250xf32>
    %c2_32 = arith.constant 2 : index
    %c0_33 = arith.constant 0 : index
    %c0_34 = arith.constant 0 : index
    %36 = vector.load %arg3[%c2_32, %c0_33, %c0_34] : memref<27x1x8xf32, #tpu.memory_space<vmem>>, vector<1x1x8xf32>
    %37 = vector.shape_cast %36 : vector<1x1x8xf32> to vector<1x8xf32>
    %cst_35 = arith.constant dense<0.000000e+00> : vector<1x250xf32>
    %38 = tpu.matmul %37, %35, %cst_35 {dimension_numbers = #tpu.dot_dimension_numbers<[1], [0], [0], [1], [0, 0, 1, 1], [], []>} : vector<1x8xf32>, vector<8x250xf32>, vector<1x250xf32> -> vector<1x250xf32>
    %39 = arith.addf %26, %38 : vector<1x250xf32>
    %c3 = arith.constant 3 : index
    %c0_36 = arith.constant 0 : index
    %c0_37 = arith.constant 0 : index
    %40 = vector.load %arg0[%c3, %c0_36, %c0_37] : memref<27x162x250xbf16, #tpu.memory_space<vmem>>, vector<1x162x250xbf16>
    %41 = vector.shape_cast %40 : vector<1x162x250xbf16> to vector<162x250xbf16>
    %c0_38 = arith.constant 0 : index
    %c0_39 = arith.constant 0 : index
    %42 = vector.load %arg1[%c0_38, %c0_39] : memref<8x162xbf16, #tpu.memory_space<vmem>>, vector<8x162xbf16>
    %cst_40 = arith.constant dense<0.000000e+00> : vector<8x250xf32>
    %43 = tpu.matmul %42, %41, %cst_40 {dimension_numbers = #tpu.dot_dimension_numbers<[1], [0], [0], [1], [0, 0, 1, 1], [], []>} : vector<8x162xbf16>, vector<162x250xbf16>, vector<8x250xf32> -> vector<8x250xf32>
    %c0_41 = arith.constant 0 : index
    %c0_42 = arith.constant 0 : index
    %44 = vector.load %arg2[%c0_41, %c0_42] : memref<8x1xf32, #tpu.memory_space<vmem>>, vector<8x1xf32>
    %45 = vector.broadcast %44 : vector<8x1xf32> to vector<8x250xf32>
    %46 = arith.addf %43, %45 : vector<8x250xf32>
    %cst_43 = arith.constant 0.000000e+00 : f32
    %47 = vector.broadcast %cst_43 : f32 to vector<8x250xf32>
    %48 = arith.maximumf %46, %47 : vector<8x250xf32>
    %c3_44 = arith.constant 3 : index
    %c0_45 = arith.constant 0 : index
    %c0_46 = arith.constant 0 : index
    %49 = vector.load %arg3[%c3_44, %c0_45, %c0_46] : memref<27x1x8xf32, #tpu.memory_space<vmem>>, vector<1x1x8xf32>
    %50 = vector.shape_cast %49 : vector<1x1x8xf32> to vector<1x8xf32>
    %cst_47 = arith.constant dense<0.000000e+00> : vector<1x250xf32>
    %51 = tpu.matmul %50, %48, %cst_47 {dimension_numbers = #tpu.dot_dimension_numbers<[1], [0], [0], [1], [0, 0, 1, 1], [], []>} : vector<1x8xf32>, vector<8x250xf32>, vector<1x250xf32> -> vector<1x250xf32>
    %52 = arith.addf %39, %51 : vector<1x250xf32>
    %c4 = arith.constant 4 : index
    %c0_48 = arith.constant 0 : index
    %c0_49 = arith.constant 0 : index
    %53 = vector.load %arg0[%c4, %c0_48, %c0_49] : memref<27x162x250xbf16, #tpu.memory_space<vmem>>, vector<1x162x250xbf16>
    %54 = vector.shape_cast %53 : vector<1x162x250xbf16> to vector<162x250xbf16>
    %c0_50 = arith.constant 0 : index
    %c0_51 = arith.constant 0 : index
    %55 = vector.load %arg1[%c0_50, %c0_51] : memref<8x162xbf16, #tpu.memory_space<vmem>>, vector<8x162xbf16>
    %cst_52 = arith.constant dense<0.000000e+00> : vector<8x250xf32>
    %56 = tpu.matmul %55, %54, %cst_52 {dimension_numbers = #tpu.dot_dimension_numbers<[1], [0], [0], [1], [0, 0, 1, 1], [], []>} : vector<8x162xbf16>, vector<162x250xbf16>, vector<8x250xf32> -> vector<8x250xf32>
    %c0_53 = arith.constant 0 : index
    %c0_54 = arith.constant 0 : index
    %57 = vector.load %arg2[%c0_53, %c0_54] : memref<8x1xf32, #tpu.memory_space<vmem>>, vector<8x1xf32>
    %58 = vector.broadcast %57 : vector<8x1xf32> to vector<8x250xf32>
    %59 = arith.addf %56, %58 : vector<8x250xf32>
    %cst_55 = arith.constant 0.000000e+00 : f32
    %60 = vector.broadcast %cst_55 : f32 to vector<8x250xf32>
    %61 = arith.maximumf %59, %60 : vector<8x250xf32>
    %c4_56 = arith.constant 4 : index
    %c0_57 = arith.constant 0 : index
    %c0_58 = arith.constant 0 : index
    %62 = vector.load %arg3[%c4_56, %c0_57, %c0_58] : memref<27x1x8xf32, #tpu.memory_space<vmem>>, vector<1x1x8xf32>
    %63 = vector.shape_cast %62 : vector<1x1x8xf32> to vector<1x8xf32>
    %cst_59 = arith.constant dense<0.000000e+00> : vector<1x250xf32>
    %64 = tpu.matmul %63, %61, %cst_59 {dimension_numbers = #tpu.dot_dimension_numbers<[1], [0], [0], [1], [0, 0, 1, 1], [], []>} : vector<1x8xf32>, vector<8x250xf32>, vector<1x250xf32> -> vector<1x250xf32>
    %65 = arith.addf %52, %64 : vector<1x250xf32>
    %c5 = arith.constant 5 : index
    %c0_60 = arith.constant 0 : index
    %c0_61 = arith.constant 0 : index
    %66 = vector.load %arg0[%c5, %c0_60, %c0_61] : memref<27x162x250xbf16, #tpu.memory_space<vmem>>, vector<1x162x250xbf16>
    %67 = vector.shape_cast %66 : vector<1x162x250xbf16> to vector<162x250xbf16>
    %c0_62 = arith.constant 0 : index
    %c0_63 = arith.constant 0 : index
    %68 = vector.load %arg1[%c0_62, %c0_63] : memref<8x162xbf16, #tpu.memory_space<vmem>>, vector<8x162xbf16>
    %cst_64 = arith.constant dense<0.000000e+00> : vector<8x250xf32>
    %69 = tpu.matmul %68, %67, %cst_64 {dimension_numbers = #tpu.dot_dimension_numbers<[1], [0], [0], [1], [0, 0, 1, 1], [], []>} : vector<8x162xbf16>, vector<162x250xbf16>, vector<8x250xf32> -> vector<8x250xf32>
    %c0_65 = arith.constant 0 : index
    %c0_66 = arith.constant 0 : index
    %70 = vector.load %arg2[%c0_65, %c0_66] : memref<8x1xf32, #tpu.memory_space<vmem>>, vector<8x1xf32>
    %71 = vector.broadcast %70 : vector<8x1xf32> to vector<8x250xf32>
    %72 = arith.addf %69, %71 : vector<8x250xf32>
    %cst_67 = arith.constant 0.000000e+00 : f32
    %73 = vector.broadcast %cst_67 : f32 to vector<8x250xf32>
    %74 = arith.maximumf %72, %73 : vector<8x250xf32>
    %c5_68 = arith.constant 5 : index
    %c0_69 = arith.constant 0 : index
    %c0_70 = arith.constant 0 : index
    %75 = vector.load %arg3[%c5_68, %c0_69, %c0_70] : memref<27x1x8xf32, #tpu.memory_space<vmem>>, vector<1x1x8xf32>
    %76 = vector.shape_cast %75 : vector<1x1x8xf32> to vector<1x8xf32>
    %cst_71 = arith.constant dense<0.000000e+00> : vector<1x250xf32>
    %77 = tpu.matmul %76, %74, %cst_71 {dimension_numbers = #tpu.dot_dimension_numbers<[1], [0], [0], [1], [0, 0, 1, 1], [], []>} : vector<1x8xf32>, vector<8x250xf32>, vector<1x250xf32> -> vector<1x250xf32>
    %78 = arith.addf %65, %77 : vector<1x250xf32>
    %c6 = arith.constant 6 : index
    %c0_72 = arith.constant 0 : index
    %c0_73 = arith.constant 0 : index
    %79 = vector.load %arg0[%c6, %c0_72, %c0_73] : memref<27x162x250xbf16, #tpu.memory_space<vmem>>, vector<1x162x250xbf16>
    %80 = vector.shape_cast %79 : vector<1x162x250xbf16> to vector<162x250xbf16>
    %c0_74 = arith.constant 0 : index
    %c0_75 = arith.constant 0 : index
    %81 = vector.load %arg1[%c0_74, %c0_75] : memref<8x162xbf16, #tpu.memory_space<vmem>>, vector<8x162xbf16>
    %cst_76 = arith.constant dense<0.000000e+00> : vector<8x250xf32>
    %82 = tpu.matmul %81, %80, %cst_76 {dimension_numbers = #tpu.dot_dimension_numbers<[1], [0], [0], [1], [0, 0, 1, 1], [], []>} : vector<8x162xbf16>, vector<162x250xbf16>, vector<8x250xf32> -> vector<8x250xf32>
    %c0_77 = arith.constant 0 : index
    %c0_78 = arith.constant 0 : index
    %83 = vector.load %arg2[%c0_77, %c0_78] : memref<8x1xf32, #tpu.memory_space<vmem>>, vector<8x1xf32>
    %84 = vector.broadcast %83 : vector<8x1xf32> to vector<8x250xf32>
    %85 = arith.addf %82, %84 : vector<8x250xf32>
    %cst_79 = arith.constant 0.000000e+00 : f32
    %86 = vector.broadcast %cst_79 : f32 to vector<8x250xf32>
    %87 = arith.maximumf %85, %86 : vector<8x250xf32>
    %c6_80 = arith.constant 6 : index
    %c0_81 = arith.constant 0 : index
    %c0_82 = arith.constant 0 : index
    %88 = vector.load %arg3[%c6_80, %c0_81, %c0_82] : memref<27x1x8xf32, #tpu.memory_space<vmem>>, vector<1x1x8xf32>
    %89 = vector.shape_cast %88 : vector<1x1x8xf32> to vector<1x8xf32>
    %cst_83 = arith.constant dense<0.000000e+00> : vector<1x250xf32>
    %90 = tpu.matmul %89, %87, %cst_83 {dimension_numbers = #tpu.dot_dimension_numbers<[1], [0], [0], [1], [0, 0, 1, 1], [], []>} : vector<1x8xf32>, vector<8x250xf32>, vector<1x250xf32> -> vector<1x250xf32>
    %91 = arith.addf %78, %90 : vector<1x250xf32>
    %c7 = arith.constant 7 : index
    %c0_84 = arith.constant 0 : index
    %c0_85 = arith.constant 0 : index
    %92 = vector.load %arg0[%c7, %c0_84, %c0_85] : memref<27x162x250xbf16, #tpu.memory_space<vmem>>, vector<1x162x250xbf16>
    %93 = vector.shape_cast %92 : vector<1x162x250xbf16> to vector<162x250xbf16>
    %c0_86 = arith.constant 0 : index
    %c0_87 = arith.constant 0 : index
    %94 = vector.load %arg1[%c0_86, %c0_87] : memref<8x162xbf16, #tpu.memory_space<vmem>>, vector<8x162xbf16>
    %cst_88 = arith.constant dense<0.000000e+00> : vector<8x250xf32>
    %95 = tpu.matmul %94, %93, %cst_88 {dimension_numbers = #tpu.dot_dimension_numbers<[1], [0], [0], [1], [0, 0, 1, 1], [], []>} : vector<8x162xbf16>, vector<162x250xbf16>, vector<8x250xf32> -> vector<8x250xf32>
    %c0_89 = arith.constant 0 : index
    %c0_90 = arith.constant 0 : index
    %96 = vector.load %arg2[%c0_89, %c0_90] : memref<8x1xf32, #tpu.memory_space<vmem>>, vector<8x1xf32>
    %97 = vector.broadcast %96 : vector<8x1xf32> to vector<8x250xf32>
    %98 = arith.addf %95, %97 : vector<8x250xf32>
    %cst_91 = arith.constant 0.000000e+00 : f32
    %99 = vector.broadcast %cst_91 : f32 to vector<8x250xf32>
    %100 = arith.maximumf %98, %99 : vector<8x250xf32>
    %c7_92 = arith.constant 7 : index
    %c0_93 = arith.constant 0 : index
    %c0_94 = arith.constant 0 : index
    %101 = vector.load %arg3[%c7_92, %c0_93, %c0_94] : memref<27x1x8xf32, #tpu.memory_space<vmem>>, vector<1x1x8xf32>
    %102 = vector.shape_cast %101 : vector<1x1x8xf32> to vector<1x8xf32>
    %cst_95 = arith.constant dense<0.000000e+00> : vector<1x250xf32>
    %103 = tpu.matmul %102, %100, %cst_95 {dimension_numbers = #tpu.dot_dimension_numbers<[1], [0], [0], [1], [0, 0, 1, 1], [], []>} : vector<1x8xf32>, vector<8x250xf32>, vector<1x250xf32> -> vector<1x250xf32>
    %104 = arith.addf %91, %103 : vector<1x250xf32>
    %c8 = arith.constant 8 : index
    %c0_96 = arith.constant 0 : index
    %c0_97 = arith.constant 0 : index
    %105 = vector.load %arg0[%c8, %c0_96, %c0_97] : memref<27x162x250xbf16, #tpu.memory_space<vmem>>, vector<1x162x250xbf16>
    %106 = vector.shape_cast %105 : vector<1x162x250xbf16> to vector<162x250xbf16>
    %c0_98 = arith.constant 0 : index
    %c0_99 = arith.constant 0 : index
    %107 = vector.load %arg1[%c0_98, %c0_99] : memref<8x162xbf16, #tpu.memory_space<vmem>>, vector<8x162xbf16>
    %cst_100 = arith.constant dense<0.000000e+00> : vector<8x250xf32>
    %108 = tpu.matmul %107, %106, %cst_100 {dimension_numbers = #tpu.dot_dimension_numbers<[1], [0], [0], [1], [0, 0, 1, 1], [], []>} : vector<8x162xbf16>, vector<162x250xbf16>, vector<8x250xf32> -> vector<8x250xf32>
    %c0_101 = arith.constant 0 : index
    %c0_102 = arith.constant 0 : index
    %109 = vector.load %arg2[%c0_101, %c0_102] : memref<8x1xf32, #tpu.memory_space<vmem>>, vector<8x1xf32>
    %110 = vector.broadcast %109 : vector<8x1xf32> to vector<8x250xf32>
    %111 = arith.addf %108, %110 : vector<8x250xf32>
    %cst_103 = arith.constant 0.000000e+00 : f32
    %112 = vector.broadcast %cst_103 : f32 to vector<8x250xf32>
    %113 = arith.maximumf %111, %112 : vector<8x250xf32>
    %c8_104 = arith.constant 8 : index
    %c0_105 = arith.constant 0 : index
    %c0_106 = arith.constant 0 : index
    %114 = vector.load %arg3[%c8_104, %c0_105, %c0_106] : memref<27x1x8xf32, #tpu.memory_space<vmem>>, vector<1x1x8xf32>
    %115 = vector.shape_cast %114 : vector<1x1x8xf32> to vector<1x8xf32>
    %cst_107 = arith.constant dense<0.000000e+00> : vector<1x250xf32>
    %116 = tpu.matmul %115, %113, %cst_107 {dimension_numbers = #tpu.dot_dimension_numbers<[1], [0], [0], [1], [0, 0, 1, 1], [], []>} : vector<1x8xf32>, vector<8x250xf32>, vector<1x250xf32> -> vector<1x250xf32>
    %117 = arith.addf %104, %116 : vector<1x250xf32>
    %c9 = arith.constant 9 : index
    %c0_108 = arith.constant 0 : index
    %c0_109 = arith.constant 0 : index
    %118 = vector.load %arg0[%c9, %c0_108, %c0_109] : memref<27x162x250xbf16, #tpu.memory_space<vmem>>, vector<1x162x250xbf16>
    %119 = vector.shape_cast %118 : vector<1x162x250xbf16> to vector<162x250xbf16>
    %c0_110 = arith.constant 0 : index
    %c0_111 = arith.constant 0 : index
    %120 = vector.load %arg1[%c0_110, %c0_111] : memref<8x162xbf16, #tpu.memory_space<vmem>>, vector<8x162xbf16>
    %cst_112 = arith.constant dense<0.000000e+00> : vector<8x250xf32>
    %121 = tpu.matmul %120, %119, %cst_112 {dimension_numbers = #tpu.dot_dimension_numbers<[1], [0], [0], [1], [0, 0, 1, 1], [], []>} : vector<8x162xbf16>, vector<162x250xbf16>, vector<8x250xf32> -> vector<8x250xf32>
    %c0_113 = arith.constant 0 : index
    %c0_114 = arith.constant 0 : index
    %122 = vector.load %arg2[%c0_113, %c0_114] : memref<8x1xf32, #tpu.memory_space<vmem>>, vector<8x1xf32>
    %123 = vector.broadcast %122 : vector<8x1xf32> to vector<8x250xf32>
    %124 = arith.addf %121, %123 : vector<8x250xf32>
    %cst_115 = arith.constant 0.000000e+00 : f32
    %125 = vector.broadcast %cst_115 : f32 to vector<8x250xf32>
    %126 = arith.maximumf %124, %125 : vector<8x250xf32>
    %c9_116 = arith.constant 9 : index
    %c0_117 = arith.constant 0 : index
    %c0_118 = arith.constant 0 : index
    %127 = vector.load %arg3[%c9_116, %c0_117, %c0_118] : memref<27x1x8xf32, #tpu.memory_space<vmem>>, vector<1x1x8xf32>
    %128 = vector.shape_cast %127 : vector<1x1x8xf32> to vector<1x8xf32>
    %cst_119 = arith.constant dense<0.000000e+00> : vector<1x250xf32>
    %129 = tpu.matmul %128, %126, %cst_119 {dimension_numbers = #tpu.dot_dimension_numbers<[1], [0], [0], [1], [0, 0, 1, 1], [], []>} : vector<1x8xf32>, vector<8x250xf32>, vector<1x250xf32> -> vector<1x250xf32>
    %130 = arith.addf %117, %129 : vector<1x250xf32>
    %c10 = arith.constant 10 : index
    %c0_120 = arith.constant 0 : index
    %c0_121 = arith.constant 0 : index
    %131 = vector.load %arg0[%c10, %c0_120, %c0_121] : memref<27x162x250xbf16, #tpu.memory_space<vmem>>, vector<1x162x250xbf16>
    %132 = vector.shape_cast %131 : vector<1x162x250xbf16> to vector<162x250xbf16>
    %c0_122 = arith.constant 0 : index
    %c0_123 = arith.constant 0 : index
    %133 = vector.load %arg1[%c0_122, %c0_123] : memref<8x162xbf16, #tpu.memory_space<vmem>>, vector<8x162xbf16>
    %cst_124 = arith.constant dense<0.000000e+00> : vector<8x250xf32>
    %134 = tpu.matmul %133, %132, %cst_124 {dimension_numbers = #tpu.dot_dimension_numbers<[1], [0], [0], [1], [0, 0, 1, 1], [], []>} : vector<8x162xbf16>, vector<162x250xbf16>, vector<8x250xf32> -> vector<8x250xf32>
    %c0_125 = arith.constant 0 : index
    %c0_126 = arith.constant 0 : index
    %135 = vector.load %arg2[%c0_125, %c0_126] : memref<8x1xf32, #tpu.memory_space<vmem>>, vector<8x1xf32>
    %136 = vector.broadcast %135 : vector<8x1xf32> to vector<8x250xf32>
    %137 = arith.addf %134, %136 : vector<8x250xf32>
    %cst_127 = arith.constant 0.000000e+00 : f32
    %138 = vector.broadcast %cst_127 : f32 to vector<8x250xf32>
    %139 = arith.maximumf %137, %138 : vector<8x250xf32>
    %c10_128 = arith.constant 10 : index
    %c0_129 = arith.constant 0 : index
    %c0_130 = arith.constant 0 : index
    %140 = vector.load %arg3[%c10_128, %c0_129, %c0_130] : memref<27x1x8xf32, #tpu.memory_space<vmem>>, vector<1x1x8xf32>
    %141 = vector.shape_cast %140 : vector<1x1x8xf32> to vector<1x8xf32>
    %cst_131 = arith.constant dense<0.000000e+00> : vector<1x250xf32>
    %142 = tpu.matmul %141, %139, %cst_131 {dimension_numbers = #tpu.dot_dimension_numbers<[1], [0], [0], [1], [0, 0, 1, 1], [], []>} : vector<1x8xf32>, vector<8x250xf32>, vector<1x250xf32> -> vector<1x250xf32>
    %143 = arith.addf %130, %142 : vector<1x250xf32>
    %c11 = arith.constant 11 : index
    %c0_132 = arith.constant 0 : index
    %c0_133 = arith.constant 0 : index
    %144 = vector.load %arg0[%c11, %c0_132, %c0_133] : memref<27x162x250xbf16, #tpu.memory_space<vmem>>, vector<1x162x250xbf16>
    %145 = vector.shape_cast %144 : vector<1x162x250xbf16> to vector<162x250xbf16>
    %c0_134 = arith.constant 0 : index
    %c0_135 = arith.constant 0 : index
    %146 = vector.load %arg1[%c0_134, %c0_135] : memref<8x162xbf16, #tpu.memory_space<vmem>>, vector<8x162xbf16>
    %cst_136 = arith.constant dense<0.000000e+00> : vector<8x250xf32>
    %147 = tpu.matmul %146, %145, %cst_136 {dimension_numbers = #tpu.dot_dimension_numbers<[1], [0], [0], [1], [0, 0, 1, 1], [], []>} : vector<8x162xbf16>, vector<162x250xbf16>, vector<8x250xf32> -> vector<8x250xf32>
    %c0_137 = arith.constant 0 : index
    %c0_138 = arith.constant 0 : index
    %148 = vector.load %arg2[%c0_137, %c0_138] : memref<8x1xf32, #tpu.memory_space<vmem>>, vector<8x1xf32>
    %149 = vector.broadcast %148 : vector<8x1xf32> to vector<8x250xf32>
    %150 = arith.addf %147, %149 : vector<8x250xf32>
    %cst_139 = arith.constant 0.000000e+00 : f32
    %151 = vector.broadcast %cst_139 : f32 to vector<8x250xf32>
    %152 = arith.maximumf %150, %151 : vector<8x250xf32>
    %c11_140 = arith.constant 11 : index
    %c0_141 = arith.constant 0 : index
    %c0_142 = arith.constant 0 : index
    %153 = vector.load %arg3[%c11_140, %c0_141, %c0_142] : memref<27x1x8xf32, #tpu.memory_space<vmem>>, vector<1x1x8xf32>
    %154 = vector.shape_cast %153 : vector<1x1x8xf32> to vector<1x8xf32>
    %cst_143 = arith.constant dense<0.000000e+00> : vector<1x250xf32>
    %155 = tpu.matmul %154, %152, %cst_143 {dimension_numbers = #tpu.dot_dimension_numbers<[1], [0], [0], [1], [0, 0, 1, 1], [], []>} : vector<1x8xf32>, vector<8x250xf32>, vector<1x250xf32> -> vector<1x250xf32>
    %156 = arith.addf %143, %155 : vector<1x250xf32>
    %c12 = arith.constant 12 : index
    %c0_144 = arith.constant 0 : index
    %c0_145 = arith.constant 0 : index
    %157 = vector.load %arg0[%c12, %c0_144, %c0_145] : memref<27x162x250xbf16, #tpu.memory_space<vmem>>, vector<1x162x250xbf16>
    %158 = vector.shape_cast %157 : vector<1x162x250xbf16> to vector<162x250xbf16>
    %c0_146 = arith.constant 0 : index
    %c0_147 = arith.constant 0 : index
    %159 = vector.load %arg1[%c0_146, %c0_147] : memref<8x162xbf16, #tpu.memory_space<vmem>>, vector<8x162xbf16>
    %cst_148 = arith.constant dense<0.000000e+00> : vector<8x250xf32>
    %160 = tpu.matmul %159, %158, %cst_148 {dimension_numbers = #tpu.dot_dimension_numbers<[1], [0], [0], [1], [0, 0, 1, 1], [], []>} : vector<8x162xbf16>, vector<162x250xbf16>, vector<8x250xf32> -> vector<8x250xf32>
    %c0_149 = arith.constant 0 : index
    %c0_150 = arith.constant 0 : index
    %161 = vector.load %arg2[%c0_149, %c0_150] : memref<8x1xf32, #tpu.memory_space<vmem>>, vector<8x1xf32>
    %162 = vector.broadcast %161 : vector<8x1xf32> to vector<8x250xf32>
    %163 = arith.addf %160, %162 : vector<8x250xf32>
    %cst_151 = arith.constant 0.000000e+00 : f32
    %164 = vector.broadcast %cst_151 : f32 to vector<8x250xf32>
    %165 = arith.maximumf %163, %164 : vector<8x250xf32>
    %c12_152 = arith.constant 12 : index
    %c0_153 = arith.constant 0 : index
    %c0_154 = arith.constant 0 : index
    %166 = vector.load %arg3[%c12_152, %c0_153, %c0_154] : memref<27x1x8xf32, #tpu.memory_space<vmem>>, vector<1x1x8xf32>
    %167 = vector.shape_cast %166 : vector<1x1x8xf32> to vector<1x8xf32>
    %cst_155 = arith.constant dense<0.000000e+00> : vector<1x250xf32>
    %168 = tpu.matmul %167, %165, %cst_155 {dimension_numbers = #tpu.dot_dimension_numbers<[1], [0], [0], [1], [0, 0, 1, 1], [], []>} : vector<1x8xf32>, vector<8x250xf32>, vector<1x250xf32> -> vector<1x250xf32>
    %169 = arith.addf %156, %168 : vector<1x250xf32>
    %c13 = arith.constant 13 : index
    %c0_156 = arith.constant 0 : index
    %c0_157 = arith.constant 0 : index
    %170 = vector.load %arg0[%c13, %c0_156, %c0_157] : memref<27x162x250xbf16, #tpu.memory_space<vmem>>, vector<1x162x250xbf16>
    %171 = vector.shape_cast %170 : vector<1x162x250xbf16> to vector<162x250xbf16>
    %c0_158 = arith.constant 0 : index
    %c0_159 = arith.constant 0 : index
    %172 = vector.load %arg1[%c0_158, %c0_159] : memref<8x162xbf16, #tpu.memory_space<vmem>>, vector<8x162xbf16>
    %cst_160 = arith.constant dense<0.000000e+00> : vector<8x250xf32>
    %173 = tpu.matmul %172, %171, %cst_160 {dimension_numbers = #tpu.dot_dimension_numbers<[1], [0], [0], [1], [0, 0, 1, 1], [], []>} : vector<8x162xbf16>, vector<162x250xbf16>, vector<8x250xf32> -> vector<8x250xf32>
    %c0_161 = arith.constant 0 : index
    %c0_162 = arith.constant 0 : index
    %174 = vector.load %arg2[%c0_161, %c0_162] : memref<8x1xf32, #tpu.memory_space<vmem>>, vector<8x1xf32>
    %175 = vector.broadcast %174 : vector<8x1xf32> to vector<8x250xf32>
    %176 = arith.addf %173, %175 : vector<8x250xf32>
    %cst_163 = arith.constant 0.000000e+00 : f32
    %177 = vector.broadcast %cst_163 : f32 to vector<8x250xf32>
    %178 = arith.maximumf %176, %177 : vector<8x250xf32>
    %c13_164 = arith.constant 13 : index
    %c0_165 = arith.constant 0 : index
    %c0_166 = arith.constant 0 : index
    %179 = vector.load %arg3[%c13_164, %c0_165, %c0_166] : memref<27x1x8xf32, #tpu.memory_space<vmem>>, vector<1x1x8xf32>
    %180 = vector.shape_cast %179 : vector<1x1x8xf32> to vector<1x8xf32>
    %cst_167 = arith.constant dense<0.000000e+00> : vector<1x250xf32>
    %181 = tpu.matmul %180, %178, %cst_167 {dimension_numbers = #tpu.dot_dimension_numbers<[1], [0], [0], [1], [0, 0, 1, 1], [], []>} : vector<1x8xf32>, vector<8x250xf32>, vector<1x250xf32> -> vector<1x250xf32>
    %182 = arith.addf %169, %181 : vector<1x250xf32>
    %c14 = arith.constant 14 : index
    %c0_168 = arith.constant 0 : index
    %c0_169 = arith.constant 0 : index
    %183 = vector.load %arg0[%c14, %c0_168, %c0_169] : memref<27x162x250xbf16, #tpu.memory_space<vmem>>, vector<1x162x250xbf16>
    %184 = vector.shape_cast %183 : vector<1x162x250xbf16> to vector<162x250xbf16>
    %c0_170 = arith.constant 0 : index
    %c0_171 = arith.constant 0 : index
    %185 = vector.load %arg1[%c0_170, %c0_171] : memref<8x162xbf16, #tpu.memory_space<vmem>>, vector<8x162xbf16>
    %cst_172 = arith.constant dense<0.000000e+00> : vector<8x250xf32>
    %186 = tpu.matmul %185, %184, %cst_172 {dimension_numbers = #tpu.dot_dimension_numbers<[1], [0], [0], [1], [0, 0, 1, 1], [], []>} : vector<8x162xbf16>, vector<162x250xbf16>, vector<8x250xf32> -> vector<8x250xf32>
    %c0_173 = arith.constant 0 : index
    %c0_174 = arith.constant 0 : index
    %187 = vector.load %arg2[%c0_173, %c0_174] : memref<8x1xf32, #tpu.memory_space<vmem>>, vector<8x1xf32>
    %188 = vector.broadcast %187 : vector<8x1xf32> to vector<8x250xf32>
    %189 = arith.addf %186, %188 : vector<8x250xf32>
    %cst_175 = arith.constant 0.000000e+00 : f32
    %190 = vector.broadcast %cst_175 : f32 to vector<8x250xf32>
    %191 = arith.maximumf %189, %190 : vector<8x250xf32>
    %c14_176 = arith.constant 14 : index
    %c0_177 = arith.constant 0 : index
    %c0_178 = arith.constant 0 : index
    %192 = vector.load %arg3[%c14_176, %c0_177, %c0_178] : memref<27x1x8xf32, #tpu.memory_space<vmem>>, vector<1x1x8xf32>
    %193 = vector.shape_cast %192 : vector<1x1x8xf32> to vector<1x8xf32>
    %cst_179 = arith.constant dense<0.000000e+00> : vector<1x250xf32>
    %194 = tpu.matmul %193, %191, %cst_179 {dimension_numbers = #tpu.dot_dimension_numbers<[1], [0], [0], [1], [0, 0, 1, 1], [], []>} : vector<1x8xf32>, vector<8x250xf32>, vector<1x250xf32> -> vector<1x250xf32>
    %195 = arith.addf %182, %194 : vector<1x250xf32>
    %c15 = arith.constant 15 : index
    %c0_180 = arith.constant 0 : index
    %c0_181 = arith.constant 0 : index
    %196 = vector.load %arg0[%c15, %c0_180, %c0_181] : memref<27x162x250xbf16, #tpu.memory_space<vmem>>, vector<1x162x250xbf16>
    %197 = vector.shape_cast %196 : vector<1x162x250xbf16> to vector<162x250xbf16>
    %c0_182 = arith.constant 0 : index
    %c0_183 = arith.constant 0 : index
    %198 = vector.load %arg1[%c0_182, %c0_183] : memref<8x162xbf16, #tpu.memory_space<vmem>>, vector<8x162xbf16>
    %cst_184 = arith.constant dense<0.000000e+00> : vector<8x250xf32>
    %199 = tpu.matmul %198, %197, %cst_184 {dimension_numbers = #tpu.dot_dimension_numbers<[1], [0], [0], [1], [0, 0, 1, 1], [], []>} : vector<8x162xbf16>, vector<162x250xbf16>, vector<8x250xf32> -> vector<8x250xf32>
    %c0_185 = arith.constant 0 : index
    %c0_186 = arith.constant 0 : index
    %200 = vector.load %arg2[%c0_185, %c0_186] : memref<8x1xf32, #tpu.memory_space<vmem>>, vector<8x1xf32>
    %201 = vector.broadcast %200 : vector<8x1xf32> to vector<8x250xf32>
    %202 = arith.addf %199, %201 : vector<8x250xf32>
    %cst_187 = arith.constant 0.000000e+00 : f32
    %203 = vector.broadcast %cst_187 : f32 to vector<8x250xf32>
    %204 = arith.maximumf %202, %203 : vector<8x250xf32>
    %c15_188 = arith.constant 15 : index
    %c0_189 = arith.constant 0 : index
    %c0_190 = arith.constant 0 : index
    %205 = vector.load %arg3[%c15_188, %c0_189, %c0_190] : memref<27x1x8xf32, #tpu.memory_space<vmem>>, vector<1x1x8xf32>
    %206 = vector.shape_cast %205 : vector<1x1x8xf32> to vector<1x8xf32>
    %cst_191 = arith.constant dense<0.000000e+00> : vector<1x250xf32>
    %207 = tpu.matmul %206, %204, %cst_191 {dimension_numbers = #tpu.dot_dimension_numbers<[1], [0], [0], [1], [0, 0, 1, 1], [], []>} : vector<1x8xf32>, vector<8x250xf32>, vector<1x250xf32> -> vector<1x250xf32>
    %208 = arith.addf %195, %207 : vector<1x250xf32>
    %c16 = arith.constant 16 : index
    %c0_192 = arith.constant 0 : index
    %c0_193 = arith.constant 0 : index
    %209 = vector.load %arg0[%c16, %c0_192, %c0_193] : memref<27x162x250xbf16, #tpu.memory_space<vmem>>, vector<1x162x250xbf16>
    %210 = vector.shape_cast %209 : vector<1x162x250xbf16> to vector<162x250xbf16>
    %c0_194 = arith.constant 0 : index
    %c0_195 = arith.constant 0 : index
    %211 = vector.load %arg1[%c0_194, %c0_195] : memref<8x162xbf16, #tpu.memory_space<vmem>>, vector<8x162xbf16>
    %cst_196 = arith.constant dense<0.000000e+00> : vector<8x250xf32>
    %212 = tpu.matmul %211, %210, %cst_196 {dimension_numbers = #tpu.dot_dimension_numbers<[1], [0], [0], [1], [0, 0, 1, 1], [], []>} : vector<8x162xbf16>, vector<162x250xbf16>, vector<8x250xf32> -> vector<8x250xf32>
    %c0_197 = arith.constant 0 : index
    %c0_198 = arith.constant 0 : index
    %213 = vector.load %arg2[%c0_197, %c0_198] : memref<8x1xf32, #tpu.memory_space<vmem>>, vector<8x1xf32>
    %214 = vector.broadcast %213 : vector<8x1xf32> to vector<8x250xf32>
    %215 = arith.addf %212, %214 : vector<8x250xf32>
    %cst_199 = arith.constant 0.000000e+00 : f32
    %216 = vector.broadcast %cst_199 : f32 to vector<8x250xf32>
    %217 = arith.maximumf %215, %216 : vector<8x250xf32>
    %c16_200 = arith.constant 16 : index
    %c0_201 = arith.constant 0 : index
    %c0_202 = arith.constant 0 : index
    %218 = vector.load %arg3[%c16_200, %c0_201, %c0_202] : memref<27x1x8xf32, #tpu.memory_space<vmem>>, vector<1x1x8xf32>
    %219 = vector.shape_cast %218 : vector<1x1x8xf32> to vector<1x8xf32>
    %cst_203 = arith.constant dense<0.000000e+00> : vector<1x250xf32>
    %220 = tpu.matmul %219, %217, %cst_203 {dimension_numbers = #tpu.dot_dimension_numbers<[1], [0], [0], [1], [0, 0, 1, 1], [], []>} : vector<1x8xf32>, vector<8x250xf32>, vector<1x250xf32> -> vector<1x250xf32>
    %221 = arith.addf %208, %220 : vector<1x250xf32>
    %c17 = arith.constant 17 : index
    %c0_204 = arith.constant 0 : index
    %c0_205 = arith.constant 0 : index
    %222 = vector.load %arg0[%c17, %c0_204, %c0_205] : memref<27x162x250xbf16, #tpu.memory_space<vmem>>, vector<1x162x250xbf16>
    %223 = vector.shape_cast %222 : vector<1x162x250xbf16> to vector<162x250xbf16>
    %c0_206 = arith.constant 0 : index
    %c0_207 = arith.constant 0 : index
    %224 = vector.load %arg1[%c0_206, %c0_207] : memref<8x162xbf16, #tpu.memory_space<vmem>>, vector<8x162xbf16>
    %cst_208 = arith.constant dense<0.000000e+00> : vector<8x250xf32>
    %225 = tpu.matmul %224, %223, %cst_208 {dimension_numbers = #tpu.dot_dimension_numbers<[1], [0], [0], [1], [0, 0, 1, 1], [], []>} : vector<8x162xbf16>, vector<162x250xbf16>, vector<8x250xf32> -> vector<8x250xf32>
    %c0_209 = arith.constant 0 : index
    %c0_210 = arith.constant 0 : index
    %226 = vector.load %arg2[%c0_209, %c0_210] : memref<8x1xf32, #tpu.memory_space<vmem>>, vector<8x1xf32>
    %227 = vector.broadcast %226 : vector<8x1xf32> to vector<8x250xf32>
    %228 = arith.addf %225, %227 : vector<8x250xf32>
    %cst_211 = arith.constant 0.000000e+00 : f32
    %229 = vector.broadcast %cst_211 : f32 to vector<8x250xf32>
    %230 = arith.maximumf %228, %229 : vector<8x250xf32>
    %c17_212 = arith.constant 17 : index
    %c0_213 = arith.constant 0 : index
    %c0_214 = arith.constant 0 : index
    %231 = vector.load %arg3[%c17_212, %c0_213, %c0_214] : memref<27x1x8xf32, #tpu.memory_space<vmem>>, vector<1x1x8xf32>
    %232 = vector.shape_cast %231 : vector<1x1x8xf32> to vector<1x8xf32>
    %cst_215 = arith.constant dense<0.000000e+00> : vector<1x250xf32>
    %233 = tpu.matmul %232, %230, %cst_215 {dimension_numbers = #tpu.dot_dimension_numbers<[1], [0], [0], [1], [0, 0, 1, 1], [], []>} : vector<1x8xf32>, vector<8x250xf32>, vector<1x250xf32> -> vector<1x250xf32>
    %234 = arith.addf %221, %233 : vector<1x250xf32>
    %c18 = arith.constant 18 : index
    %c0_216 = arith.constant 0 : index
    %c0_217 = arith.constant 0 : index
    %235 = vector.load %arg0[%c18, %c0_216, %c0_217] : memref<27x162x250xbf16, #tpu.memory_space<vmem>>, vector<1x162x250xbf16>
    %236 = vector.shape_cast %235 : vector<1x162x250xbf16> to vector<162x250xbf16>
    %c0_218 = arith.constant 0 : index
    %c0_219 = arith.constant 0 : index
    %237 = vector.load %arg1[%c0_218, %c0_219] : memref<8x162xbf16, #tpu.memory_space<vmem>>, vector<8x162xbf16>
    %cst_220 = arith.constant dense<0.000000e+00> : vector<8x250xf32>
    %238 = tpu.matmul %237, %236, %cst_220 {dimension_numbers = #tpu.dot_dimension_numbers<[1], [0], [0], [1], [0, 0, 1, 1], [], []>} : vector<8x162xbf16>, vector<162x250xbf16>, vector<8x250xf32> -> vector<8x250xf32>
    %c0_221 = arith.constant 0 : index
    %c0_222 = arith.constant 0 : index
    %239 = vector.load %arg2[%c0_221, %c0_222] : memref<8x1xf32, #tpu.memory_space<vmem>>, vector<8x1xf32>
    %240 = vector.broadcast %239 : vector<8x1xf32> to vector<8x250xf32>
    %241 = arith.addf %238, %240 : vector<8x250xf32>
    %cst_223 = arith.constant 0.000000e+00 : f32
    %242 = vector.broadcast %cst_223 : f32 to vector<8x250xf32>
    %243 = arith.maximumf %241, %242 : vector<8x250xf32>
    %c18_224 = arith.constant 18 : index
    %c0_225 = arith.constant 0 : index
    %c0_226 = arith.constant 0 : index
    %244 = vector.load %arg3[%c18_224, %c0_225, %c0_226] : memref<27x1x8xf32, #tpu.memory_space<vmem>>, vector<1x1x8xf32>
    %245 = vector.shape_cast %244 : vector<1x1x8xf32> to vector<1x8xf32>
    %cst_227 = arith.constant dense<0.000000e+00> : vector<1x250xf32>
    %246 = tpu.matmul %245, %243, %cst_227 {dimension_numbers = #tpu.dot_dimension_numbers<[1], [0], [0], [1], [0, 0, 1, 1], [], []>} : vector<1x8xf32>, vector<8x250xf32>, vector<1x250xf32> -> vector<1x250xf32>
    %247 = arith.addf %234, %246 : vector<1x250xf32>
    %c19 = arith.constant 19 : index
    %c0_228 = arith.constant 0 : index
    %c0_229 = arith.constant 0 : index
    %248 = vector.load %arg0[%c19, %c0_228, %c0_229] : memref<27x162x250xbf16, #tpu.memory_space<vmem>>, vector<1x162x250xbf16>
    %249 = vector.shape_cast %248 : vector<1x162x250xbf16> to vector<162x250xbf16>
    %c0_230 = arith.constant 0 : index
    %c0_231 = arith.constant 0 : index
    %250 = vector.load %arg1[%c0_230, %c0_231] : memref<8x162xbf16, #tpu.memory_space<vmem>>, vector<8x162xbf16>
    %cst_232 = arith.constant dense<0.000000e+00> : vector<8x250xf32>
    %251 = tpu.matmul %250, %249, %cst_232 {dimension_numbers = #tpu.dot_dimension_numbers<[1], [0], [0], [1], [0, 0, 1, 1], [], []>} : vector<8x162xbf16>, vector<162x250xbf16>, vector<8x250xf32> -> vector<8x250xf32>
    %c0_233 = arith.constant 0 : index
    %c0_234 = arith.constant 0 : index
    %252 = vector.load %arg2[%c0_233, %c0_234] : memref<8x1xf32, #tpu.memory_space<vmem>>, vector<8x1xf32>
    %253 = vector.broadcast %252 : vector<8x1xf32> to vector<8x250xf32>
    %254 = arith.addf %251, %253 : vector<8x250xf32>
    %cst_235 = arith.constant 0.000000e+00 : f32
    %255 = vector.broadcast %cst_235 : f32 to vector<8x250xf32>
    %256 = arith.maximumf %254, %255 : vector<8x250xf32>
    %c19_236 = arith.constant 19 : index
    %c0_237 = arith.constant 0 : index
    %c0_238 = arith.constant 0 : index
    %257 = vector.load %arg3[%c19_236, %c0_237, %c0_238] : memref<27x1x8xf32, #tpu.memory_space<vmem>>, vector<1x1x8xf32>
    %258 = vector.shape_cast %257 : vector<1x1x8xf32> to vector<1x8xf32>
    %cst_239 = arith.constant dense<0.000000e+00> : vector<1x250xf32>
    %259 = tpu.matmul %258, %256, %cst_239 {dimension_numbers = #tpu.dot_dimension_numbers<[1], [0], [0], [1], [0, 0, 1, 1], [], []>} : vector<1x8xf32>, vector<8x250xf32>, vector<1x250xf32> -> vector<1x250xf32>
    %260 = arith.addf %247, %259 : vector<1x250xf32>
    %c20 = arith.constant 20 : index
    %c0_240 = arith.constant 0 : index
    %c0_241 = arith.constant 0 : index
    %261 = vector.load %arg0[%c20, %c0_240, %c0_241] : memref<27x162x250xbf16, #tpu.memory_space<vmem>>, vector<1x162x250xbf16>
    %262 = vector.shape_cast %261 : vector<1x162x250xbf16> to vector<162x250xbf16>
    %c0_242 = arith.constant 0 : index
    %c0_243 = arith.constant 0 : index
    %263 = vector.load %arg1[%c0_242, %c0_243] : memref<8x162xbf16, #tpu.memory_space<vmem>>, vector<8x162xbf16>
    %cst_244 = arith.constant dense<0.000000e+00> : vector<8x250xf32>
    %264 = tpu.matmul %263, %262, %cst_244 {dimension_numbers = #tpu.dot_dimension_numbers<[1], [0], [0], [1], [0, 0, 1, 1], [], []>} : vector<8x162xbf16>, vector<162x250xbf16>, vector<8x250xf32> -> vector<8x250xf32>
    %c0_245 = arith.constant 0 : index
    %c0_246 = arith.constant 0 : index
    %265 = vector.load %arg2[%c0_245, %c0_246] : memref<8x1xf32, #tpu.memory_space<vmem>>, vector<8x1xf32>
    %266 = vector.broadcast %265 : vector<8x1xf32> to vector<8x250xf32>
    %267 = arith.addf %264, %266 : vector<8x250xf32>
    %cst_247 = arith.constant 0.000000e+00 : f32
    %268 = vector.broadcast %cst_247 : f32 to vector<8x250xf32>
    %269 = arith.maximumf %267, %268 : vector<8x250xf32>
    %c20_248 = arith.constant 20 : index
    %c0_249 = arith.constant 0 : index
    %c0_250 = arith.constant 0 : index
    %270 = vector.load %arg3[%c20_248, %c0_249, %c0_250] : memref<27x1x8xf32, #tpu.memory_space<vmem>>, vector<1x1x8xf32>
    %271 = vector.shape_cast %270 : vector<1x1x8xf32> to vector<1x8xf32>
    %cst_251 = arith.constant dense<0.000000e+00> : vector<1x250xf32>
    %272 = tpu.matmul %271, %269, %cst_251 {dimension_numbers = #tpu.dot_dimension_numbers<[1], [0], [0], [1], [0, 0, 1, 1], [], []>} : vector<1x8xf32>, vector<8x250xf32>, vector<1x250xf32> -> vector<1x250xf32>
    %273 = arith.addf %260, %272 : vector<1x250xf32>
    %c21 = arith.constant 21 : index
    %c0_252 = arith.constant 0 : index
    %c0_253 = arith.constant 0 : index
    %274 = vector.load %arg0[%c21, %c0_252, %c0_253] : memref<27x162x250xbf16, #tpu.memory_space<vmem>>, vector<1x162x250xbf16>
    %275 = vector.shape_cast %274 : vector<1x162x250xbf16> to vector<162x250xbf16>
    %c0_254 = arith.constant 0 : index
    %c0_255 = arith.constant 0 : index
    %276 = vector.load %arg1[%c0_254, %c0_255] : memref<8x162xbf16, #tpu.memory_space<vmem>>, vector<8x162xbf16>
    %cst_256 = arith.constant dense<0.000000e+00> : vector<8x250xf32>
    %277 = tpu.matmul %276, %275, %cst_256 {dimension_numbers = #tpu.dot_dimension_numbers<[1], [0], [0], [1], [0, 0, 1, 1], [], []>} : vector<8x162xbf16>, vector<162x250xbf16>, vector<8x250xf32> -> vector<8x250xf32>
    %c0_257 = arith.constant 0 : index
    %c0_258 = arith.constant 0 : index
    %278 = vector.load %arg2[%c0_257, %c0_258] : memref<8x1xf32, #tpu.memory_space<vmem>>, vector<8x1xf32>
    %279 = vector.broadcast %278 : vector<8x1xf32> to vector<8x250xf32>
    %280 = arith.addf %277, %279 : vector<8x250xf32>
    %cst_259 = arith.constant 0.000000e+00 : f32
    %281 = vector.broadcast %cst_259 : f32 to vector<8x250xf32>
    %282 = arith.maximumf %280, %281 : vector<8x250xf32>
    %c21_260 = arith.constant 21 : index
    %c0_261 = arith.constant 0 : index
    %c0_262 = arith.constant 0 : index
    %283 = vector.load %arg3[%c21_260, %c0_261, %c0_262] : memref<27x1x8xf32, #tpu.memory_space<vmem>>, vector<1x1x8xf32>
    %284 = vector.shape_cast %283 : vector<1x1x8xf32> to vector<1x8xf32>
    %cst_263 = arith.constant dense<0.000000e+00> : vector<1x250xf32>
    %285 = tpu.matmul %284, %282, %cst_263 {dimension_numbers = #tpu.dot_dimension_numbers<[1], [0], [0], [1], [0, 0, 1, 1], [], []>} : vector<1x8xf32>, vector<8x250xf32>, vector<1x250xf32> -> vector<1x250xf32>
    %286 = arith.addf %273, %285 : vector<1x250xf32>
    %c22 = arith.constant 22 : index
    %c0_264 = arith.constant 0 : index
    %c0_265 = arith.constant 0 : index
    %287 = vector.load %arg0[%c22, %c0_264, %c0_265] : memref<27x162x250xbf16, #tpu.memory_space<vmem>>, vector<1x162x250xbf16>
    %288 = vector.shape_cast %287 : vector<1x162x250xbf16> to vector<162x250xbf16>
    %c0_266 = arith.constant 0 : index
    %c0_267 = arith.constant 0 : index
    %289 = vector.load %arg1[%c0_266, %c0_267] : memref<8x162xbf16, #tpu.memory_space<vmem>>, vector<8x162xbf16>
    %cst_268 = arith.constant dense<0.000000e+00> : vector<8x250xf32>
    %290 = tpu.matmul %289, %288, %cst_268 {dimension_numbers = #tpu.dot_dimension_numbers<[1], [0], [0], [1], [0, 0, 1, 1], [], []>} : vector<8x162xbf16>, vector<162x250xbf16>, vector<8x250xf32> -> vector<8x250xf32>
    %c0_269 = arith.constant 0 : index
    %c0_270 = arith.constant 0 : index
    %291 = vector.load %arg2[%c0_269, %c0_270] : memref<8x1xf32, #tpu.memory_space<vmem>>, vector<8x1xf32>
    %292 = vector.broadcast %291 : vector<8x1xf32> to vector<8x250xf32>
    %293 = arith.addf %290, %292 : vector<8x250xf32>
    %cst_271 = arith.constant 0.000000e+00 : f32
    %294 = vector.broadcast %cst_271 : f32 to vector<8x250xf32>
    %295 = arith.maximumf %293, %294 : vector<8x250xf32>
    %c22_272 = arith.constant 22 : index
    %c0_273 = arith.constant 0 : index
    %c0_274 = arith.constant 0 : index
    %296 = vector.load %arg3[%c22_272, %c0_273, %c0_274] : memref<27x1x8xf32, #tpu.memory_space<vmem>>, vector<1x1x8xf32>
    %297 = vector.shape_cast %296 : vector<1x1x8xf32> to vector<1x8xf32>
    %cst_275 = arith.constant dense<0.000000e+00> : vector<1x250xf32>
    %298 = tpu.matmul %297, %295, %cst_275 {dimension_numbers = #tpu.dot_dimension_numbers<[1], [0], [0], [1], [0, 0, 1, 1], [], []>} : vector<1x8xf32>, vector<8x250xf32>, vector<1x250xf32> -> vector<1x250xf32>
    %299 = arith.addf %286, %298 : vector<1x250xf32>
    %c23 = arith.constant 23 : index
    %c0_276 = arith.constant 0 : index
    %c0_277 = arith.constant 0 : index
    %300 = vector.load %arg0[%c23, %c0_276, %c0_277] : memref<27x162x250xbf16, #tpu.memory_space<vmem>>, vector<1x162x250xbf16>
    %301 = vector.shape_cast %300 : vector<1x162x250xbf16> to vector<162x250xbf16>
    %c0_278 = arith.constant 0 : index
    %c0_279 = arith.constant 0 : index
    %302 = vector.load %arg1[%c0_278, %c0_279] : memref<8x162xbf16, #tpu.memory_space<vmem>>, vector<8x162xbf16>
    %cst_280 = arith.constant dense<0.000000e+00> : vector<8x250xf32>
    %303 = tpu.matmul %302, %301, %cst_280 {dimension_numbers = #tpu.dot_dimension_numbers<[1], [0], [0], [1], [0, 0, 1, 1], [], []>} : vector<8x162xbf16>, vector<162x250xbf16>, vector<8x250xf32> -> vector<8x250xf32>
    %c0_281 = arith.constant 0 : index
    %c0_282 = arith.constant 0 : index
    %304 = vector.load %arg2[%c0_281, %c0_282] : memref<8x1xf32, #tpu.memory_space<vmem>>, vector<8x1xf32>
    %305 = vector.broadcast %304 : vector<8x1xf32> to vector<8x250xf32>
    %306 = arith.addf %303, %305 : vector<8x250xf32>
    %cst_283 = arith.constant 0.000000e+00 : f32
    %307 = vector.broadcast %cst_283 : f32 to vector<8x250xf32>
    %308 = arith.maximumf %306, %307 : vector<8x250xf32>
    %c23_284 = arith.constant 23 : index
    %c0_285 = arith.constant 0 : index
    %c0_286 = arith.constant 0 : index
    %309 = vector.load %arg3[%c23_284, %c0_285, %c0_286] : memref<27x1x8xf32, #tpu.memory_space<vmem>>, vector<1x1x8xf32>
    %310 = vector.shape_cast %309 : vector<1x1x8xf32> to vector<1x8xf32>
    %cst_287 = arith.constant dense<0.000000e+00> : vector<1x250xf32>
    %311 = tpu.matmul %310, %308, %cst_287 {dimension_numbers = #tpu.dot_dimension_numbers<[1], [0], [0], [1], [0, 0, 1, 1], [], []>} : vector<1x8xf32>, vector<8x250xf32>, vector<1x250xf32> -> vector<1x250xf32>
    %312 = arith.addf %299, %311 : vector<1x250xf32>
    %c24 = arith.constant 24 : index
    %c0_288 = arith.constant 0 : index
    %c0_289 = arith.constant 0 : index
    %313 = vector.load %arg0[%c24, %c0_288, %c0_289] : memref<27x162x250xbf16, #tpu.memory_space<vmem>>, vector<1x162x250xbf16>
    %314 = vector.shape_cast %313 : vector<1x162x250xbf16> to vector<162x250xbf16>
    %c0_290 = arith.constant 0 : index
    %c0_291 = arith.constant 0 : index
    %315 = vector.load %arg1[%c0_290, %c0_291] : memref<8x162xbf16, #tpu.memory_space<vmem>>, vector<8x162xbf16>
    %cst_292 = arith.constant dense<0.000000e+00> : vector<8x250xf32>
    %316 = tpu.matmul %315, %314, %cst_292 {dimension_numbers = #tpu.dot_dimension_numbers<[1], [0], [0], [1], [0, 0, 1, 1], [], []>} : vector<8x162xbf16>, vector<162x250xbf16>, vector<8x250xf32> -> vector<8x250xf32>
    %c0_293 = arith.constant 0 : index
    %c0_294 = arith.constant 0 : index
    %317 = vector.load %arg2[%c0_293, %c0_294] : memref<8x1xf32, #tpu.memory_space<vmem>>, vector<8x1xf32>
    %318 = vector.broadcast %317 : vector<8x1xf32> to vector<8x250xf32>
    %319 = arith.addf %316, %318 : vector<8x250xf32>
    %cst_295 = arith.constant 0.000000e+00 : f32
    %320 = vector.broadcast %cst_295 : f32 to vector<8x250xf32>
    %321 = arith.maximumf %319, %320 : vector<8x250xf32>
    %c24_296 = arith.constant 24 : index
    %c0_297 = arith.constant 0 : index
    %c0_298 = arith.constant 0 : index
    %322 = vector.load %arg3[%c24_296, %c0_297, %c0_298] : memref<27x1x8xf32, #tpu.memory_space<vmem>>, vector<1x1x8xf32>
    %323 = vector.shape_cast %322 : vector<1x1x8xf32> to vector<1x8xf32>
    %cst_299 = arith.constant dense<0.000000e+00> : vector<1x250xf32>
    %324 = tpu.matmul %323, %321, %cst_299 {dimension_numbers = #tpu.dot_dimension_numbers<[1], [0], [0], [1], [0, 0, 1, 1], [], []>} : vector<1x8xf32>, vector<8x250xf32>, vector<1x250xf32> -> vector<1x250xf32>
    %325 = arith.addf %312, %324 : vector<1x250xf32>
    %c25 = arith.constant 25 : index
    %c0_300 = arith.constant 0 : index
    %c0_301 = arith.constant 0 : index
    %326 = vector.load %arg0[%c25, %c0_300, %c0_301] : memref<27x162x250xbf16, #tpu.memory_space<vmem>>, vector<1x162x250xbf16>
    %327 = vector.shape_cast %326 : vector<1x162x250xbf16> to vector<162x250xbf16>
    %c0_302 = arith.constant 0 : index
    %c0_303 = arith.constant 0 : index
    %328 = vector.load %arg1[%c0_302, %c0_303] : memref<8x162xbf16, #tpu.memory_space<vmem>>, vector<8x162xbf16>
    %cst_304 = arith.constant dense<0.000000e+00> : vector<8x250xf32>
    %329 = tpu.matmul %328, %327, %cst_304 {dimension_numbers = #tpu.dot_dimension_numbers<[1], [0], [0], [1], [0, 0, 1, 1], [], []>} : vector<8x162xbf16>, vector<162x250xbf16>, vector<8x250xf32> -> vector<8x250xf32>
    %c0_305 = arith.constant 0 : index
    %c0_306 = arith.constant 0 : index
    %330 = vector.load %arg2[%c0_305, %c0_306] : memref<8x1xf32, #tpu.memory_space<vmem>>, vector<8x1xf32>
    %331 = vector.broadcast %330 : vector<8x1xf32> to vector<8x250xf32>
    %332 = arith.addf %329, %331 : vector<8x250xf32>
    %cst_307 = arith.constant 0.000000e+00 : f32
    %333 = vector.broadcast %cst_307 : f32 to vector<8x250xf32>
    %334 = arith.maximumf %332, %333 : vector<8x250xf32>
    %c25_308 = arith.constant 25 : index
    %c0_309 = arith.constant 0 : index
    %c0_310 = arith.constant 0 : index
    %335 = vector.load %arg3[%c25_308, %c0_309, %c0_310] : memref<27x1x8xf32, #tpu.memory_space<vmem>>, vector<1x1x8xf32>
    %336 = vector.shape_cast %335 : vector<1x1x8xf32> to vector<1x8xf32>
    %cst_311 = arith.constant dense<0.000000e+00> : vector<1x250xf32>
    %337 = tpu.matmul %336, %334, %cst_311 {dimension_numbers = #tpu.dot_dimension_numbers<[1], [0], [0], [1], [0, 0, 1, 1], [], []>} : vector<1x8xf32>, vector<8x250xf32>, vector<1x250xf32> -> vector<1x250xf32>
    %338 = arith.addf %325, %337 : vector<1x250xf32>
    %c26 = arith.constant 26 : index
    %c0_312 = arith.constant 0 : index
    %c0_313 = arith.constant 0 : index
    %339 = vector.load %arg0[%c26, %c0_312, %c0_313] : memref<27x162x250xbf16, #tpu.memory_space<vmem>>, vector<1x162x250xbf16>
    %340 = vector.shape_cast %339 : vector<1x162x250xbf16> to vector<162x250xbf16>
    %c0_314 = arith.constant 0 : index
    %c0_315 = arith.constant 0 : index
    %341 = vector.load %arg1[%c0_314, %c0_315] : memref<8x162xbf16, #tpu.memory_space<vmem>>, vector<8x162xbf16>
    %cst_316 = arith.constant dense<0.000000e+00> : vector<8x250xf32>
    %342 = tpu.matmul %341, %340, %cst_316 {dimension_numbers = #tpu.dot_dimension_numbers<[1], [0], [0], [1], [0, 0, 1, 1], [], []>} : vector<8x162xbf16>, vector<162x250xbf16>, vector<8x250xf32> -> vector<8x250xf32>
    %c0_317 = arith.constant 0 : index
    %c0_318 = arith.constant 0 : index
    %343 = vector.load %arg2[%c0_317, %c0_318] : memref<8x1xf32, #tpu.memory_space<vmem>>, vector<8x1xf32>
    %344 = vector.broadcast %343 : vector<8x1xf32> to vector<8x250xf32>
    %345 = arith.addf %342, %344 : vector<8x250xf32>
    %cst_319 = arith.constant 0.000000e+00 : f32
    %346 = vector.broadcast %cst_319 : f32 to vector<8x250xf32>
    %347 = arith.maximumf %345, %346 : vector<8x250xf32>
    %c26_320 = arith.constant 26 : index
    %c0_321 = arith.constant 0 : index
    %c0_322 = arith.constant 0 : index
    %348 = vector.load %arg3[%c26_320, %c0_321, %c0_322] : memref<27x1x8xf32, #tpu.memory_space<vmem>>, vector<1x1x8xf32>
    %349 = vector.shape_cast %348 : vector<1x1x8xf32> to vector<1x8xf32>
    %cst_323 = arith.constant dense<0.000000e+00> : vector<1x250xf32>
    %350 = tpu.matmul %349, %347, %cst_323 {dimension_numbers = #tpu.dot_dimension_numbers<[1], [0], [0], [1], [0, 0, 1, 1], [], []>} : vector<1x8xf32>, vector<8x250xf32>, vector<1x250xf32> -> vector<1x250xf32>
    %351 = arith.addf %338, %350 : vector<1x250xf32>
    %c0_324 = arith.constant 0 : index
    %c0_325 = arith.constant 0 : index
    %352 = vector.load %arg4[%c0_324, %c0_325] : memref<1x1xf32, #tpu.memory_space<vmem>>, vector<1x1xf32>
    %353 = vector.broadcast %352 : vector<1x1xf32> to vector<1x250xf32>
    %354 = arith.addf %351, %353 : vector<1x250xf32>
    %cst_326 = arith.constant 0.000000e+00 : f32
    %355 = vector.broadcast %cst_326 : f32 to vector<1x250xf32>
    %356 = arith.maximumf %354, %355 : vector<1x250xf32>
    %357 = vector.extract_strided_slice %356 {offsets = [0, 0], sizes = [1, 125], strides = [1, 1]} : vector<1x250xf32> to vector<1x125xf32>
    %358 = vector.extract_strided_slice %356 {offsets = [0, 125], sizes = [1, 125], strides = [1, 1]} : vector<1x250xf32> to vector<1x125xf32>
    %359 = tpu.concatenate %357, %358 in 0 : vector<1x125xf32>, vector<1x125xf32> -> vector<2x125xf32>
    %c0_327 = arith.constant 0 : index
    %c0_328 = arith.constant 0 : index
    %360 = vector.load %arg5[%c0_327, %c0_328] : memref<125x50xf32, #tpu.memory_space<vmem>>, vector<125x50xf32>
    %cst_329 = arith.constant dense<0.000000e+00> : vector<2x50xf32>
    %361 = tpu.matmul %359, %360, %cst_329 {dimension_numbers = #tpu.dot_dimension_numbers<[1], [0], [0], [1], [0, 0, 1, 1], [], []>} : vector<2x125xf32>, vector<125x50xf32>, vector<2x50xf32> -> vector<2x50xf32>
    %c0_330 = arith.constant 0 : index
    %c0_331 = arith.constant 0 : index
    %362 = vector.load %arg6[%c0_330, %c0_331] : memref<1x50xf32, #tpu.memory_space<vmem>>, vector<1x50xf32>
    %363 = vector.broadcast %362 : vector<1x50xf32> to vector<2x50xf32>
    %364 = arith.addf %361, %363 : vector<2x50xf32>
    %cst_332 = arith.constant 0.000000e+00 : f32
    %365 = vector.broadcast %cst_332 : f32 to vector<2x50xf32>
    %366 = arith.maximumf %364, %365 : vector<2x50xf32>
    %c0_333 = arith.constant 0 : index
    %c0_334 = arith.constant 0 : index
    %367 = vector.load %arg7[%c0_333, %c0_334] : memref<50x4xf32, #tpu.memory_space<vmem>>, vector<50x4xf32>
    %cst_335 = arith.constant dense<0.000000e+00> : vector<2x4xf32>
    %368 = tpu.matmul %366, %367, %cst_335 {dimension_numbers = #tpu.dot_dimension_numbers<[1], [0], [0], [1], [0, 0, 1, 1], [], []>} : vector<2x50xf32>, vector<50x4xf32>, vector<2x4xf32> -> vector<2x4xf32>
    %c0_336 = arith.constant 0 : index
    %c0_337 = arith.constant 0 : index
    %369 = vector.load %arg8[%c0_336, %c0_337] : memref<1x4xf32, #tpu.memory_space<vmem>>, vector<1x4xf32>
    %370 = vector.broadcast %369 : vector<1x4xf32> to vector<2x4xf32>
    %371 = arith.addf %368, %370 : vector<2x4xf32>
    %cst_338 = arith.constant dense<0xFF800000> : vector<2xf32>
    %372 = vector.multi_reduction <maximumf>, %371, %cst_338 [1] : vector<2x4xf32> to vector<2xf32>
    %373 = vector.shape_cast %372 : vector<2xf32> to vector<2x1xf32>
    %374 = vector.broadcast %373 : vector<2x1xf32> to vector<2x4xf32>
    %375 = arith.subf %371, %374 : vector<2x4xf32>
    %376 = math.exp %375 : vector<2x4xf32>
    %cst_339 = arith.constant dense<0.000000e+00> : vector<2xf32>
    %377 = vector.multi_reduction <add>, %376, %cst_339 [1] : vector<2x4xf32> to vector<2xf32>
    %378 = vector.shape_cast %377 : vector<2xf32> to vector<2x1xf32>
    %379 = math.log %378 : vector<2x1xf32>
    %380 = arith.addf %373, %379 : vector<2x1xf32>
    %381 = vector.broadcast %380 : vector<2x1xf32> to vector<2x4xf32>
    %382 = arith.subf %371, %381 : vector<2x4xf32>
    %c0_340 = arith.constant 0 : index
    %c0_341 = arith.constant 0 : index
    %383 = vector.load %arg9[%c0_340, %c0_341] : memref<2x4xf32, #tpu.memory_space<vmem>>, vector<2x4xf32>
    tpu.vector_store %arg9[%c0_340, %c0_341], %382 {strides = array<i32>} : memref<2x4xf32, #tpu.memory_space<vmem>>, vector<2x4xf32>,
    return
  }
}

</mosaic_0001>

<bundles_post_ra>
// kernel: net_forward.2
= control target key start
LH: loop header
LB: loop body
LE: loop exit
PB: predicated region body
PF: predicated region fallthrough
CT: control target
= control target key end

     0   :  { %s11014_s12 = smov 0   ;;  %s11016_s13 = smov 0   ;;  %s13385_s0 = inlined_call_operand.vmem [shape: bf16[8,162], index: 0, kind: input, shape index: {}]   ;;  %s13386_s1 = inlined_call_operand.vmem [shape: bf16[162,18522], index: 1, kind: input, shape index: {}]   ;;  %s13387_s2 = inlined_call_operand.vmem [shape: f32[8,1], index: 2, kind: input, shape index: {}]   ;;  %s13388_s3 = inlined_call_operand.vmem [shape: bf16[8,18522], index: 3, kind: output, shape index: {}]  }
   0x1   :  { %s11018_s14 = smov 0  }
   0x2 LB: > { %s11030_s15 = sadd.s32 4294967295, %s10859_s14   ;;  %s11033_s16 = sadd.s32 1, %s10859_s14   ;;  %s10859_s14 = sphi %s11018_s14, %s13420_s14   ;;  %s10855_s13 = sphi %s11016_s13, %s13419_s13   ;;  %s10851_s12 = sphi %s11014_s12, %s13418_s12  }
   0x3   : > { %s38_s17 = ssub.s32 %s10859_s14, %s11033_s16  ;;  %s41_s18 = sadd.s32 1, %s10855_s13 }
   0x4   : > { %p39_p0 = scmp.eq.s32.totalorder %s38_s17, 0  ;;  %p48_p1 = scmp.ne.s32.totalorder %s10855_s13, %s10851_s12 }
   0x5   : > { %p49_p2 = scmp.eq.s32.totalorder %s10859_s14, 0  ;;  %p99_p3 = scmp.eq.s32.totalorder %s11030_s15, 1 }
   0x6   : > { %s11043_s19 = scalar_select %p39_p0, %s10855_s13, %s41_s18  }
   0x7   : > { %p50_p4 = por %p49_p2, %p48_p1  ;;  %p11045_p5 = por %p99_p3, %p48_p1 }
   0x8   : > { %p8240_p6 = scmp.ge.s32.totalorder %s10859_s14, 2 }
   0xa   : > { %127 = sbr.rel (%p8240_p6) target bundleno = 250 (0xfa), region = 24 }
  0x11   : > { %130 = sbr.rel (!%p50_p4) target bundleno = 250 (0xfa), region = 28  ;;  %s132_s21 = sand.u32 (%p50_p4), 1, %s10855_s13  }
  0x12   : > { %s135_s22 = smul.u32 (%p50_p4), 73, %s10859_s14 }
  0x13   : > { %s9255_s23 = smul.u32 (%p50_p4), 6132, %s132_s21 }
  0x14   : > { %s136_s24 = ssub.s32 (%p50_p4), 145, %s135_s22  ;;  %s9208_s25 = smul.u32 (%p50_p4), 292, %s10859_s14 }
  0x15   : > { %p137_p7 = scmp.lt.s32.totalorder (%p50_p4), %s136_s24, 73  ;;  %s11060_s4 = scalar_lea.vmem (%p50_p4), [#allocation2], %s9255_s23  }
  0x16   : > { %s11056_s28 = scalar_lea.vmem (%p50_p4), %s13386_s1, %s9208_s25  }
  0x18   : > { %s13422_s24 = smov (!%p137_p7, %s136_s24), 73 }
  0x19   : > { %s139_s29 = smul.u32 1344, %s13422_s24  ;;  %s11058_s30 = sshll.u32 %s13422_s24, 2 }
  0x1b   : > { %p8244_p8 = scmp.eq.s32.totalorder %s139_s29, 0 }
  0x1c   : > { %p147_p9 = scmp.lt.u32.totalorder (!%p8244_p8), %s11058_s30, 8 }
  0x1d   : > { %146 = sbr.rel (%p8244_p8) target bundleno = 250 (0xfa), region = 32 }
  0x24   : > { %150 = sbr.rel (%p147_p9) target bundleno = 225 (0xe1), region = 36  ;;  %s11064_s5 = sand.u32 (!%p147_p9), 7, %s11058_s30  }
  0x25   : > { %p206_p10 = scmp.eq.s32.totalorder (!%p147_p9), %s11064_s5, 0  ;;  %p8245_p11 = scmp.ne.s32.totalorder (!%p147_p9), %s11064_s5, 0 }
  0x2b   : > { %209 = sbr.rel (%p8245_p11) target bundleno = 122 (0x7a), region = 51  ;;  %s210_s6 = sshrl.u32 (!%p8245_p11), %s11058_s30, 3 }
  0x2c   : > { %s11071_s7 = sshrl.u32 (!%p8245_p11), %s210_s6, 2 }
  0x2d   : > { %p8246_p12 = scmp.le.s32.totalorder (!%p8245_p11), %s11071_s7, 0 }
  0x32   : > { %8110 = sbr.rel (%p8246_p12) target bundleno = 100 (0x64), region = 229  ;;  %s13390_s8 = smov (!%p8246_p12), %s11060_s4 }
  0x33   : > { %s13391_s9 = smov (!%p8246_p12), %s11056_s28  ;;  %s11080_s10 = smov (!%p8246_p12), 0  }
  0x34   : > { %s11082_s11 = smov (!%p8246_p12), 0  }
  0x39 LB: >> { %v223_v0 = vld [vmem:[%s10867_s9] sm:$0xff]  ;;  %v225_v1 = vld [vmem:[%s10867_s9 + $0x8] sm:$0xff]  ;;  %v227_v2 = vld [vmem:[%s10867_s9 + $0x10] sm:$0xff]  ;;  %s391_s17 = sadd.s32 1, %s10871_s10  ;;  %s217_s11 = sadd.s32 1, %s10875_s11   ;;  %s10875_s11 = sphi %s11082_s11, %s217_s11   ;;  %s10871_s10 = sphi %s11080_s10, %s13394_s10   ;;  %s10867_s9 = sphi %s13391_s9, %s13393_s9   ;;  %s10863_s8 = sphi %s13390_s8, %s13392_s8  }
  0x3a   : >> { %224 = vst [vmem:[%s10863_s8] sm:$0xff] %v223_v0  ;;  %226 = vst [vmem:[%s10863_s8 + $0x8] sm:$0xff] %v225_v1  ;;  %v229_v3 = vld [vmem:[%s10867_s9 + $0x18] sm:$0xff]  ;;  %v231_v4 = vld [vmem:[%s10867_s9 + $0x244] sm:$0xff]  ;;  %p392_p13 = scmp.ge.s32.totalorder %s391_s17, %s11071_s7  ;;  %p216_p0 = scmp.ge.s32.totalorder %s217_s11, %s11071_s7 }
  0x3b   : >> { %228 = vst [vmem:[%s10863_s8 + $0x10] sm:$0xff] %v227_v2  ;;  %v233_v5 = vld [vmem:[%s10867_s9 + $0x24c] sm:$0xff]  ;;  %230 = vst [vmem:[%s10863_s8 + $0x18] sm:$0xff] %v229_v3  ;;  %v235_v6 = vld [vmem:[%s10867_s9 + $0x254] sm:$0xff] }
  0x3c   : >> { %232 = vst [vmem:[%s10863_s8 + $0x124] sm:$0xff] %v231_v4  ;;  %234 = vst [vmem:[%s10863_s8 + $0x12c] sm:$0xff] %v233_v5  ;;  %v237_v7 = vld [vmem:[%s10867_s9 + $0x25c] sm:$0xff]  ;;  %v239_v8 = vld [vmem:[%s10867_s9 + $0x488] sm:$0xff]  ;;  %s13424_s17 = smov (%p392_p13, %s391_s17), 0 }
  0x3d   : >> { %236 = vst [vmem:[%s10863_s8 + $0x134] sm:$0xff] %v235_v6  ;;  %238 = vst [vmem:[%s10863_s8 + $0x13c] sm:$0xff] %v237_v7  ;;  %v241_v9 = vld [vmem:[%s10867_s9 + $0x490] sm:$0xff]  ;;  %v243_v10 = vld [vmem:[%s10867_s9 + $0x498] sm:$0xff]  ;;  %s8247_s18 = sshll.u32 %s13424_s17, 5  ;;  %s13394_s10 = smov %s13424_s17 }
  0x3e   : >> { %240 = vst [vmem:[%s10863_s8 + $0x248] sm:$0xff] %v239_v8  ;;  %v245_v11 = vld [vmem:[%s10867_s9 + $0x4a0] sm:$0xff]  ;;  %242 = vst [vmem:[%s10863_s8 + $0x250] sm:$0xff] %v241_v9  ;;  %v247_v12 = vld [vmem:[%s10867_s9 + $0x6cc] sm:$0xff]  ;;  %s11138_s21 = scalar_lea.vmem %s11056_s28, %s8247_s18   ;;  %s11141_s22 = scalar_lea.vmem %s11060_s4, %s8247_s18 [#allocation2]  }
  0x3f   : >> { %244 = vst [vmem:[%s10863_s8 + $0x258] sm:$0xff] %v243_v10  ;;  %246 = vst [vmem:[%s10863_s8 + $0x260] sm:$0xff] %v245_v11  ;;  %v249_v13 = vld [vmem:[%s10867_s9 + $0x6d4] sm:$0xff]  ;;  %v251_v14 = vld [vmem:[%s10867_s9 + $0x6dc] sm:$0xff] }
  0x40   : >> { %248 = vst [vmem:[%s10863_s8 + $0x36c] sm:$0xff] %v247_v12  ;;  %250 = vst [vmem:[%s10863_s8 + $0x374] sm:$0xff] %v249_v13  ;;  %v253_v15 = vld [vmem:[%s10867_s9 + $0x6e4] sm:$0xff]  ;;  %v255_v16 = vld [vmem:[%s10867_s9 + $0x910] sm:$0xff] }
  0x41   : >> { %252 = vst [vmem:[%s10863_s8 + $0x37c] sm:$0xff] %v251_v14  ;;  %v257_v17 = vld [vmem:[%s10867_s9 + $0x918] sm:$0xff]  ;;  %254 = vst [vmem:[%s10863_s8 + $0x384] sm:$0xff] %v253_v15  ;;  %v259_v18 = vld [vmem:[%s10867_s9 + $0x920] sm:$0xff] }
  0x42   : >> { %256 = vst [vmem:[%s10863_s8 + $0x490] sm:$0xff] %v255_v16  ;;  %258 = vst [vmem:[%s10863_s8 + $0x498] sm:$0xff] %v257_v17  ;;  %v261_v19 = vld [vmem:[%s10867_s9 + $0x928] sm:$0xff]  ;;  %v263_v20 = vld [vmem:[%s10867_s9 + $0xb54] sm:$0xff] }
  0x43   : >> { %260 = vst [vmem:[%s10863_s8 + $0x4a0] sm:$0xff] %v259_v18  ;;  %262 = vst [vmem:[%s10863_s8 + $0x4a8] sm:$0xff] %v261_v19  ;;  %v265_v21 = vld [vmem:[%s10867_s9 + $0xb5c] sm:$0xff]  ;;  %v267_v22 = vld [vmem:[%s10867_s9 + $0xb64] sm:$0xff] }
  0x44   : >> { %264 = vst [vmem:[%s10863_s8 + $0x5b4] sm:$0xff] %v263_v20  ;;  %v269_v23 = vld [vmem:[%s10867_s9 + $0xb6c] sm:$0xff]  ;;  %266 = vst [vmem:[%s10863_s8 + $0x5bc] sm:$0xff] %v265_v21  ;;  %v271_v24 = vld [vmem:[%s10867_s9 + $0xd98] sm:$0xff] }
  0x45   : >> { %268 = vst [vmem:[%s10863_s8 + $0x5c4] sm:$0xff] %v267_v22  ;;  %270 = vst [vmem:[%s10863_s8 + $0x5cc] sm:$0xff] %v269_v23  ;;  %v273_v25 = vld [vmem:[%s10867_s9 + $0xda0] sm:$0xff]  ;;  %v275_v26 = vld [vmem:[%s10867_s9 + $0xda8] sm:$0xff] }
  0x46   : >> { %272 = vst [vmem:[%s10863_s8 + $0x6d8] sm:$0xff] %v271_v24  ;;  %274 = vst [vmem:[%s10863_s8 + $0x6e0] sm:$0xff] %v273_v25  ;;  %v277_v27 = vld [vmem:[%s10867_s9 + $0xdb0] sm:$0xff]  ;;  %v279_v28 = vld [vmem:[%s10867_s9 + $0xfdc] sm:$0xff] }
  0x47   : >> { %276 = vst [vmem:[%s10863_s8 + $0x6e8] sm:$0xff] %v275_v26  ;;  %v281_v29 = vld [vmem:[%s10867_s9 + $0xfe4] sm:$0xff]  ;;  %278 = vst [vmem:[%s10863_s8 + $0x6f0] sm:$0xff] %v277_v27  ;;  %v283_v30 = vld [vmem:[%s10867_s9 + $0xfec] sm:$0xff] }
  0x48   : >> { %280 = vst [vmem:[%s10863_s8 + $0x7fc] sm:$0xff] %v279_v28  ;;  %282 = vst [vmem:[%s10863_s8 + $0x804] sm:$0xff] %v281_v29  ;;  %v285_v31 = vld [vmem:[%s10867_s9 + $0xff4] sm:$0xff]  ;;  %v287_v32 = vld [vmem:[%s10867_s9 + $0x1220] sm:$0xff] }
  0x49   : >> { %284 = vst [vmem:[%s10863_s8 + $0x80c] sm:$0xff] %v283_v30  ;;  %286 = vst [vmem:[%s10863_s8 + $0x814] sm:$0xff] %v285_v31  ;;  %v289_v33 = vld [vmem:[%s10867_s9 + $0x1228] sm:$0xff]  ;;  %v291_v34 = vld [vmem:[%s10867_s9 + $0x1230] sm:$0xff] }
  0x4a   : >> { %288 = vst [vmem:[%s10863_s8 + $0x920] sm:$0xff] %v287_v32  ;;  %v293_v35 = vld [vmem:[%s10867_s9 + $0x1238] sm:$0xff]  ;;  %290 = vst [vmem:[%s10863_s8 + $0x928] sm:$0xff] %v289_v33  ;;  %v295_v36 = vld [vmem:[%s10867_s9 + $0x1464] sm:$0xff] }
  0x4b   : >> { %292 = vst [vmem:[%s10863_s8 + $0x930] sm:$0xff] %v291_v34  ;;  %294 = vst [vmem:[%s10863_s8 + $0x938] sm:$0xff] %v293_v35  ;;  %v297_v37 = vld [vmem:[%s10867_s9 + $0x146c] sm:$0xff]  ;;  %v299_v38 = vld [vmem:[%s10867_s9 + $0x1474] sm:$0xff] }
  0x4c   : >> { %296 = vst [vmem:[%s10863_s8 + $0xa44] sm:$0xff] %v295_v36  ;;  %298 = vst [vmem:[%s10863_s8 + $0xa4c] sm:$0xff] %v297_v37  ;;  %v301_v39 = vld [vmem:[%s10867_s9 + $0x147c] sm:$0xff]  ;;  %v303_v40 = vld [vmem:[%s10867_s9 + $0x16a8] sm:$0xff] }
  0x4d   : >> { %300 = vst [vmem:[%s10863_s8 + $0xa54] sm:$0xff] %v299_v38  ;;  %v305_v41 = vld [vmem:[%s10867_s9 + $0x16b0] sm:$0xff]  ;;  %302 = vst [vmem:[%s10863_s8 + $0xa5c] sm:$0xff] %v301_v39  ;;  %v307_v42 = vld [vmem:[%s10867_s9 + $0x16b8] sm:$0xff] }
  0x4e   : >> { %304 = vst [vmem:[%s10863_s8 + $0xb68] sm:$0xff] %v303_v40  ;;  %306 = vst [vmem:[%s10863_s8 + $0xb70] sm:$0xff] %v305_v41  ;;  %v309_v43 = vld [vmem:[%s10867_s9 + $0x16c0] sm:$0xff]  ;;  %v311_v44 = vld [vmem:[%s10867_s9 + $0x18ec] sm:$0xff] }
  0x4f   : >> { %308 = vst [vmem:[%s10863_s8 + $0xb78] sm:$0xff] %v307_v42  ;;  %310 = vst [vmem:[%s10863_s8 + $0xb80] sm:$0xff] %v309_v43  ;;  %v313_v45 = vld [vmem:[%s10867_s9 + $0x18f4] sm:$0xff]  ;;  %v315_v46 = vld [vmem:[%s10867_s9 + $0x18fc] sm:$0xff] }
  0x50   : >> { %312 = vst [vmem:[%s10863_s8 + $0xc8c] sm:$0xff] %v311_v44  ;;  %v317_v47 = vld [vmem:[%s10867_s9 + $0x1904] sm:$0xff]  ;;  %314 = vst [vmem:[%s10863_s8 + $0xc94] sm:$0xff] %v313_v45  ;;  %v319_v48 = vld [vmem:[%s10867_s9 + $0x1b30] sm:$0xff] }
  0x51   : >> { %316 = vst [vmem:[%s10863_s8 + $0xc9c] sm:$0xff] %v315_v46  ;;  %318 = vst [vmem:[%s10863_s8 + $0xca4] sm:$0xff] %v317_v47  ;;  %v321_v49 = vld [vmem:[%s10867_s9 + $0x1b38] sm:$0xff]  ;;  %v323_v50 = vld [vmem:[%s10867_s9 + $0x1b40] sm:$0xff] }
  0x52   : >> { %320 = vst [vmem:[%s10863_s8 + $0xdb0] sm:$0xff] %v319_v48  ;;  %322 = vst [vmem:[%s10863_s8 + $0xdb8] sm:$0xff] %v321_v49  ;;  %v325_v51 = vld [vmem:[%s10867_s9 + $0x1b48] sm:$0xff]  ;;  %v327_v52 = vld [vmem:[%s10867_s9 + $0x1d74] sm:$0xff] }
  0x53   : >> { %324 = vst [vmem:[%s10863_s8 + $0xdc0] sm:$0xff] %v323_v50  ;;  %v329_v53 = vld [vmem:[%s10867_s9 + $0x1d7c] sm:$0xff]  ;;  %326 = vst [vmem:[%s10863_s8 + $0xdc8] sm:$0xff] %v325_v51  ;;  %v331_v54 = vld [vmem:[%s10867_s9 + $0x1d84] sm:$0xff] }
  0x54   : >> { %328 = vst [vmem:[%s10863_s8 + $0xed4] sm:$0xff] %v327_v52  ;;  %330 = vst [vmem:[%s10863_s8 + $0xedc] sm:$0xff] %v329_v53  ;;  %v333_v55 = vld [vmem:[%s10867_s9 + $0x1d8c] sm:$0xff]  ;;  %v335_v56 = vld [vmem:[%s10867_s9 + $0x1fb8] sm:$0xff] }
  0x55   : >> { %332 = vst [vmem:[%s10863_s8 + $0xee4] sm:$0xff] %v331_v54  ;;  %334 = vst [vmem:[%s10863_s8 + $0xeec] sm:$0xff] %v333_v55  ;;  %v337_v57 = vld [vmem:[%s10867_s9 + $0x1fc0] sm:$0xff]  ;;  %v339_v58 = vld [vmem:[%s10867_s9 + $0x1fc8] sm:$0xff] }
  0x56   : >> { %336 = vst [vmem:[%s10863_s8 + $0xff8] sm:$0xff] %v335_v56  ;;  %v341_v59 = vld [vmem:[%s10867_s9 + $0x1fd0] sm:$0xff]  ;;  %338 = vst [vmem:[%s10863_s8 + $0x1000] sm:$0xff] %v337_v57  ;;  %v343_v60 = vld [vmem:[%s10867_s9 + $0x21fc] sm:$0xff] }
  0x57   : >> { %340 = vst [vmem:[%s10863_s8 + $0x1008] sm:$0xff] %v339_v58  ;;  %342 = vst [vmem:[%s10863_s8 + $0x1010] sm:$0xff] %v341_v59  ;;  %v345_v61 = vld [vmem:[%s10867_s9 + $0x2204] sm:$0xff]  ;;  %v347_v62 = vld [vmem:[%s10867_s9 + $0x220c] sm:$0xff] }
  0x58   : >> { %344 = vst [vmem:[%s10863_s8 + $0x111c] sm:$0xff] %v343_v60  ;;  %346 = vst [vmem:[%s10863_s8 + $0x1124] sm:$0xff] %v345_v61  ;;  %v349_v63 = vld [vmem:[%s10867_s9 + $0x2214] sm:$0xff]  ;;  %v351_v0 = vld [vmem:[%s10867_s9 + $0x2440] sm:$0xff] }
  0x59   : >> { %348 = vst [vmem:[%s10863_s8 + $0x112c] sm:$0xff] %v347_v62  ;;  %v353_v1 = vld [vmem:[%s10867_s9 + $0x2448] sm:$0xff]  ;;  %350 = vst [vmem:[%s10863_s8 + $0x1134] sm:$0xff] %v349_v63  ;;  %v355_v2 = vld [vmem:[%s10867_s9 + $0x2450] sm:$0xff] }
  0x5a   : >> { %352 = vst [vmem:[%s10863_s8 + $0x1240] sm:$0xff] %v351_v0  ;;  %354 = vst [vmem:[%s10863_s8 + $0x1248] sm:$0xff] %v353_v1  ;;  %v357_v3 = vld [vmem:[%s10867_s9 + $0x2458] sm:$0xff]  ;;  %v359_v4 = vld [vmem:[%s10867_s9 + $0x2684] sm:$0xff] }
  0x5b   : >> { %356 = vst [vmem:[%s10863_s8 + $0x1250] sm:$0xff] %v355_v2  ;;  %358 = vst [vmem:[%s10863_s8 + $0x1258] sm:$0xff] %v357_v3  ;;  %v361_v5 = vld [vmem:[%s10867_s9 + $0x268c] sm:$0xff]  ;;  %v363_v6 = vld [vmem:[%s10867_s9 + $0x2694] sm:$0xff] }
  0x5c   : >> { %360 = vst [vmem:[%s10863_s8 + $0x1364] sm:$0xff] %v359_v4  ;;  %v365_v7 = vld [vmem:[%s10867_s9 + $0x269c] sm:$0xff]  ;;  %362 = vst [vmem:[%s10863_s8 + $0x136c] sm:$0xff] %v361_v5  ;;  %v367_v8 = vld [vmem:[%s10867_s9 + $0x28c8] sm:$0xff] }
  0x5d   : >> { %364 = vst [vmem:[%s10863_s8 + $0x1374] sm:$0xff] %v363_v6  ;;  %366 = vst [vmem:[%s10863_s8 + $0x137c] sm:$0xff] %v365_v7  ;;  %v369_v9 = vld [vmem:[%s10867_s9 + $0x28d0] sm:$0xff]  ;;  %v371_v10 = vld [vmem:[%s10867_s9 + $0x28d8] sm:$0xff]  ;;  %219 = sbr.rel (!%p216_p0) target bundleno = 57 (0x39), region = 235 }
  0x5e   : >> { %368 = vst [vmem:[%s10863_s8 + $0x1488] sm:$0xff] %v367_v8  ;;  %370 = vst [vmem:[%s10863_s8 + $0x1490] sm:$0xff] %v369_v9  ;;  %v373_v11 = vld [vmem:[%s10867_s9 + $0x28e0] sm:$0xff]  ;;  %v375_v12 = vld [vmem:[%s10867_s9 + $0x2b0c] sm:$0xff] }
  0x5f   : >> { %372 = vst [vmem:[%s10863_s8 + $0x1498] sm:$0xff] %v371_v10  ;;  %v377_v13 = vld [vmem:[%s10867_s9 + $0x2b14] sm:$0xff]  ;;  %374 = vst [vmem:[%s10863_s8 + $0x14a0] sm:$0xff] %v373_v11  ;;  %v379_v14 = vld [vmem:[%s10867_s9 + $0x2b1c] sm:$0xff] }
  0x60   : >> { %376 = vst [vmem:[%s10863_s8 + $0x15ac] sm:$0xff] %v375_v12  ;;  %378 = vst [vmem:[%s10863_s8 + $0x15b4] sm:$0xff] %v377_v13  ;;  %v381_v15 = vld [vmem:[%s10867_s9 + $0x2b24] sm:$0xff]  ;;  %v383_v16 = vld [vmem:[%s10867_s9 + $0x2d50] sm:$0xff] }
  0x61   : >> { %380 = vst [vmem:[%s10863_s8 + $0x15bc] sm:$0xff] %v379_v14  ;;  %382 = vst [vmem:[%s10863_s8 + $0x15c4] sm:$0xff] %v381_v15  ;;  %v385_v17 = vld [vmem:[%s10867_s9 + $0x2d58] sm:$0xff]  ;;  %v387_v18 = vld [vmem:[%s10867_s9 + $0x2d60] sm:$0xff] }
  0x62   : >> { %384 = vst [vmem:[%s10863_s8 + $0x16d0] sm:$0xff] %v383_v16  ;;  %v389_v19 = vld [vmem:[%s10867_s9 + $0x2d68] sm:$0xff]  ;;  %386 = vst [vmem:[%s10863_s8 + $0x16d8] sm:$0xff] %v385_v17  ;;  %s13393_s9 = smov %s11138_s21 }
  0x63   : >> { %388 = vst [vmem:[%s10863_s8 + $0x16e0] sm:$0xff] %v387_v18  ;;  %390 = vst [vmem:[%s10863_s8 + $0x16e8] sm:$0xff] %v389_v19  ;;  %s13392_s8 = smov %s11141_s22 }
  0x64 PF: > { %s11287_s23 = sand.u32 3, %s210_s6   ;;  %s9209_s24 = sshll.u32 %s11071_s7, 9 }
  0x65   : > { %s402_s25 = sshra.s32 %s9209_s24, 4  ;;  %p8252_p1 = scmp.le.s32.totalorder %s11287_s23, 0 }
  0x66   : > { %s11291_s26 = scalar_lea.vmem %s11056_s28, %s402_s25   ;;  %s11294_s27 = scalar_lea.vmem %s11060_s4, %s402_s25 [#allocation2]  }
  0x67   : > { %8124 = sbr.rel (%p8252_p1) target bundleno = 122 (0x7a), region = 240  ;;  %s13395_s29 = smov (!%p8252_p1), %s11294_s27 }
  0x68   : > { %s13396_s8 = smov (!%p8252_p1), %s11291_s26  ;;  %s11303_s9 = smov (!%p8252_p1), 0  }
  0x69   : > { %s11305_s10 = smov (!%p8252_p1), 0  }
  0x6e LB: >> { %v418_v20 = vld [vmem:[%s10883_s8] sm:$0xff]  ;;  %v422_v22 = vld [vmem:[%s10883_s8 + $0x488] sm:$0xff]  ;;  %s460_s6 = sadd.s32 1, %s10887_s9  ;;  %v426_v24 = vld [vmem:[%s10883_s8 + $0x910] sm:$0xff]  ;;  %s412_s10 = sadd.s32 1, %s10891_s10   ;;  %s10891_s10 = sphi %s11305_s10, %s412_s10   ;;  %s10887_s9 = sphi %s11303_s9, %s13398_s9   ;;  %s10883_s8 = sphi %s13396_s8, %s465_s8   ;;  %s10879_s29 = sphi %s13395_s29, %s13397_s29  }
  0x6f   : >> { %v420_v21 = vld [vmem:[%s10883_s8 + $0x244] sm:$0xff]  ;;  %419 = vst [vmem:[%s10879_s29] sm:$0xff] %v418_v20  ;;  %423 = vst [vmem:[%s10879_s29 + $0x248] sm:$0xff] %v422_v22  ;;  %v424_v23 = vld [vmem:[%s10883_s8 + $0x6cc] sm:$0xff]  ;;  %p461_p2 = scmp.ge.s32.totalorder %s460_s6, %s11287_s23  ;;  %p411_p3 = scmp.ge.s32.totalorder %s412_s10, %s11287_s23 }
  0x70   : >> { %421 = vst [vmem:[%s10879_s29 + $0x124] sm:$0xff] %v420_v21  ;;  %v428_v25 = vld [vmem:[%s10883_s8 + $0xb54] sm:$0xff]  ;;  %425 = vst [vmem:[%s10879_s29 + $0x36c] sm:$0xff] %v424_v23  ;;  %v432_v27 = vld [vmem:[%s10883_s8 + $0xfdc] sm:$0xff] }
  0x71   : >> { %427 = vst [vmem:[%s10879_s29 + $0x490] sm:$0xff] %v426_v24  ;;  %429 = vst [vmem:[%s10879_s29 + $0x5b4] sm:$0xff] %v428_v25  ;;  %v430_v26 = vld [vmem:[%s10883_s8 + $0xd98] sm:$0xff]  ;;  %v434_v28 = vld [vmem:[%s10883_s8 + $0x1220] sm:$0xff]  ;;  %s13426_s6 = smov (%p461_p2, %s460_s6), 0 }
  0x72   : >> { %431 = vst [vmem:[%s10879_s29 + $0x6d8] sm:$0xff] %v430_v26  ;;  %433 = vst [vmem:[%s10879_s29 + $0x7fc] sm:$0xff] %v432_v27  ;;  %v436_v29 = vld [vmem:[%s10883_s8 + $0x1464] sm:$0xff]  ;;  %v440_v31 = vld [vmem:[%s10883_s8 + $0x18ec] sm:$0xff]  ;;  %s8253_s7 = sshll.u32 %s13426_s6, 3  ;;  %s13398_s9 = smov %s13426_s6 }
  0x73   : >> { %435 = vst [vmem:[%s10879_s29 + $0x920] sm:$0xff] %v434_v28  ;;  %v438_v30 = vld [vmem:[%s10883_s8 + $0x16a8] sm:$0xff]  ;;  %437 = vst [vmem:[%s10879_s29 + $0xa44] sm:$0xff] %v436_v29  ;;  %v442_v32 = vld [vmem:[%s10883_s8 + $0x1b30] sm:$0xff]  ;;  %s466_s11 = scalar_lea.vmem %s11294_s27, %s8253_s7 [#allocation2]   ;;  %414 = sbr.rel (!%p411_p3) target bundleno = 110 (0x6e), region = 246 }
  0x74   : >> { %439 = vst [vmem:[%s10879_s29 + $0xb68] sm:$0xff] %v438_v30  ;;  %441 = vst [vmem:[%s10879_s29 + $0xc8c] sm:$0xff] %v440_v31  ;;  %v444_v33 = vld [vmem:[%s10883_s8 + $0x1d74] sm:$0xff]  ;;  %v448_v35 = vld [vmem:[%s10883_s8 + $0x21fc] sm:$0xff] }
  0x75   : >> { %v446_v34 = vld [vmem:[%s10883_s8 + $0x1fb8] sm:$0xff]  ;;  %443 = vst [vmem:[%s10879_s29 + $0xdb0] sm:$0xff] %v442_v32  ;;  %445 = vst [vmem:[%s10879_s29 + $0xed4] sm:$0xff] %v444_v33  ;;  %v450_v36 = vld [vmem:[%s10883_s8 + $0x2440] sm:$0xff] }
  0x76   : >> { %447 = vst [vmem:[%s10879_s29 + $0xff8] sm:$0xff] %v446_v34  ;;  %v452_v37 = vld [vmem:[%s10883_s8 + $0x2684] sm:$0xff]  ;;  %449 = vst [vmem:[%s10879_s29 + $0x111c] sm:$0xff] %v448_v35  ;;  %v456_v39 = vld [vmem:[%s10883_s8 + $0x2b0c] sm:$0xff] }
  0x77   : >> { %451 = vst [vmem:[%s10879_s29 + $0x1240] sm:$0xff] %v450_v36  ;;  %453 = vst [vmem:[%s10879_s29 + $0x1364] sm:$0xff] %v452_v37  ;;  %v454_v38 = vld [vmem:[%s10883_s8 + $0x28c8] sm:$0xff]  ;;  %v458_v40 = vld [vmem:[%s10883_s8 + $0x2d50] sm:$0xff]  ;;  %s465_s8 = scalar_lea.vmem %s11291_s26, %s8253_s7  }
  0x78   : >> { %455 = vst [vmem:[%s10879_s29 + $0x1488] sm:$0xff] %v454_v38  ;;  %457 = vst [vmem:[%s10879_s29 + $0x15ac] sm:$0xff] %v456_v39 }
  0x79   : >> { %459 = vst [vmem:[%s10879_s29 + $0x16d0] sm:$0xff] %v458_v40  ;;  %s13397_s29 = smov %s466_s11 }
  0x7a PF: > { %469 = sbr.rel (%p206_p10) target bundleno = 225 (0xe1), region = 69  ;;  %s471_s17 = ssub.s32 (!%p206_p10), %s11058_s30, %s11064_s5 }
  0x7b   : > { %s475_s18 = sshrl.u32 (!%p206_p10), %s11058_s30, 3  ;;  %s11378_s21 = scalar_lea.vmem (!%p206_p10), %s11056_s28, %s471_s17 }
  0x7c   : > { %s11381_s22 = scalar_lea.vmem (!%p206_p10), %s11060_s4, %s471_s17 [#allocation2]  ;;  %s11385_s24 = sshrl.u32 (!%p206_p10), %s475_s18, 2 }
  0x7d   : > { %p8255_p4 = scmp.le.s32.totalorder (!%p206_p10), %s11385_s24, 0 }
  0x81   : > { %8138 = sbr.rel (%p8255_p4) target bundleno = 179 (0xb3), region = 251  ;;  %s13399_s23 = smov (!%p8255_p4), %s11060_s4 }
  0x82   : > { %s13400_s25 = smov (!%p8255_p4), %s11056_s28  ;;  %s11394_s26 = smov (!%p8255_p4), 0  }
  0x83   : > { %s11396_s27 = smov (!%p8255_p4), 0  }
  0x88 LB: >> { %v488_v41 = vld [vmem:[%s10899_s25] sm:$0xff]  ;;  %v490_v42 = vld [vmem:[%s10899_s25 + $0x8] sm:$0xff]  ;;  %v492_v43 = vld [vmem:[%s10899_s25 + $0x10] sm:$0xff]  ;;  %s656_s29 = sadd.s32 1, %s10903_s26  ;;  %s482_s27 = sadd.s32 1, %s10907_s27   ;;  %s10907_s27 = sphi %s11396_s27, %s482_s27   ;;  %s10903_s26 = sphi %s11394_s26, %s13403_s26   ;;  %s10899_s25 = sphi %s13400_s25, %s13402_s25   ;;  %s10895_s23 = sphi %s13399_s23, %s13401_s23  }
  0x89   : >> { %489 = vst [vmem:[%s10895_s23] sm:$0xff] %v488_v41  ;;  %491 = vst [vmem:[%s10895_s23 + $0x8] sm:$0xff] %v490_v42  ;;  %v494_v44 = vld [vmem:[%s10899_s25 + $0x18] sm:$0xff]  ;;  %v496_v45 = vld [vmem:[%s10899_s25 + $0x244] sm:$0xff]  ;;  %p657_p6 = scmp.ge.s32.totalorder %s656_s29, %s11385_s24  ;;  %p481_p7 = scmp.ge.s32.totalorder %s482_s27, %s11385_s24 }
  0x8a   : >> { %493 = vst [vmem:[%s10895_s23 + $0x10] sm:$0xff] %v492_v43  ;;  %v498_v46 = vld [vmem:[%s10899_s25 + $0x24c] sm:$0xff]  ;;  %495 = vst [vmem:[%s10895_s23 + $0x18] sm:$0xff] %v494_v44  ;;  %v500_v47 = vld [vmem:[%s10899_s25 + $0x254] sm:$0xff] }
  0x8b   : >> { %497 = vst [vmem:[%s10895_s23 + $0x124] sm:$0xff] %v496_v45  ;;  %499 = vst [vmem:[%s10895_s23 + $0x12c] sm:$0xff] %v498_v46  ;;  %v502_v48 = vld [vmem:[%s10899_s25 + $0x25c] sm:$0xff]  ;;  %v504_v49 = vld [vmem:[%s10899_s25 + $0x488] sm:$0xff]  ;;  %s13428_s29 = smov (%p657_p6, %s656_s29), 0 }
  0x8c   : >> { %501 = vst [vmem:[%s10895_s23 + $0x134] sm:$0xff] %v500_v47  ;;  %503 = vst [vmem:[%s10895_s23 + $0x13c] sm:$0xff] %v502_v48  ;;  %v506_v50 = vld [vmem:[%s10899_s25 + $0x490] sm:$0xff]  ;;  %v508_v51 = vld [vmem:[%s10899_s25 + $0x498] sm:$0xff]  ;;  %s8256_s8 = sshll.u32 %s13428_s29, 5  ;;  %s13403_s26 = smov %s13428_s29 }
  0x8d   : >> { %505 = vst [vmem:[%s10895_s23 + $0x248] sm:$0xff] %v504_v49  ;;  %v510_v52 = vld [vmem:[%s10899_s25 + $0x4a0] sm:$0xff]  ;;  %507 = vst [vmem:[%s10895_s23 + $0x250] sm:$0xff] %v506_v50  ;;  %v512_v53 = vld [vmem:[%s10899_s25 + $0x6cc] sm:$0xff]  ;;  %s11452_s9 = scalar_lea.vmem %s11056_s28, %s8256_s8   ;;  %s11455_s10 = scalar_lea.vmem %s11060_s4, %s8256_s8 [#allocation2]  }
  0x8e   : >> { %509 = vst [vmem:[%s10895_s23 + $0x258] sm:$0xff] %v508_v51  ;;  %511 = vst [vmem:[%s10895_s23 + $0x260] sm:$0xff] %v510_v52  ;;  %v514_v54 = vld [vmem:[%s10899_s25 + $0x6d4] sm:$0xff]  ;;  %v516_v55 = vld [vmem:[%s10899_s25 + $0x6dc] sm:$0xff] }
  0x8f   : >> { %513 = vst [vmem:[%s10895_s23 + $0x36c] sm:$0xff] %v512_v53  ;;  %515 = vst [vmem:[%s10895_s23 + $0x374] sm:$0xff] %v514_v54  ;;  %v518_v56 = vld [vmem:[%s10899_s25 + $0x6e4] sm:$0xff]  ;;  %v520_v57 = vld [vmem:[%s10899_s25 + $0x910] sm:$0xff] }
  0x90   : >> { %517 = vst [vmem:[%s10895_s23 + $0x37c] sm:$0xff] %v516_v55  ;;  %v522_v58 = vld [vmem:[%s10899_s25 + $0x918] sm:$0xff]  ;;  %519 = vst [vmem:[%s10895_s23 + $0x384] sm:$0xff] %v518_v56  ;;  %v524_v59 = vld [vmem:[%s10899_s25 + $0x920] sm:$0xff] }
  0x91   : >> { %521 = vst [vmem:[%s10895_s23 + $0x490] sm:$0xff] %v520_v57  ;;  %523 = vst [vmem:[%s10895_s23 + $0x498] sm:$0xff] %v522_v58  ;;  %v526_v60 = vld [vmem:[%s10899_s25 + $0x928] sm:$0xff]  ;;  %v528_v61 = vld [vmem:[%s10899_s25 + $0xb54] sm:$0xff] }
  0x92   : >> { %525 = vst [vmem:[%s10895_s23 + $0x4a0] sm:$0xff] %v524_v59  ;;  %527 = vst [vmem:[%s10895_s23 + $0x4a8] sm:$0xff] %v526_v60  ;;  %v530_v62 = vld [vmem:[%s10899_s25 + $0xb5c] sm:$0xff]  ;;  %v532_v63 = vld [vmem:[%s10899_s25 + $0xb64] sm:$0xff] }
  0x93   : >> { %529 = vst [vmem:[%s10895_s23 + $0x5b4] sm:$0xff] %v528_v61  ;;  %v534_v0 = vld [vmem:[%s10899_s25 + $0xb6c] sm:$0xff]  ;;  %531 = vst [vmem:[%s10895_s23 + $0x5bc] sm:$0xff] %v530_v62  ;;  %v536_v1 = vld [vmem:[%s10899_s25 + $0xd98] sm:$0xff] }
  0x94   : >> { %533 = vst [vmem:[%s10895_s23 + $0x5c4] sm:$0xff] %v532_v63  ;;  %535 = vst [vmem:[%s10895_s23 + $0x5cc] sm:$0xff] %v534_v0  ;;  %v538_v2 = vld [vmem:[%s10899_s25 + $0xda0] sm:$0xff]  ;;  %v540_v3 = vld [vmem:[%s10899_s25 + $0xda8] sm:$0xff] }
  0x95   : >> { %537 = vst [vmem:[%s10895_s23 + $0x6d8] sm:$0xff] %v536_v1  ;;  %539 = vst [vmem:[%s10895_s23 + $0x6e0] sm:$0xff] %v538_v2  ;;  %v542_v4 = vld [vmem:[%s10899_s25 + $0xdb0] sm:$0xff]  ;;  %v544_v5 = vld [vmem:[%s10899_s25 + $0xfdc] sm:$0xff] }
  0x96   : >> { %541 = vst [vmem:[%s10895_s23 + $0x6e8] sm:$0xff] %v540_v3  ;;  %v546_v6 = vld [vmem:[%s10899_s25 + $0xfe4] sm:$0xff]  ;;  %543 = vst [vmem:[%s10895_s23 + $0x6f0] sm:$0xff] %v542_v4  ;;  %v548_v7 = vld [vmem:[%s10899_s25 + $0xfec] sm:$0xff] }
  0x97   : >> { %545 = vst [vmem:[%s10895_s23 + $0x7fc] sm:$0xff] %v544_v5  ;;  %547 = vst [vmem:[%s10895_s23 + $0x804] sm:$0xff] %v546_v6  ;;  %v550_v8 = vld [vmem:[%s10899_s25 + $0xff4] sm:$0xff]  ;;  %v552_v9 = vld [vmem:[%s10899_s25 + $0x1220] sm:$0xff] }
  0x98   : >> { %549 = vst [vmem:[%s10895_s23 + $0x80c] sm:$0xff] %v548_v7  ;;  %551 = vst [vmem:[%s10895_s23 + $0x814] sm:$0xff] %v550_v8  ;;  %v554_v10 = vld [vmem:[%s10899_s25 + $0x1228] sm:$0xff]  ;;  %v556_v11 = vld [vmem:[%s10899_s25 + $0x1230] sm:$0xff] }
  0x99   : >> { %553 = vst [vmem:[%s10895_s23 + $0x920] sm:$0xff] %v552_v9  ;;  %v558_v12 = vld [vmem:[%s10899_s25 + $0x1238] sm:$0xff]  ;;  %555 = vst [vmem:[%s10895_s23 + $0x928] sm:$0xff] %v554_v10  ;;  %v560_v13 = vld [vmem:[%s10899_s25 + $0x1464] sm:$0xff] }
  0x9a   : >> { %557 = vst [vmem:[%s10895_s23 + $0x930] sm:$0xff] %v556_v11  ;;  %559 = vst [vmem:[%s10895_s23 + $0x938] sm:$0xff] %v558_v12  ;;  %v562_v14 = vld [vmem:[%s10899_s25 + $0x146c] sm:$0xff]  ;;  %v564_v15 = vld [vmem:[%s10899_s25 + $0x1474] sm:$0xff] }
  0x9b   : >> { %561 = vst [vmem:[%s10895_s23 + $0xa44] sm:$0xff] %v560_v13  ;;  %563 = vst [vmem:[%s10895_s23 + $0xa4c] sm:$0xff] %v562_v14  ;;  %v566_v16 = vld [vmem:[%s10899_s25 + $0x147c] sm:$0xff]  ;;  %v568_v17 = vld [vmem:[%s10899_s25 + $0x16a8] sm:$0xff] }
  0x9c   : >> { %565 = vst [vmem:[%s10895_s23 + $0xa54] sm:$0xff] %v564_v15  ;;  %v570_v18 = vld [vmem:[%s10899_s25 + $0x16b0] sm:$0xff]  ;;  %567 = vst [vmem:[%s10895_s23 + $0xa5c] sm:$0xff] %v566_v16  ;;  %v572_v19 = vld [vmem:[%s10899_s25 + $0x16b8] sm:$0xff] }
  0x9d   : >> { %569 = vst [vmem:[%s10895_s23 + $0xb68] sm:$0xff] %v568_v17  ;;  %571 = vst [vmem:[%s10895_s23 + $0xb70] sm:$0xff] %v570_v18  ;;  %v574_v20 = vld [vmem:[%s10899_s25 + $0x16c0] sm:$0xff]  ;;  %v576_v21 = vld [vmem:[%s10899_s25 + $0x18ec] sm:$0xff] }
  0x9e   : >> { %573 = vst [vmem:[%s10895_s23 + $0xb78] sm:$0xff] %v572_v19  ;;  %575 = vst [vmem:[%s10895_s23 + $0xb80] sm:$0xff] %v574_v20  ;;  %v578_v22 = vld [vmem:[%s10899_s25 + $0x18f4] sm:$0xff]  ;;  %v580_v23 = vld [vmem:[%s10899_s25 + $0x18fc] sm:$0xff] }
  0x9f   : >> { %577 = vst [vmem:[%s10895_s23 + $0xc8c] sm:$0xff] %v576_v21  ;;  %v582_v24 = vld [vmem:[%s10899_s25 + $0x1904] sm:$0xff]  ;;  %579 = vst [vmem:[%s10895_s23 + $0xc94] sm:$0xff] %v578_v22  ;;  %v584_v25 = vld [vmem:[%s10899_s25 + $0x1b30] sm:$0xff] }
  0xa0   : >> { %581 = vst [vmem:[%s10895_s23 + $0xc9c] sm:$0xff] %v580_v23  ;;  %583 = vst [vmem:[%s10895_s23 + $0xca4] sm:$0xff] %v582_v24  ;;  %v586_v26 = vld [vmem:[%s10899_s25 + $0x1b38] sm:$0xff]  ;;  %v588_v27 = vld [vmem:[%s10899_s25 + $0x1b40] sm:$0xff] }
  0xa1   : >> { %585 = vst [vmem:[%s10895_s23 + $0xdb0] sm:$0xff] %v584_v25  ;;  %587 = vst [vmem:[%s10895_s23 + $0xdb8] sm:$0xff] %v586_v26  ;;  %v590_v28 = vld [vmem:[%s10899_s25 + $0x1b48] sm:$0xff]  ;;  %v592_v29 = vld [vmem:[%s10899_s25 + $0x1d74] sm:$0xff] }
  0xa2   : >> { %589 = vst [vmem:[%s10895_s23 + $0xdc0] sm:$0xff] %v588_v27  ;;  %v594_v30 = vld [vmem:[%s10899_s25 + $0x1d7c] sm:$0xff]  ;;  %591 = vst [vmem:[%s10895_s23 + $0xdc8] sm:$0xff] %v590_v28  ;;  %v596_v31 = vld [vmem:[%s10899_s25 + $0x1d84] sm:$0xff] }
  0xa3   : >> { %593 = vst [vmem:[%s10895_s23 + $0xed4] sm:$0xff] %v592_v29  ;;  %595 = vst [vmem:[%s10895_s23 + $0xedc] sm:$0xff] %v594_v30  ;;  %v598_v32 = vld [vmem:[%s10899_s25 + $0x1d8c] sm:$0xff]  ;;  %v600_v33 = vld [vmem:[%s10899_s25 + $0x1fb8] sm:$0xff] }
  0xa4   : >> { %597 = vst [vmem:[%s10895_s23 + $0xee4] sm:$0xff] %v596_v31  ;;  %599 = vst [vmem:[%s10895_s23 + $0xeec] sm:$0xff] %v598_v32  ;;  %v602_v34 = vld [vmem:[%s10899_s25 + $0x1fc0] sm:$0xff]  ;;  %v604_v35 = vld [vmem:[%s10899_s25 + $0x1fc8] sm:$0xff] }
  0xa5   : >> { %601 = vst [vmem:[%s10895_s23 + $0xff8] sm:$0xff] %v600_v33  ;;  %v606_v36 = vld [vmem:[%s10899_s25 + $0x1fd0] sm:$0xff]  ;;  %603 = vst [vmem:[%s10895_s23 + $0x1000] sm:$0xff] %v602_v34  ;;  %v608_v37 = vld [vmem:[%s10899_s25 + $0x21fc] sm:$0xff] }
  0xa6   : >> { %605 = vst [vmem:[%s10895_s23 + $0x1008] sm:$0xff] %v604_v35  ;;  %607 = vst [vmem:[%s10895_s23 + $0x1010] sm:$0xff] %v606_v36  ;;  %v610_v38 = vld [vmem:[%s10899_s25 + $0x2204] sm:$0xff]  ;;  %v612_v39 = vld [vmem:[%s10899_s25 + $0x220c] sm:$0xff] }
  0xa7   : >> { %609 = vst [vmem:[%s10895_s23 + $0x111c] sm:$0xff] %v608_v37  ;;  %611 = vst [vmem:[%s10895_s23 + $0x1124] sm:$0xff] %v610_v38  ;;  %v614_v40 = vld [vmem:[%s10899_s25 + $0x2214] sm:$0xff]  ;;  %v616_v41 = vld [vmem:[%s10899_s25 + $0x2440] sm:$0xff] }
  0xa8   : >> { %613 = vst [vmem:[%s10895_s23 + $0x112c] sm:$0xff] %v612_v39  ;;  %v618_v42 = vld [vmem:[%s10899_s25 + $0x2448] sm:$0xff]  ;;  %615 = vst [vmem:[%s10895_s23 + $0x1134] sm:$0xff] %v614_v40  ;;  %v620_v43 = vld [vmem:[%s10899_s25 + $0x2450] sm:$0xff] }
  0xa9   : >> { %617 = vst [vmem:[%s10895_s23 + $0x1240] sm:$0xff] %v616_v41  ;;  %619 = vst [vmem:[%s10895_s23 + $0x1248] sm:$0xff] %v618_v42  ;;  %v622_v44 = vld [vmem:[%s10899_s25 + $0x2458] sm:$0xff]  ;;  %v624_v45 = vld [vmem:[%s10899_s25 + $0x2684] sm:$0xff] }
  0xaa   : >> { %621 = vst [vmem:[%s10895_s23 + $0x1250] sm:$0xff] %v620_v43  ;;  %623 = vst [vmem:[%s10895_s23 + $0x1258] sm:$0xff] %v622_v44  ;;  %v626_v46 = vld [vmem:[%s10899_s25 + $0x268c] sm:$0xff]  ;;  %v628_v47 = vld [vmem:[%s10899_s25 + $0x2694] sm:$0xff] }
  0xab   : >> { %625 = vst [vmem:[%s10895_s23 + $0x1364] sm:$0xff] %v624_v45  ;;  %v630_v48 = vld [vmem:[%s10899_s25 + $0x269c] sm:$0xff]  ;;  %627 = vst [vmem:[%s10895_s23 + $0x136c] sm:$0xff] %v626_v46  ;;  %v632_v49 = vld [vmem:[%s10899_s25 + $0x28c8] sm:$0xff] }
  0xac   : >> { %629 = vst [vmem:[%s10895_s23 + $0x1374] sm:$0xff] %v628_v47  ;;  %631 = vst [vmem:[%s10895_s23 + $0x137c] sm:$0xff] %v630_v48  ;;  %v634_v50 = vld [vmem:[%s10899_s25 + $0x28d0] sm:$0xff]  ;;  %v636_v51 = vld [vmem:[%s10899_s25 + $0x28d8] sm:$0xff]  ;;  %484 = sbr.rel (!%p481_p7) target bundleno = 136 (0x88), region = 257 }
  0xad   : >> { %633 = vst [vmem:[%s10895_s23 + $0x1488] sm:$0xff] %v632_v49  ;;  %635 = vst [vmem:[%s10895_s23 + $0x1490] sm:$0xff] %v634_v50  ;;  %v638_v52 = vld [vmem:[%s10899_s25 + $0x28e0] sm:$0xff]  ;;  %v640_v53 = vld [vmem:[%s10899_s25 + $0x2b0c] sm:$0xff] }
  0xae   : >> { %637 = vst [vmem:[%s10895_s23 + $0x1498] sm:$0xff] %v636_v51  ;;  %v642_v54 = vld [vmem:[%s10899_s25 + $0x2b14] sm:$0xff]  ;;  %639 = vst [vmem:[%s10895_s23 + $0x14a0] sm:$0xff] %v638_v52  ;;  %v644_v55 = vld [vmem:[%s10899_s25 + $0x2b1c] sm:$0xff] }
  0xaf   : >> { %641 = vst [vmem:[%s10895_s23 + $0x15ac] sm:$0xff] %v640_v53  ;;  %643 = vst [vmem:[%s10895_s23 + $0x15b4] sm:$0xff] %v642_v54  ;;  %v646_v56 = vld [vmem:[%s10899_s25 + $0x2b24] sm:$0xff]  ;;  %v648_v57 = vld [vmem:[%s10899_s25 + $0x2d50] sm:$0xff] }
  0xb0   : >> { %645 = vst [vmem:[%s10895_s23 + $0x15bc] sm:$0xff] %v644_v55  ;;  %647 = vst [vmem:[%s10895_s23 + $0x15c4] sm:$0xff] %v646_v56  ;;  %v650_v58 = vld [vmem:[%s10899_s25 + $0x2d58] sm:$0xff]  ;;  %v652_v59 = vld [vmem:[%s10899_s25 + $0x2d60] sm:$0xff] }
  0xb1   : >> { %649 = vst [vmem:[%s10895_s23 + $0x16d0] sm:$0xff] %v648_v57  ;;  %v654_v60 = vld [vmem:[%s10899_s25 + $0x2d68] sm:$0xff]  ;;  %651 = vst [vmem:[%s10895_s23 + $0x16d8] sm:$0xff] %v650_v58  ;;  %s13402_s25 = smov %s11452_s9 }
  0xb2   : >> { %653 = vst [vmem:[%s10895_s23 + $0x16e0] sm:$0xff] %v652_v59  ;;  %655 = vst [vmem:[%s10895_s23 + $0x16e8] sm:$0xff] %v654_v60  ;;  %s13401_s23 = smov %s11455_s10 }
  0xb3 PF: > { %s11601_s6 = sand.u32 3, %s475_s18   ;;  %s9211_s7 = sshll.u32 %s11385_s24, 9 }
  0xb4   : > { %s667_s11 = sshra.s32 %s9211_s7, 4  ;;  %p8261_p8 = scmp.le.s32.totalorder %s11601_s6, 0 }
  0xb5   : > { %s11605_s17 = scalar_lea.vmem %s11056_s28, %s667_s11   ;;  %s11608_s8 = scalar_lea.vmem %s11060_s4, %s667_s11 [#allocation2]  }
  0xb6   : > { %8152 = sbr.rel (%p8261_p8) target bundleno = 201 (0xc9), region = 262  ;;  %s13404_s23 = smov (!%p8261_p8), %s11608_s8 }
  0xb7   : > { %s13405_s25 = smov (!%p8261_p8), %s11605_s17  ;;  %s11617_s26 = smov (!%p8261_p8), 0  }
  0xb8   : > { %s11619_s27 = smov (!%p8261_p8), 0  }
  0xbd LB: >> { %v683_v61 = vld [vmem:[%s10915_s25] sm:$0xff]  ;;  %v687_v63 = vld [vmem:[%s10915_s25 + $0x488] sm:$0xff]  ;;  %s725_s18 = sadd.s32 1, %s10919_s26  ;;  %v691_v1 = vld [vmem:[%s10915_s25 + $0x910] sm:$0xff]  ;;  %s677_s27 = sadd.s32 1, %s10923_s27   ;;  %s10923_s27 = sphi %s11619_s27, %s677_s27   ;;  %s10919_s26 = sphi %s11617_s26, %s13407_s26   ;;  %s10915_s25 = sphi %s13405_s25, %s730_s25   ;;  %s10911_s23 = sphi %s13404_s23, %s13406_s23  }
  0xbe   : >> { %v685_v62 = vld [vmem:[%s10915_s25 + $0x244] sm:$0xff]  ;;  %684 = vst [vmem:[%s10911_s23] sm:$0xff] %v683_v61  ;;  %688 = vst [vmem:[%s10911_s23 + $0x248] sm:$0xff] %v687_v63  ;;  %v689_v0 = vld [vmem:[%s10915_s25 + $0x6cc] sm:$0xff]  ;;  %p726_p9 = scmp.ge.s32.totalorder %s725_s18, %s11601_s6  ;;  %p676_p10 = scmp.ge.s32.totalorder %s677_s27, %s11601_s6 }
  0xbf   : >> { %686 = vst [vmem:[%s10911_s23 + $0x124] sm:$0xff] %v685_v62  ;;  %v693_v2 = vld [vmem:[%s10915_s25 + $0xb54] sm:$0xff]  ;;  %690 = vst [vmem:[%s10911_s23 + $0x36c] sm:$0xff] %v689_v0  ;;  %v697_v4 = vld [vmem:[%s10915_s25 + $0xfdc] sm:$0xff] }
  0xc0   : >> { %692 = vst [vmem:[%s10911_s23 + $0x490] sm:$0xff] %v691_v1  ;;  %694 = vst [vmem:[%s10911_s23 + $0x5b4] sm:$0xff] %v693_v2  ;;  %v695_v3 = vld [vmem:[%s10915_s25 + $0xd98] sm:$0xff]  ;;  %v699_v5 = vld [vmem:[%s10915_s25 + $0x1220] sm:$0xff]  ;;  %s13430_s18 = smov (%p726_p9, %s725_s18), 0 }
  0xc1   : >> { %696 = vst [vmem:[%s10911_s23 + $0x6d8] sm:$0xff] %v695_v3  ;;  %698 = vst [vmem:[%s10911_s23 + $0x7fc] sm:$0xff] %v697_v4  ;;  %v701_v6 = vld [vmem:[%s10915_s25 + $0x1464] sm:$0xff]  ;;  %v705_v8 = vld [vmem:[%s10915_s25 + $0x18ec] sm:$0xff]  ;;  %s8262_s24 = sshll.u32 %s13430_s18, 3  ;;  %s13407_s26 = smov %s13430_s18 }
  0xc2   : >> { %700 = vst [vmem:[%s10911_s23 + $0x920] sm:$0xff] %v699_v5  ;;  %v703_v7 = vld [vmem:[%s10915_s25 + $0x16a8] sm:$0xff]  ;;  %702 = vst [vmem:[%s10911_s23 + $0xa44] sm:$0xff] %v701_v6  ;;  %v707_v9 = vld [vmem:[%s10915_s25 + $0x1b30] sm:$0xff]  ;;  %s731_s29 = scalar_lea.vmem %s11608_s8, %s8262_s24 [#allocation2]   ;;  %679 = sbr.rel (!%p676_p10) target bundleno = 189 (0xbd), region = 268 }
  0xc3   : >> { %704 = vst [vmem:[%s10911_s23 + $0xb68] sm:$0xff] %v703_v7  ;;  %706 = vst [vmem:[%s10911_s23 + $0xc8c] sm:$0xff] %v705_v8  ;;  %v709_v10 = vld [vmem:[%s10915_s25 + $0x1d74] sm:$0xff]  ;;  %v713_v12 = vld [vmem:[%s10915_s25 + $0x21fc] sm:$0xff] }
  0xc4   : >> { %v711_v11 = vld [vmem:[%s10915_s25 + $0x1fb8] sm:$0xff]  ;;  %708 = vst [vmem:[%s10911_s23 + $0xdb0] sm:$0xff] %v707_v9  ;;  %710 = vst [vmem:[%s10911_s23 + $0xed4] sm:$0xff] %v709_v10  ;;  %v715_v13 = vld [vmem:[%s10915_s25 + $0x2440] sm:$0xff] }
  0xc5   : >> { %712 = vst [vmem:[%s10911_s23 + $0xff8] sm:$0xff] %v711_v11  ;;  %v717_v14 = vld [vmem:[%s10915_s25 + $0x2684] sm:$0xff]  ;;  %714 = vst [vmem:[%s10911_s23 + $0x111c] sm:$0xff] %v713_v12  ;;  %v721_v16 = vld [vmem:[%s10915_s25 + $0x2b0c] sm:$0xff] }
  0xc6   : >> { %716 = vst [vmem:[%s10911_s23 + $0x1240] sm:$0xff] %v715_v13  ;;  %718 = vst [vmem:[%s10911_s23 + $0x1364] sm:$0xff] %v717_v14  ;;  %v719_v15 = vld [vmem:[%s10915_s25 + $0x28c8] sm:$0xff]  ;;  %v723_v17 = vld [vmem:[%s10915_s25 + $0x2d50] sm:$0xff]  ;;  %s730_s25 = scalar_lea.vmem %s11605_s17, %s8262_s24  }
  0xc7   : >> { %720 = vst [vmem:[%s10911_s23 + $0x1488] sm:$0xff] %v719_v15  ;;  %722 = vst [vmem:[%s10911_s23 + $0x15ac] sm:$0xff] %v721_v16 }
  0xc8   : >> { %724 = vst [vmem:[%s10911_s23 + $0x16d0] sm:$0xff] %v723_v17  ;;  %s13406_s23 = smov %s731_s29 }
  0xc9 PF: > { %s10989_s9 = smov 0  }
  0xca   : > { %s11687_s10 = sshllo.u32 %s10989_s9, %s11064_s5 }
  0xcb   : > { %v741_v18 = vld [vmem:[%s11378_s21] sm:%s11687_s10]  ;;  %v745_v20 = vld [vmem:[%s11378_s21 + $0x488] sm:%s11687_s10] }
  0xcc   : > { %v743_v19 = vld [vmem:[%s11378_s21 + $0x244] sm:%s11687_s10]  ;;  %742 = vst [vmem:[%s11381_s22] sm:%s11687_s10] %v741_v18 }
  0xcd   : > { %744 = vst [vmem:[%s11381_s22 + $0x124] sm:%s11687_s10] %v743_v19  ;;  %v747_v21 = vld [vmem:[%s11378_s21 + $0x6cc] sm:%s11687_s10] }
  0xce   : > { %746 = vst [vmem:[%s11381_s22 + $0x248] sm:%s11687_s10] %v745_v20  ;;  %748 = vst [vmem:[%s11381_s22 + $0x36c] sm:%s11687_s10] %v747_v21 }
  0xcf   : > { %v749_v22 = vld [vmem:[%s11378_s21 + $0x910] sm:%s11687_s10]  ;;  %v753_v24 = vld [vmem:[%s11378_s21 + $0xd98] sm:%s11687_s10] }
  0xd0   : > { %v751_v23 = vld [vmem:[%s11378_s21 + $0xb54] sm:%s11687_s10]  ;;  %750 = vst [vmem:[%s11381_s22 + $0x490] sm:%s11687_s10] %v749_v22 }
  0xd1   : > { %752 = vst [vmem:[%s11381_s22 + $0x5b4] sm:%s11687_s10] %v751_v23  ;;  %v755_v25 = vld [vmem:[%s11378_s21 + $0xfdc] sm:%s11687_s10] }
  0xd2   : > { %754 = vst [vmem:[%s11381_s22 + $0x6d8] sm:%s11687_s10] %v753_v24  ;;  %756 = vst [vmem:[%s11381_s22 + $0x7fc] sm:%s11687_s10] %v755_v25 }
  0xd3   : > { %v757_v26 = vld [vmem:[%s11378_s21 + $0x1220] sm:%s11687_s10]  ;;  %v761_v28 = vld [vmem:[%s11378_s21 + $0x16a8] sm:%s11687_s10] }
  0xd4   : > { %v759_v27 = vld [vmem:[%s11378_s21 + $0x1464] sm:%s11687_s10]  ;;  %758 = vst [vmem:[%s11381_s22 + $0x920] sm:%s11687_s10] %v757_v26 }
  0xd5   : > { %760 = vst [vmem:[%s11381_s22 + $0xa44] sm:%s11687_s10] %v759_v27  ;;  %v763_v29 = vld [vmem:[%s11378_s21 + $0x18ec] sm:%s11687_s10] }
  0xd6   : > { %762 = vst [vmem:[%s11381_s22 + $0xb68] sm:%s11687_s10] %v761_v28  ;;  %764 = vst [vmem:[%s11381_s22 + $0xc8c] sm:%s11687_s10] %v763_v29 }
  0xd7   : > { %v765_v30 = vld [vmem:[%s11378_s21 + $0x1b30] sm:%s11687_s10]  ;;  %v769_v32 = vld [vmem:[%s11378_s21 + $0x1fb8] sm:%s11687_s10] }
  0xd8   : > { %v767_v31 = vld [vmem:[%s11378_s21 + $0x1d74] sm:%s11687_s10]  ;;  %766 = vst [vmem:[%s11381_s22 + $0xdb0] sm:%s11687_s10] %v765_v30 }
  0xd9   : > { %768 = vst [vmem:[%s11381_s22 + $0xed4] sm:%s11687_s10] %v767_v31  ;;  %v771_v33 = vld [vmem:[%s11378_s21 + $0x21fc] sm:%s11687_s10] }
  0xda   : > { %770 = vst [vmem:[%s11381_s22 + $0xff8] sm:%s11687_s10] %v769_v32  ;;  %772 = vst [vmem:[%s11381_s22 + $0x111c] sm:%s11687_s10] %v771_v33 }
  0xdb   : > { %v773_v34 = vld [vmem:[%s11378_s21 + $0x2440] sm:%s11687_s10]  ;;  %v777_v36 = vld [vmem:[%s11378_s21 + $0x28c8] sm:%s11687_s10] }
  0xdc   : > { %v775_v35 = vld [vmem:[%s11378_s21 + $0x2684] sm:%s11687_s10]  ;;  %774 = vst [vmem:[%s11381_s22 + $0x1240] sm:%s11687_s10] %v773_v34 }
  0xdd   : > { %776 = vst [vmem:[%s11381_s22 + $0x1364] sm:%s11687_s10] %v775_v35  ;;  %v779_v37 = vld [vmem:[%s11378_s21 + $0x2b0c] sm:%s11687_s10] }
  0xde   : > { %778 = vst [vmem:[%s11381_s22 + $0x1488] sm:%s11687_s10] %v777_v36  ;;  %780 = vst [vmem:[%s11381_s22 + $0x15ac] sm:%s11687_s10] %v779_v37 }
  0xdf   : > { %v781_v38 = vld [vmem:[%s11378_s21 + $0x2d50] sm:%s11687_s10] }
  0xe0   : > { %782 = vst [vmem:[%s11381_s22 + $0x16d0] sm:%s11687_s10] %v781_v38 }
  0xe1 PF: > { %p8264_p11 = scmp.ge.u32.totalorder %s11058_s30, 8 }
  0xe2   : > { %s10990_s5 = smov (!%p8264_p11), 0  }
  0xe3   : > { %153 = sbr.rel (%p8264_p11) target bundleno = 250 (0xfa), region = 40  ;;  %s11775_s21 = sshllo.u32 (!%p8264_p11), %s10990_s5, %s11058_s30 }
  0xe4   : > { %v163_v39 = vld [vmem:[%s11056_s28] sm:%s11775_s21] (!%p8264_p11)  ;;  %v167_v41 = vld [vmem:[%s11056_s28 + $0x488] sm:%s11775_s21] (!%p8264_p11) }
  0xe5   : > { %v165_v40 = vld [vmem:[%s11056_s28 + $0x244] sm:%s11775_s21] (!%p8264_p11)  ;;  %164 = vst [vmem:[%s11060_s4] sm:%s11775_s21] (!%p8264_p11), %v163_v39 }
  0xe6   : > { %166 = vst [vmem:[%s11060_s4 + $0x124] sm:%s11775_s21] (!%p8264_p11), %v165_v40  ;;  %v169_v42 = vld [vmem:[%s11056_s28 + $0x6cc] sm:%s11775_s21] (!%p8264_p11) }
  0xe7   : > { %168 = vst [vmem:[%s11060_s4 + $0x248] sm:%s11775_s21] (!%p8264_p11), %v167_v41  ;;  %170 = vst [vmem:[%s11060_s4 + $0x36c] sm:%s11775_s21] (!%p8264_p11), %v169_v42 }
  0xe8   : > { %v171_v43 = vld [vmem:[%s11056_s28 + $0x910] sm:%s11775_s21] (!%p8264_p11)  ;;  %v175_v45 = vld [vmem:[%s11056_s28 + $0xd98] sm:%s11775_s21] (!%p8264_p11) }
  0xe9   : > { %v173_v44 = vld [vmem:[%s11056_s28 + $0xb54] sm:%s11775_s21] (!%p8264_p11)  ;;  %172 = vst [vmem:[%s11060_s4 + $0x490] sm:%s11775_s21] (!%p8264_p11), %v171_v43 }
  0xea   : > { %174 = vst [vmem:[%s11060_s4 + $0x5b4] sm:%s11775_s21] %v173_v44  ;;  %v177_v46 = vld [vmem:[%s11056_s28 + $0xfdc] sm:%s11775_s21] }
  0xeb   : > { %176 = vst [vmem:[%s11060_s4 + $0x6d8] sm:%s11775_s21] %v175_v45  ;;  %178 = vst [vmem:[%s11060_s4 + $0x7fc] sm:%s11775_s21] %v177_v46 }
  0xec   : > { %v179_v47 = vld [vmem:[%s11056_s28 + $0x1220] sm:%s11775_s21]  ;;  %v183_v49 = vld [vmem:[%s11056_s28 + $0x16a8] sm:%s11775_s21] }
  0xed   : > { %v181_v48 = vld [vmem:[%s11056_s28 + $0x1464] sm:%s11775_s21]  ;;  %180 = vst [vmem:[%s11060_s4 + $0x920] sm:%s11775_s21] %v179_v47 }
  0xee   : > { %182 = vst [vmem:[%s11060_s4 + $0xa44] sm:%s11775_s21] %v181_v48  ;;  %v185_v50 = vld [vmem:[%s11056_s28 + $0x18ec] sm:%s11775_s21] }
  0xef   : > { %184 = vst [vmem:[%s11060_s4 + $0xb68] sm:%s11775_s21] %v183_v49  ;;  %186 = vst [vmem:[%s11060_s4 + $0xc8c] sm:%s11775_s21] %v185_v50 }
  0xf0   : > { %v187_v51 = vld [vmem:[%s11056_s28 + $0x1b30] sm:%s11775_s21]  ;;  %v191_v53 = vld [vmem:[%s11056_s28 + $0x1fb8] sm:%s11775_s21] }
  0xf1   : > { %v189_v52 = vld [vmem:[%s11056_s28 + $0x1d74] sm:%s11775_s21]  ;;  %188 = vst [vmem:[%s11060_s4 + $0xdb0] sm:%s11775_s21] %v187_v51 }
  0xf2   : > { %190 = vst [vmem:[%s11060_s4 + $0xed4] sm:%s11775_s21] %v189_v52  ;;  %v193_v54 = vld [vmem:[%s11056_s28 + $0x21fc] sm:%s11775_s21] }
  0xf3   : > { %192 = vst [vmem:[%s11060_s4 + $0xff8] sm:%s11775_s21] %v191_v53  ;;  %194 = vst [vmem:[%s11060_s4 + $0x111c] sm:%s11775_s21] %v193_v54 }
  0xf4   : > { %v195_v55 = vld [vmem:[%s11056_s28 + $0x2440] sm:%s11775_s21]  ;;  %v199_v57 = vld [vmem:[%s11056_s28 + $0x28c8] sm:%s11775_s21] }
  0xf5   : > { %v197_v56 = vld [vmem:[%s11056_s28 + $0x2684] sm:%s11775_s21]  ;;  %196 = vst [vmem:[%s11060_s4 + $0x1240] sm:%s11775_s21] %v195_v55 }
  0xf6   : > { %198 = vst [vmem:[%s11060_s4 + $0x1364] sm:%s11775_s21] %v197_v56  ;;  %v201_v58 = vld [vmem:[%s11056_s28 + $0x2b0c] sm:%s11775_s21] }
  0xf7   : > { %200 = vst [vmem:[%s11060_s4 + $0x1488] sm:%s11775_s21] %v199_v57  ;;  %202 = vst [vmem:[%s11060_s4 + $0x15ac] sm:%s11775_s21] %v201_v58 }
  0xf8   : > { %v203_v59 = vld [vmem:[%s11056_s28 + $0x2d50] sm:%s11775_s21] }
  0xf9   : > { %204 = vst [vmem:[%s11060_s4 + $0x16d0] sm:%s11775_s21] %v203_v59 }
  0xfa PF: > { %p8265_p12 = scmp.ge.s32.totalorder %s10859_s14, 1  ;;  %p785_p13 = scmp.lt.s32.totalorder %s10859_s14, 3 }
  0xfc   : > { %p786_p0 = pnand %p8265_p12, %p785_p13 }
  0xfd   : > { %s792_s30 = sand.u32 (!%p786_p0), 1, %s10851_s12   ;;  %v11867_v60 = vld [vmem:[%s13385_s0] sm:$0xff] (!%p786_p0)  ;;  %vm5458_vm0 = vcmask (!%p786_p0), 277504   ;;  %v10991_v63 = vmov (!%p786_p0), 0   ;;  %vm5462_vm1 = vcmask (!%p786_p0), 1040384  }
  0xfe   : > { %789 = sbr.rel (%p786_p0) target bundleno = 1479 (0x5c7), region = 94  ;;  %v11873_v61 = vcombine.high (!%p786_p0), %v11867_v60, %v11867_v60  ;;  %9543 = vset.pattern.permute.xlu0 (!%p786_p0), %v10991_v63  ;;  %v11924_v40 = vcombine.low (!%p786_p0), %v11867_v60, %v11867_v60 }
  0xff   : > { %s9256_s28 = smul.u32 (!%p786_p0), 6132, %s792_s30 }
 0x100   : > { %9072 = vmatprep.mubr.msk.bf16.mxu0 (!%p786_p0), %vm5458_vm0, %v11873_v61  ;;  %9074 = vmatprep.mubr.msk.bf16.mxu1 (!%p786_p0), %vm5458_vm0, %v11873_v61  ;;  %s9257_s11 = smul.u32 (!%p786_p0), 292, %s792_s30 }
 0x101   : > { %s11879_s14 = scalar_lea.vmem (!%p786_p0), [#allocation2], %s9256_s28 }
 0x102   : > { %v9544_v62 = vld [vmem:[%s11879_s14 + $0x4] ss:$292 sps:$4 sm:$0xff] (!%p786_p0)   ;;  %v9547_v1 = vld [vmem:[%s11879_s14 + $0x24c] ss:$292 sps:$4 sm:$0xff] (!%p786_p0)   ;;  %v9550_v3 = vld [vmem:[%s11879_s14 + $0x494] ss:$292 sps:$4 sm:$0xff] (!%p786_p0)  }
 0x103   : > { %v9546_v0 = vld [vmem:[%s11879_s14] ss:$292 sps:$4 sm:$0xff] (!%p786_p0)   ;;  %5682 = vmatprep.subr.bf16.mxu0 (!%p786_p0), %v9544_v62  ;;  %v9549_v2 = vld [vmem:[%s11879_s14 + $0x248] ss:$292 sps:$4 sm:$0xff] (!%p786_p0)   ;;  %v9552_v4 = vld [vmem:[%s11879_s14 + $0x490] ss:$292 sps:$4 sm:$0xff] (!%p786_p0)  }
 0x104   : > { %5683 = vmatpush1.bf16.msra.mxu0 (!%p786_p0), %v9546_v0  ;;  %v9553_v5 = vld [vmem:[%s11879_s14 + $0x6dc] ss:$292 sps:$4 sm:$0xff] (!%p786_p0)   ;;  %v9556_v7 = vld [vmem:[%s11879_s14 + $0x924] ss:$292 sps:$4 sm:$0xff] (!%p786_p0)   ;;  %v9575_v9 = vld [vmem:[%s11879_s14 + $0xc] ss:$292 sps:$4 sm:$0xff] (!%p786_p0)  }
 0x105   : > { %5684 = vmatprep.subr.bf16.mxu0 %v9547_v1  ;;  %v9555_v6 = vld [vmem:[%s11879_s14 + $0x6d8] ss:$292 sps:$4 sm:$0xff]   ;;  %v9558_v8 = vld [vmem:[%s11879_s14 + $0x920] ss:$292 sps:$4 sm:$0xff]   ;;  %v9578_v10 = vld [vmem:[%s11879_s14 + $0x8] ss:$292 sps:$4 sm:$0xff]   ;;  %5723 = vmatprep.subr.bf16.mxu1 %v9575_v9 }
 0x106   : > { %v9581_v11 = vld [vmem:[%s11879_s14 + $0x254] ss:$292 sps:$4 sm:$0xff]   ;;  %v9559_v12 = vld [vmem:[%s11879_s14 + $0xb6c] ss:$292 sps:$4 sm:$0xff]   ;;  %5724 = vmatpush1.bf16.msra.mxu1 %v9578_v10  ;;  %v9587_v14 = vld [vmem:[%s11879_s14 + $0x49c] ss:$292 sps:$4 sm:$0xff]  }
 0x107   : > { %v9586_v13 = vld [vmem:[%s11879_s14 + $0x250] ss:$292 sps:$4 sm:$0xff]   ;;  %5725 = vmatprep.subr.bf16.mxu1 %v9581_v11  ;;  %v9561_v15 = vld [vmem:[%s11879_s14 + $0xb68] ss:$292 sps:$4 sm:$0xff]   ;;  %v9592_v17 = vld [vmem:[%s11879_s14 + $0x498] ss:$292 sps:$4 sm:$0xff]  }
 0x108   : > { %5685 = vmatpush1.bf16.msra.mxu0 %v9549_v2  ;;  %v9562_v16 = vld [vmem:[%s11879_s14 + $0xdb4] ss:$292 sps:$4 sm:$0xff]   ;;  %v9593_v18 = vld [vmem:[%s11879_s14 + $0x6e4] ss:$292 sps:$4 sm:$0xff]   ;;  %v9565_v20 = vld [vmem:[%s11879_s14 + $0xffc] ss:$292 sps:$4 sm:$0xff]  }
 0x109   : > { %5686 = vmatprep.subr.bf16.mxu0 %v9550_v3  ;;  %v9564_v19 = vld [vmem:[%s11879_s14 + $0xdb0] ss:$292 sps:$4 sm:$0xff]   ;;  %v9598_v21 = vld [vmem:[%s11879_s14 + $0x6e0] ss:$292 sps:$4 sm:$0xff]   ;;  %v9567_v23 = vld [vmem:[%s11879_s14 + $0xff8] ss:$292 sps:$4 sm:$0xff]  }
 0x10a   : > { %5726 = vmatpush1.bf16.msra.mxu1 %v9586_v13  ;;  %v9599_v22 = vld [vmem:[%s11879_s14 + $0x92c] ss:$292 sps:$4 sm:$0xff]   ;;  %v9568_v24 = vld [vmem:[%s11879_s14 + $0x1244] ss:$292 sps:$4 sm:$0xff]   ;;  %v9605_v26 = vld [vmem:[%s11879_s14 + $0xb74] ss:$292 sps:$4 sm:$0xff]  }
 0x10b   : > { %5727 = vmatprep.subr.bf16.mxu1 %v9587_v14  ;;  %v9604_v25 = vld [vmem:[%s11879_s14 + $0x928] ss:$292 sps:$4 sm:$0xff]   ;;  %v9570_v27 = vld [vmem:[%s11879_s14 + $0x1240] ss:$292 sps:$4 sm:$0xff]   ;;  %v1566_v29 = vld [vmem:[%s11879_s14 + $0x16d0] sm:$0x11] }
 0x10c   : > { %5687 = vmatpush1.bf16.msra.mxu0 %v9552_v4  ;;  %v9571_v28 = vld [vmem:[%s11879_s14 + $0x148c] ss:$292 sps:$4 sm:$0xff]   ;;  %v9611_v31 = vld [vmem:[%s11879_s14 + $0xdbc] ss:$292 sps:$4 sm:$0xff]   ;;  %v8999_v33 = vcombine.high %v1566_v29, %v1566_v29  ;;  %v8998_v34 = vcombine.low %v1566_v29, %v1566_v29  ;;  %v9617_v36 = vld [vmem:[%s11879_s14 + $0x1004] ss:$292 sps:$4 sm:$0xff]  }
 0x10d   : > { %5688 = vmatprep.subr.bf16.mxu0 %v9553_v5  ;;  %v9610_v30 = vld [vmem:[%s11879_s14 + $0xb70] ss:$292 sps:$4 sm:$0xff]   ;;  %v9573_v32 = vld [vmem:[%s11879_s14 + $0x1488] ss:$292 sps:$4 sm:$0xff]   ;;  %v9616_v35 = vld [vmem:[%s11879_s14 + $0xdb8] ss:$292 sps:$4 sm:$0xff]  }
 0x10e   : > { %5728 = vmatpush1.bf16.msra.mxu1 %v9592_v17  ;;  %v5464_v37 = vsel %vm5462_vm1, %v8998_v34, 0  ;;  %v9585_v38 = vld [vmem:[%s11879_s14 + $0x14] ss:$292 sps:$4 sm:$0xff]   ;;  %v9622_v39 = vld [vmem:[%s11879_s14 + $0x1000] ss:$292 sps:$4 sm:$0xff]   ;;  %s12200_s12 = scalar_lea.vmem [#allocation3], %s9257_s11  }
 0x10f   : > { %5729 = vmatprep.subr.bf16.mxu1 %v9593_v18  ;;  %v9623_v41 = vld [vmem:[%s11879_s14 + $0x124c] ss:$292 sps:$4 sm:$0xff]   ;;  %v9591_v43 = vld [vmem:[%s11879_s14 + $0x25c] ss:$292 sps:$4 sm:$0xff]   ;;  %v9629_v45 = vld [vmem:[%s11879_s14 + $0x1494] ss:$292 sps:$4 sm:$0xff]  }
 0x110   : > { %5689 = vmatpush1.bf16.msra.mxu0 %v9555_v6  ;;  %v9583_v42 = vld [vmem:[%s11879_s14 + $0x10] ss:$292 sps:$4 sm:$0xff]   ;;  %v9628_v44 = vld [vmem:[%s11879_s14 + $0x1248] ss:$292 sps:$4 sm:$0xff]   ;;  %v9589_v46 = vld [vmem:[%s11879_s14 + $0x258] ss:$292 sps:$4 sm:$0xff]  }
 0x111   : > { %5690 = vmatprep.subr.bf16.mxu0 %v9556_v7  ;;  %v1567_v47 = vld [vmem:[%s11879_s14 + $0x16d8] sm:$0x11]  ;;  %v9597_v48 = vld [vmem:[%s11879_s14 + $0x4a4] ss:$292 sps:$4 sm:$0xff]   ;;  %v9634_v49 = vld [vmem:[%s11879_s14 + $0x1490] ss:$292 sps:$4 sm:$0xff]  }
 0x112   : > { %5730 = vmatpush1.bf16.msra.mxu1 %v9598_v21  ;;  %v9001_v50 = vcombine.high %v1567_v47, %v1567_v47  ;;  %v9000_v51 = vcombine.low %v1567_v47, %v1567_v47  ;;  %v9595_v52 = vld [vmem:[%s11879_s14 + $0x4a0] ss:$292 sps:$4 sm:$0xff]   ;;  %v9603_v53 = vld [vmem:[%s11879_s14 + $0x6ec] ss:$292 sps:$4 sm:$0xff]   ;;  %v9609_v57 = vld [vmem:[%s11879_s14 + $0x934] ss:$292 sps:$4 sm:$0xff]  }
 0x113   : > { %5731 = vmatprep.subr.bf16.mxu1 %v9599_v22  ;;  %v9643_v55 = vld [vmem:[%s11879_s14 + $0x1c] ss:$292 sps:$4 sm:$0xff]   ;;  %v9601_v56 = vld [vmem:[%s11879_s14 + $0x6e8] ss:$292 sps:$4 sm:$0xff]   ;;  %v9607_v60 = vld [vmem:[%s11879_s14 + $0x930] ss:$292 sps:$4 sm:$0xff]  }
 0x114   : > { %5691 = vmatpush1.bf16.msra.mxu0 %v9558_v8  ;;  %v5470_v54 = vsel %vm5462_vm1, %v9000_v51, 0  ;;  %v9641_v58 = vld [vmem:[%s11879_s14 + $0x18] ss:$292 sps:$4 sm:$0xff]   ;;  %v9647_v59 = vld [vmem:[%s11879_s14 + $0x264] ss:$292 sps:$4 sm:$0xff]   ;;  %s7608_s17 = smul.u32 (%p11045_p5), 73, %s11030_s15 }
 0x115   : > { %5692 = vmatprep.subr.bf16.mxu0 %v9559_v12  ;;  %v9615_v62 = vld [vmem:[%s11879_s14 + $0xb7c] ss:$292 sps:$4 sm:$0xff]   ;;  %v9653_v1 = vld [vmem:[%s11879_s14 + $0x4ac] ss:$292 sps:$4 sm:$0xff]   ;;  %v9621_v3 = vld [vmem:[%s11879_s14 + $0xdc4] ss:$292 sps:$4 sm:$0xff]  }
 0x116   : > { %5732 = vmatpush1.bf16.msra.mxu1 %v9604_v25  ;;  %v9645_v0 = vld [vmem:[%s11879_s14 + $0x260] ss:$292 sps:$4 sm:$0xff]   ;;  %v9613_v2 = vld [vmem:[%s11879_s14 + $0xb78] ss:$292 sps:$4 sm:$0xff]   ;;  %v9651_v4 = vld [vmem:[%s11879_s14 + $0x4a8] ss:$292 sps:$4 sm:$0xff]  }
 0x117   : > { %5733 = vmatprep.subr.bf16.mxu1 %v9605_v26  ;;  %v9659_v5 = vld [vmem:[%s11879_s14 + $0x6f4] ss:$292 sps:$4 sm:$0xff]   ;;  %v9619_v6 = vld [vmem:[%s11879_s14 + $0xdc0] ss:$292 sps:$4 sm:$0xff]   ;;  %v9627_v7 = vld [vmem:[%s11879_s14 + $0x100c] ss:$292 sps:$4 sm:$0xff]  }
 0x118   : > { %5693 = vmatpush1.bf16.msra.mxu0 %v9561_v15  ;;  %v9657_v8 = vld [vmem:[%s11879_s14 + $0x6f0] ss:$292 sps:$4 sm:$0xff]   ;;  %v9665_v10 = vld [vmem:[%s11879_s14 + $0x93c] ss:$292 sps:$4 sm:$0xff]   ;;  %v9625_v11 = vld [vmem:[%s11879_s14 + $0x1008] ss:$292 sps:$4 sm:$0xff]  }
 0x119   : > { %5694 = vmatprep.subr.bf16.mxu0 %v9562_v16  ;;  %v1603_v9 = vld [vmem:[%s13387_s2] sm:$0xff]  ;;  %v9633_v12 = vld [vmem:[%s11879_s14 + $0x1254] ss:$292 sps:$4 sm:$0xff]   ;;  %s9250_s8 = smul.u32 (%p11045_p5), 292, %s11030_s15  ;;  %s7609_s23 = ssub.s32 (%p11045_p5), 145, %s7608_s17 }
 0x11a   : > { %5734 = vmatpush1.bf16.msra.mxu1 %v9610_v30  ;;  %1606 = vperm.xlu0 %9543, %v1603_v9   ;;  %v9663_v13 = vld [vmem:[%s11879_s14 + $0x938] ss:$292 sps:$4 sm:$0xff]   ;;  %v9671_v14 = vld [vmem:[%s11879_s14 + $0xb84] ss:$292 sps:$4 sm:$0xff]   ;;  %v9631_v15 = vld [vmem:[%s11879_s14 + $0x1250] ss:$292 sps:$4 sm:$0xff]  }
 0x11b   : > { %5735 = vmatprep.subr.bf16.mxu1 %v9611_v31  ;;  %v9638_v16 = vld [vmem:[%s11879_s14 + $0x149c] ss:$292 sps:$4 sm:$0xff]   ;;  %v9650_v26 = vld [vmem:[%s11879_s14 + $0x24] ss:$292 sps:$4 sm:$0xff]   ;;  %v9656_v30 = vld [vmem:[%s11879_s14 + $0x26c] ss:$292 sps:$4 sm:$0xff]   ;;  %s12970_s27 = scalar_lea.vmem (%p11045_p5), %s13388_s3, %s9250_s8  }
 0x11c   : > { %5695 = vmatpush1.bf16.msra.mxu0 %v9564_v19  ;;  %v1568_v17 = vld [vmem:[%s11879_s14 + $0x16e0] sm:$0x11]  ;;  %v9677_v19 = vld [vmem:[%s11879_s14 + $0xdcc] ss:$292 sps:$4 sm:$0xff]   ;;  %v9711_v47 = vld [vmem:[%s11879_s14 + $0x274] ss:$292 sps:$4 sm:$0xff]  }
 0x11d   : > { %5696 = vmatprep.subr.bf16.mxu0 %v9565_v20  ;;  %v9669_v18 = vld [vmem:[%s11879_s14 + $0xb80] ss:$292 sps:$4 sm:$0xff]   ;;  %v9636_v20 = vld [vmem:[%s11879_s14 + $0x1498] ss:$292 sps:$4 sm:$0xff]   ;;  %v9003_v21 = vcombine.high %v1568_v17, %v1568_v17  ;;  %v9002_v22 = vcombine.low %v1568_v17, %v1568_v17  ;;  %v9654_v31 = vld [vmem:[%s11879_s14 + $0x268] ss:$292 sps:$4 sm:$0xff]  }
 0x11e   : > { %5736 = vmatpush1.bf16.msra.mxu1 %v9616_v35  ;;  %v9648_v29 = vld [vmem:[%s11879_s14 + $0x20] ss:$292 sps:$4 sm:$0xff]   ;;  %v1569_v34 = vld [vmem:[%s11879_s14 + $0x16e8] sm:$0x11]  ;;  %v9662_v35 = vld [vmem:[%s11879_s14 + $0x4b4] ss:$292 sps:$4 sm:$0xff]  }
 0x11f   : > { %5737 = vmatprep.subr.bf16.mxu1 %v9617_v36  ;;  %v5476_v25 = vsel %vm5462_vm1, %v9002_v22, 0  ;;  %v9693_v36 = vld [vmem:[%s11879_s14 + $0x14a0] ss:$292 sps:$4 sm:$0xff]   ;;  %p7610_p1 = scmp.lt.s32.totalorder (%p11045_p5), %s7609_s23, 73 }
 0x120   : > { %5697 = vmatpush1.bf16.msra.mxu0 %v9567_v23  ;;  %v9675_v23 = vld [vmem:[%s11879_s14 + $0xdc8] ss:$292 sps:$4 sm:$0xff]   ;;  %v9717_v51 = vld [vmem:[%s11879_s14 + $0x4bc] ss:$292 sps:$4 sm:$0xff]  }
 0x121   : > { %5698 = vmatprep.subr.bf16.mxu0 %v9568_v24  ;;  %v9683_v24 = vld [vmem:[%s11879_s14 + $0x1014] ss:$292 sps:$4 sm:$0xff]   ;;  %v9720_v17 = vld [vmem:[%s11879_s14 + $0x27c] ss:$292 sps:$4 sm:$0xff]   ;;  %v9726_v22 = vld [vmem:[%s11879_s14 + $0x4c4] ss:$292 sps:$4 sm:$0xff]  }
 0x122   : > { %5738 = vmatpush1.bf16.msra.mxu1 %v9622_v39  ;;  %v9660_v39 = vld [vmem:[%s11879_s14 + $0x4b0] ss:$292 sps:$4 sm:$0xff]  }
 0x123   : > { %5739 = vmatprep.subr.bf16.mxu1 %v9623_v41  ;;  %v9668_v41 = vld [vmem:[%s11879_s14 + $0x6fc] ss:$292 sps:$4 sm:$0xff]  }
 0x124   : > { %5699 = vmatpush1.bf16.msra.mxu0 %v9570_v27  ;;  %v9681_v27 = vld [vmem:[%s11879_s14 + $0x1010] ss:$292 sps:$4 sm:$0xff]  }
 0x125   : > { %5700 = vmatprep.subr.bf16.mxu0 %v9571_v28  ;;  %v9689_v28 = vld [vmem:[%s11879_s14 + $0x125c] ss:$292 sps:$4 sm:$0xff]  }
 0x126   : > { %5740 = vmatpush1.bf16.msra.mxu1 %v9628_v44  ;;  %v9666_v44 = vld [vmem:[%s11879_s14 + $0x6f8] ss:$292 sps:$4 sm:$0xff]  }
 0x127   : > { %5741 = vmatprep.subr.bf16.mxu1 %v9629_v45  ;;  %v9674_v45 = vld [vmem:[%s11879_s14 + $0x944] ss:$292 sps:$4 sm:$0xff]  }
 0x128   : > { %5701 = vmatpush1.bf16.msra.mxu0 %v9573_v32  ;;  %v9687_v32 = vld [vmem:[%s11879_s14 + $0x1258] ss:$292 sps:$4 sm:$0xff]  }
 0x129   : > { %9071 = vmatprep.subr.msk.bf16.mxu0 %vm5462_vm1, %v8999_v33  ;;  %v9695_v33 = vld [vmem:[%s11879_s14 + $0x14a4] ss:$292 sps:$4 sm:$0xff]  }
 0x12a   : > { %5742 = vmatpush1.bf16.msra.mxu1 %v9634_v49  ;;  %v9680_v49 = vld [vmem:[%s11879_s14 + $0xb8c] ss:$292 sps:$4 sm:$0xff]  }
 0x12b   : > { %9073 = vmatprep.subr.msk.bf16.mxu1 %vm5462_vm1, %v9001_v50  ;;  %v9709_v50 = vld [vmem:[%s11879_s14 + $0x270] ss:$292 sps:$4 sm:$0xff]  }
 0x12c   : > { %5703 = vmatpush1.bf16.msra.mxu0 %v5464_v37  ;;  %v9005_v37 = vcombine.high %v1569_v34, %v1569_v34 }
 0x12d   : > { %5764 = vmatprep.subr.bf16.mxu0 %v9585_v38  ;;  %v9004_v38 = vcombine.low %v1569_v34, %v1569_v34  ;;  %v9736_v34 = vld [vmem:[%s11879_s14 + $0x950] ss:$292 sps:$4 sm:$0xff]  }
 0x12e   : > { %5744 = vmatpush1.bf16.msra.mxu1 %v5470_v54  ;;  %v9715_v54 = vld [vmem:[%s11879_s14 + $0x4b8] ss:$292 sps:$4 sm:$0xff]  }
 0x12f   : > { %5715 = vmatmul.mubr.bf16.vlgmr.msra.gmra.mrb[0].mxu0 %v11924_v40  ;;  %5805 = vmatprep.subr.bf16.mxu1 %v9643_v55  ;;  %v9723_v55 = vld [vmem:[%s11879_s14 + $0x704] ss:$292 sps:$4 sm:$0xff]  }
 0x130   : > { %5765 = vmatpush1.bf16.msra.mxu0 %v9583_v42  ;;  %9076 = vmatprep.mubr.msk.bf16.mxu0 %vm5458_vm0, %v11873_v61  ;;  %v5482_v42 = vsel %vm5462_vm1, %v9004_v38, 0  ;;  %v9742_v38 = vld [vmem:[%s11879_s14 + $0xb98] ss:$292 sps:$4 sm:$0xff]  }
 0x131   : > { %5766 = vmatprep.subr.bf16.mxu0 %v9591_v43  ;;  %5756 = vmatmul.mubr.bf16.vlgmr.msra.gmra.mrb[0].mxu1 %v11924_v40  ;;  %v9707_v43 = vld [vmem:[%s11879_s14 + $0x2c] ss:$292 sps:$4 sm:$0xff]  }
 0x132   : > { %5806 = vmatpush1.bf16.msra.mxu1 %v9641_v58  ;;  %9078 = vmatprep.mubr.msk.bf16.mxu1 %vm5458_vm0, %v11873_v61  ;;  %v9721_v58 = vld [vmem:[%s11879_s14 + $0x700] ss:$292 sps:$4 sm:$0xff]  }
 0x133   : > { %5807 = vmatprep.subr.bf16.mxu1 %v9647_v59  ;;  %v9729_v59 = vld [vmem:[%s11879_s14 + $0x94c] ss:$292 sps:$4 sm:$0xff]  }
 0x134   : > { %5767 = vmatpush1.bf16.msra.mxu0 %v9589_v46  ;;  %v9705_v46 = vld [vmem:[%s11879_s14 + $0x28] ss:$292 sps:$4 sm:$0xff]  }
 0x135   : > { %5768 = vmatprep.subr.bf16.mxu0 %v9597_v48  ;;  %v9672_v48 = vld [vmem:[%s11879_s14 + $0x940] ss:$292 sps:$4 sm:$0xff]  }
 0x136   : > { %5808 = vmatpush1.bf16.msra.mxu1 %v9645_v0  ;;  %v9727_v0 = vld [vmem:[%s11879_s14 + $0x948] ss:$292 sps:$4 sm:$0xff]  }
 0x137   : > { %5809 = vmatprep.subr.bf16.mxu1 %v9653_v1  ;;  %v9735_v1 = vld [vmem:[%s11879_s14 + $0xb94] ss:$292 sps:$4 sm:$0xff]  }
 0x138   : > { %5769 = vmatpush1.bf16.msra.mxu0 %v9595_v52  ;;  %v9678_v52 = vld [vmem:[%s11879_s14 + $0xb88] ss:$292 sps:$4 sm:$0xff]  }
 0x139   : > { %5770 = vmatprep.subr.bf16.mxu0 %v9603_v53  ;;  %v9686_v53 = vld [vmem:[%s11879_s14 + $0xdd4] ss:$292 sps:$4 sm:$0xff]  }
 0x13a   : > { %5810 = vmatpush1.bf16.msra.mxu1 %v9651_v4  ;;  %v1570_v4 = vld [vmem:[%s11879_s14 + $0x16f0] sm:$0x11] }
 0x13b   : > { %5811 = vmatprep.subr.bf16.mxu1 %v9659_v5  ;;  %v9733_v5 = vld [vmem:[%s11879_s14 + $0xb90] ss:$292 sps:$4 sm:$0xff]   ;;  %v9006_v9 = vcombine.low %v1570_v4, %v1570_v4 }
 0x13c   : > { %5771 = vmatpush1.bf16.msra.mxu0 %v9601_v56  ;;  %v9684_v56 = vld [vmem:[%s11879_s14 + $0xdd0] ss:$292 sps:$4 sm:$0xff]  }
 0x13d   : > { %5772 = vmatprep.subr.bf16.mxu0 %v9609_v57  ;;  %v9692_v57 = vld [vmem:[%s11879_s14 + $0x101c] ss:$292 sps:$4 sm:$0xff]  }
 0x13e   : > { %5812 = vmatpush1.bf16.msra.mxu1 %v9657_v8  ;;  %v9007_v8 = vcombine.high %v1570_v4, %v1570_v4  ;;  %v9784_v4 = vld [vmem:[%s11879_s14 + $0x28c] ss:$292 sps:$4 sm:$0xff]  }
 0x13f   : > { %5813 = vmatprep.subr.bf16.mxu1 %v9665_v10  ;;  %v9739_v10 = vld [vmem:[%s11879_s14 + $0xdd8] ss:$292 sps:$4 sm:$0xff]  }
 0x140   : > { %5773 = vmatpush1.bf16.msra.mxu0 %v9607_v60  ;;  %v9690_v60 = vld [vmem:[%s11879_s14 + $0x1018] ss:$292 sps:$4 sm:$0xff]  }
 0x141   : > { %5774 = vmatprep.subr.bf16.mxu0 %v9615_v62  ;;  %v9698_v62 = vld [vmem:[%s11879_s14 + $0x1264] ss:$292 sps:$4 sm:$0xff]  }
 0x142   : > { %5814 = vmatpush1.bf16.msra.mxu1 %v9663_v13  ;;  %v9714_v13 = vld [vmem:[%s11879_s14 + $0x34] ss:$292 sps:$4 sm:$0xff]  }
 0x143   : > { %5815 = vmatprep.subr.bf16.mxu1 %v9671_v14  ;;  %v9745_v14 = vld [vmem:[%s11879_s14 + $0x1020] ss:$292 sps:$4 sm:$0xff]  }
 0x144   : > { %5775 = vmatpush1.bf16.msra.mxu0 %v9613_v2  ;;  %v9696_v2 = vld [vmem:[%s11879_s14 + $0x1260] ss:$292 sps:$4 sm:$0xff]  }
 0x145   : > { %5776 = vmatprep.subr.bf16.mxu0 %v9621_v3  ;;  %v9702_v3 = vld [vmem:[%s11879_s14 + $0x14ac] ss:$292 sps:$4 sm:$0xff]  }
 0x146   : > { %5816 = vmatpush1.bf16.msra.mxu1 %v9669_v18  ;;  %v9718_v18 = vld [vmem:[%s11879_s14 + $0x278] ss:$292 sps:$4 sm:$0xff]  }
 0x147   : > { %5817 = vmatprep.subr.bf16.mxu1 %v9677_v19  ;;  %v9751_v19 = vld [vmem:[%s11879_s14 + $0x1268] ss:$292 sps:$4 sm:$0xff]  }
 0x148   : > { %5777 = vmatpush1.bf16.msra.mxu0 %v9619_v6  ;;  %v9741_v6 = vld [vmem:[%s11879_s14 + $0xddc] ss:$292 sps:$4 sm:$0xff]  }
 0x149   : > { %5778 = vmatprep.subr.bf16.mxu0 %v9627_v7  ;;  %v9700_v7 = vld [vmem:[%s11879_s14 + $0x14a8] ss:$292 sps:$4 sm:$0xff]  }
 0x14a   : > { %5818 = vmatpush1.bf16.msra.mxu1 %v9675_v23  ;;  %v9757_v23 = vld [vmem:[%s11879_s14 + $0x14b0] ss:$292 sps:$4 sm:$0xff]  }
 0x14b   : > { %5819 = vmatprep.subr.bf16.mxu1 %v9683_v24 }
 0x14c   : > { %5779 = vmatpush1.bf16.msra.mxu0 %v9625_v11  ;;  %v9747_v11 = vld [vmem:[%s11879_s14 + $0x1024] ss:$292 sps:$4 sm:$0xff]  }
 0x14d   : > { %5780 = vmatprep.subr.bf16.mxu0 %v9633_v12  ;;  %v5488_v12 = vsel %vm5462_vm1, %v9006_v9, 0  ;;  %v9790_v9 = vld [vmem:[%s11879_s14 + $0x4d4] ss:$292 sps:$4 sm:$0xff]  }
 0x14e   : > { %5820 = vmatpush1.bf16.msra.mxu1 %v9681_v27  ;;  %v9732_v27 = vld [vmem:[%s11879_s14 + $0x70c] ss:$292 sps:$4 sm:$0xff]  }
 0x14f   : > { %5821 = vmatprep.subr.bf16.mxu1 %v9689_v28 }
 0x150   : > { %5781 = vmatpush1.bf16.msra.mxu0 %v9631_v15  ;;  %v9753_v15 = vld [vmem:[%s11879_s14 + $0x126c] ss:$292 sps:$4 sm:$0xff]  }
 0x151   : > { %5782 = vmatprep.subr.bf16.mxu0 %v9638_v16  ;;  %v9712_v16 = vld [vmem:[%s11879_s14 + $0x30] ss:$292 sps:$4 sm:$0xff]  }
 0x152   : > { %5822 = vmatpush1.bf16.msra.mxu1 %v9687_v32  ;;  %v9769_v32 = vld [vmem:[%s11879_s14 + $0x38] ss:$292 sps:$4 sm:$0xff]  }
 0x153   : > { %5823 = vmatprep.subr.bf16.mxu1 %v9695_v33  ;;  %v9775_v33 = vld [vmem:[%s11879_s14 + $0x284] ss:$292 sps:$4 sm:$0xff]  }
 0x154   : > { %5783 = vmatpush1.bf16.msra.mxu0 %v9636_v20  ;;  %v9759_v20 = vld [vmem:[%s11879_s14 + $0x14b4] ss:$292 sps:$4 sm:$0xff]  }
 0x155   : > { %9075 = vmatprep.subr.msk.bf16.mxu0 %vm5462_vm1, %v9003_v21  ;;  %v1571_v21 = vld [vmem:[%s11879_s14 + $0x16f8] sm:$0x11] }
 0x156   : > { %5824 = vmatpush1.bf16.msra.mxu1 %v9693_v36  ;;  %v9009_v24 = vcombine.high %v1571_v21, %v1571_v21  ;;  %v9773_v36 = vld [vmem:[%s11879_s14 + $0x280] ss:$292 sps:$4 sm:$0xff]  }
 0x157   : > { %9077 = vmatprep.subr.msk.bf16.mxu1 %vm5462_vm1, %v9005_v37  ;;  %v9781_v37 = vld [vmem:[%s11879_s14 + $0x4cc] ss:$292 sps:$4 sm:$0xff]  }
 0x158   : > { %5785 = vmatpush1.bf16.msra.mxu0 %v5476_v25  ;;  %v9008_v25 = vcombine.low %v1571_v21, %v1571_v21  ;;  %v9800_v21 = vld [vmem:[%s11879_s14 + $0x960] ss:$292 sps:$4 sm:$0xff]  }
 0x159   : > { %5846 = vmatprep.subr.bf16.mxu0 %v9650_v26  ;;  %v9724_v26 = vld [vmem:[%s11879_s14 + $0x4c0] ss:$292 sps:$4 sm:$0xff]  }
 0x15a   : > { %5826 = vmatpush1.bf16.msra.mxu1 %v5482_v42  ;;  %v5494_v28 = vsel %vm5462_vm1, %v9008_v25, 0  ;;  %v9787_v42 = vld [vmem:[%s11879_s14 + $0x714] ss:$292 sps:$4 sm:$0xff]   ;;  %v9806_v25 = vld [vmem:[%s11879_s14 + $0xba8] ss:$292 sps:$4 sm:$0xff]  }
 0x15b   : > { %5797 = vmatmul.mubr.bf16.vlgmr.msra.gmra.mrb[4].mxu0 %v11924_v40  ;;  %5887 = vmatprep.subr.bf16.mxu1 %v9707_v43  ;;  %v9748_v43 = vld [vmem:[%s11879_s14 + $0xde0] ss:$292 sps:$4 sm:$0xff]  }
 0x15c   : > { %5847 = vmatpush1.bf16.msra.mxu0 %v9648_v29  ;;  %9080 = vmatprep.mubr.msk.bf16.mxu0 %vm5458_vm0, %v11873_v61  ;;  %v9771_v29 = vld [vmem:[%s11879_s14 + $0x3c] ss:$292 sps:$4 sm:$0xff]  }
 0x15d   : > { %5848 = vmatprep.subr.bf16.mxu0 %v9656_v30  ;;  %5838 = vmatmul.mubr.bf16.vlgmr.msra.gmra.mrb[4].mxu1 %v11924_v40  ;;  %v9730_v30 = vld [vmem:[%s11879_s14 + $0x708] ss:$292 sps:$4 sm:$0xff]  }
 0x15e   : > { %5888 = vmatpush1.bf16.msra.mxu1 %v9705_v46  ;;  %9082 = vmatprep.mubr.msk.bf16.mxu1 %vm5458_vm0, %v11873_v61  ;;  %v9793_v46 = vld [vmem:[%s11879_s14 + $0x95c] ss:$292 sps:$4 sm:$0xff]  }
 0x15f   : > { %5889 = vmatprep.subr.bf16.mxu1 %v9711_v47  ;;  %v9754_v47 = vld [vmem:[%s11879_s14 + $0x1028] ss:$292 sps:$4 sm:$0xff]  }
 0x160   : > { %5849 = vmatpush1.bf16.msra.mxu0 %v9654_v31  ;;  %v9738_v31 = vld [vmem:[%s11879_s14 + $0x954] ss:$292 sps:$4 sm:$0xff]  }
 0x161   : > { %5850 = vmatprep.subr.bf16.mxu0 %v9662_v35  ;;  %v9744_v35 = vld [vmem:[%s11879_s14 + $0xb9c] ss:$292 sps:$4 sm:$0xff]  }
 0x162   : > { %5890 = vmatpush1.bf16.msra.mxu1 %v9709_v50  ;;  %v9799_v50 = vld [vmem:[%s11879_s14 + $0xba4] ss:$292 sps:$4 sm:$0xff]  }
 0x163   : > { %5891 = vmatprep.subr.bf16.mxu1 %v9717_v51  ;;  %v9760_v51 = vld [vmem:[%s11879_s14 + $0x1270] ss:$292 sps:$4 sm:$0xff]  }
 0x164   : > { %5851 = vmatpush1.bf16.msra.mxu0 %v9660_v39  ;;  %v9750_v39 = vld [vmem:[%s11879_s14 + $0xde4] ss:$292 sps:$4 sm:$0xff]  }
 0x165   : > { %5852 = vmatprep.subr.bf16.mxu0 %v9668_v41  ;;  %v9779_v41 = vld [vmem:[%s11879_s14 + $0x4c8] ss:$292 sps:$4 sm:$0xff]  }
 0x166   : > { %5892 = vmatpush1.bf16.msra.mxu1 %v9715_v54  ;;  %v9797_v54 = vld [vmem:[%s11879_s14 + $0xba0] ss:$292 sps:$4 sm:$0xff]  }
 0x167   : > { %5893 = vmatprep.subr.bf16.mxu1 %v9723_v55  ;;  %v9805_v55 = vld [vmem:[%s11879_s14 + $0xdec] ss:$292 sps:$4 sm:$0xff]  }
 0x168   : > { %5853 = vmatpush1.bf16.msra.mxu0 %v9666_v44  ;;  %v9756_v44 = vld [vmem:[%s11879_s14 + $0x102c] ss:$292 sps:$4 sm:$0xff]  }
 0x169   : > { %5854 = vmatprep.subr.bf16.mxu0 %v9674_v45  ;;  %v9785_v45 = vld [vmem:[%s11879_s14 + $0x710] ss:$292 sps:$4 sm:$0xff]  }
 0x16a   : > { %5894 = vmatpush1.bf16.msra.mxu1 %v9721_v58 }
 0x16b   : > { %5895 = vmatprep.subr.bf16.mxu1 %v9729_v59  ;;  %v9803_v59 = vld [vmem:[%s11879_s14 + $0xde8] ss:$292 sps:$4 sm:$0xff]  }
 0x16c   : > { %5855 = vmatpush1.bf16.msra.mxu0 %v9672_v48  ;;  %v9762_v48 = vld [vmem:[%s11879_s14 + $0x1274] ss:$292 sps:$4 sm:$0xff]  }
 0x16d   : > { %5856 = vmatprep.subr.bf16.mxu0 %v9680_v49  ;;  %v9791_v49 = vld [vmem:[%s11879_s14 + $0x958] ss:$292 sps:$4 sm:$0xff]  }
 0x16e   : > { %5896 = vmatpush1.bf16.msra.mxu1 %v9727_v0  ;;  %v9778_v0 = vld [vmem:[%s11879_s14 + $0x44] ss:$292 sps:$4 sm:$0xff]  }
 0x16f   : > { %5897 = vmatprep.subr.bf16.mxu1 %v9735_v1  ;;  %v9809_v1 = vld [vmem:[%s11879_s14 + $0x1030] ss:$292 sps:$4 sm:$0xff]  }
 0x170   : > { %5857 = vmatpush1.bf16.msra.mxu0 %v9678_v52  ;;  %v9766_v52 = vld [vmem:[%s11879_s14 + $0x14bc] ss:$292 sps:$4 sm:$0xff]  }
 0x171   : > { %5858 = vmatprep.subr.bf16.mxu0 %v9686_v53  ;;  %v1572_v53 = vld [vmem:[%s11879_s14 + $0x1700] sm:$0x11] }
 0x172   : > { %5898 = vmatpush1.bf16.msra.mxu1 %v9733_v5  ;;  %v9010_v58 = vcombine.low %v1572_v53, %v1572_v53  ;;  %v9782_v5 = vld [vmem:[%s11879_s14 + $0x288] ss:$292 sps:$4 sm:$0xff]  }
 0x173   : > { %5899 = vmatprep.subr.bf16.mxu1 %v9741_v6  ;;  %v9815_v6 = vld [vmem:[%s11879_s14 + $0x1278] ss:$292 sps:$4 sm:$0xff]  }
 0x174   : > { %5859 = vmatpush1.bf16.msra.mxu0 %v9684_v56  ;;  %v9764_v56 = vld [vmem:[%s11879_s14 + $0x14b8] ss:$292 sps:$4 sm:$0xff]  }
 0x175   : > { %5860 = vmatprep.subr.bf16.mxu0 %v9692_v57  ;;  %v9011_v57 = vcombine.high %v1572_v53, %v1572_v53  ;;  %v9848_v53 = vld [vmem:[%s11879_s14 + $0x29c] ss:$292 sps:$4 sm:$0xff]  }
 0x176   : > { %5900 = vmatpush1.bf16.msra.mxu1 %v9739_v10  ;;  %v9821_v10 = vld [vmem:[%s11879_s14 + $0x14c0] ss:$292 sps:$4 sm:$0xff]  }
 0x177   : > { %5901 = vmatprep.subr.bf16.mxu1 %v9747_v11 }
 0x178   : > { %5861 = vmatpush1.bf16.msra.mxu0 %v9690_v60  ;;  %v9811_v60 = vld [vmem:[%s11879_s14 + $0x1034] ss:$292 sps:$4 sm:$0xff]  }
 0x179   : > { %5862 = vmatprep.subr.bf16.mxu0 %v9698_v62  ;;  %v5500_v62 = vsel %vm5462_vm1, %v9010_v58, 0  ;;  %v9854_v58 = vld [vmem:[%s11879_s14 + $0x4e4] ss:$292 sps:$4 sm:$0xff]  }
 0x17a   : > { %5902 = vmatpush1.bf16.msra.mxu1 %v9745_v14  ;;  %v9796_v14 = vld [vmem:[%s11879_s14 + $0x71c] ss:$292 sps:$4 sm:$0xff]  }
 0x17b   : > { %5903 = vmatprep.subr.bf16.mxu1 %v9753_v15  ;;  %v9835_v15 = vld [vmem:[%s11879_s14 + $0x4c] ss:$292 sps:$4 sm:$0xff]  }
 0x17c   : > { %5863 = vmatpush1.bf16.msra.mxu0 %v9696_v2  ;;  %v9817_v2 = vld [vmem:[%s11879_s14 + $0x127c] ss:$292 sps:$4 sm:$0xff]  }
 0x17d   : > { %5864 = vmatprep.subr.bf16.mxu0 %v9702_v3  ;;  %v9776_v3 = vld [vmem:[%s11879_s14 + $0x40] ss:$292 sps:$4 sm:$0xff]  }
 0x17e   : > { %5904 = vmatpush1.bf16.msra.mxu1 %v9751_v19  ;;  %v9833_v19 = vld [vmem:[%s11879_s14 + $0x48] ss:$292 sps:$4 sm:$0xff]  }
 0x17f   : > { %5905 = vmatprep.subr.bf16.mxu1 %v9759_v20  ;;  %v9839_v20 = vld [vmem:[%s11879_s14 + $0x294] ss:$292 sps:$4 sm:$0xff]  }
 0x180   : > { %5865 = vmatpush1.bf16.msra.mxu0 %v9700_v7  ;;  %v9823_v7 = vld [vmem:[%s11879_s14 + $0x14c4] ss:$292 sps:$4 sm:$0xff]  }
 0x181   : > { %9079 = vmatprep.subr.msk.bf16.mxu0 %vm5462_vm1, %v9007_v8  ;;  %v1573_v8 = vld [vmem:[%s11879_s14 + $0x1708] sm:$0x11] }
 0x182   : > { %5906 = vmatpush1.bf16.msra.mxu1 %v9757_v23  ;;  %v9013_v11 = vcombine.high %v1573_v8, %v1573_v8  ;;  %v9837_v23 = vld [vmem:[%s11879_s14 + $0x290] ss:$292 sps:$4 sm:$0xff]  }
 0x183   : > { %9081 = vmatprep.subr.msk.bf16.mxu1 %vm5462_vm1, %v9009_v24  ;;  %v9845_v24 = vld [vmem:[%s11879_s14 + $0x4dc] ss:$292 sps:$4 sm:$0xff]  }
 0x184   : > { %5867 = vmatpush1.bf16.msra.mxu0 %v5488_v12  ;;  %v9012_v12 = vcombine.low %v1573_v8, %v1573_v8  ;;  %v9864_v8 = vld [vmem:[%s11879_s14 + $0x970] ss:$292 sps:$4 sm:$0xff]  }
 0x185   : > { %5928 = vmatprep.subr.bf16.mxu0 %v9714_v13  ;;  %v9788_v13 = vld [vmem:[%s11879_s14 + $0x4d0] ss:$292 sps:$4 sm:$0xff]  }
 0x186   : > { %5908 = vmatpush1.bf16.msra.mxu1 %v5494_v28  ;;  %v9851_v28 = vld [vmem:[%s11879_s14 + $0x724] ss:$292 sps:$4 sm:$0xff]  }
 0x187   : > { %5879 = vmatmul.mubr.bf16.vlgmr.msra.gmra.mrb[8].mxu0 %v11924_v40  ;;  %5969 = vmatprep.subr.bf16.mxu1 %v9771_v29  ;;  %v9812_v29 = vld [vmem:[%s11879_s14 + $0xdf0] ss:$292 sps:$4 sm:$0xff]  }
 0x188   : > { %5929 = vmatpush1.bf16.msra.mxu0 %v9712_v16  ;;  %9084 = vmatprep.mubr.msk.bf16.mxu0 %vm5458_vm0, %v11873_v61  ;;  %v5506_v16 = vsel %vm5462_vm1, %v9012_v12, 0  ;;  %v9870_v12 = vld [vmem:[%s11879_s14 + $0xbb8] ss:$292 sps:$4 sm:$0xff]  }
 0x189   : > { %5930 = vmatprep.subr.bf16.mxu0 %v9720_v17  ;;  %5920 = vmatmul.mubr.bf16.vlgmr.msra.gmra.mrb[8].mxu1 %v11924_v40  ;;  %v9794_v17 = vld [vmem:[%s11879_s14 + $0x718] ss:$292 sps:$4 sm:$0xff]  }
 0x18a   : > { %5970 = vmatpush1.bf16.msra.mxu1 %v9769_v32  ;;  %9086 = vmatprep.mubr.msk.bf16.mxu1 %vm5458_vm0, %v11873_v61  ;;  %v9857_v32 = vld [vmem:[%s11879_s14 + $0x96c] ss:$292 sps:$4 sm:$0xff]  }
 0x18b   : > { %5971 = vmatprep.subr.bf16.mxu1 %v9775_v33  ;;  %v9818_v33 = vld [vmem:[%s11879_s14 + $0x1038] ss:$292 sps:$4 sm:$0xff]  }
 0x18c   : > { %5931 = vmatpush1.bf16.msra.mxu0 %v9718_v18  ;;  %v9802_v18 = vld [vmem:[%s11879_s14 + $0x964] ss:$292 sps:$4 sm:$0xff]  }
 0x18d   : > { %5932 = vmatprep.subr.bf16.mxu0 %v9726_v22  ;;  %v9808_v22 = vld [vmem:[%s11879_s14 + $0xbac] ss:$292 sps:$4 sm:$0xff]  }
 0x18e   : > { %5972 = vmatpush1.bf16.msra.mxu1 %v9773_v36  ;;  %v9863_v36 = vld [vmem:[%s11879_s14 + $0xbb4] ss:$292 sps:$4 sm:$0xff]  }
 0x18f   : > { %5973 = vmatprep.subr.bf16.mxu1 %v9781_v37  ;;  %v9824_v37 = vld [vmem:[%s11879_s14 + $0x1280] ss:$292 sps:$4 sm:$0xff]  }
 0x190   : > { %5933 = vmatpush1.bf16.msra.mxu0 %v9724_v26  ;;  %v9814_v26 = vld [vmem:[%s11879_s14 + $0xdf4] ss:$292 sps:$4 sm:$0xff]  }
 0x191   : > { %5934 = vmatprep.subr.bf16.mxu0 %v9732_v27  ;;  %v9843_v27 = vld [vmem:[%s11879_s14 + $0x4d8] ss:$292 sps:$4 sm:$0xff]  }
 0x192   : > { %5974 = vmatpush1.bf16.msra.mxu1 %v9779_v41  ;;  %v9861_v41 = vld [vmem:[%s11879_s14 + $0xbb0] ss:$292 sps:$4 sm:$0xff]  }
 0x193   : > { %5975 = vmatprep.subr.bf16.mxu1 %v9787_v42  ;;  %v9869_v42 = vld [vmem:[%s11879_s14 + $0xdfc] ss:$292 sps:$4 sm:$0xff]  }
 0x194   : > { %5935 = vmatpush1.bf16.msra.mxu0 %v9730_v30  ;;  %v9820_v30 = vld [vmem:[%s11879_s14 + $0x103c] ss:$292 sps:$4 sm:$0xff]  }
 0x195   : > { %5936 = vmatprep.subr.bf16.mxu0 %v9738_v31  ;;  %v9849_v31 = vld [vmem:[%s11879_s14 + $0x720] ss:$292 sps:$4 sm:$0xff]  }
 0x196   : > { %5976 = vmatpush1.bf16.msra.mxu1 %v9785_v45 }
 0x197   : > { %5977 = vmatprep.subr.bf16.mxu1 %v9793_v46 }
 0x198   : > { %5937 = vmatpush1.bf16.msra.mxu0 %v9736_v34  ;;  %v9826_v34 = vld [vmem:[%s11879_s14 + $0x1284] ss:$292 sps:$4 sm:$0xff]  }
 0x199   : > { %5938 = vmatprep.subr.bf16.mxu0 %v9744_v35  ;;  %v9855_v35 = vld [vmem:[%s11879_s14 + $0x968] ss:$292 sps:$4 sm:$0xff]  }
 0x19a   : > { %5978 = vmatpush1.bf16.msra.mxu1 %v9791_v49 }
 0x19b   : > { %5979 = vmatprep.subr.bf16.mxu1 %v9799_v50  ;;  %v9873_v50 = vld [vmem:[%s11879_s14 + $0x1040] ss:$292 sps:$4 sm:$0xff]  }
 0x19c   : > { %5939 = vmatpush1.bf16.msra.mxu0 %v9742_v38  ;;  %v9830_v38 = vld [vmem:[%s11879_s14 + $0x14cc] ss:$292 sps:$4 sm:$0xff]  }
 0x19d   : > { %5940 = vmatprep.subr.bf16.mxu0 %v9750_v39  ;;  %v1574_v39 = vld [vmem:[%s11879_s14 + $0x1710] sm:$0x11] }
 0x19e   : > { %5980 = vmatpush1.bf16.msra.mxu1 %v9797_v54  ;;  %v9015_v45 = vcombine.high %v1574_v39, %v1574_v39  ;;  %v9014_v46 = vcombine.low %v1574_v39, %v1574_v39  ;;  %v9879_v54 = vld [vmem:[%s11879_s14 + $0x1288] ss:$292 sps:$4 sm:$0xff]  }
 0x19f   : > { %5981 = vmatprep.subr.bf16.mxu1 %v9805_v55  ;;  %v9887_v55 = vld [vmem:[%s11879_s14 + $0x14d4] ss:$292 sps:$4 sm:$0xff]  }
 0x1a0   : > { %5941 = vmatpush1.bf16.msra.mxu0 %v9748_v43  ;;  %v9828_v43 = vld [vmem:[%s11879_s14 + $0x14c8] ss:$292 sps:$4 sm:$0xff]   ;;  %v5512_v49 = vsel %vm5462_vm1, %v9014_v46, 0 }
 0x1a1   : > { %5942 = vmatprep.subr.bf16.mxu0 %v9756_v44  ;;  %v9867_v44 = vld [vmem:[%s11879_s14 + $0xdf8] ss:$292 sps:$4 sm:$0xff]  }
 0x1a2   : > { %5982 = vmatpush1.bf16.msra.mxu1 %v9803_v59  ;;  %v9885_v59 = vld [vmem:[%s11879_s14 + $0x14d0] ss:$292 sps:$4 sm:$0xff]  }
 0x1a3   : > { %5983 = vmatprep.subr.bf16.mxu1 %v9811_v60 }
 0x1a4   : > { %5943 = vmatpush1.bf16.msra.mxu0 %v9754_v47  ;;  %v9875_v47 = vld [vmem:[%s11879_s14 + $0x1044] ss:$292 sps:$4 sm:$0xff]  }
 0x1a5   : > { %5944 = vmatprep.subr.bf16.mxu0 %v9762_v48  ;;  %v9842_v48 = vld [vmem:[%s11879_s14 + $0x54] ss:$292 sps:$4 sm:$0xff]  }
 0x1a6   : > { %5984 = vmatpush1.bf16.msra.mxu1 %v9809_v1  ;;  %v9860_v1 = vld [vmem:[%s11879_s14 + $0x72c] ss:$292 sps:$4 sm:$0xff]  }
 0x1a7   : > { %5985 = vmatprep.subr.bf16.mxu1 %v9817_v2  ;;  %v9899_v2 = vld [vmem:[%s11879_s14 + $0x5c] ss:$292 sps:$4 sm:$0xff]  }
 0x1a8   : > { %5945 = vmatpush1.bf16.msra.mxu0 %v9760_v51  ;;  %v9840_v51 = vld [vmem:[%s11879_s14 + $0x50] ss:$292 sps:$4 sm:$0xff]  }
 0x1a9   : > { %5946 = vmatprep.subr.bf16.mxu0 %v9766_v52  ;;  %v9881_v52 = vld [vmem:[%s11879_s14 + $0x128c] ss:$292 sps:$4 sm:$0xff]  }
 0x1aa   : > { %5986 = vmatpush1.bf16.msra.mxu1 %v9815_v6  ;;  %v9897_v6 = vld [vmem:[%s11879_s14 + $0x58] ss:$292 sps:$4 sm:$0xff]  }
 0x1ab   : > { %5987 = vmatprep.subr.bf16.mxu1 %v9823_v7  ;;  %v9903_v7 = vld [vmem:[%s11879_s14 + $0x2a4] ss:$292 sps:$4 sm:$0xff]  }
 0x1ac   : > { %5947 = vmatpush1.bf16.msra.mxu0 %v9764_v56  ;;  %v9846_v56 = vld [vmem:[%s11879_s14 + $0x298] ss:$292 sps:$4 sm:$0xff]  }
 0x1ad   : > { %9083 = vmatprep.subr.msk.bf16.mxu0 %vm5462_vm1, %v9011_v57  ;;  %v1575_v57 = vld [vmem:[%s11879_s14 + $0x1718] sm:$0x11] }
 0x1ae   : > { %5988 = vmatpush1.bf16.msra.mxu1 %v9821_v10  ;;  %v9017_v60 = vcombine.high %v1575_v57, %v1575_v57  ;;  %v9901_v10 = vld [vmem:[%s11879_s14 + $0x2a0] ss:$292 sps:$4 sm:$0xff]  }
 0x1af   : > { %9085 = vmatprep.subr.msk.bf16.mxu1 %vm5462_vm1, %v9013_v11  ;;  %v9909_v11 = vld [vmem:[%s11879_s14 + $0x4ec] ss:$292 sps:$4 sm:$0xff]  }
 0x1b0   : > { %5949 = vmatpush1.bf16.msra.mxu0 %v5500_v62  ;;  %v9016_v62 = vcombine.low %v1575_v57, %v1575_v57 }
 0x1b1   : > { %6010 = vmatprep.subr.bf16.mxu0 %v9778_v0  ;;  %v9852_v0 = vld [vmem:[%s11879_s14 + $0x4e0] ss:$292 sps:$4 sm:$0xff]  }
 0x1b2   : > { %5990 = vmatpush1.bf16.msra.mxu1 %v5506_v16  ;;  %v9876_v16 = vld [vmem:[%s11879_s14 + $0xe00] ss:$292 sps:$4 sm:$0xff]  }
 0x1b3   : > { %5961 = vmatmul.mubr.bf16.vlgmr.msra.gmra.mrb[12].mxu0 %v11924_v40  ;;  %6051 = vmatprep.subr.bf16.mxu1 %v9835_v15  ;;  %v9915_v15 = vld [vmem:[%s11879_s14 + $0x734] ss:$292 sps:$4 sm:$0xff]  }
 0x1b4   : > { %6011 = vmatpush1.bf16.msra.mxu0 %v9776_v3  ;;  %9088 = vmatprep.mubr.msk.bf16.mxu0 %vm5458_vm0, %v11873_v61  ;;  %v5518_v3 = vsel %vm5462_vm1, %v9016_v62, 0  ;;  %v9924_v62 = vld [vmem:[%s11879_s14 + $0x73c] ss:$292 sps:$4 sm:$0xff]  }
 0x1b5   : > { %6012 = vmatprep.subr.bf16.mxu0 %v9784_v4  ;;  %6002 = vmatmul.mubr.bf16.vlgmr.msra.gmra.mrb[12].mxu1 %v11924_v40  ;;  %v9858_v4 = vld [vmem:[%s11879_s14 + $0x728] ss:$292 sps:$4 sm:$0xff]  }
 0x1b6   : > { %6052 = vmatpush1.bf16.msra.mxu1 %v9833_v19  ;;  %9090 = vmatprep.mubr.msk.bf16.mxu1 %vm5458_vm0, %v11873_v61  ;;  %v9921_v19 = vld [vmem:[%s11879_s14 + $0x97c] ss:$292 sps:$4 sm:$0xff]  }
 0x1b7   : > { %6053 = vmatprep.subr.bf16.mxu1 %v9839_v20  ;;  %v9882_v20 = vld [vmem:[%s11879_s14 + $0x1048] ss:$292 sps:$4 sm:$0xff]  }
 0x1b8   : > { %6013 = vmatpush1.bf16.msra.mxu0 %v9782_v5  ;;  %v9866_v5 = vld [vmem:[%s11879_s14 + $0x974] ss:$292 sps:$4 sm:$0xff]  }
 0x1b9   : > { %6014 = vmatprep.subr.bf16.mxu0 %v9790_v9  ;;  %v9872_v9 = vld [vmem:[%s11879_s14 + $0xbbc] ss:$292 sps:$4 sm:$0xff]  }
 0x1ba   : > { %6054 = vmatpush1.bf16.msra.mxu1 %v9837_v23  ;;  %v9927_v23 = vld [vmem:[%s11879_s14 + $0xbc4] ss:$292 sps:$4 sm:$0xff]  }
 0x1bb   : > { %6055 = vmatprep.subr.bf16.mxu1 %v9845_v24  ;;  %v9888_v24 = vld [vmem:[%s11879_s14 + $0x1290] ss:$292 sps:$4 sm:$0xff]  }
 0x1bc   : > { %6015 = vmatpush1.bf16.msra.mxu0 %v9788_v13  ;;  %v9878_v13 = vld [vmem:[%s11879_s14 + $0xe04] ss:$292 sps:$4 sm:$0xff]  }
 0x1bd   : > { %6016 = vmatprep.subr.bf16.mxu0 %v9796_v14  ;;  %v9907_v14 = vld [vmem:[%s11879_s14 + $0x4e8] ss:$292 sps:$4 sm:$0xff]  }
 0x1be   : > { %6056 = vmatpush1.bf16.msra.mxu1 %v9843_v27  ;;  %v9925_v27 = vld [vmem:[%s11879_s14 + $0xbc0] ss:$292 sps:$4 sm:$0xff]  }
 0x1bf   : > { %6057 = vmatprep.subr.bf16.mxu1 %v9851_v28  ;;  %v9933_v28 = vld [vmem:[%s11879_s14 + $0xe0c] ss:$292 sps:$4 sm:$0xff]  }
 0x1c0   : > { %6017 = vmatpush1.bf16.msra.mxu0 %v9794_v17  ;;  %v9884_v17 = vld [vmem:[%s11879_s14 + $0x104c] ss:$292 sps:$4 sm:$0xff]  }
 0x1c1   : > { %6018 = vmatprep.subr.bf16.mxu0 %v9802_v18  ;;  %v9913_v18 = vld [vmem:[%s11879_s14 + $0x730] ss:$292 sps:$4 sm:$0xff]  }
 0x1c2   : > { %6058 = vmatpush1.bf16.msra.mxu1 %v9849_v31 }
 0x1c3   : > { %6059 = vmatprep.subr.bf16.mxu1 %v9857_v32  ;;  %v9931_v32 = vld [vmem:[%s11879_s14 + $0xe08] ss:$292 sps:$4 sm:$0xff]  }
 0x1c4   : > { %6019 = vmatpush1.bf16.msra.mxu0 %v9800_v21  ;;  %v9890_v21 = vld [vmem:[%s11879_s14 + $0x1294] ss:$292 sps:$4 sm:$0xff]  }
 0x1c5   : > { %6020 = vmatprep.subr.bf16.mxu0 %v9808_v22  ;;  %v9919_v22 = vld [vmem:[%s11879_s14 + $0x978] ss:$292 sps:$4 sm:$0xff]  }
 0x1c6   : > { %6060 = vmatpush1.bf16.msra.mxu1 %v9855_v35 }
 0x1c7   : > { %6061 = vmatprep.subr.bf16.mxu1 %v9863_v36 }
 0x1c8   : > { %6021 = vmatpush1.bf16.msra.mxu0 %v9806_v25  ;;  %v9894_v25 = vld [vmem:[%s11879_s14 + $0x14dc] ss:$292 sps:$4 sm:$0xff]  }
 0x1c9   : > { %6022 = vmatprep.subr.bf16.mxu0 %v9814_v26  ;;  %v1576_v26 = vld [vmem:[%s11879_s14 + $0x1720] sm:$0x11] }
 0x1ca   : > { %6062 = vmatpush1.bf16.msra.mxu1 %v9861_v41  ;;  %v9018_v31 = vcombine.low %v1576_v26, %v1576_v26 }
 0x1cb   : > { %6063 = vmatprep.subr.bf16.mxu1 %v9869_v42  ;;  %v9906_v42 = vld [vmem:[%s11879_s14 + $0x64] ss:$292 sps:$4 sm:$0xff]  }
 0x1cc   : > { %6023 = vmatpush1.bf16.msra.mxu0 %v9812_v29  ;;  %v12182_v29 = vpop.permute.xlu0 %1606  ;;  %v5524_v41 = vsel %vm5462_vm1, %v9018_v31, 0  ;;  %v9952_v31 = vld [vmem:[%s11879_s14 + $0x12a0] ss:$292 sps:$4 sm:$0xff]  }
 0x1cd   : > { %6024 = vmatprep.subr.bf16.mxu0 %v9820_v30  ;;  %v9892_v30 = vld [vmem:[%s11879_s14 + $0x14d8] ss:$292 sps:$4 sm:$0xff]  }
 0x1ce   : > { %6064 = vmatpush1.bf16.msra.mxu1 %v9867_v44 }
 0x1cf   : > { %6065 = vmatprep.subr.bf16.mxu1 %v9875_v47  ;;  %v9904_v47 = vld [vmem:[%s11879_s14 + $0x60] ss:$292 sps:$4 sm:$0xff]  }
 0x1d0   : > { %6025 = vmatpush1.bf16.msra.mxu0 %v9818_v33  ;;  %v9019_v33 = vcombine.high %v1576_v26, %v1576_v26  ;;  %v9946_v26 = vld [vmem:[%s11879_s14 + $0x1058] ss:$292 sps:$4 sm:$0xff]  }
 0x1d1   : > { %6026 = vmatprep.subr.bf16.mxu0 %v9826_v34  ;;  %v9939_v34 = vld [vmem:[%s11879_s14 + $0x1054] ss:$292 sps:$4 sm:$0xff]  }
 0x1d2   : > { %6066 = vmatpush1.bf16.msra.mxu1 %v9873_v50 }
 0x1d3   : > { %6067 = vmatprep.subr.bf16.mxu1 %v9881_v52  ;;  %v9951_v52 = vld [vmem:[%s11879_s14 + $0x14e4] ss:$292 sps:$4 sm:$0xff]  }
 0x1d4   : > { %6027 = vmatpush1.bf16.msra.mxu0 %v9824_v37 }
 0x1d5   : > { %6028 = vmatprep.subr.bf16.mxu0 %v9830_v38 }
 0x1d6   : > { %6068 = vmatpush1.bf16.msra.mxu1 %v9879_v54  ;;  %v1577_v54 = vld [vmem:[%s11879_s14 + $0x1728] sm:$0x11] }
 0x1d7   : > { %6069 = vmatprep.subr.bf16.mxu1 %v9887_v55  ;;  %v9918_v55 = vld [vmem:[%s11879_s14 + $0x4f4] ss:$292 sps:$4 sm:$0xff]   ;;  %v9021_v57 = vcombine.high %v1577_v54, %v1577_v54 }
 0x1d8   : > { %6029 = vmatpush1.bf16.msra.mxu0 %v9828_v43 }
 0x1d9   : > { %9087 = vmatprep.subr.msk.bf16.mxu0 %vm5462_vm1, %v9015_v45  ;;  %v9937_v45 = vld [vmem:[%s11879_s14 + $0x1050] ss:$292 sps:$4 sm:$0xff]  }
 0x1da   : > { %6070 = vmatpush1.bf16.msra.mxu1 %v9885_v59  ;;  %v9916_v59 = vld [vmem:[%s11879_s14 + $0x4f0] ss:$292 sps:$4 sm:$0xff]  }
 0x1db   : > { %9089 = vmatprep.subr.msk.bf16.mxu1 %vm5462_vm1, %v9017_v60 }
 0x1dc   : > { %6031 = vmatpush1.bf16.msra.mxu0 %v5512_v49  ;;  %v9912_v49 = vld [vmem:[%s11879_s14 + $0x2ac] ss:$292 sps:$4 sm:$0xff]  }
 0x1dd   : > { %6092 = vmatprep.subr.bf16.mxu0 %v9842_v48  ;;  %v9945_v48 = vld [vmem:[%s11879_s14 + $0x129c] ss:$292 sps:$4 sm:$0xff]  }
 0x1de   : > { %6072 = vmatpush1.bf16.msra.mxu1 %v5518_v3 }
 0x1df   : > { %6043 = vmatmul.mubr.bf16.vlgmr.msra.gmra.mrb[16].mxu0 %v11924_v40  ;;  %6133 = vmatprep.subr.bf16.mxu1 %v9899_v2  ;;  %v9963_v2 = vld [vmem:[%s11879_s14 + $0x6c] ss:$292 sps:$4 sm:$0xff]  }
 0x1e0   : > { %6093 = vmatpush1.bf16.msra.mxu0 %v9840_v51  ;;  %9092 = vmatprep.mubr.msk.bf16.mxu0 %vm5458_vm0, %v11873_v61  ;;  %v9943_v51 = vld [vmem:[%s11879_s14 + $0x1298] ss:$292 sps:$4 sm:$0xff]  }
 0x1e1   : > { %6094 = vmatprep.subr.bf16.mxu0 %v9848_v53  ;;  %6084 = vmatmul.mubr.bf16.vlgmr.msra.gmra.mrb[16].mxu1 %v11924_v40  ;;  %v9910_v53 = vld [vmem:[%s11879_s14 + $0x2a8] ss:$292 sps:$4 sm:$0xff]  }
 0x1e2   : > { %6134 = vmatpush1.bf16.msra.mxu1 %v9897_v6  ;;  %9094 = vmatprep.mubr.msk.bf16.mxu1 %vm5458_vm0, %v11873_v61 }
 0x1e3   : > { %6135 = vmatprep.subr.bf16.mxu1 %v9903_v7 }
 0x1e4   : > { %6095 = vmatpush1.bf16.msra.mxu0 %v9846_v56  ;;  %v9949_v56 = vld [vmem:[%s11879_s14 + $0x14e0] ss:$292 sps:$4 sm:$0xff]  }
 0x1e5   : > { %6096 = vmatprep.subr.bf16.mxu0 %v9854_v58  ;;  %v9020_v58 = vcombine.low %v1577_v54, %v1577_v54  ;;  %v10009_v54 = vld [vmem:[%s11879_s14 + $0x12ac] ss:$292 sps:$4 sm:$0xff]  }
 0x1e6   : > { %6136 = vmatpush1.bf16.msra.mxu1 %v9901_v10 }
 0x1e7   : > { %6137 = vmatprep.subr.bf16.mxu1 %v9909_v11  ;;  %v5530_v7 = vsel %vm5462_vm1, %v9020_v58, 0  ;;  %v9961_v11 = vld [vmem:[%s11879_s14 + $0x68] ss:$292 sps:$4 sm:$0xff]   ;;  %v10015_v58 = vld [vmem:[%s11879_s14 + $0x14f4] ss:$292 sps:$4 sm:$0xff]  }
 0x1e8   : > { %6097 = vmatpush1.bf16.msra.mxu0 %v9852_v0 }
 0x1e9   : > { %6098 = vmatprep.subr.bf16.mxu0 %v9860_v1 }
 0x1ea   : > { %6138 = vmatpush1.bf16.msra.mxu1 %v9907_v14  ;;  %v9928_v14 = vld [vmem:[%s11879_s14 + $0x980] ss:$292 sps:$4 sm:$0xff]  }
 0x1eb   : > { %6139 = vmatprep.subr.bf16.mxu1 %v9915_v15  ;;  %v9936_v15 = vld [vmem:[%s11879_s14 + $0xbcc] ss:$292 sps:$4 sm:$0xff]  }
 0x1ec   : > { %6099 = vmatpush1.bf16.msra.mxu0 %v9858_v4 }
 0x1ed   : > { %6100 = vmatprep.subr.bf16.mxu0 %v9866_v5 }
 0x1ee   : > { %6140 = vmatpush1.bf16.msra.mxu1 %v9913_v18  ;;  %v9934_v18 = vld [vmem:[%s11879_s14 + $0xbc8] ss:$292 sps:$4 sm:$0xff]  }
 0x1ef   : > { %6141 = vmatprep.subr.bf16.mxu1 %v9921_v19  ;;  %v9942_v19 = vld [vmem:[%s11879_s14 + $0xe14] ss:$292 sps:$4 sm:$0xff]  }
 0x1f0   : > { %6101 = vmatpush1.bf16.msra.mxu0 %v9864_v8  ;;  %v9922_v8 = vld [vmem:[%s11879_s14 + $0x738] ss:$292 sps:$4 sm:$0xff]  }
 0x1f1   : > { %6102 = vmatprep.subr.bf16.mxu0 %v9872_v9  ;;  %v9930_v9 = vld [vmem:[%s11879_s14 + $0x984] ss:$292 sps:$4 sm:$0xff]  }
 0x1f2   : > { %6142 = vmatpush1.bf16.msra.mxu1 %v9919_v22  ;;  %v9940_v22 = vld [vmem:[%s11879_s14 + $0xe10] ss:$292 sps:$4 sm:$0xff]  }
 0x1f3   : > { %6143 = vmatprep.subr.bf16.mxu1 %v9927_v23  ;;  %v9948_v23 = vld [vmem:[%s11879_s14 + $0x105c] ss:$292 sps:$4 sm:$0xff]  }
 0x1f4   : > { %6103 = vmatpush1.bf16.msra.mxu0 %v9870_v12  ;;  %v9967_v12 = vld [vmem:[%s11879_s14 + $0x2b4] ss:$292 sps:$4 sm:$0xff]  }
 0x1f5   : > { %6104 = vmatprep.subr.bf16.mxu0 %v9878_v13 }
 0x1f6   : > { %6144 = vmatpush1.bf16.msra.mxu1 %v9925_v27  ;;  %v9954_v27 = vld [vmem:[%s11879_s14 + $0x12a4] ss:$292 sps:$4 sm:$0xff]  }
 0x1f7   : > { %6145 = vmatprep.subr.bf16.mxu1 %v9933_v28  ;;  %v9983_v28 = vld [vmem:[%s11879_s14 + $0x988] ss:$292 sps:$4 sm:$0xff]  }
 0x1f8   : > { %6105 = vmatpush1.bf16.msra.mxu0 %v9876_v16  ;;  %v9965_v16 = vld [vmem:[%s11879_s14 + $0x2b0] ss:$292 sps:$4 sm:$0xff]  }
 0x1f9   : > { %6106 = vmatprep.subr.bf16.mxu0 %v9884_v17  ;;  %v9973_v17 = vld [vmem:[%s11879_s14 + $0x4fc] ss:$292 sps:$4 sm:$0xff]  }
 0x1fa   : > { %6146 = vmatpush1.bf16.msra.mxu1 %v9931_v32  ;;  %v9958_v32 = vld [vmem:[%s11879_s14 + $0x14ec] ss:$292 sps:$4 sm:$0xff]  }
 0x1fb   : > { %6147 = vmatprep.subr.bf16.mxu1 %v9939_v34  ;;  %v9989_v34 = vld [vmem:[%s11879_s14 + $0xbd0] ss:$292 sps:$4 sm:$0xff]  }
 0x1fc   : > { %6107 = vmatpush1.bf16.msra.mxu0 %v9882_v20  ;;  %v9971_v20 = vld [vmem:[%s11879_s14 + $0x4f8] ss:$292 sps:$4 sm:$0xff]  }
 0x1fd   : > { %6108 = vmatprep.subr.bf16.mxu0 %v9890_v21  ;;  %v9979_v21 = vld [vmem:[%s11879_s14 + $0x744] ss:$292 sps:$4 sm:$0xff]  }
 0x1fe   : > { %6148 = vmatpush1.bf16.msra.mxu1 %v9937_v45 }
 0x1ff   : > { %6149 = vmatprep.subr.bf16.mxu1 %v9945_v48  ;;  %v9970_v48 = vld [vmem:[%s11879_s14 + $0x74] ss:$292 sps:$4 sm:$0xff]  }
 0x200   : > { %6109 = vmatpush1.bf16.msra.mxu0 %v9888_v24  ;;  %v9977_v24 = vld [vmem:[%s11879_s14 + $0x740] ss:$292 sps:$4 sm:$0xff]  }
 0x201   : > { %6110 = vmatprep.subr.bf16.mxu0 %v9894_v25  ;;  %v9985_v25 = vld [vmem:[%s11879_s14 + $0x98c] ss:$292 sps:$4 sm:$0xff]  }
 0x202   : > { %v5716_v35 = vpop.f32.mrb[0].mxu0  ;;  %6150 = vmatpush1.bf16.msra.mxu1 %v9943_v51  ;;  %v10001_v51 = vld [vmem:[%s11879_s14 + $0x1060] ss:$292 sps:$4 sm:$0xff]  }
 0x203   : > { %v5717_v36 = vadd.f32 %v5716_v35, %v12182_v29  ;;  %v5718_v37 = vpop.f32.mrb[1].mxu0  ;;  %6151 = vmatprep.subr.bf16.mxu1 %v9951_v52  ;;  %v9997_v35 = vld [vmem:[%s11879_s14 + $0xe1c] ss:$292 sps:$4 sm:$0xff]  }
 0x204   : > { %v5719_v38 = vadd.f32 %v5718_v37, %v12182_v29  ;;  %v5720_v39 = vpop.f32.mrb[2].mxu0  ;;  %6111 = vmatpush1.bf16.msra.mxu0 %v9892_v30  ;;  %v5757_v60 = vpop.f32.mrb[0].mxu1  ;;  %v9991_v30 = vld [vmem:[%s11879_s14 + $0xbd4] ss:$292 sps:$4 sm:$0xff]  }
 0x205   : > { %v7198_v43 = vmax.f32 %v5717_v36, 0.0  ;;  %v5721_v44 = vpop.f32.mrb[3].mxu0  ;;  %9091 = vmatprep.subr.msk.bf16.mxu0 %vm5462_vm1, %v9019_v33  ;;  %v5758_v0 = vadd.f32 %v5757_v60, %v12182_v29  ;;  %v5759_v1 = vpop.f32.mrb[1].mxu1  ;;  %v1578_v33 = vld [vmem:[%s11879_s14 + $0x1730] sm:$0x11] }
 0x206   : > { %v7199_v46 = vmax.f32 %v5719_v38, 0.0  ;;  %v5760_v3 = vadd.f32 %v5759_v1, %v12182_v29  ;;  %6152 = vmatpush1.bf16.msra.mxu1 %v9949_v56  ;;  %v5761_v4 = vpop.f32.mrb[2].mxu1  ;;  %v9956_v36 = vld [vmem:[%s11879_s14 + $0x14e8] ss:$292 sps:$4 sm:$0xff]   ;;  %v9022_v37 = vcombine.low %v1578_v33, %v1578_v33  ;;  %v9995_v38 = vld [vmem:[%s11879_s14 + $0xe18] ss:$292 sps:$4 sm:$0xff]   ;;  %v9023_v39 = vcombine.high %v1578_v33, %v1578_v33 }
 0x207   : > { %v7200_v5 = vmax.f32 %v5758_v0, 0.0  ;;  %v5762_v6 = vpop.f32.mrb[3].mxu1  ;;  %9093 = vmatprep.subr.msk.bf16.mxu1 %vm5462_vm1, %v9021_v57  ;;  %v10007_v57 = vld [vmem:[%s11879_s14 + $0x12a8] ss:$292 sps:$4 sm:$0xff]   ;;  %v1579_v60 = vld [vmem:[%s11879_s14 + $0x1738] sm:$0x11] }
 0x208   : > { %v9213_v50 = vpack.c.bf16 %v7199_v46, %v7198_v43  ;;  %6113 = vmatpush1.bf16.msra.mxu0 %v5524_v41  ;;  %v7201_v10 = vmax.f32 %v5760_v3, 0.0  ;;  %v10003_v41 = vld [vmem:[%s11879_s14 + $0x1064] ss:$292 sps:$4 sm:$0xff]   ;;  %v10013_v0 = vld [vmem:[%s11879_s14 + $0x14f0] ss:$292 sps:$4 sm:$0xff]   ;;  %v9025_v1 = vcombine.high %v1579_v60, %v1579_v60 }
 0x209   : > { %6174 = vmatprep.subr.bf16.mxu0 %v9906_v42  ;;  %v9980_v3 = vld [vmem:[%s11879_s14 + $0x500] ss:$292 sps:$4 sm:$0xff]   ;;  %v10010_v33 = vld [vmem:[%s11879_s14 + $0x1068] ss:$292 sps:$4 sm:$0xff]  }
 0x20a   : > { %7564 = vst [vmem:[%s12200_s12] sm:$0xff] %v9213_v50  ;;  %v9214_v13 = vpack.c.bf16 %v7201_v10, %v7200_v5  ;;  %6154 = vmatpush1.bf16.msra.mxu1 %v5530_v7  ;;  %v9988_v5 = vld [vmem:[%s11879_s14 + $0x74c] ss:$292 sps:$4 sm:$0xff]  }
 0x20b   : > { %6125 = vmatmul.mubr.bf16.vlgmr.msra.gmra.mrb[20].mxu0 %v11924_v40  ;;  %6215 = vmatprep.subr.bf16.mxu1 %v9963_v2  ;;  %v9024_v2 = vcombine.low %v1579_v60, %v1579_v60  ;;  %v10073_v60 = vld [vmem:[%s11879_s14 + $0x12bc] ss:$292 sps:$4 sm:$0xff]  }
 0x20c   : > { %6175 = vmatpush1.bf16.msra.mxu0 %v9904_v47  ;;  %9096 = vmatprep.mubr.msk.bf16.mxu0 %vm5458_vm0, %v11873_v61  ;;  %7565 = vst [vmem:[%s12200_s12 + $0x8] sm:$0xff] %v9214_v13  ;;  %v5536_v47 = vsel %vm5462_vm1, %v9022_v37, 0  ;;  %v10016_v37 = vld [vmem:[%s11879_s14 + $0x12b0] ss:$292 sps:$4 sm:$0xff]  }
 0x20d   : > { %6176 = vmatprep.subr.bf16.mxu0 %v9912_v49  ;;  %6166 = vmatmul.mubr.bf16.vlgmr.msra.gmra.mrb[20].mxu1 %v11924_v40  ;;  %v5542_v13 = vsel %vm5462_vm1, %v9024_v2, 0  ;;  %v10079_v2 = vld [vmem:[%s11879_s14 + $0x1504] ss:$292 sps:$4 sm:$0xff]  }
 0x20e   : > { %6216 = vmatpush1.bf16.msra.mxu1 %v9961_v11  ;;  %9098 = vmatprep.mubr.msk.bf16.mxu1 %vm5458_vm0, %v11873_v61 }
 0x20f   : > { %6217 = vmatprep.subr.bf16.mxu1 %v9967_v12 }
 0x210   : > { %6177 = vmatpush1.bf16.msra.mxu0 %v9910_v53  ;;  %v9968_v53 = vld [vmem:[%s11879_s14 + $0x70] ss:$292 sps:$4 sm:$0xff]  }
 0x211   : > { %6178 = vmatprep.subr.bf16.mxu0 %v9918_v55  ;;  %v9976_v55 = vld [vmem:[%s11879_s14 + $0x2bc] ss:$292 sps:$4 sm:$0xff]  }
 0x212   : > { %6218 = vmatpush1.bf16.msra.mxu1 %v9965_v16 }
 0x213   : > { %6219 = vmatprep.subr.bf16.mxu1 %v9973_v17  ;;  %v10025_v17 = vld [vmem:[%s11879_s14 + $0x78] ss:$292 sps:$4 sm:$0xff]  }
 0x214   : > { %6179 = vmatpush1.bf16.msra.mxu0 %v9916_v59  ;;  %v9974_v59 = vld [vmem:[%s11879_s14 + $0x2b8] ss:$292 sps:$4 sm:$0xff]  }
 0x215   : > { %6180 = vmatprep.subr.bf16.mxu0 %v9924_v62  ;;  %v9982_v62 = vld [vmem:[%s11879_s14 + $0x504] ss:$292 sps:$4 sm:$0xff]  }
 0x216   : > { %6220 = vmatpush1.bf16.msra.mxu1 %v9971_v20  ;;  %v9992_v20 = vld [vmem:[%s11879_s14 + $0x990] ss:$292 sps:$4 sm:$0xff]  }
 0x217   : > { %6221 = vmatprep.subr.bf16.mxu1 %v9979_v21  ;;  %v10000_v21 = vld [vmem:[%s11879_s14 + $0xbdc] ss:$292 sps:$4 sm:$0xff]  }
 0x218   : > { %6181 = vmatpush1.bf16.msra.mxu0 %v9922_v8  ;;  %v10027_v8 = vld [vmem:[%s11879_s14 + $0x7c] ss:$292 sps:$4 sm:$0xff]  }
 0x219   : > { %6182 = vmatprep.subr.bf16.mxu0 %v9930_v9 }
 0x21a   : > { %6222 = vmatpush1.bf16.msra.mxu1 %v9977_v24  ;;  %v9998_v24 = vld [vmem:[%s11879_s14 + $0xbd8] ss:$292 sps:$4 sm:$0xff]  }
 0x21b   : > { %6223 = vmatprep.subr.bf16.mxu1 %v9985_v25  ;;  %v10006_v25 = vld [vmem:[%s11879_s14 + $0xe24] ss:$292 sps:$4 sm:$0xff]  }
 0x21c   : > { %6183 = vmatpush1.bf16.msra.mxu0 %v9928_v14  ;;  %v9986_v14 = vld [vmem:[%s11879_s14 + $0x748] ss:$292 sps:$4 sm:$0xff]  }
 0x21d   : > { %6184 = vmatprep.subr.bf16.mxu0 %v9936_v15  ;;  %v9994_v15 = vld [vmem:[%s11879_s14 + $0x994] ss:$292 sps:$4 sm:$0xff]  }
 0x21e   : > { %6224 = vmatpush1.bf16.msra.mxu1 %v9983_v28  ;;  %v10004_v28 = vld [vmem:[%s11879_s14 + $0xe20] ss:$292 sps:$4 sm:$0xff]  }
 0x21f   : > { %6225 = vmatprep.subr.bf16.mxu1 %v9991_v30  ;;  %v10012_v30 = vld [vmem:[%s11879_s14 + $0x106c] ss:$292 sps:$4 sm:$0xff]  }
 0x220   : > { %6185 = vmatpush1.bf16.msra.mxu0 %v9934_v18  ;;  %v10031_v18 = vld [vmem:[%s11879_s14 + $0x2c4] ss:$292 sps:$4 sm:$0xff]  }
 0x221   : > { %6186 = vmatprep.subr.bf16.mxu0 %v9942_v19 }
 0x222   : > { %6226 = vmatpush1.bf16.msra.mxu1 %v9989_v34  ;;  %v10018_v34 = vld [vmem:[%s11879_s14 + $0x12b4] ss:$292 sps:$4 sm:$0xff]  }
 0x223   : > { %6227 = vmatprep.subr.bf16.mxu1 %v9997_v35  ;;  %v10047_v35 = vld [vmem:[%s11879_s14 + $0x998] ss:$292 sps:$4 sm:$0xff]  }
 0x224   : > { %6187 = vmatpush1.bf16.msra.mxu0 %v9940_v22  ;;  %v10029_v22 = vld [vmem:[%s11879_s14 + $0x2c0] ss:$292 sps:$4 sm:$0xff]  }
 0x225   : > { %6188 = vmatprep.subr.bf16.mxu0 %v9948_v23  ;;  %v10037_v23 = vld [vmem:[%s11879_s14 + $0x50c] ss:$292 sps:$4 sm:$0xff]  }
 0x226   : > { %6228 = vmatpush1.bf16.msra.mxu1 %v9995_v38  ;;  %v10022_v38 = vld [vmem:[%s11879_s14 + $0x14fc] ss:$292 sps:$4 sm:$0xff]  }
 0x227   : > { %6229 = vmatprep.subr.bf16.mxu1 %v10003_v41  ;;  %v10053_v41 = vld [vmem:[%s11879_s14 + $0xbe0] ss:$292 sps:$4 sm:$0xff]  }
 0x228   : > { %6189 = vmatpush1.bf16.msra.mxu0 %v9946_v26  ;;  %v10035_v26 = vld [vmem:[%s11879_s14 + $0x508] ss:$292 sps:$4 sm:$0xff]  }
 0x229   : > { %6190 = vmatprep.subr.bf16.mxu0 %v9954_v27  ;;  %v10043_v27 = vld [vmem:[%s11879_s14 + $0x754] ss:$292 sps:$4 sm:$0xff]  }
 0x22a   : > { %6230 = vmatpush1.bf16.msra.mxu1 %v10001_v51 }
 0x22b   : > { %6231 = vmatprep.subr.bf16.mxu1 %v10009_v54  ;;  %v10034_v54 = vld [vmem:[%s11879_s14 + $0x84] ss:$292 sps:$4 sm:$0xff]  }
 0x22c   : > { %6191 = vmatpush1.bf16.msra.mxu0 %v9952_v31  ;;  %v10041_v31 = vld [vmem:[%s11879_s14 + $0x750] ss:$292 sps:$4 sm:$0xff]  }
 0x22d   : > { %6192 = vmatprep.subr.bf16.mxu0 %v9958_v32  ;;  %v10049_v32 = vld [vmem:[%s11879_s14 + $0x99c] ss:$292 sps:$4 sm:$0xff]  }
 0x22e   : > { %v5798_v42 = vpop.f32.mrb[4].mxu0  ;;  %6232 = vmatpush1.bf16.msra.mxu1 %v10007_v57  ;;  %v10065_v57 = vld [vmem:[%s11879_s14 + $0x1070] ss:$292 sps:$4 sm:$0xff]  }
 0x22f   : > { %v5799_v43 = vadd.f32 %v5798_v42, %v12182_v29  ;;  %v5800_v44 = vpop.f32.mrb[5].mxu0  ;;  %6233 = vmatprep.subr.bf16.mxu1 %v10015_v58  ;;  %v10061_v42 = vld [vmem:[%s11879_s14 + $0xe2c] ss:$292 sps:$4 sm:$0xff]  }
 0x230   : > { %v5801_v45 = vadd.f32 %v5800_v44, %v12182_v29  ;;  %v5802_v46 = vpop.f32.mrb[6].mxu0  ;;  %6193 = vmatpush1.bf16.msra.mxu0 %v9956_v36  ;;  %v5839_v4 = vpop.f32.mrb[4].mxu1  ;;  %v10055_v36 = vld [vmem:[%s11879_s14 + $0xbe4] ss:$292 sps:$4 sm:$0xff]  }
 0x231   : > { %v7202_v49 = vmax.f32 %v5799_v43, 0.0  ;;  %v5803_v50 = vpop.f32.mrb[7].mxu0  ;;  %9095 = vmatprep.subr.msk.bf16.mxu0 %vm5462_vm1, %v9023_v39  ;;  %v5840_v6 = vadd.f32 %v5839_v4, %v12182_v29  ;;  %v5841_v7 = vpop.f32.mrb[5].mxu1  ;;  %v1580_v39 = vld [vmem:[%s11879_s14 + $0x1740] sm:$0x11] }
 0x232   : > { %v7203_v52 = vmax.f32 %v5801_v45, 0.0  ;;  %v5842_v9 = vadd.f32 %v5841_v7, %v12182_v29  ;;  %6234 = vmatpush1.bf16.msra.mxu1 %v10013_v0  ;;  %v5843_v10 = vpop.f32.mrb[6].mxu1  ;;  %v10020_v43 = vld [vmem:[%s11879_s14 + $0x14f8] ss:$292 sps:$4 sm:$0xff]   ;;  %v9026_v44 = vcombine.low %v1580_v39, %v1580_v39  ;;  %v10059_v45 = vld [vmem:[%s11879_s14 + $0xe28] ss:$292 sps:$4 sm:$0xff]   ;;  %v9027_v46 = vcombine.high %v1580_v39, %v1580_v39 }
 0x233   : > { %v7204_v11 = vmax.f32 %v5840_v6, 0.0  ;;  %v5844_v12 = vpop.f32.mrb[7].mxu1  ;;  %9097 = vmatprep.subr.msk.bf16.mxu1 %vm5462_vm1, %v9025_v1  ;;  %v10071_v1 = vld [vmem:[%s11879_s14 + $0x12b8] ss:$292 sps:$4 sm:$0xff]   ;;  %v1581_v4 = vld [vmem:[%s11879_s14 + $0x1748] sm:$0x11] }
 0x234   : > { %v9215_v56 = vpack.c.bf16 %v7203_v52, %v7202_v49  ;;  %6195 = vmatpush1.bf16.msra.mxu0 %v5536_v47  ;;  %v7205_v16 = vmax.f32 %v5842_v9, 0.0  ;;  %v10067_v47 = vld [vmem:[%s11879_s14 + $0x1074] ss:$292 sps:$4 sm:$0xff]   ;;  %v10077_v6 = vld [vmem:[%s11879_s14 + $0x1500] ss:$292 sps:$4 sm:$0xff]   ;;  %v9029_v7 = vcombine.high %v1581_v4, %v1581_v4 }
 0x235   : > { %6256 = vmatprep.subr.bf16.mxu0 %v9970_v48  ;;  %v10044_v9 = vld [vmem:[%s11879_s14 + $0x510] ss:$292 sps:$4 sm:$0xff]   ;;  %v10074_v39 = vld [vmem:[%s11879_s14 + $0x1078] ss:$292 sps:$4 sm:$0xff]  }
 0x236   : > { %7566 = vst [vmem:[%s12200_s12 + $0x10] sm:$0xff] %v9215_v56  ;;  %v9216_v19 = vpack.c.bf16 %v7205_v16, %v7204_v11  ;;  %6236 = vmatpush1.bf16.msra.mxu1 %v5542_v13  ;;  %v10052_v11 = vld [vmem:[%s11879_s14 + $0x75c] ss:$292 sps:$4 sm:$0xff]  }
 0x237   : > { %6207 = vmatmul.mubr.bf16.vlgmr.msra.gmra.mrb[24].mxu0 %v11924_v40  ;;  %6297 = vmatprep.subr.bf16.mxu1 %v10027_v8  ;;  %v9028_v8 = vcombine.low %v1581_v4, %v1581_v4  ;;  %v10137_v4 = vld [vmem:[%s11879_s14 + $0x12cc] ss:$292 sps:$4 sm:$0xff]  }
 0x238   : > { %6257 = vmatpush1.bf16.msra.mxu0 %v9968_v53  ;;  %9100 = vmatprep.mubr.msk.bf16.mxu0 %vm5458_vm0, %v11873_v61  ;;  %7567 = vst [vmem:[%s12200_s12 + $0x18] sm:$0xff] %v9216_v19  ;;  %v5548_v53 = vsel %vm5462_vm1, %v9026_v44, 0  ;;  %v10080_v44 = vld [vmem:[%s11879_s14 + $0x12c0] ss:$292 sps:$4 sm:$0xff]  }
 0x239   : > { %6258 = vmatprep.subr.bf16.mxu0 %v9976_v55  ;;  %6248 = vmatmul.mubr.bf16.vlgmr.msra.gmra.mrb[24].mxu1 %v11924_v40  ;;  %v5554_v19 = vsel %vm5462_vm1, %v9028_v8, 0  ;;  %v10143_v8 = vld [vmem:[%s11879_s14 + $0x1514] ss:$292 sps:$4 sm:$0xff]  }
 0x23a   : > { %6298 = vmatpush1.bf16.msra.mxu1 %v10025_v17  ;;  %9102 = vmatprep.mubr.msk.bf16.mxu1 %vm5458_vm0, %v11873_v61 }
 0x23b   : > { %6299 = vmatprep.subr.bf16.mxu1 %v10031_v18 }
 0x23c   : > { %6259 = vmatpush1.bf16.msra.mxu0 %v9974_v59  ;;  %v10032_v59 = vld [vmem:[%s11879_s14 + $0x80] ss:$292 sps:$4 sm:$0xff]  }
 0x23d   : > { %6260 = vmatprep.subr.bf16.mxu0 %v9982_v62  ;;  %v10040_v62 = vld [vmem:[%s11879_s14 + $0x2cc] ss:$292 sps:$4 sm:$0xff]  }
 0x23e   : > { %6300 = vmatpush1.bf16.msra.mxu1 %v10029_v22 }
 0x23f   : > { %6301 = vmatprep.subr.bf16.mxu1 %v10037_v23  ;;  %v10089_v23 = vld [vmem:[%s11879_s14 + $0x88] ss:$292 sps:$4 sm:$0xff]  }
 0x240   : > { %6261 = vmatpush1.bf16.msra.mxu0 %v9980_v3  ;;  %v10038_v3 = vld [vmem:[%s11879_s14 + $0x2c8] ss:$292 sps:$4 sm:$0xff]  }
 0x241   : > { %6262 = vmatprep.subr.bf16.mxu0 %v9988_v5  ;;  %v10046_v5 = vld [vmem:[%s11879_s14 + $0x514] ss:$292 sps:$4 sm:$0xff]  }
 0x242   : > { %6302 = vmatpush1.bf16.msra.mxu1 %v10035_v26  ;;  %v10056_v26 = vld [vmem:[%s11879_s14 + $0x9a0] ss:$292 sps:$4 sm:$0xff]  }
 0x243   : > { %6303 = vmatprep.subr.bf16.mxu1 %v10043_v27  ;;  %v10064_v27 = vld [vmem:[%s11879_s14 + $0xbec] ss:$292 sps:$4 sm:$0xff]  }
 0x244   : > { %6263 = vmatpush1.bf16.msra.mxu0 %v9986_v14  ;;  %v10091_v14 = vld [vmem:[%s11879_s14 + $0x8c] ss:$292 sps:$4 sm:$0xff]  }
 0x245   : > { %6264 = vmatprep.subr.bf16.mxu0 %v9994_v15 }
 0x246   : > { %6304 = vmatpush1.bf16.msra.mxu1 %v10041_v31  ;;  %v10062_v31 = vld [vmem:[%s11879_s14 + $0xbe8] ss:$292 sps:$4 sm:$0xff]  }
 0x247   : > { %6305 = vmatprep.subr.bf16.mxu1 %v10049_v32  ;;  %v10070_v32 = vld [vmem:[%s11879_s14 + $0xe34] ss:$292 sps:$4 sm:$0xff]  }
 0x248   : > { %6265 = vmatpush1.bf16.msra.mxu0 %v9992_v20  ;;  %v10050_v20 = vld [vmem:[%s11879_s14 + $0x758] ss:$292 sps:$4 sm:$0xff]  }
 0x249   : > { %6266 = vmatprep.subr.bf16.mxu0 %v10000_v21  ;;  %v10058_v21 = vld [vmem:[%s11879_s14 + $0x9a4] ss:$292 sps:$4 sm:$0xff]  }
 0x24a   : > { %6306 = vmatpush1.bf16.msra.mxu1 %v10047_v35  ;;  %v10068_v35 = vld [vmem:[%s11879_s14 + $0xe30] ss:$292 sps:$4 sm:$0xff]  }
 0x24b   : > { %6307 = vmatprep.subr.bf16.mxu1 %v10055_v36  ;;  %v10076_v36 = vld [vmem:[%s11879_s14 + $0x107c] ss:$292 sps:$4 sm:$0xff]  }
 0x24c   : > { %6267 = vmatpush1.bf16.msra.mxu0 %v9998_v24  ;;  %v10095_v24 = vld [vmem:[%s11879_s14 + $0x2d4] ss:$292 sps:$4 sm:$0xff]  }
 0x24d   : > { %6268 = vmatprep.subr.bf16.mxu0 %v10006_v25 }
 0x24e   : > { %6308 = vmatpush1.bf16.msra.mxu1 %v10053_v41  ;;  %v10082_v41 = vld [vmem:[%s11879_s14 + $0x12c4] ss:$292 sps:$4 sm:$0xff]  }
 0x24f   : > { %6309 = vmatprep.subr.bf16.mxu1 %v10061_v42  ;;  %v10111_v42 = vld [vmem:[%s11879_s14 + $0x9a8] ss:$292 sps:$4 sm:$0xff]  }
 0x250   : > { %6269 = vmatpush1.bf16.msra.mxu0 %v10004_v28  ;;  %v10093_v28 = vld [vmem:[%s11879_s14 + $0x2d0] ss:$292 sps:$4 sm:$0xff]  }
 0x251   : > { %6270 = vmatprep.subr.bf16.mxu0 %v10012_v30  ;;  %v10101_v30 = vld [vmem:[%s11879_s14 + $0x51c] ss:$292 sps:$4 sm:$0xff]  }
 0x252   : > { %6310 = vmatpush1.bf16.msra.mxu1 %v10059_v45  ;;  %v10086_v45 = vld [vmem:[%s11879_s14 + $0x150c] ss:$292 sps:$4 sm:$0xff]  }
 0x253   : > { %6311 = vmatprep.subr.bf16.mxu1 %v10067_v47  ;;  %v10117_v47 = vld [vmem:[%s11879_s14 + $0xbf0] ss:$292 sps:$4 sm:$0xff]  }
 0x254   : > { %6271 = vmatpush1.bf16.msra.mxu0 %v10010_v33  ;;  %v10099_v33 = vld [vmem:[%s11879_s14 + $0x518] ss:$292 sps:$4 sm:$0xff]  }
 0x255   : > { %6272 = vmatprep.subr.bf16.mxu0 %v10018_v34  ;;  %v10107_v34 = vld [vmem:[%s11879_s14 + $0x764] ss:$292 sps:$4 sm:$0xff]  }
 0x256   : > { %6312 = vmatpush1.bf16.msra.mxu1 %v10065_v57 }
 0x257   : > { %6313 = vmatprep.subr.bf16.mxu1 %v10073_v60  ;;  %v10098_v60 = vld [vmem:[%s11879_s14 + $0x94] ss:$292 sps:$4 sm:$0xff]  }
 0x258   : > { %6273 = vmatpush1.bf16.msra.mxu0 %v10016_v37  ;;  %v10105_v37 = vld [vmem:[%s11879_s14 + $0x760] ss:$292 sps:$4 sm:$0xff]  }
 0x259   : > { %6274 = vmatprep.subr.bf16.mxu0 %v10022_v38  ;;  %v10113_v38 = vld [vmem:[%s11879_s14 + $0x9ac] ss:$292 sps:$4 sm:$0xff]  }
 0x25a   : > { %v5880_v48 = vpop.f32.mrb[8].mxu0  ;;  %6314 = vmatpush1.bf16.msra.mxu1 %v10071_v1  ;;  %v10129_v1 = vld [vmem:[%s11879_s14 + $0x1080] ss:$292 sps:$4 sm:$0xff]  }
 0x25b   : > { %v5881_v49 = vadd.f32 %v5880_v48, %v12182_v29  ;;  %v5882_v50 = vpop.f32.mrb[9].mxu0  ;;  %6315 = vmatprep.subr.bf16.mxu1 %v10079_v2  ;;  %v10125_v48 = vld [vmem:[%s11879_s14 + $0xe3c] ss:$292 sps:$4 sm:$0xff]  }
 0x25c   : > { %v5883_v51 = vadd.f32 %v5882_v50, %v12182_v29  ;;  %v5884_v52 = vpop.f32.mrb[10].mxu0  ;;  %6275 = vmatpush1.bf16.msra.mxu0 %v10020_v43  ;;  %v5921_v10 = vpop.f32.mrb[8].mxu1  ;;  %v10119_v43 = vld [vmem:[%s11879_s14 + $0xbf4] ss:$292 sps:$4 sm:$0xff]  }
 0x25d   : > { %v7206_v55 = vmax.f32 %v5881_v49, 0.0  ;;  %v5885_v56 = vpop.f32.mrb[11].mxu0  ;;  %9099 = vmatprep.subr.msk.bf16.mxu0 %vm5462_vm1, %v9027_v46  ;;  %v5922_v12 = vadd.f32 %v5921_v10, %v12182_v29  ;;  %v5923_v13 = vpop.f32.mrb[9].mxu1  ;;  %v1582_v46 = vld [vmem:[%s11879_s14 + $0x1750] sm:$0x11] }
 0x25e   : > { %v7207_v58 = vmax.f32 %v5883_v51, 0.0  ;;  %v5924_v15 = vadd.f32 %v5923_v13, %v12182_v29  ;;  %6316 = vmatpush1.bf16.msra.mxu1 %v10077_v6  ;;  %v5925_v16 = vpop.f32.mrb[10].mxu1  ;;  %v10084_v49 = vld [vmem:[%s11879_s14 + $0x1508] ss:$292 sps:$4 sm:$0xff]   ;;  %v9030_v50 = vcombine.low %v1582_v46, %v1582_v46  ;;  %v10123_v51 = vld [vmem:[%s11879_s14 + $0xe38] ss:$292 sps:$4 sm:$0xff]   ;;  %v9031_v52 = vcombine.high %v1582_v46, %v1582_v46 }
 0x25f   : > { %v7208_v17 = vmax.f32 %v5922_v12, 0.0  ;;  %v5926_v18 = vpop.f32.mrb[11].mxu1  ;;  %9101 = vmatprep.subr.msk.bf16.mxu1 %vm5462_vm1, %v9029_v7  ;;  %v10135_v7 = vld [vmem:[%s11879_s14 + $0x12c8] ss:$292 sps:$4 sm:$0xff]   ;;  %v1583_v10 = vld [vmem:[%s11879_s14 + $0x1758] sm:$0x11] }
 0x260   : > { %v9217_v0 = vpack.c.bf16 %v7207_v58, %v7206_v55  ;;  %6277 = vmatpush1.bf16.msra.mxu0 %v5548_v53  ;;  %v7209_v22 = vmax.f32 %v5924_v15, 0.0  ;;  %v10131_v53 = vld [vmem:[%s11879_s14 + $0x1084] ss:$292 sps:$4 sm:$0xff]   ;;  %v9032_v12 = vcombine.low %v1583_v10, %v1583_v10  ;;  %v10141_v13 = vld [vmem:[%s11879_s14 + $0x1510] ss:$292 sps:$4 sm:$0xff]  }
 0x261   : > { %6338 = vmatprep.subr.bf16.mxu0 %v10034_v54  ;;  %v10108_v15 = vld [vmem:[%s11879_s14 + $0x520] ss:$292 sps:$4 sm:$0xff]   ;;  %v10116_v16 = vld [vmem:[%s11879_s14 + $0x76c] ss:$292 sps:$4 sm:$0xff]  }
 0x262   : > { %7568 = vst [vmem:[%s12200_s12 + $0x20] sm:$0xff] %v9217_v0  ;;  %v9218_v25 = vpack.c.bf16 %v7209_v22, %v7208_v17  ;;  %6318 = vmatpush1.bf16.msra.mxu1 %v5554_v19  ;;  %v10138_v46 = vld [vmem:[%s11879_s14 + $0x1088] ss:$292 sps:$4 sm:$0xff]  }
 0x263   : > { %6289 = vmatmul.mubr.bf16.vlgmr.msra.gmra.mrb[28].mxu0 %v11924_v40  ;;  %6379 = vmatprep.subr.bf16.mxu1 %v10091_v14  ;;  %v9033_v14 = vcombine.high %v1583_v10, %v1583_v10 }
 0x264   : > { %6339 = vmatpush1.bf16.msra.mxu0 %v10032_v59  ;;  %9104 = vmatprep.mubr.msk.bf16.mxu0 %vm5458_vm0, %v11873_v61  ;;  %7569 = vst [vmem:[%s12200_s12 + $0x28] sm:$0xff] %v9218_v25  ;;  %v5560_v59 = vsel %vm5462_vm1, %v9030_v50, 0  ;;  %v10144_v50 = vld [vmem:[%s11879_s14 + $0x12d0] ss:$292 sps:$4 sm:$0xff]  }
 0x265   : > { %6340 = vmatprep.subr.bf16.mxu0 %v10040_v62  ;;  %6330 = vmatmul.mubr.bf16.vlgmr.msra.gmra.mrb[28].mxu1 %v11924_v40 }
 0x266   : > { %6380 = vmatpush1.bf16.msra.mxu1 %v10089_v23  ;;  %9106 = vmatprep.mubr.msk.bf16.mxu1 %vm5458_vm0, %v11873_v61 }
 0x267   : > { %6381 = vmatprep.subr.bf16.mxu1 %v10095_v24 }
 0x268   : > { %6341 = vmatpush1.bf16.msra.mxu0 %v10038_v3  ;;  %v10096_v3 = vld [vmem:[%s11879_s14 + $0x90] ss:$292 sps:$4 sm:$0xff]  }
 0x269   : > { %6342 = vmatprep.subr.bf16.mxu0 %v10046_v5  ;;  %v10104_v5 = vld [vmem:[%s11879_s14 + $0x2dc] ss:$292 sps:$4 sm:$0xff]  }
 0x26a   : > { %6382 = vmatpush1.bf16.msra.mxu1 %v10093_v28 }
 0x26b   : > { %6383 = vmatprep.subr.bf16.mxu1 %v10101_v30  ;;  %v10153_v30 = vld [vmem:[%s11879_s14 + $0x98] ss:$292 sps:$4 sm:$0xff]  }
 0x26c   : > { %6343 = vmatpush1.bf16.msra.mxu0 %v10044_v9  ;;  %v10102_v9 = vld [vmem:[%s11879_s14 + $0x2d8] ss:$292 sps:$4 sm:$0xff]  }
 0x26d   : > { %6344 = vmatprep.subr.bf16.mxu0 %v10052_v11  ;;  %v10110_v11 = vld [vmem:[%s11879_s14 + $0x524] ss:$292 sps:$4 sm:$0xff]  }
 0x26e   : > { %6384 = vmatpush1.bf16.msra.mxu1 %v10099_v33  ;;  %v10120_v33 = vld [vmem:[%s11879_s14 + $0x9b0] ss:$292 sps:$4 sm:$0xff]  }
 0x26f   : > { %6385 = vmatprep.subr.bf16.mxu1 %v10107_v34  ;;  %v10128_v34 = vld [vmem:[%s11879_s14 + $0xbfc] ss:$292 sps:$4 sm:$0xff]  }
 0x270   : > { %6345 = vmatpush1.bf16.msra.mxu0 %v10050_v20  ;;  %v5566_v20 = vsel %vm5462_vm1, %v9032_v12, 0  ;;  %v10168_v12 = vld [vmem:[%s11879_s14 + $0x2ec] ss:$292 sps:$4 sm:$0xff]  }
 0x271   : > { %6346 = vmatprep.subr.bf16.mxu0 %v10058_v21  ;;  %v10155_v21 = vld [vmem:[%s11879_s14 + $0x9c] ss:$292 sps:$4 sm:$0xff]  }
 0x272   : > { %6386 = vmatpush1.bf16.msra.mxu1 %v10105_v37  ;;  %v10126_v37 = vld [vmem:[%s11879_s14 + $0xbf8] ss:$292 sps:$4 sm:$0xff]  }
 0x273   : > { %6387 = vmatprep.subr.bf16.mxu1 %v10113_v38  ;;  %v10134_v38 = vld [vmem:[%s11879_s14 + $0xe44] ss:$292 sps:$4 sm:$0xff]  }
 0x274   : > { %6347 = vmatpush1.bf16.msra.mxu0 %v10056_v26  ;;  %v10114_v26 = vld [vmem:[%s11879_s14 + $0x768] ss:$292 sps:$4 sm:$0xff]  }
 0x275   : > { %6348 = vmatprep.subr.bf16.mxu0 %v10064_v27  ;;  %v10122_v27 = vld [vmem:[%s11879_s14 + $0x9b4] ss:$292 sps:$4 sm:$0xff]  }
 0x276   : > { %6388 = vmatpush1.bf16.msra.mxu1 %v10111_v42  ;;  %v10132_v42 = vld [vmem:[%s11879_s14 + $0xe40] ss:$292 sps:$4 sm:$0xff]  }
 0x277   : > { %6389 = vmatprep.subr.bf16.mxu1 %v10119_v43  ;;  %v10140_v43 = vld [vmem:[%s11879_s14 + $0x108c] ss:$292 sps:$4 sm:$0xff]  }
 0x278   : > { %6349 = vmatpush1.bf16.msra.mxu0 %v10062_v31  ;;  %v10159_v31 = vld [vmem:[%s11879_s14 + $0x2e4] ss:$292 sps:$4 sm:$0xff]  }
 0x279   : > { %6350 = vmatprep.subr.bf16.mxu0 %v10070_v32 }
 0x27a   : > { %6390 = vmatpush1.bf16.msra.mxu1 %v10117_v47  ;;  %v10146_v47 = vld [vmem:[%s11879_s14 + $0x12d4] ss:$292 sps:$4 sm:$0xff]  }
 0x27b   : > { %6391 = vmatprep.subr.bf16.mxu1 %v10125_v48  ;;  %v10175_v48 = vld [vmem:[%s11879_s14 + $0x9b8] ss:$292 sps:$4 sm:$0xff]  }
 0x27c   : > { %6351 = vmatpush1.bf16.msra.mxu0 %v10068_v35  ;;  %v10157_v35 = vld [vmem:[%s11879_s14 + $0x2e0] ss:$292 sps:$4 sm:$0xff]  }
 0x27d   : > { %6352 = vmatprep.subr.bf16.mxu0 %v10076_v36  ;;  %v10165_v36 = vld [vmem:[%s11879_s14 + $0x52c] ss:$292 sps:$4 sm:$0xff]  }
 0x27e   : > { %6392 = vmatpush1.bf16.msra.mxu1 %v10123_v51  ;;  %v10150_v51 = vld [vmem:[%s11879_s14 + $0x151c] ss:$292 sps:$4 sm:$0xff]  }
 0x27f   : > { %6393 = vmatprep.subr.bf16.mxu1 %v10131_v53  ;;  %v10181_v53 = vld [vmem:[%s11879_s14 + $0xc00] ss:$292 sps:$4 sm:$0xff]  }
 0x280   : > { %6353 = vmatpush1.bf16.msra.mxu0 %v10074_v39  ;;  %v10163_v39 = vld [vmem:[%s11879_s14 + $0x528] ss:$292 sps:$4 sm:$0xff]  }
 0x281   : > { %6354 = vmatprep.subr.bf16.mxu0 %v10082_v41  ;;  %v10171_v41 = vld [vmem:[%s11879_s14 + $0x774] ss:$292 sps:$4 sm:$0xff]  }
 0x282   : > { %6394 = vmatpush1.bf16.msra.mxu1 %v10129_v1 }
 0x283   : > { %6395 = vmatprep.subr.bf16.mxu1 %v10137_v4 }
 0x284   : > { %6355 = vmatpush1.bf16.msra.mxu0 %v10080_v44  ;;  %v10169_v44 = vld [vmem:[%s11879_s14 + $0x770] ss:$292 sps:$4 sm:$0xff]  }
 0x285   : > { %6356 = vmatprep.subr.bf16.mxu0 %v10086_v45  ;;  %v10177_v45 = vld [vmem:[%s11879_s14 + $0x9bc] ss:$292 sps:$4 sm:$0xff]  }
 0x286   : > { %v5962_v54 = vpop.f32.mrb[12].mxu0  ;;  %6396 = vmatpush1.bf16.msra.mxu1 %v10135_v7 }
 0x287   : > { %v5963_v55 = vadd.f32 %v5962_v54, %v12182_v29  ;;  %v5964_v56 = vpop.f32.mrb[13].mxu0  ;;  %6397 = vmatprep.subr.bf16.mxu1 %v10143_v8  ;;  %v10189_v54 = vld [vmem:[%s11879_s14 + $0xe4c] ss:$292 sps:$4 sm:$0xff]  }
 0x288   : > { %v5965_v57 = vadd.f32 %v5964_v56, %v12182_v29  ;;  %v5966_v58 = vpop.f32.mrb[14].mxu0  ;;  %6357 = vmatpush1.bf16.msra.mxu0 %v10084_v49  ;;  %v6003_v17 = vpop.f32.mrb[12].mxu1  ;;  %v10183_v49 = vld [vmem:[%s11879_s14 + $0xc04] ss:$292 sps:$4 sm:$0xff]   ;;  %v10193_v8 = vld [vmem:[%s11879_s14 + $0x1090] ss:$292 sps:$4 sm:$0xff]  }
 0x289   : > { %v7210_v62 = vmax.f32 %v5963_v55, 0.0  ;;  %v5967_v0 = vpop.f32.mrb[15].mxu0  ;;  %9103 = vmatprep.subr.msk.bf16.mxu0 %vm5462_vm1, %v9031_v52  ;;  %v6004_v18 = vadd.f32 %v6003_v17, %v12182_v29  ;;  %v6005_v19 = vpop.f32.mrb[13].mxu1  ;;  %v1584_v52 = vld [vmem:[%s11879_s14 + $0x1760] sm:$0x11] }
 0x28a   : > { %v7211_v2 = vmax.f32 %v5965_v57, 0.0  ;;  %v6006_v22 = vadd.f32 %v6005_v19, %v12182_v29  ;;  %6398 = vmatpush1.bf16.msra.mxu1 %v10141_v13  ;;  %v6007_v23 = vpop.f32.mrb[14].mxu1  ;;  %v10148_v55 = vld [vmem:[%s11879_s14 + $0x1518] ss:$292 sps:$4 sm:$0xff]   ;;  %v9035_v56 = vcombine.high %v1584_v52, %v1584_v52  ;;  %v9034_v57 = vcombine.low %v1584_v52, %v1584_v52 }
 0x28b   : > { %v7212_v24 = vmax.f32 %v6004_v18, 0.0  ;;  %v6008_v25 = vpop.f32.mrb[15].mxu1  ;;  %9105 = vmatprep.subr.msk.bf16.mxu1 %vm5462_vm1, %v9033_v14  ;;  %v10195_v0 = vld [vmem:[%s11879_s14 + $0x1094] ss:$292 sps:$4 sm:$0xff]   ;;  %v10207_v14 = vld [vmem:[%s11879_s14 + $0x1524] ss:$292 sps:$4 sm:$0xff]  }
 0x28c   : > { %v9219_v6 = vpack.c.bf16 %v7211_v2, %v7210_v62  ;;  %6359 = vmatpush1.bf16.msra.mxu0 %v5560_v59  ;;  %v7213_v28 = vmax.f32 %v6006_v22, 0.0  ;;  %v10187_v59 = vld [vmem:[%s11879_s14 + $0xe48] ss:$292 sps:$4 sm:$0xff]   ;;  %v10199_v13 = vld [vmem:[%s11879_s14 + $0x12d8] ss:$292 sps:$4 sm:$0xff]  }
 0x28d   : > { %6420 = vmatprep.subr.bf16.mxu0 %v10098_v60  ;;  %v10174_v17 = vld [vmem:[%s11879_s14 + $0x534] ss:$292 sps:$4 sm:$0xff]   ;;  %v10205_v18 = vld [vmem:[%s11879_s14 + $0x1520] ss:$292 sps:$4 sm:$0xff]  }
 0x28e   : > { %7570 = vst [vmem:[%s12200_s12 + $0x30] sm:$0xff] %v9219_v6  ;;  %v9220_v32 = vpack.c.bf16 %v7213_v28, %v7212_v24  ;;  %6400 = vmatpush1.bf16.msra.mxu1 %v5566_v20  ;;  %v10162_v6 = vld [vmem:[%s11879_s14 + $0xa4] ss:$292 sps:$4 sm:$0xff]   ;;  %v10180_v23 = vld [vmem:[%s11879_s14 + $0x77c] ss:$292 sps:$4 sm:$0xff]  }
 0x28f   : > { %6371 = vmatmul.mubr.bf16.vlgmr.msra.gmra.mrb[32].mxu0 %v11924_v40  ;;  %6461 = vmatprep.subr.bf16.mxu1 %v10155_v21  ;;  %v10172_v21 = vld [vmem:[%s11879_s14 + $0x530] ss:$292 sps:$4 sm:$0xff]   ;;  %v10202_v52 = vld [vmem:[%s11879_s14 + $0x1098] ss:$292 sps:$4 sm:$0xff]  }
 0x290   : > { %6421 = vmatpush1.bf16.msra.mxu0 %v10096_v3  ;;  %9108 = vmatprep.mubr.msk.bf16.mxu0 %vm5458_vm0, %v11873_v61  ;;  %7571 = vst [vmem:[%s12200_s12 + $0x38] sm:$0xff] %v9220_v32  ;;  %v10219_v32 = vld [vmem:[%s11879_s14 + $0xac] ss:$292 sps:$4 sm:$0xff]  }
 0x291   : > { %6422 = vmatprep.subr.bf16.mxu0 %v10104_v5  ;;  %6412 = vmatmul.mubr.bf16.vlgmr.msra.gmra.mrb[32].mxu1 %v11924_v40  ;;  %v5572_v5 = vsel %vm5462_vm1, %v9034_v57, 0  ;;  %v10214_v57 = vld [vmem:[%s11879_s14 + $0x152c] ss:$292 sps:$4 sm:$0xff]  }
 0x292   : > { %6462 = vmatpush1.bf16.msra.mxu1 %v10153_v30  ;;  %9110 = vmatprep.mubr.msk.bf16.mxu1 %vm5458_vm0, %v11873_v61 }
 0x293   : > { %6463 = vmatprep.subr.bf16.mxu1 %v10159_v31 }
 0x294   : > { %6423 = vmatpush1.bf16.msra.mxu0 %v10102_v9  ;;  %v10201_v9 = vld [vmem:[%s11879_s14 + $0x12dc] ss:$292 sps:$4 sm:$0xff]  }
 0x295   : > { %6424 = vmatprep.subr.bf16.mxu0 %v10110_v11  ;;  %v10160_v11 = vld [vmem:[%s11879_s14 + $0xa0] ss:$292 sps:$4 sm:$0xff]  }
 0x296   : > { %6464 = vmatpush1.bf16.msra.mxu1 %v10157_v35  ;;  %v10186_v35 = vld [vmem:[%s11879_s14 + $0x9c4] ss:$292 sps:$4 sm:$0xff]  }
 0x297   : > { %6465 = vmatprep.subr.bf16.mxu1 %v10165_v36 }
 0x298   : > { %6425 = vmatpush1.bf16.msra.mxu0 %v10108_v15  ;;  %v10166_v15 = vld [vmem:[%s11879_s14 + $0x2e8] ss:$292 sps:$4 sm:$0xff]  }
 0x299   : > { %6426 = vmatprep.subr.bf16.mxu0 %v10116_v16  ;;  %v1585_v16 = vld [vmem:[%s11879_s14 + $0x1768] sm:$0x11] }
 0x29a   : > { %6466 = vmatpush1.bf16.msra.mxu1 %v10163_v39  ;;  %v9037_v19 = vcombine.high %v1585_v16, %v1585_v16  ;;  %v9036_v20 = vcombine.low %v1585_v16, %v1585_v16  ;;  %v10184_v39 = vld [vmem:[%s11879_s14 + $0x9c0] ss:$292 sps:$4 sm:$0xff]  }
 0x29b   : > { %6467 = vmatprep.subr.bf16.mxu1 %v10171_v41  ;;  %v10192_v41 = vld [vmem:[%s11879_s14 + $0xc0c] ss:$292 sps:$4 sm:$0xff]  }
 0x29c   : > { %6427 = vmatpush1.bf16.msra.mxu0 %v10114_v26  ;;  %v5578_v31 = vsel %vm5462_vm1, %v9036_v20, 0  ;;  %v10271_v20 = vld [vmem:[%s11879_s14 + $0x1534] ss:$292 sps:$4 sm:$0xff]  }
 0x29d   : > { %6428 = vmatprep.subr.bf16.mxu0 %v10122_v27 }
 0x29e   : > { %6468 = vmatpush1.bf16.msra.mxu1 %v10169_v44  ;;  %v10190_v44 = vld [vmem:[%s11879_s14 + $0xc08] ss:$292 sps:$4 sm:$0xff]  }
 0x29f   : > { %6469 = vmatprep.subr.bf16.mxu1 %v10177_v45  ;;  %v10198_v45 = vld [vmem:[%s11879_s14 + $0xe54] ss:$292 sps:$4 sm:$0xff]  }
 0x2a0   : > { %6429 = vmatpush1.bf16.msra.mxu0 %v10120_v33  ;;  %v10178_v33 = vld [vmem:[%s11879_s14 + $0x778] ss:$292 sps:$4 sm:$0xff]  }
 0x2a1   : > { %6430 = vmatprep.subr.bf16.mxu0 %v10128_v34 }
 0x2a2   : > { %6470 = vmatpush1.bf16.msra.mxu1 %v10175_v48  ;;  %v10196_v48 = vld [vmem:[%s11879_s14 + $0xe50] ss:$292 sps:$4 sm:$0xff]  }
 0x2a3   : > { %6471 = vmatprep.subr.bf16.mxu1 %v10183_v49  ;;  %v10204_v49 = vld [vmem:[%s11879_s14 + $0x109c] ss:$292 sps:$4 sm:$0xff]  }
 0x2a4   : > { %6431 = vmatpush1.bf16.msra.mxu0 %v10126_v37  ;;  %v10217_v37 = vld [vmem:[%s11879_s14 + $0xa8] ss:$292 sps:$4 sm:$0xff]  }
 0x2a5   : > { %6432 = vmatprep.subr.bf16.mxu0 %v10134_v38  ;;  %v10223_v38 = vld [vmem:[%s11879_s14 + $0x2f4] ss:$292 sps:$4 sm:$0xff]  }
 0x2a6   : > { %6472 = vmatpush1.bf16.msra.mxu1 %v10181_v53  ;;  %v10210_v53 = vld [vmem:[%s11879_s14 + $0x12e4] ss:$292 sps:$4 sm:$0xff]  }
 0x2a7   : > { %6473 = vmatprep.subr.bf16.mxu1 %v10189_v54  ;;  %v10239_v54 = vld [vmem:[%s11879_s14 + $0x9c8] ss:$292 sps:$4 sm:$0xff]  }
 0x2a8   : > { %6433 = vmatpush1.bf16.msra.mxu0 %v10132_v42  ;;  %v10221_v42 = vld [vmem:[%s11879_s14 + $0x2f0] ss:$292 sps:$4 sm:$0xff]  }
 0x2a9   : > { %6434 = vmatprep.subr.bf16.mxu0 %v10140_v43  ;;  %v10229_v43 = vld [vmem:[%s11879_s14 + $0x53c] ss:$292 sps:$4 sm:$0xff]  }
 0x2aa   : > { %6474 = vmatpush1.bf16.msra.mxu1 %v10187_v59  ;;  %v10245_v59 = vld [vmem:[%s11879_s14 + $0xc10] ss:$292 sps:$4 sm:$0xff]  }
 0x2ab   : > { %6475 = vmatprep.subr.bf16.mxu1 %v10195_v0 }
 0x2ac   : > { %6435 = vmatpush1.bf16.msra.mxu0 %v10138_v46  ;;  %v10227_v46 = vld [vmem:[%s11879_s14 + $0x538] ss:$292 sps:$4 sm:$0xff]  }
 0x2ad   : > { %6436 = vmatprep.subr.bf16.mxu0 %v10146_v47  ;;  %v10235_v47 = vld [vmem:[%s11879_s14 + $0x784] ss:$292 sps:$4 sm:$0xff]  }
 0x2ae   : > { %6476 = vmatpush1.bf16.msra.mxu1 %v10193_v8 }
 0x2af   : > { %6477 = vmatprep.subr.bf16.mxu1 %v10201_v9 }
 0x2b0   : > { %6437 = vmatpush1.bf16.msra.mxu0 %v10144_v50  ;;  %v10233_v50 = vld [vmem:[%s11879_s14 + $0x780] ss:$292 sps:$4 sm:$0xff]  }
 0x2b1   : > { %6438 = vmatprep.subr.bf16.mxu0 %v10150_v51  ;;  %v10241_v51 = vld [vmem:[%s11879_s14 + $0x9cc] ss:$292 sps:$4 sm:$0xff]  }
 0x2b2   : > { %v6044_v58 = vpop.f32.mrb[16].mxu0  ;;  %6478 = vmatpush1.bf16.msra.mxu1 %v10199_v13 }
 0x2b3   : > { %v6045_v60 = vadd.f32 %v6044_v58, %v12182_v29  ;;  %v6046_v62 = vpop.f32.mrb[17].mxu0  ;;  %6479 = vmatprep.subr.bf16.mxu1 %v10207_v14  ;;  %v1586_v58 = vld [vmem:[%s11879_s14 + $0x1770] sm:$0x11]  ;;  %v10257_v14 = vld [vmem:[%s11879_s14 + $0x10a0] ss:$292 sps:$4 sm:$0xff]  }
 0x2b4   : > { %v6047_v1 = vadd.f32 %v6046_v62, %v12182_v29  ;;  %v6048_v2 = vpop.f32.mrb[18].mxu0  ;;  %6439 = vmatpush1.bf16.msra.mxu0 %v10148_v55  ;;  %v6085_v22 = vpop.f32.mrb[16].mxu1  ;;  %v10247_v55 = vld [vmem:[%s11879_s14 + $0xc14] ss:$292 sps:$4 sm:$0xff]   ;;  %v10212_v62 = vld [vmem:[%s11879_s14 + $0x1528] ss:$292 sps:$4 sm:$0xff]   ;;  %v9039_v0 = vcombine.high %v1586_v58, %v1586_v58 }
 0x2b5   : > { %v7214_v3 = vmax.f32 %v6045_v60, 0.0  ;;  %v6049_v4 = vpop.f32.mrb[19].mxu0  ;;  %9107 = vmatprep.subr.msk.bf16.mxu0 %vm5462_vm1, %v9035_v56  ;;  %v6086_v24 = vadd.f32 %v6085_v22, %v12182_v29  ;;  %v6087_v25 = vpop.f32.mrb[17].mxu1  ;;  %v10208_v56 = vld [vmem:[%s11879_s14 + $0x12e0] ss:$292 sps:$4 sm:$0xff]  }
 0x2b6   : > { %v7215_v7 = vmax.f32 %v6047_v1, 0.0  ;;  %v6088_v26 = vadd.f32 %v6087_v25, %v12182_v29  ;;  %6480 = vmatpush1.bf16.msra.mxu1 %v10205_v18  ;;  %v6089_v27 = vpop.f32.mrb[18].mxu1  ;;  %v10253_v60 = vld [vmem:[%s11879_s14 + $0xe5c] ss:$292 sps:$4 sm:$0xff]   ;;  %v9038_v1 = vcombine.low %v1586_v58, %v1586_v58  ;;  %v10266_v58 = vld [vmem:[%s11879_s14 + $0x10a8] ss:$292 sps:$4 sm:$0xff]  }
 0x2b7   : > { %v7216_v28 = vmax.f32 %v6086_v24, 0.0  ;;  %v6090_v30 = vpop.f32.mrb[19].mxu1  ;;  %9109 = vmatprep.subr.msk.bf16.mxu1 %vm5462_vm1, %v9037_v19  ;;  %v10232_v18 = vld [vmem:[%s11879_s14 + $0x2fc] ss:$292 sps:$4 sm:$0xff]   ;;  %v10263_v19 = vld [vmem:[%s11879_s14 + $0x12e8] ss:$292 sps:$4 sm:$0xff]  }
 0x2b8   : > { %v9221_v10 = vpack.c.bf16 %v7215_v7, %v7214_v3  ;;  %6441 = vmatpush1.bf16.msra.mxu0 %v5572_v5  ;;  %v7217_v34 = vmax.f32 %v6088_v26, 0.0  ;;  %v10251_v3 = vld [vmem:[%s11879_s14 + $0xe58] ss:$292 sps:$4 sm:$0xff]   ;;  %v10269_v24 = vld [vmem:[%s11879_s14 + $0x1530] ss:$292 sps:$4 sm:$0xff]  }
 0x2b9   : > { %6502 = vmatprep.subr.bf16.mxu0 %v10162_v6  ;;  %v10259_v6 = vld [vmem:[%s11879_s14 + $0x10a4] ss:$292 sps:$4 sm:$0xff]   ;;  %v1587_v22 = vld [vmem:[%s11879_s14 + $0x1778] sm:$0x11]  ;;  %v10244_v30 = vld [vmem:[%s11879_s14 + $0x78c] ss:$292 sps:$4 sm:$0xff]  }
 0x2ba   : > { %7572 = vst [vmem:[%s12200_s12 + $0x40] sm:$0xff] %v9221_v10  ;;  %v9222_v36 = vpack.c.bf16 %v7217_v34, %v7216_v28  ;;  %6482 = vmatpush1.bf16.msra.mxu1 %v5578_v31  ;;  %v9041_v25 = vcombine.high %v1587_v22, %v1587_v22  ;;  %v9040_v26 = vcombine.low %v1587_v22, %v1587_v22  ;;  %v10236_v27 = vld [vmem:[%s11879_s14 + $0x540] ss:$292 sps:$4 sm:$0xff]  }
 0x2bb   : > { %6453 = vmatmul.mubr.bf16.vlgmr.msra.gmra.mrb[36].mxu0 %v11924_v40  ;;  %6543 = vmatprep.subr.bf16.mxu1 %v10219_v32 }
 0x2bc   : > { %6503 = vmatpush1.bf16.msra.mxu0 %v10160_v11  ;;  %9112 = vmatprep.mubr.msk.bf16.mxu0 %vm5458_vm0, %v11873_v61  ;;  %7573 = vst [vmem:[%s12200_s12 + $0x48] sm:$0xff] %v9222_v36  ;;  %v5584_v11 = vsel %vm5462_vm1, %v9038_v1, 0  ;;  %v10278_v1 = vld [vmem:[%s11879_s14 + $0x153c] ss:$292 sps:$4 sm:$0xff]  }
 0x2bd   : > { %6504 = vmatprep.subr.bf16.mxu0 %v10168_v12  ;;  %6494 = vmatmul.mubr.bf16.vlgmr.msra.gmra.mrb[36].mxu1 %v11924_v40  ;;  %v10226_v12 = vld [vmem:[%s11879_s14 + $0xb4] ss:$292 sps:$4 sm:$0xff]  }
 0x2be   : > { %6544 = vmatpush1.bf16.msra.mxu1 %v10217_v37  ;;  %9114 = vmatprep.mubr.msk.bf16.mxu1 %vm5458_vm0, %v11873_v61  ;;  %v5590_v37 = vsel %vm5462_vm1, %v9040_v26, 0  ;;  %v10335_v26 = vld [vmem:[%s11879_s14 + $0x1544] ss:$292 sps:$4 sm:$0xff]  }
 0x2bf   : > { %6545 = vmatprep.subr.bf16.mxu1 %v10223_v38  ;;  %v10283_v38 = vld [vmem:[%s11879_s14 + $0xbc] ss:$292 sps:$4 sm:$0xff]  }
 0x2c0   : > { %6505 = vmatpush1.bf16.msra.mxu0 %v10166_v15  ;;  %v10265_v15 = vld [vmem:[%s11879_s14 + $0x12ec] ss:$292 sps:$4 sm:$0xff]  }
 0x2c1   : > { %6506 = vmatprep.subr.bf16.mxu0 %v10174_v17  ;;  %v10224_v17 = vld [vmem:[%s11879_s14 + $0xb0] ss:$292 sps:$4 sm:$0xff]  }
 0x2c2   : > { %6546 = vmatpush1.bf16.msra.mxu1 %v10221_v42  ;;  %v10250_v42 = vld [vmem:[%s11879_s14 + $0x9d4] ss:$292 sps:$4 sm:$0xff]  }
 0x2c3   : > { %6547 = vmatprep.subr.bf16.mxu1 %v10229_v43 }
 0x2c4   : > { %6507 = vmatpush1.bf16.msra.mxu0 %v10172_v21  ;;  %v10230_v21 = vld [vmem:[%s11879_s14 + $0x2f8] ss:$292 sps:$4 sm:$0xff]  }
 0x2c5   : > { %6508 = vmatprep.subr.bf16.mxu0 %v10180_v23  ;;  %v10238_v23 = vld [vmem:[%s11879_s14 + $0x544] ss:$292 sps:$4 sm:$0xff]  }
 0x2c6   : > { %6548 = vmatpush1.bf16.msra.mxu1 %v10227_v46  ;;  %v10248_v46 = vld [vmem:[%s11879_s14 + $0x9d0] ss:$292 sps:$4 sm:$0xff]  }
 0x2c7   : > { %6549 = vmatprep.subr.bf16.mxu1 %v10235_v47  ;;  %v10256_v47 = vld [vmem:[%s11879_s14 + $0xc1c] ss:$292 sps:$4 sm:$0xff]  }
 0x2c8   : > { %6509 = vmatpush1.bf16.msra.mxu0 %v10178_v33 }
 0x2c9   : > { %6510 = vmatprep.subr.bf16.mxu0 %v10186_v35 }
 0x2ca   : > { %6550 = vmatpush1.bf16.msra.mxu1 %v10233_v50  ;;  %v10254_v50 = vld [vmem:[%s11879_s14 + $0xc18] ss:$292 sps:$4 sm:$0xff]  }
 0x2cb   : > { %6551 = vmatprep.subr.bf16.mxu1 %v10241_v51  ;;  %v10262_v51 = vld [vmem:[%s11879_s14 + $0xe64] ss:$292 sps:$4 sm:$0xff]  }
 0x2cc   : > { %6511 = vmatpush1.bf16.msra.mxu0 %v10184_v39  ;;  %v10242_v39 = vld [vmem:[%s11879_s14 + $0x788] ss:$292 sps:$4 sm:$0xff]  }
 0x2cd   : > { %6512 = vmatprep.subr.bf16.mxu0 %v10192_v41 }
 0x2ce   : > { %6552 = vmatpush1.bf16.msra.mxu1 %v10239_v54  ;;  %v10260_v54 = vld [vmem:[%s11879_s14 + $0xe60] ss:$292 sps:$4 sm:$0xff]  }
 0x2cf   : > { %6553 = vmatprep.subr.bf16.mxu1 %v10247_v55  ;;  %v10268_v55 = vld [vmem:[%s11879_s14 + $0x10ac] ss:$292 sps:$4 sm:$0xff]  }
 0x2d0   : > { %6513 = vmatpush1.bf16.msra.mxu0 %v10190_v44  ;;  %v10281_v44 = vld [vmem:[%s11879_s14 + $0xb8] ss:$292 sps:$4 sm:$0xff]  }
 0x2d1   : > { %6514 = vmatprep.subr.bf16.mxu0 %v10198_v45  ;;  %v10287_v45 = vld [vmem:[%s11879_s14 + $0x304] ss:$292 sps:$4 sm:$0xff]  }
 0x2d2   : > { %6554 = vmatpush1.bf16.msra.mxu1 %v10245_v59  ;;  %v10274_v59 = vld [vmem:[%s11879_s14 + $0x12f4] ss:$292 sps:$4 sm:$0xff]  }
 0x2d3   : > { %6555 = vmatprep.subr.bf16.mxu1 %v10253_v60  ;;  %v10303_v60 = vld [vmem:[%s11879_s14 + $0x9d8] ss:$292 sps:$4 sm:$0xff]  }
 0x2d4   : > { %6515 = vmatpush1.bf16.msra.mxu0 %v10196_v48  ;;  %v10285_v48 = vld [vmem:[%s11879_s14 + $0x300] ss:$292 sps:$4 sm:$0xff]  }
 0x2d5   : > { %6516 = vmatprep.subr.bf16.mxu0 %v10204_v49  ;;  %v10293_v49 = vld [vmem:[%s11879_s14 + $0x54c] ss:$292 sps:$4 sm:$0xff]  }
 0x2d6   : > { %6556 = vmatpush1.bf16.msra.mxu1 %v10251_v3  ;;  %v10309_v3 = vld [vmem:[%s11879_s14 + $0xc20] ss:$292 sps:$4 sm:$0xff]  }
 0x2d7   : > { %6557 = vmatprep.subr.bf16.mxu1 %v10259_v6 }
 0x2d8   : > { %6517 = vmatpush1.bf16.msra.mxu0 %v10202_v52  ;;  %v10291_v52 = vld [vmem:[%s11879_s14 + $0x548] ss:$292 sps:$4 sm:$0xff]  }
 0x2d9   : > { %6518 = vmatprep.subr.bf16.mxu0 %v10210_v53  ;;  %v10299_v53 = vld [vmem:[%s11879_s14 + $0x794] ss:$292 sps:$4 sm:$0xff]  }
 0x2da   : > { %6558 = vmatpush1.bf16.msra.mxu1 %v10257_v14 }
 0x2db   : > { %6559 = vmatprep.subr.bf16.mxu1 %v10265_v15 }
 0x2dc   : > { %6519 = vmatpush1.bf16.msra.mxu0 %v10208_v56  ;;  %v10297_v56 = vld [vmem:[%s11879_s14 + $0x790] ss:$292 sps:$4 sm:$0xff]  }
 0x2dd   : > { %6520 = vmatprep.subr.bf16.mxu0 %v10214_v57  ;;  %v10305_v57 = vld [vmem:[%s11879_s14 + $0x9dc] ss:$292 sps:$4 sm:$0xff]  }
 0x2de   : > { %v6126_v2 = vpop.f32.mrb[20].mxu0  ;;  %6560 = vmatpush1.bf16.msra.mxu1 %v10263_v19 }
 0x2df   : > { %v6127_v4 = vadd.f32 %v6126_v2, %v12182_v29  ;;  %v6128_v5 = vpop.f32.mrb[21].mxu0  ;;  %6561 = vmatprep.subr.bf16.mxu1 %v10271_v20  ;;  %v1588_v2 = vld [vmem:[%s11879_s14 + $0x1780] sm:$0x11]  ;;  %v10321_v20 = vld [vmem:[%s11879_s14 + $0x10b0] ss:$292 sps:$4 sm:$0xff]  }
 0x2e0   : > { %v6129_v7 = vadd.f32 %v6128_v5, %v12182_v29  ;;  %v6130_v8 = vpop.f32.mrb[22].mxu0  ;;  %6521 = vmatpush1.bf16.msra.mxu0 %v10212_v62  ;;  %v6167_v28 = vpop.f32.mrb[20].mxu1  ;;  %v10311_v62 = vld [vmem:[%s11879_s14 + $0xc24] ss:$292 sps:$4 sm:$0xff]   ;;  %v10276_v5 = vld [vmem:[%s11879_s14 + $0x1538] ss:$292 sps:$4 sm:$0xff]   ;;  %v9043_v6 = vcombine.high %v1588_v2, %v1588_v2 }
 0x2e1   : > { %v7218_v9 = vmax.f32 %v6127_v4, 0.0  ;;  %v6131_v10 = vpop.f32.mrb[23].mxu0  ;;  %9111 = vmatprep.subr.msk.bf16.mxu0 %vm5462_vm1, %v9039_v0  ;;  %v6168_v31 = vadd.f32 %v6167_v28, %v12182_v29  ;;  %v6169_v32 = vpop.f32.mrb[21].mxu1  ;;  %v10272_v0 = vld [vmem:[%s11879_s14 + $0x12f0] ss:$292 sps:$4 sm:$0xff]  }
 0x2e2   : > { %v7219_v13 = vmax.f32 %v6129_v7, 0.0  ;;  %v6170_v33 = vadd.f32 %v6169_v32, %v12182_v29  ;;  %6562 = vmatpush1.bf16.msra.mxu1 %v10269_v24  ;;  %v6171_v34 = vpop.f32.mrb[22].mxu1  ;;  %v10317_v4 = vld [vmem:[%s11879_s14 + $0xe6c] ss:$292 sps:$4 sm:$0xff]   ;;  %v9042_v7 = vcombine.low %v1588_v2, %v1588_v2  ;;  %v10330_v2 = vld [vmem:[%s11879_s14 + $0x10b8] ss:$292 sps:$4 sm:$0xff]  }
 0x2e3   : > { %v7220_v35 = vmax.f32 %v6168_v31, 0.0  ;;  %v6172_v36 = vpop.f32.mrb[23].mxu1  ;;  %9113 = vmatprep.subr.msk.bf16.mxu1 %vm5462_vm1, %v9041_v25  ;;  %v10296_v24 = vld [vmem:[%s11879_s14 + $0x30c] ss:$292 sps:$4 sm:$0xff]   ;;  %v10327_v25 = vld [vmem:[%s11879_s14 + $0x12f8] ss:$292 sps:$4 sm:$0xff]  }
 0x2e4   : > { %v9223_v16 = vpack.c.bf16 %v7219_v13, %v7218_v9  ;;  %6523 = vmatpush1.bf16.msra.mxu0 %v5584_v11  ;;  %v7221_v41 = vmax.f32 %v6170_v33, 0.0  ;;  %v10315_v9 = vld [vmem:[%s11879_s14 + $0xe68] ss:$292 sps:$4 sm:$0xff]   ;;  %v10333_v31 = vld [vmem:[%s11879_s14 + $0x1540] ss:$292 sps:$4 sm:$0xff]  }
 0x2e5   : > { %6584 = vmatprep.subr.bf16.mxu0 %v10226_v12  ;;  %v10323_v12 = vld [vmem:[%s11879_s14 + $0x10b4] ss:$292 sps:$4 sm:$0xff]   ;;  %v1589_v28 = vld [vmem:[%s11879_s14 + $0x1788] sm:$0x11]  ;;  %v10308_v36 = vld [vmem:[%s11879_s14 + $0x79c] ss:$292 sps:$4 sm:$0xff]  }
 0x2e6   : > { %7574 = vst [vmem:[%s12200_s12 + $0x50] sm:$0xff] %v9223_v16  ;;  %v9224_v43 = vpack.c.bf16 %v7221_v41, %v7220_v35  ;;  %6564 = vmatpush1.bf16.msra.mxu1 %v5590_v37  ;;  %v9045_v32 = vcombine.high %v1589_v28, %v1589_v28  ;;  %v9044_v33 = vcombine.low %v1589_v28, %v1589_v28  ;;  %v10300_v34 = vld [vmem:[%s11879_s14 + $0x550] ss:$292 sps:$4 sm:$0xff]  }
 0x2e7   : > { %6535 = vmatmul.mubr.bf16.vlgmr.msra.gmra.mrb[40].mxu0 %v11924_v40  ;;  %6625 = vmatprep.subr.bf16.mxu1 %v10283_v38 }
 0x2e8   : > { %6585 = vmatpush1.bf16.msra.mxu0 %v10224_v17  ;;  %9116 = vmatprep.mubr.msk.bf16.mxu0 %vm5458_vm0, %v11873_v61  ;;  %7575 = vst [vmem:[%s12200_s12 + $0x58] sm:$0xff] %v9224_v43  ;;  %v5596_v17 = vsel %vm5462_vm1, %v9042_v7, 0  ;;  %v10342_v7 = vld [vmem:[%s11879_s14 + $0x154c] ss:$292 sps:$4 sm:$0xff]  }
 0x2e9   : > { %6586 = vmatprep.subr.bf16.mxu0 %v10232_v18  ;;  %6576 = vmatmul.mubr.bf16.vlgmr.msra.gmra.mrb[40].mxu1 %v11924_v40  ;;  %v10290_v18 = vld [vmem:[%s11879_s14 + $0xc4] ss:$292 sps:$4 sm:$0xff]  }
 0x2ea   : > { %6626 = vmatpush1.bf16.msra.mxu1 %v10281_v44  ;;  %9118 = vmatprep.mubr.msk.bf16.mxu1 %vm5458_vm0, %v11873_v61  ;;  %v5602_v44 = vsel %vm5462_vm1, %v9044_v33, 0  ;;  %v10399_v33 = vld [vmem:[%s11879_s14 + $0x1554] ss:$292 sps:$4 sm:$0xff]  }
 0x2eb   : > { %6627 = vmatprep.subr.bf16.mxu1 %v10287_v45  ;;  %v10347_v45 = vld [vmem:[%s11879_s14 + $0xcc] ss:$292 sps:$4 sm:$0xff]  }
 0x2ec   : > { %6587 = vmatpush1.bf16.msra.mxu0 %v10230_v21  ;;  %v10329_v21 = vld [vmem:[%s11879_s14 + $0x12fc] ss:$292 sps:$4 sm:$0xff]  }
 0x2ed   : > { %6588 = vmatprep.subr.bf16.mxu0 %v10238_v23  ;;  %v10288_v23 = vld [vmem:[%s11879_s14 + $0xc0] ss:$292 sps:$4 sm:$0xff]  }
 0x2ee   : > { %6628 = vmatpush1.bf16.msra.mxu1 %v10285_v48  ;;  %v10314_v48 = vld [vmem:[%s11879_s14 + $0x9e4] ss:$292 sps:$4 sm:$0xff]  }
 0x2ef   : > { %6629 = vmatprep.subr.bf16.mxu1 %v10293_v49 }
 0x2f0   : > { %6589 = vmatpush1.bf16.msra.mxu0 %v10236_v27  ;;  %v10294_v27 = vld [vmem:[%s11879_s14 + $0x308] ss:$292 sps:$4 sm:$0xff]  }
 0x2f1   : > { %6590 = vmatprep.subr.bf16.mxu0 %v10244_v30  ;;  %v10302_v30 = vld [vmem:[%s11879_s14 + $0x554] ss:$292 sps:$4 sm:$0xff]  }
 0x2f2   : > { %6630 = vmatpush1.bf16.msra.mxu1 %v10291_v52  ;;  %v10312_v52 = vld [vmem:[%s11879_s14 + $0x9e0] ss:$292 sps:$4 sm:$0xff]  }
 0x2f3   : > { %6631 = vmatprep.subr.bf16.mxu1 %v10299_v53  ;;  %v10320_v53 = vld [vmem:[%s11879_s14 + $0xc2c] ss:$292 sps:$4 sm:$0xff]  }
 0x2f4   : > { %6591 = vmatpush1.bf16.msra.mxu0 %v10242_v39 }
 0x2f5   : > { %6592 = vmatprep.subr.bf16.mxu0 %v10250_v42 }
 0x2f6   : > { %6632 = vmatpush1.bf16.msra.mxu1 %v10297_v56  ;;  %v10318_v56 = vld [vmem:[%s11879_s14 + $0xc28] ss:$292 sps:$4 sm:$0xff]  }
 0x2f7   : > { %6633 = vmatprep.subr.bf16.mxu1 %v10305_v57  ;;  %v10326_v57 = vld [vmem:[%s11879_s14 + $0xe74] ss:$292 sps:$4 sm:$0xff]  }
 0x2f8   : > { %6593 = vmatpush1.bf16.msra.mxu0 %v10248_v46  ;;  %v10306_v46 = vld [vmem:[%s11879_s14 + $0x798] ss:$292 sps:$4 sm:$0xff]  }
 0x2f9   : > { %6594 = vmatprep.subr.bf16.mxu0 %v10256_v47 }
 0x2fa   : > { %6634 = vmatpush1.bf16.msra.mxu1 %v10303_v60  ;;  %v10324_v60 = vld [vmem:[%s11879_s14 + $0xe70] ss:$292 sps:$4 sm:$0xff]  }
 0x2fb   : > { %6635 = vmatprep.subr.bf16.mxu1 %v10311_v62  ;;  %v10332_v62 = vld [vmem:[%s11879_s14 + $0x10bc] ss:$292 sps:$4 sm:$0xff]  }
 0x2fc   : > { %6595 = vmatpush1.bf16.msra.mxu0 %v10254_v50  ;;  %v10345_v50 = vld [vmem:[%s11879_s14 + $0xc8] ss:$292 sps:$4 sm:$0xff]  }
 0x2fd   : > { %6596 = vmatprep.subr.bf16.mxu0 %v10262_v51  ;;  %v10351_v51 = vld [vmem:[%s11879_s14 + $0x314] ss:$292 sps:$4 sm:$0xff]  }
 0x2fe   : > { %6636 = vmatpush1.bf16.msra.mxu1 %v10309_v3  ;;  %v10338_v3 = vld [vmem:[%s11879_s14 + $0x1304] ss:$292 sps:$4 sm:$0xff]  }
 0x2ff   : > { %6637 = vmatprep.subr.bf16.mxu1 %v10317_v4  ;;  %v10367_v4 = vld [vmem:[%s11879_s14 + $0x9e8] ss:$292 sps:$4 sm:$0xff]  }
 0x300   : > { %6597 = vmatpush1.bf16.msra.mxu0 %v10260_v54  ;;  %v10349_v54 = vld [vmem:[%s11879_s14 + $0x310] ss:$292 sps:$4 sm:$0xff]  }
 0x301   : > { %6598 = vmatprep.subr.bf16.mxu0 %v10268_v55  ;;  %v10357_v55 = vld [vmem:[%s11879_s14 + $0x55c] ss:$292 sps:$4 sm:$0xff]  }
 0x302   : > { %6638 = vmatpush1.bf16.msra.mxu1 %v10315_v9  ;;  %v10373_v9 = vld [vmem:[%s11879_s14 + $0xc30] ss:$292 sps:$4 sm:$0xff]  }
 0x303   : > { %6639 = vmatprep.subr.bf16.mxu1 %v10323_v12 }
 0x304   : > { %6599 = vmatpush1.bf16.msra.mxu0 %v10266_v58  ;;  %v10355_v58 = vld [vmem:[%s11879_s14 + $0x558] ss:$292 sps:$4 sm:$0xff]  }
 0x305   : > { %6600 = vmatprep.subr.bf16.mxu0 %v10274_v59  ;;  %v10363_v59 = vld [vmem:[%s11879_s14 + $0x7a4] ss:$292 sps:$4 sm:$0xff]  }
 0x306   : > { %6640 = vmatpush1.bf16.msra.mxu1 %v10321_v20 }
 0x307   : > { %6641 = vmatprep.subr.bf16.mxu1 %v10329_v21 }
 0x308   : > { %6601 = vmatpush1.bf16.msra.mxu0 %v10272_v0  ;;  %v10361_v0 = vld [vmem:[%s11879_s14 + $0x7a0] ss:$292 sps:$4 sm:$0xff]  }
 0x309   : > { %6602 = vmatprep.subr.bf16.mxu0 %v10278_v1  ;;  %v10369_v1 = vld [vmem:[%s11879_s14 + $0x9ec] ss:$292 sps:$4 sm:$0xff]  }
 0x30a   : > { %v6208_v8 = vpop.f32.mrb[24].mxu0  ;;  %6642 = vmatpush1.bf16.msra.mxu1 %v10327_v25 }
 0x30b   : > { %v6209_v10 = vadd.f32 %v6208_v8, %v12182_v29  ;;  %v6210_v11 = vpop.f32.mrb[25].mxu0  ;;  %6643 = vmatprep.subr.bf16.mxu1 %v10335_v26  ;;  %v1590_v8 = vld [vmem:[%s11879_s14 + $0x1790] sm:$0x11]  ;;  %v10385_v26 = vld [vmem:[%s11879_s14 + $0x10c0] ss:$292 sps:$4 sm:$0xff]  }
 0x30c   : > { %v6211_v13 = vadd.f32 %v6210_v11, %v12182_v29  ;;  %v6212_v14 = vpop.f32.mrb[26].mxu0  ;;  %6603 = vmatpush1.bf16.msra.mxu0 %v10276_v5  ;;  %v6249_v35 = vpop.f32.mrb[24].mxu1  ;;  %v10375_v5 = vld [vmem:[%s11879_s14 + $0xc34] ss:$292 sps:$4 sm:$0xff]   ;;  %v10340_v11 = vld [vmem:[%s11879_s14 + $0x1548] ss:$292 sps:$4 sm:$0xff]   ;;  %v9047_v12 = vcombine.high %v1590_v8, %v1590_v8 }
 0x30d   : > { %v7222_v15 = vmax.f32 %v6209_v10, 0.0  ;;  %v6213_v16 = vpop.f32.mrb[27].mxu0  ;;  %9115 = vmatprep.subr.msk.bf16.mxu0 %vm5462_vm1, %v9043_v6  ;;  %v6250_v37 = vadd.f32 %v6249_v35, %v12182_v29  ;;  %v6251_v38 = vpop.f32.mrb[25].mxu1  ;;  %v10336_v6 = vld [vmem:[%s11879_s14 + $0x1300] ss:$292 sps:$4 sm:$0xff]  }
 0x30e   : > { %v7223_v19 = vmax.f32 %v6211_v13, 0.0  ;;  %v6252_v39 = vadd.f32 %v6251_v38, %v12182_v29  ;;  %6644 = vmatpush1.bf16.msra.mxu1 %v10333_v31  ;;  %v6253_v41 = vpop.f32.mrb[26].mxu1  ;;  %v10381_v10 = vld [vmem:[%s11879_s14 + $0xe7c] ss:$292 sps:$4 sm:$0xff]   ;;  %v9046_v13 = vcombine.low %v1590_v8, %v1590_v8  ;;  %v10394_v8 = vld [vmem:[%s11879_s14 + $0x10c8] ss:$292 sps:$4 sm:$0xff]  }
 0x30f   : > { %v7224_v42 = vmax.f32 %v6250_v37, 0.0  ;;  %v6254_v43 = vpop.f32.mrb[27].mxu1  ;;  %9117 = vmatprep.subr.msk.bf16.mxu1 %vm5462_vm1, %v9045_v32  ;;  %v10360_v31 = vld [vmem:[%s11879_s14 + $0x31c] ss:$292 sps:$4 sm:$0xff]   ;;  %v10391_v32 = vld [vmem:[%s11879_s14 + $0x1308] ss:$292 sps:$4 sm:$0xff]  }
 0x310   : > { %v9225_v22 = vpack.c.bf16 %v7223_v19, %v7222_v15  ;;  %6605 = vmatpush1.bf16.msra.mxu0 %v5596_v17  ;;  %v7225_v47 = vmax.f32 %v6252_v39, 0.0  ;;  %v10379_v15 = vld [vmem:[%s11879_s14 + $0xe78] ss:$292 sps:$4 sm:$0xff]   ;;  %v10397_v37 = vld [vmem:[%s11879_s14 + $0x1550] ss:$292 sps:$4 sm:$0xff]  }
 0x311   : > { %6666 = vmatprep.subr.bf16.mxu0 %v10290_v18  ;;  %v10387_v18 = vld [vmem:[%s11879_s14 + $0x10c4] ss:$292 sps:$4 sm:$0xff]   ;;  %v1591_v35 = vld [vmem:[%s11879_s14 + $0x1798] sm:$0x11]  ;;  %v10372_v43 = vld [vmem:[%s11879_s14 + $0x7ac] ss:$292 sps:$4 sm:$0xff]  }
 0x312   : > { %7576 = vst [vmem:[%s12200_s12 + $0x60] sm:$0xff] %v9225_v22  ;;  %v9226_v49 = vpack.c.bf16 %v7225_v47, %v7224_v42  ;;  %6646 = vmatpush1.bf16.msra.mxu1 %v5602_v44  ;;  %v9049_v38 = vcombine.high %v1591_v35, %v1591_v35  ;;  %v9048_v39 = vcombine.low %v1591_v35, %v1591_v35  ;;  %v10364_v41 = vld [vmem:[%s11879_s14 + $0x560] ss:$292 sps:$4 sm:$0xff]  }
 0x313   : > { %6617 = vmatmul.mubr.bf16.vlgmr.msra.gmra.mrb[44].mxu0 %v11924_v40  ;;  %6707 = vmatprep.subr.bf16.mxu1 %v10347_v45 }
 0x314   : > { %6667 = vmatpush1.bf16.msra.mxu0 %v10288_v23  ;;  %9120 = vmatprep.mubr.msk.bf16.mxu0 %vm5458_vm0, %v11873_v61  ;;  %7577 = vst [vmem:[%s12200_s12 + $0x68] sm:$0xff] %v9226_v49  ;;  %v5608_v23 = vsel %vm5462_vm1, %v9046_v13, 0  ;;  %v10406_v13 = vld [vmem:[%s11879_s14 + $0x155c] ss:$292 sps:$4 sm:$0xff]  }
 0x315   : > { %6668 = vmatprep.subr.bf16.mxu0 %v10296_v24  ;;  %6658 = vmatmul.mubr.bf16.vlgmr.msra.gmra.mrb[44].mxu1 %v11924_v40  ;;  %v10354_v24 = vld [vmem:[%s11879_s14 + $0xd4] ss:$292 sps:$4 sm:$0xff]  }
 0x316   : > { %6708 = vmatpush1.bf16.msra.mxu1 %v10345_v50  ;;  %9122 = vmatprep.mubr.msk.bf16.mxu1 %vm5458_vm0, %v11873_v61  ;;  %v5614_v50 = vsel %vm5462_vm1, %v9048_v39, 0  ;;  %v10463_v39 = vld [vmem:[%s11879_s14 + $0x1564] ss:$292 sps:$4 sm:$0xff]  }
 0x317   : > { %6709 = vmatprep.subr.bf16.mxu1 %v10351_v51  ;;  %v10411_v51 = vld [vmem:[%s11879_s14 + $0xdc] ss:$292 sps:$4 sm:$0xff]  }
 0x318   : > { %6669 = vmatpush1.bf16.msra.mxu0 %v10294_v27  ;;  %v10393_v27 = vld [vmem:[%s11879_s14 + $0x130c] ss:$292 sps:$4 sm:$0xff]  }
 0x319   : > { %6670 = vmatprep.subr.bf16.mxu0 %v10302_v30  ;;  %v10352_v30 = vld [vmem:[%s11879_s14 + $0xd0] ss:$292 sps:$4 sm:$0xff]  }
 0x31a   : > { %6710 = vmatpush1.bf16.msra.mxu1 %v10349_v54  ;;  %v10378_v54 = vld [vmem:[%s11879_s14 + $0x9f4] ss:$292 sps:$4 sm:$0xff]  }
 0x31b   : > { %6711 = vmatprep.subr.bf16.mxu1 %v10357_v55 }
 0x31c   : > { %6671 = vmatpush1.bf16.msra.mxu0 %v10300_v34  ;;  %v10358_v34 = vld [vmem:[%s11879_s14 + $0x318] ss:$292 sps:$4 sm:$0xff]  }
 0x31d   : > { %6672 = vmatprep.subr.bf16.mxu0 %v10308_v36  ;;  %v10366_v36 = vld [vmem:[%s11879_s14 + $0x564] ss:$292 sps:$4 sm:$0xff]  }
 0x31e   : > { %6712 = vmatpush1.bf16.msra.mxu1 %v10355_v58  ;;  %v10376_v58 = vld [vmem:[%s11879_s14 + $0x9f0] ss:$292 sps:$4 sm:$0xff]  }
 0x31f   : > { %6713 = vmatprep.subr.bf16.mxu1 %v10363_v59  ;;  %v10384_v59 = vld [vmem:[%s11879_s14 + $0xc3c] ss:$292 sps:$4 sm:$0xff]  }
 0x320   : > { %6673 = vmatpush1.bf16.msra.mxu0 %v10306_v46 }
 0x321   : > { %6674 = vmatprep.subr.bf16.mxu0 %v10314_v48 }
 0x322   : > { %6714 = vmatpush1.bf16.msra.mxu1 %v10361_v0  ;;  %v10382_v0 = vld [vmem:[%s11879_s14 + $0xc38] ss:$292 sps:$4 sm:$0xff]  }
 0x323   : > { %6715 = vmatprep.subr.bf16.mxu1 %v10369_v1  ;;  %v10390_v1 = vld [vmem:[%s11879_s14 + $0xe84] ss:$292 sps:$4 sm:$0xff]  }
 0x324   : > { %6675 = vmatpush1.bf16.msra.mxu0 %v10312_v52  ;;  %v10370_v52 = vld [vmem:[%s11879_s14 + $0x7a8] ss:$292 sps:$4 sm:$0xff]  }
 0x325   : > { %6676 = vmatprep.subr.bf16.mxu0 %v10320_v53 }
 0x326   : > { %6716 = vmatpush1.bf16.msra.mxu1 %v10367_v4  ;;  %v10388_v4 = vld [vmem:[%s11879_s14 + $0xe80] ss:$292 sps:$4 sm:$0xff]  }
 0x327   : > { %6717 = vmatprep.subr.bf16.mxu1 %v10375_v5  ;;  %v10396_v5 = vld [vmem:[%s11879_s14 + $0x10cc] ss:$292 sps:$4 sm:$0xff]  }
 0x328   : > { %6677 = vmatpush1.bf16.msra.mxu0 %v10318_v56  ;;  %v10409_v56 = vld [vmem:[%s11879_s14 + $0xd8] ss:$292 sps:$4 sm:$0xff]  }
 0x329   : > { %6678 = vmatprep.subr.bf16.mxu0 %v10326_v57  ;;  %v10415_v57 = vld [vmem:[%s11879_s14 + $0x324] ss:$292 sps:$4 sm:$0xff]  }
 0x32a   : > { %6718 = vmatpush1.bf16.msra.mxu1 %v10373_v9  ;;  %v10402_v9 = vld [vmem:[%s11879_s14 + $0x1314] ss:$292 sps:$4 sm:$0xff]  }
 0x32b   : > { %6719 = vmatprep.subr.bf16.mxu1 %v10381_v10  ;;  %v10431_v10 = vld [vmem:[%s11879_s14 + $0x9f8] ss:$292 sps:$4 sm:$0xff]  }
 0x32c   : > { %6679 = vmatpush1.bf16.msra.mxu0 %v10324_v60  ;;  %v10413_v60 = vld [vmem:[%s11879_s14 + $0x320] ss:$292 sps:$4 sm:$0xff]  }
 0x32d   : > { %6680 = vmatprep.subr.bf16.mxu0 %v10332_v62  ;;  %v10421_v62 = vld [vmem:[%s11879_s14 + $0x56c] ss:$292 sps:$4 sm:$0xff]  }
 0x32e   : > { %6720 = vmatpush1.bf16.msra.mxu1 %v10379_v15  ;;  %v10437_v15 = vld [vmem:[%s11879_s14 + $0xc40] ss:$292 sps:$4 sm:$0xff]  }
 0x32f   : > { %6721 = vmatprep.subr.bf16.mxu1 %v10387_v18 }
 0x330   : > { %6681 = vmatpush1.bf16.msra.mxu0 %v10330_v2  ;;  %v10419_v2 = vld [vmem:[%s11879_s14 + $0x568] ss:$292 sps:$4 sm:$0xff]  }
 0x331   : > { %6682 = vmatprep.subr.bf16.mxu0 %v10338_v3  ;;  %v10427_v3 = vld [vmem:[%s11879_s14 + $0x7b4] ss:$292 sps:$4 sm:$0xff]  }
 0x332   : > { %6722 = vmatpush1.bf16.msra.mxu1 %v10385_v26 }
 0x333   : > { %6723 = vmatprep.subr.bf16.mxu1 %v10393_v27 }
 0x334   : > { %6683 = vmatpush1.bf16.msra.mxu0 %v10336_v6  ;;  %v10425_v6 = vld [vmem:[%s11879_s14 + $0x7b0] ss:$292 sps:$4 sm:$0xff]  }
 0x335   : > { %6684 = vmatprep.subr.bf16.mxu0 %v10342_v7  ;;  %v10433_v7 = vld [vmem:[%s11879_s14 + $0x9fc] ss:$292 sps:$4 sm:$0xff]  }
 0x336   : > { %v6290_v14 = vpop.f32.mrb[28].mxu0  ;;  %6724 = vmatpush1.bf16.msra.mxu1 %v10391_v32 }
 0x337   : > { %v6291_v16 = vadd.f32 %v6290_v14, %v12182_v29  ;;  %v6292_v17 = vpop.f32.mrb[29].mxu0  ;;  %6725 = vmatprep.subr.bf16.mxu1 %v10399_v33  ;;  %v1592_v14 = vld [vmem:[%s11879_s14 + $0x17a0] sm:$0x11]  ;;  %v10449_v33 = vld [vmem:[%s11879_s14 + $0x10d0] ss:$292 sps:$4 sm:$0xff]  }
 0x338   : > { %v6293_v19 = vadd.f32 %v6292_v17, %v12182_v29  ;;  %v6294_v20 = vpop.f32.mrb[30].mxu0  ;;  %6685 = vmatpush1.bf16.msra.mxu0 %v10340_v11  ;;  %v6331_v42 = vpop.f32.mrb[28].mxu1  ;;  %v10439_v11 = vld [vmem:[%s11879_s14 + $0xc44] ss:$292 sps:$4 sm:$0xff]   ;;  %v10404_v17 = vld [vmem:[%s11879_s14 + $0x1558] ss:$292 sps:$4 sm:$0xff]   ;;  %v9051_v18 = vcombine.high %v1592_v14, %v1592_v14 }
 0x339   : > { %v7226_v21 = vmax.f32 %v6291_v16, 0.0  ;;  %v6295_v22 = vpop.f32.mrb[31].mxu0  ;;  %9119 = vmatprep.subr.msk.bf16.mxu0 %vm5462_vm1, %v9047_v12  ;;  %v6332_v44 = vadd.f32 %v6331_v42, %v12182_v29  ;;  %v6333_v45 = vpop.f32.mrb[29].mxu1  ;;  %v10400_v12 = vld [vmem:[%s11879_s14 + $0x1310] ss:$292 sps:$4 sm:$0xff]  }
 0x33a   : > { %v7227_v25 = vmax.f32 %v6293_v19, 0.0  ;;  %v6334_v46 = vadd.f32 %v6333_v45, %v12182_v29  ;;  %6726 = vmatpush1.bf16.msra.mxu1 %v10397_v37  ;;  %v6335_v47 = vpop.f32.mrb[30].mxu1  ;;  %v10445_v16 = vld [vmem:[%s11879_s14 + $0xe8c] ss:$292 sps:$4 sm:$0xff]   ;;  %v9050_v19 = vcombine.low %v1592_v14, %v1592_v14  ;;  %v10458_v14 = vld [vmem:[%s11879_s14 + $0x10d8] ss:$292 sps:$4 sm:$0xff]  }
 0x33b   : > { %v7228_v48 = vmax.f32 %v6332_v44, 0.0  ;;  %v6336_v49 = vpop.f32.mrb[31].mxu1  ;;  %9121 = vmatprep.subr.msk.bf16.mxu1 %vm5462_vm1, %v9049_v38  ;;  %v10424_v37 = vld [vmem:[%s11879_s14 + $0x32c] ss:$292 sps:$4 sm:$0xff]   ;;  %v10455_v38 = vld [vmem:[%s11879_s14 + $0x1318] ss:$292 sps:$4 sm:$0xff]  }
 0x33c   : > { %v9227_v28 = vpack.c.bf16 %v7227_v25, %v7226_v21  ;;  %6687 = vmatpush1.bf16.msra.mxu0 %v5608_v23  ;;  %v7229_v53 = vmax.f32 %v6334_v46, 0.0  ;;  %v10443_v21 = vld [vmem:[%s11879_s14 + $0xe88] ss:$292 sps:$4 sm:$0xff]   ;;  %v10461_v44 = vld [vmem:[%s11879_s14 + $0x1560] ss:$292 sps:$4 sm:$0xff]  }
 0x33d   : > { %6748 = vmatprep.subr.bf16.mxu0 %v10354_v24  ;;  %v10451_v24 = vld [vmem:[%s11879_s14 + $0x10d4] ss:$292 sps:$4 sm:$0xff]   ;;  %v1593_v42 = vld [vmem:[%s11879_s14 + $0x17a8] sm:$0x11]  ;;  %v10436_v49 = vld [vmem:[%s11879_s14 + $0x7bc] ss:$292 sps:$4 sm:$0xff]  }
 0x33e   : > { %7578 = vst [vmem:[%s12200_s12 + $0x70] sm:$0xff] %v9227_v28  ;;  %v9228_v55 = vpack.c.bf16 %v7229_v53, %v7228_v48  ;;  %6728 = vmatpush1.bf16.msra.mxu1 %v5614_v50  ;;  %v9053_v45 = vcombine.high %v1593_v42, %v1593_v42  ;;  %v9052_v46 = vcombine.low %v1593_v42, %v1593_v42  ;;  %v10428_v47 = vld [vmem:[%s11879_s14 + $0x570] ss:$292 sps:$4 sm:$0xff]  }
 0x33f   : > { %6699 = vmatmul.mubr.bf16.vlgmr.msra.gmra.mrb[48].mxu0 %v11924_v40  ;;  %6789 = vmatprep.subr.bf16.mxu1 %v10411_v51 }
 0x340   : > { %6749 = vmatpush1.bf16.msra.mxu0 %v10352_v30  ;;  %9124 = vmatprep.mubr.msk.bf16.mxu0 %vm5458_vm0, %v11873_v61  ;;  %7579 = vst [vmem:[%s12200_s12 + $0x78] sm:$0xff] %v9228_v55  ;;  %v5620_v30 = vsel %vm5462_vm1, %v9050_v19, 0  ;;  %v10470_v19 = vld [vmem:[%s11879_s14 + $0x156c] ss:$292 sps:$4 sm:$0xff]  }
 0x341   : > { %6750 = vmatprep.subr.bf16.mxu0 %v10360_v31  ;;  %6740 = vmatmul.mubr.bf16.vlgmr.msra.gmra.mrb[48].mxu1 %v11924_v40  ;;  %v10418_v31 = vld [vmem:[%s11879_s14 + $0xe4] ss:$292 sps:$4 sm:$0xff]  }
 0x342   : > { %6790 = vmatpush1.bf16.msra.mxu1 %v10409_v56  ;;  %9126 = vmatprep.mubr.msk.bf16.mxu1 %vm5458_vm0, %v11873_v61  ;;  %v5626_v56 = vsel %vm5462_vm1, %v9052_v46, 0  ;;  %v10527_v46 = vld [vmem:[%s11879_s14 + $0x1574] ss:$292 sps:$4 sm:$0xff]  }
 0x343   : > { %6791 = vmatprep.subr.bf16.mxu1 %v10415_v57  ;;  %v10475_v57 = vld [vmem:[%s11879_s14 + $0xec] ss:$292 sps:$4 sm:$0xff]  }
 0x344   : > { %6751 = vmatpush1.bf16.msra.mxu0 %v10358_v34  ;;  %v10457_v34 = vld [vmem:[%s11879_s14 + $0x131c] ss:$292 sps:$4 sm:$0xff]  }
 0x345   : > { %6752 = vmatprep.subr.bf16.mxu0 %v10366_v36  ;;  %v10416_v36 = vld [vmem:[%s11879_s14 + $0xe0] ss:$292 sps:$4 sm:$0xff]  }
 0x346   : > { %6792 = vmatpush1.bf16.msra.mxu1 %v10413_v60  ;;  %v10442_v60 = vld [vmem:[%s11879_s14 + $0xa04] ss:$292 sps:$4 sm:$0xff]  }
 0x347   : > { %6793 = vmatprep.subr.bf16.mxu1 %v10421_v62 }
 0x348   : > { %6753 = vmatpush1.bf16.msra.mxu0 %v10364_v41  ;;  %v10422_v41 = vld [vmem:[%s11879_s14 + $0x328] ss:$292 sps:$4 sm:$0xff]  }
 0x349   : > { %6754 = vmatprep.subr.bf16.mxu0 %v10372_v43  ;;  %v10430_v43 = vld [vmem:[%s11879_s14 + $0x574] ss:$292 sps:$4 sm:$0xff]  }
 0x34a   : > { %6794 = vmatpush1.bf16.msra.mxu1 %v10419_v2  ;;  %v10440_v2 = vld [vmem:[%s11879_s14 + $0xa00] ss:$292 sps:$4 sm:$0xff]  }
 0x34b   : > { %6795 = vmatprep.subr.bf16.mxu1 %v10427_v3  ;;  %v10448_v3 = vld [vmem:[%s11879_s14 + $0xc4c] ss:$292 sps:$4 sm:$0xff]  }
 0x34c   : > { %6755 = vmatpush1.bf16.msra.mxu0 %v10370_v52 }
 0x34d   : > { %6756 = vmatprep.subr.bf16.mxu0 %v10378_v54 }
 0x34e   : > { %6796 = vmatpush1.bf16.msra.mxu1 %v10425_v6  ;;  %v10446_v6 = vld [vmem:[%s11879_s14 + $0xc48] ss:$292 sps:$4 sm:$0xff]  }
 0x34f   : > { %6797 = vmatprep.subr.bf16.mxu1 %v10433_v7  ;;  %v10454_v7 = vld [vmem:[%s11879_s14 + $0xe94] ss:$292 sps:$4 sm:$0xff]  }
 0x350   : > { %6757 = vmatpush1.bf16.msra.mxu0 %v10376_v58  ;;  %v10434_v58 = vld [vmem:[%s11879_s14 + $0x7b8] ss:$292 sps:$4 sm:$0xff]  }
 0x351   : > { %6758 = vmatprep.subr.bf16.mxu0 %v10384_v59 }
 0x352   : > { %6798 = vmatpush1.bf16.msra.mxu1 %v10431_v10  ;;  %v10452_v10 = vld [vmem:[%s11879_s14 + $0xe90] ss:$292 sps:$4 sm:$0xff]  }
 0x353   : > { %6799 = vmatprep.subr.bf16.mxu1 %v10439_v11  ;;  %v10460_v11 = vld [vmem:[%s11879_s14 + $0x10dc] ss:$292 sps:$4 sm:$0xff]  }
 0x354   : > { %6759 = vmatpush1.bf16.msra.mxu0 %v10382_v0  ;;  %v10473_v0 = vld [vmem:[%s11879_s14 + $0xe8] ss:$292 sps:$4 sm:$0xff]  }
 0x355   : > { %6760 = vmatprep.subr.bf16.mxu0 %v10390_v1  ;;  %v10479_v1 = vld [vmem:[%s11879_s14 + $0x334] ss:$292 sps:$4 sm:$0xff]  }
 0x356   : > { %6800 = vmatpush1.bf16.msra.mxu1 %v10437_v15  ;;  %v10466_v15 = vld [vmem:[%s11879_s14 + $0x1324] ss:$292 sps:$4 sm:$0xff]  }
 0x357   : > { %6801 = vmatprep.subr.bf16.mxu1 %v10445_v16  ;;  %v10495_v16 = vld [vmem:[%s11879_s14 + $0xa08] ss:$292 sps:$4 sm:$0xff]  }
 0x358   : > { %6761 = vmatpush1.bf16.msra.mxu0 %v10388_v4  ;;  %v10477_v4 = vld [vmem:[%s11879_s14 + $0x330] ss:$292 sps:$4 sm:$0xff]  }
 0x359   : > { %6762 = vmatprep.subr.bf16.mxu0 %v10396_v5  ;;  %v10485_v5 = vld [vmem:[%s11879_s14 + $0x57c] ss:$292 sps:$4 sm:$0xff]  }
 0x35a   : > { %6802 = vmatpush1.bf16.msra.mxu1 %v10443_v21  ;;  %v10501_v21 = vld [vmem:[%s11879_s14 + $0xc50] ss:$292 sps:$4 sm:$0xff]  }
 0x35b   : > { %6803 = vmatprep.subr.bf16.mxu1 %v10451_v24 }
 0x35c   : > { %6763 = vmatpush1.bf16.msra.mxu0 %v10394_v8  ;;  %v10483_v8 = vld [vmem:[%s11879_s14 + $0x578] ss:$292 sps:$4 sm:$0xff]  }
 0x35d   : > { %6764 = vmatprep.subr.bf16.mxu0 %v10402_v9  ;;  %v10491_v9 = vld [vmem:[%s11879_s14 + $0x7c4] ss:$292 sps:$4 sm:$0xff]  }
 0x35e   : > { %6804 = vmatpush1.bf16.msra.mxu1 %v10449_v33 }
 0x35f   : > { %6805 = vmatprep.subr.bf16.mxu1 %v10457_v34 }
 0x360   : > { %6765 = vmatpush1.bf16.msra.mxu0 %v10400_v12  ;;  %v10489_v12 = vld [vmem:[%s11879_s14 + $0x7c0] ss:$292 sps:$4 sm:$0xff]  }
 0x361   : > { %6766 = vmatprep.subr.bf16.mxu0 %v10406_v13  ;;  %v10497_v13 = vld [vmem:[%s11879_s14 + $0xa0c] ss:$292 sps:$4 sm:$0xff]  }
 0x362   : > { %v6372_v20 = vpop.f32.mrb[32].mxu0  ;;  %6806 = vmatpush1.bf16.msra.mxu1 %v10455_v38 }
 0x363   : > { %v6373_v22 = vadd.f32 %v6372_v20, %v12182_v29  ;;  %v6374_v23 = vpop.f32.mrb[33].mxu0  ;;  %6807 = vmatprep.subr.bf16.mxu1 %v10463_v39  ;;  %v1594_v20 = vld [vmem:[%s11879_s14 + $0x17b0] sm:$0x11]  ;;  %v10513_v39 = vld [vmem:[%s11879_s14 + $0x10e0] ss:$292 sps:$4 sm:$0xff]  }
 0x364   : > { %v6375_v25 = vadd.f32 %v6374_v23, %v12182_v29  ;;  %v6376_v26 = vpop.f32.mrb[34].mxu0  ;;  %6767 = vmatpush1.bf16.msra.mxu0 %v10404_v17  ;;  %v6413_v48 = vpop.f32.mrb[32].mxu1  ;;  %v10503_v17 = vld [vmem:[%s11879_s14 + $0xc54] ss:$292 sps:$4 sm:$0xff]   ;;  %v10468_v23 = vld [vmem:[%s11879_s14 + $0x1568] ss:$292 sps:$4 sm:$0xff]   ;;  %v9055_v24 = vcombine.high %v1594_v20, %v1594_v20 }
 0x365   : > { %v7230_v27 = vmax.f32 %v6373_v22, 0.0  ;;  %v6377_v28 = vpop.f32.mrb[35].mxu0  ;;  %9123 = vmatprep.subr.msk.bf16.mxu0 %vm5462_vm1, %v9051_v18  ;;  %v6414_v50 = vadd.f32 %v6413_v48, %v12182_v29  ;;  %v6415_v51 = vpop.f32.mrb[33].mxu1  ;;  %v10464_v18 = vld [vmem:[%s11879_s14 + $0x1320] ss:$292 sps:$4 sm:$0xff]  }
 0x366   : > { %v7231_v32 = vmax.f32 %v6375_v25, 0.0  ;;  %v6416_v52 = vadd.f32 %v6415_v51, %v12182_v29  ;;  %6808 = vmatpush1.bf16.msra.mxu1 %v10461_v44  ;;  %v6417_v53 = vpop.f32.mrb[34].mxu1  ;;  %v10509_v22 = vld [vmem:[%s11879_s14 + $0xe9c] ss:$292 sps:$4 sm:$0xff]   ;;  %v9054_v25 = vcombine.low %v1594_v20, %v1594_v20  ;;  %v10522_v20 = vld [vmem:[%s11879_s14 + $0x10e8] ss:$292 sps:$4 sm:$0xff]  }
 0x367   : > { %v7232_v54 = vmax.f32 %v6414_v50, 0.0  ;;  %v6418_v55 = vpop.f32.mrb[35].mxu1  ;;  %9125 = vmatprep.subr.msk.bf16.mxu1 %vm5462_vm1, %v9053_v45  ;;  %v10488_v44 = vld [vmem:[%s11879_s14 + $0x33c] ss:$292 sps:$4 sm:$0xff]   ;;  %v10519_v45 = vld [vmem:[%s11879_s14 + $0x1328] ss:$292 sps:$4 sm:$0xff]  }
 0x368   : > { %v9229_v35 = vpack.c.bf16 %v7231_v32, %v7230_v27  ;;  %6769 = vmatpush1.bf16.msra.mxu0 %v5620_v30  ;;  %v7233_v59 = vmax.f32 %v6416_v52, 0.0  ;;  %v10507_v27 = vld [vmem:[%s11879_s14 + $0xe98] ss:$292 sps:$4 sm:$0xff]   ;;  %v10525_v50 = vld [vmem:[%s11879_s14 + $0x1570] ss:$292 sps:$4 sm:$0xff]  }
 0x369   : > { %6830 = vmatprep.subr.bf16.mxu0 %v10418_v31  ;;  %v10515_v31 = vld [vmem:[%s11879_s14 + $0x10e4] ss:$292 sps:$4 sm:$0xff]   ;;  %v1595_v48 = vld [vmem:[%s11879_s14 + $0x17b8] sm:$0x11]  ;;  %v10500_v55 = vld [vmem:[%s11879_s14 + $0x7cc] ss:$292 sps:$4 sm:$0xff]  }
 0x36a   : > { %7580 = vst [vmem:[%s12200_s12 + $0x80] sm:$0xff] %v9229_v35  ;;  %v9230_v62 = vpack.c.bf16 %v7233_v59, %v7232_v54  ;;  %6810 = vmatpush1.bf16.msra.mxu1 %v5626_v56  ;;  %v9057_v51 = vcombine.high %v1595_v48, %v1595_v48  ;;  %v9056_v52 = vcombine.low %v1595_v48, %v1595_v48  ;;  %v10492_v53 = vld [vmem:[%s11879_s14 + $0x580] ss:$292 sps:$4 sm:$0xff]  }
 0x36b   : > { %6781 = vmatmul.mubr.bf16.vlgmr.msra.gmra.mrb[52].mxu0 %v11924_v40  ;;  %6871 = vmatprep.subr.bf16.mxu1 %v10475_v57 }
 0x36c   : > { %6831 = vmatpush1.bf16.msra.mxu0 %v10416_v36  ;;  %9128 = vmatprep.mubr.msk.bf16.mxu0 %vm5458_vm0, %v11873_v61  ;;  %7581 = vst [vmem:[%s12200_s12 + $0x88] sm:$0xff] %v9230_v62  ;;  %v5632_v36 = vsel %vm5462_vm1, %v9054_v25, 0  ;;  %v10534_v25 = vld [vmem:[%s11879_s14 + $0x157c] ss:$292 sps:$4 sm:$0xff]  }
 0x36d   : > { %6832 = vmatprep.subr.bf16.mxu0 %v10424_v37  ;;  %6822 = vmatmul.mubr.bf16.vlgmr.msra.gmra.mrb[52].mxu1 %v11924_v40  ;;  %v10482_v37 = vld [vmem:[%s11879_s14 + $0xf4] ss:$292 sps:$4 sm:$0xff]  }
 0x36e   : > { %6872 = vmatpush1.bf16.msra.mxu1 %v10473_v0  ;;  %9130 = vmatprep.mubr.msk.bf16.mxu1 %vm5458_vm0, %v11873_v61  ;;  %v5638_v0 = vsel %vm5462_vm1, %v9056_v52, 0  ;;  %v10591_v52 = vld [vmem:[%s11879_s14 + $0x1584] ss:$292 sps:$4 sm:$0xff]  }
 0x36f   : > { %6873 = vmatprep.subr.bf16.mxu1 %v10479_v1  ;;  %v10539_v1 = vld [vmem:[%s11879_s14 + $0xfc] ss:$292 sps:$4 sm:$0xff]  }
 0x370   : > { %6833 = vmatpush1.bf16.msra.mxu0 %v10422_v41  ;;  %v10521_v41 = vld [vmem:[%s11879_s14 + $0x132c] ss:$292 sps:$4 sm:$0xff]  }
 0x371   : > { %6834 = vmatprep.subr.bf16.mxu0 %v10430_v43  ;;  %v10480_v43 = vld [vmem:[%s11879_s14 + $0xf0] ss:$292 sps:$4 sm:$0xff]  }
 0x372   : > { %6874 = vmatpush1.bf16.msra.mxu1 %v10477_v4  ;;  %v10506_v4 = vld [vmem:[%s11879_s14 + $0xa14] ss:$292 sps:$4 sm:$0xff]  }
 0x373   : > { %6875 = vmatprep.subr.bf16.mxu1 %v10485_v5 }
 0x374   : > { %6835 = vmatpush1.bf16.msra.mxu0 %v10428_v47  ;;  %v10486_v47 = vld [vmem:[%s11879_s14 + $0x338] ss:$292 sps:$4 sm:$0xff]  }
 0x375   : > { %6836 = vmatprep.subr.bf16.mxu0 %v10436_v49  ;;  %v10494_v49 = vld [vmem:[%s11879_s14 + $0x584] ss:$292 sps:$4 sm:$0xff]  }
 0x376   : > { %6876 = vmatpush1.bf16.msra.mxu1 %v10483_v8  ;;  %v10504_v8 = vld [vmem:[%s11879_s14 + $0xa10] ss:$292 sps:$4 sm:$0xff]  }
 0x377   : > { %6877 = vmatprep.subr.bf16.mxu1 %v10491_v9  ;;  %v10512_v9 = vld [vmem:[%s11879_s14 + $0xc5c] ss:$292 sps:$4 sm:$0xff]  }
 0x378   : > { %6837 = vmatpush1.bf16.msra.mxu0 %v10434_v58 }
 0x379   : > { %6838 = vmatprep.subr.bf16.mxu0 %v10442_v60 }
 0x37a   : > { %6878 = vmatpush1.bf16.msra.mxu1 %v10489_v12  ;;  %v10510_v12 = vld [vmem:[%s11879_s14 + $0xc58] ss:$292 sps:$4 sm:$0xff]  }
 0x37b   : > { %6879 = vmatprep.subr.bf16.mxu1 %v10497_v13  ;;  %v10518_v13 = vld [vmem:[%s11879_s14 + $0xea4] ss:$292 sps:$4 sm:$0xff]  }
 0x37c   : > { %6839 = vmatpush1.bf16.msra.mxu0 %v10440_v2  ;;  %v10498_v2 = vld [vmem:[%s11879_s14 + $0x7c8] ss:$292 sps:$4 sm:$0xff]  }
 0x37d   : > { %6840 = vmatprep.subr.bf16.mxu0 %v10448_v3 }
 0x37e   : > { %6880 = vmatpush1.bf16.msra.mxu1 %v10495_v16  ;;  %v10516_v16 = vld [vmem:[%s11879_s14 + $0xea0] ss:$292 sps:$4 sm:$0xff]  }
 0x37f   : > { %6881 = vmatprep.subr.bf16.mxu1 %v10503_v17  ;;  %v10524_v17 = vld [vmem:[%s11879_s14 + $0x10ec] ss:$292 sps:$4 sm:$0xff]  }
 0x380   : > { %6841 = vmatpush1.bf16.msra.mxu0 %v10446_v6  ;;  %v10537_v6 = vld [vmem:[%s11879_s14 + $0xf8] ss:$292 sps:$4 sm:$0xff]  }
 0x381   : > { %6842 = vmatprep.subr.bf16.mxu0 %v10454_v7  ;;  %v10543_v7 = vld [vmem:[%s11879_s14 + $0x344] ss:$292 sps:$4 sm:$0xff]  }
 0x382   : > { %6882 = vmatpush1.bf16.msra.mxu1 %v10501_v21  ;;  %v10530_v21 = vld [vmem:[%s11879_s14 + $0x1334] ss:$292 sps:$4 sm:$0xff]  }
 0x383   : > { %6883 = vmatprep.subr.bf16.mxu1 %v10509_v22  ;;  %v10559_v22 = vld [vmem:[%s11879_s14 + $0xa18] ss:$292 sps:$4 sm:$0xff]  }
 0x384   : > { %6843 = vmatpush1.bf16.msra.mxu0 %v10452_v10  ;;  %v10541_v10 = vld [vmem:[%s11879_s14 + $0x340] ss:$292 sps:$4 sm:$0xff]  }
 0x385   : > { %6844 = vmatprep.subr.bf16.mxu0 %v10460_v11  ;;  %v10549_v11 = vld [vmem:[%s11879_s14 + $0x58c] ss:$292 sps:$4 sm:$0xff]  }
 0x386   : > { %6884 = vmatpush1.bf16.msra.mxu1 %v10507_v27  ;;  %v10565_v27 = vld [vmem:[%s11879_s14 + $0xc60] ss:$292 sps:$4 sm:$0xff]  }
 0x387   : > { %6885 = vmatprep.subr.bf16.mxu1 %v10515_v31 }
 0x388   : > { %6845 = vmatpush1.bf16.msra.mxu0 %v10458_v14  ;;  %v10547_v14 = vld [vmem:[%s11879_s14 + $0x588] ss:$292 sps:$4 sm:$0xff]  }
 0x389   : > { %6846 = vmatprep.subr.bf16.mxu0 %v10466_v15  ;;  %v10555_v15 = vld [vmem:[%s11879_s14 + $0x7d4] ss:$292 sps:$4 sm:$0xff]  }
 0x38a   : > { %6886 = vmatpush1.bf16.msra.mxu1 %v10513_v39 }
 0x38b   : > { %6887 = vmatprep.subr.bf16.mxu1 %v10521_v41 }
 0x38c   : > { %6847 = vmatpush1.bf16.msra.mxu0 %v10464_v18  ;;  %v10553_v18 = vld [vmem:[%s11879_s14 + $0x7d0] ss:$292 sps:$4 sm:$0xff]  }
 0x38d   : > { %6848 = vmatprep.subr.bf16.mxu0 %v10470_v19  ;;  %v10561_v19 = vld [vmem:[%s11879_s14 + $0xa1c] ss:$292 sps:$4 sm:$0xff]  }
 0x38e   : > { %v6454_v26 = vpop.f32.mrb[36].mxu0  ;;  %6888 = vmatpush1.bf16.msra.mxu1 %v10519_v45 }
 0x38f   : > { %v6455_v28 = vadd.f32 %v6454_v26, %v12182_v29  ;;  %v6456_v30 = vpop.f32.mrb[37].mxu0  ;;  %6889 = vmatprep.subr.bf16.mxu1 %v10527_v46  ;;  %v1596_v26 = vld [vmem:[%s11879_s14 + $0x17c0] sm:$0x11]  ;;  %v10577_v46 = vld [vmem:[%s11879_s14 + $0x10f0] ss:$292 sps:$4 sm:$0xff]  }
 0x390   : > { %v6457_v32 = vadd.f32 %v6456_v30, %v12182_v29  ;;  %v6458_v33 = vpop.f32.mrb[38].mxu0  ;;  %6849 = vmatpush1.bf16.msra.mxu0 %v10468_v23  ;;  %v6495_v54 = vpop.f32.mrb[36].mxu1  ;;  %v10567_v23 = vld [vmem:[%s11879_s14 + $0xc64] ss:$292 sps:$4 sm:$0xff]   ;;  %v10532_v30 = vld [vmem:[%s11879_s14 + $0x1578] ss:$292 sps:$4 sm:$0xff]   ;;  %v9059_v31 = vcombine.high %v1596_v26, %v1596_v26 }
 0x391   : > { %v7234_v34 = vmax.f32 %v6455_v28, 0.0  ;;  %v6459_v35 = vpop.f32.mrb[39].mxu0  ;;  %9127 = vmatprep.subr.msk.bf16.mxu0 %vm5462_vm1, %v9055_v24  ;;  %v6496_v56 = vadd.f32 %v6495_v54, %v12182_v29  ;;  %v6497_v57 = vpop.f32.mrb[37].mxu1  ;;  %v10528_v24 = vld [vmem:[%s11879_s14 + $0x1330] ss:$292 sps:$4 sm:$0xff]  }
 0x392   : > { %v7235_v38 = vmax.f32 %v6457_v32, 0.0  ;;  %v6498_v58 = vadd.f32 %v6497_v57, %v12182_v29  ;;  %6890 = vmatpush1.bf16.msra.mxu1 %v10525_v50  ;;  %v6499_v59 = vpop.f32.mrb[38].mxu1  ;;  %v10573_v28 = vld [vmem:[%s11879_s14 + $0xeac] ss:$292 sps:$4 sm:$0xff]   ;;  %v9058_v32 = vcombine.low %v1596_v26, %v1596_v26  ;;  %v10586_v26 = vld [vmem:[%s11879_s14 + $0x10f8] ss:$292 sps:$4 sm:$0xff]  }
 0x393   : > { %v7236_v60 = vmax.f32 %v6496_v56, 0.0  ;;  %v6500_v62 = vpop.f32.mrb[39].mxu1  ;;  %9129 = vmatprep.subr.msk.bf16.mxu1 %vm5462_vm1, %v9057_v51  ;;  %v10552_v50 = vld [vmem:[%s11879_s14 + $0x34c] ss:$292 sps:$4 sm:$0xff]   ;;  %v10583_v51 = vld [vmem:[%s11879_s14 + $0x1338] ss:$292 sps:$4 sm:$0xff]  }
 0x394   : > { %v9231_v42 = vpack.c.bf16 %v7235_v38, %v7234_v34  ;;  %6851 = vmatpush1.bf16.msra.mxu0 %v5632_v36  ;;  %v7237_v3 = vmax.f32 %v6498_v58, 0.0  ;;  %v10571_v34 = vld [vmem:[%s11879_s14 + $0xea8] ss:$292 sps:$4 sm:$0xff]   ;;  %v10589_v56 = vld [vmem:[%s11879_s14 + $0x1580] ss:$292 sps:$4 sm:$0xff]  }
 0x395   : > { %6912 = vmatprep.subr.bf16.mxu0 %v10482_v37  ;;  %v10579_v37 = vld [vmem:[%s11879_s14 + $0x10f4] ss:$292 sps:$4 sm:$0xff]   ;;  %v1597_v54 = vld [vmem:[%s11879_s14 + $0x17c8] sm:$0x11]  ;;  %v10564_v62 = vld [vmem:[%s11879_s14 + $0x7dc] ss:$292 sps:$4 sm:$0xff]  }
 0x396   : > { %7582 = vst [vmem:[%s12200_s12 + $0x90] sm:$0xff] %v9231_v42  ;;  %v9232_v5 = vpack.c.bf16 %v7237_v3, %v7236_v60  ;;  %6892 = vmatpush1.bf16.msra.mxu1 %v5638_v0  ;;  %v9061_v57 = vcombine.high %v1597_v54, %v1597_v54  ;;  %v9060_v58 = vcombine.low %v1597_v54, %v1597_v54  ;;  %v10556_v59 = vld [vmem:[%s11879_s14 + $0x590] ss:$292 sps:$4 sm:$0xff]  }
 0x397   : > { %6863 = vmatmul.mubr.bf16.vlgmr.msra.gmra.mrb[56].mxu0 %v11924_v40  ;;  %6953 = vmatprep.subr.bf16.mxu1 %v10539_v1 }
 0x398   : > { %6913 = vmatpush1.bf16.msra.mxu0 %v10480_v43  ;;  %9132 = vmatprep.mubr.msk.bf16.mxu0 %vm5458_vm0, %v11873_v61  ;;  %7583 = vst [vmem:[%s12200_s12 + $0x98] sm:$0xff] %v9232_v5  ;;  %v5644_v43 = vsel %vm5462_vm1, %v9058_v32, 0  ;;  %v10598_v32 = vld [vmem:[%s11879_s14 + $0x158c] ss:$292 sps:$4 sm:$0xff]  }
 0x399   : > { %6914 = vmatprep.subr.bf16.mxu0 %v10488_v44  ;;  %6904 = vmatmul.mubr.bf16.vlgmr.msra.gmra.mrb[56].mxu1 %v11924_v40  ;;  %v10546_v44 = vld [vmem:[%s11879_s14 + $0x104] ss:$292 sps:$4 sm:$0xff]  }
 0x39a   : > { %6954 = vmatpush1.bf16.msra.mxu1 %v10537_v6  ;;  %9134 = vmatprep.mubr.msk.bf16.mxu1 %vm5458_vm0, %v11873_v61  ;;  %v5650_v6 = vsel %vm5462_vm1, %v9060_v58, 0  ;;  %v10655_v58 = vld [vmem:[%s11879_s14 + $0x1594] ss:$292 sps:$4 sm:$0xff]  }
 0x39b   : > { %6955 = vmatprep.subr.bf16.mxu1 %v10543_v7  ;;  %v10603_v7 = vld [vmem:[%s11879_s14 + $0x10c] ss:$292 sps:$4 sm:$0xff]  }
 0x39c   : > { %6915 = vmatpush1.bf16.msra.mxu0 %v10486_v47  ;;  %v10585_v47 = vld [vmem:[%s11879_s14 + $0x133c] ss:$292 sps:$4 sm:$0xff]  }
 0x39d   : > { %6916 = vmatprep.subr.bf16.mxu0 %v10494_v49  ;;  %v10544_v49 = vld [vmem:[%s11879_s14 + $0x100] ss:$292 sps:$4 sm:$0xff]  }
 0x39e   : > { %6956 = vmatpush1.bf16.msra.mxu1 %v10541_v10  ;;  %v10570_v10 = vld [vmem:[%s11879_s14 + $0xa24] ss:$292 sps:$4 sm:$0xff]  }
 0x39f   : > { %6957 = vmatprep.subr.bf16.mxu1 %v10549_v11 }
 0x3a0   : > { %6917 = vmatpush1.bf16.msra.mxu0 %v10492_v53  ;;  %v10550_v53 = vld [vmem:[%s11879_s14 + $0x348] ss:$292 sps:$4 sm:$0xff]  }
 0x3a1   : > { %6918 = vmatprep.subr.bf16.mxu0 %v10500_v55  ;;  %v10558_v55 = vld [vmem:[%s11879_s14 + $0x594] ss:$292 sps:$4 sm:$0xff]  }
 0x3a2   : > { %6958 = vmatpush1.bf16.msra.mxu1 %v10547_v14  ;;  %v10568_v14 = vld [vmem:[%s11879_s14 + $0xa20] ss:$292 sps:$4 sm:$0xff]  }
 0x3a3   : > { %6959 = vmatprep.subr.bf16.mxu1 %v10555_v15  ;;  %v10576_v15 = vld [vmem:[%s11879_s14 + $0xc6c] ss:$292 sps:$4 sm:$0xff]  }
 0x3a4   : > { %6919 = vmatpush1.bf16.msra.mxu0 %v10498_v2 }
 0x3a5   : > { %6920 = vmatprep.subr.bf16.mxu0 %v10506_v4 }
 0x3a6   : > { %6960 = vmatpush1.bf16.msra.mxu1 %v10553_v18  ;;  %v10574_v18 = vld [vmem:[%s11879_s14 + $0xc68] ss:$292 sps:$4 sm:$0xff]  }
 0x3a7   : > { %6961 = vmatprep.subr.bf16.mxu1 %v10561_v19  ;;  %v10582_v19 = vld [vmem:[%s11879_s14 + $0xeb4] ss:$292 sps:$4 sm:$0xff]  }
 0x3a8   : > { %6921 = vmatpush1.bf16.msra.mxu0 %v10504_v8  ;;  %v10562_v8 = vld [vmem:[%s11879_s14 + $0x7d8] ss:$292 sps:$4 sm:$0xff]  }
 0x3a9   : > { %6922 = vmatprep.subr.bf16.mxu0 %v10512_v9 }
 0x3aa   : > { %6962 = vmatpush1.bf16.msra.mxu1 %v10559_v22  ;;  %v10580_v22 = vld [vmem:[%s11879_s14 + $0xeb0] ss:$292 sps:$4 sm:$0xff]  }
 0x3ab   : > { %6963 = vmatprep.subr.bf16.mxu1 %v10567_v23  ;;  %v10588_v23 = vld [vmem:[%s11879_s14 + $0x10fc] ss:$292 sps:$4 sm:$0xff]  }
 0x3ac   : > { %6923 = vmatpush1.bf16.msra.mxu0 %v10510_v12  ;;  %v10601_v12 = vld [vmem:[%s11879_s14 + $0x108] ss:$292 sps:$4 sm:$0xff]  }
 0x3ad   : > { %6924 = vmatprep.subr.bf16.mxu0 %v10518_v13  ;;  %v10607_v13 = vld [vmem:[%s11879_s14 + $0x354] ss:$292 sps:$4 sm:$0xff]  }
 0x3ae   : > { %6964 = vmatpush1.bf16.msra.mxu1 %v10565_v27  ;;  %v10594_v27 = vld [vmem:[%s11879_s14 + $0x1344] ss:$292 sps:$4 sm:$0xff]  }
 0x3af   : > { %6965 = vmatprep.subr.bf16.mxu1 %v10573_v28  ;;  %v10623_v28 = vld [vmem:[%s11879_s14 + $0xa28] ss:$292 sps:$4 sm:$0xff]  }
 0x3b0   : > { %6925 = vmatpush1.bf16.msra.mxu0 %v10516_v16  ;;  %v10605_v16 = vld [vmem:[%s11879_s14 + $0x350] ss:$292 sps:$4 sm:$0xff]  }
 0x3b1   : > { %6926 = vmatprep.subr.bf16.mxu0 %v10524_v17  ;;  %v10613_v17 = vld [vmem:[%s11879_s14 + $0x59c] ss:$292 sps:$4 sm:$0xff]  }
 0x3b2   : > { %6966 = vmatpush1.bf16.msra.mxu1 %v10571_v34  ;;  %v10629_v34 = vld [vmem:[%s11879_s14 + $0xc70] ss:$292 sps:$4 sm:$0xff]  }
 0x3b3   : > { %6967 = vmatprep.subr.bf16.mxu1 %v10579_v37 }
 0x3b4   : > { %6927 = vmatpush1.bf16.msra.mxu0 %v10522_v20  ;;  %v10611_v20 = vld [vmem:[%s11879_s14 + $0x598] ss:$292 sps:$4 sm:$0xff]  }
 0x3b5   : > { %6928 = vmatprep.subr.bf16.mxu0 %v10530_v21  ;;  %v10619_v21 = vld [vmem:[%s11879_s14 + $0x7e4] ss:$292 sps:$4 sm:$0xff]  }
 0x3b6   : > { %6968 = vmatpush1.bf16.msra.mxu1 %v10577_v46 }
 0x3b7   : > { %6969 = vmatprep.subr.bf16.mxu1 %v10585_v47 }
 0x3b8   : > { %6929 = vmatpush1.bf16.msra.mxu0 %v10528_v24  ;;  %v10617_v24 = vld [vmem:[%s11879_s14 + $0x7e0] ss:$292 sps:$4 sm:$0xff]  }
 0x3b9   : > { %6930 = vmatprep.subr.bf16.mxu0 %v10534_v25  ;;  %v10625_v25 = vld [vmem:[%s11879_s14 + $0xa2c] ss:$292 sps:$4 sm:$0xff]  }
 0x3ba   : > { %v6536_v33 = vpop.f32.mrb[40].mxu0  ;;  %6970 = vmatpush1.bf16.msra.mxu1 %v10583_v51 }
 0x3bb   : > { %v6537_v35 = vadd.f32 %v6536_v33, %v12182_v29  ;;  %v6538_v36 = vpop.f32.mrb[41].mxu0  ;;  %6971 = vmatprep.subr.bf16.mxu1 %v10591_v52  ;;  %v1598_v33 = vld [vmem:[%s11879_s14 + $0x17d0] sm:$0x11]  ;;  %v10641_v52 = vld [vmem:[%s11879_s14 + $0x1100] ss:$292 sps:$4 sm:$0xff]  }
 0x3bc   : > { %v6539_v38 = vadd.f32 %v6538_v36, %v12182_v29  ;;  %v6540_v39 = vpop.f32.mrb[42].mxu0  ;;  %6931 = vmatpush1.bf16.msra.mxu0 %v10532_v30  ;;  %v6577_v60 = vpop.f32.mrb[40].mxu1  ;;  %v10631_v30 = vld [vmem:[%s11879_s14 + $0xc74] ss:$292 sps:$4 sm:$0xff]   ;;  %v10596_v36 = vld [vmem:[%s11879_s14 + $0x1588] ss:$292 sps:$4 sm:$0xff]   ;;  %v9063_v37 = vcombine.high %v1598_v33, %v1598_v33 }
 0x3bd   : > { %v7238_v41 = vmax.f32 %v6537_v35, 0.0  ;;  %v6541_v42 = vpop.f32.mrb[43].mxu0  ;;  %9131 = vmatprep.subr.msk.bf16.mxu0 %vm5462_vm1, %v9059_v31  ;;  %v6578_v0 = vadd.f32 %v6577_v60, %v12182_v29  ;;  %v6579_v1 = vpop.f32.mrb[41].mxu1  ;;  %v10592_v31 = vld [vmem:[%s11879_s14 + $0x1340] ss:$292 sps:$4 sm:$0xff]  }
 0x3be   : > { %v7239_v45 = vmax.f32 %v6539_v38, 0.0  ;;  %v6580_v2 = vadd.f32 %v6579_v1, %v12182_v29  ;;  %6972 = vmatpush1.bf16.msra.mxu1 %v10589_v56  ;;  %v6581_v3 = vpop.f32.mrb[42].mxu1  ;;  %v10637_v35 = vld [vmem:[%s11879_s14 + $0xebc] ss:$292 sps:$4 sm:$0xff]   ;;  %v9062_v38 = vcombine.low %v1598_v33, %v1598_v33  ;;  %v10650_v33 = vld [vmem:[%s11879_s14 + $0x1108] ss:$292 sps:$4 sm:$0xff]  }
 0x3bf   : > { %v7240_v4 = vmax.f32 %v6578_v0, 0.0  ;;  %v6582_v5 = vpop.f32.mrb[43].mxu1  ;;  %9133 = vmatprep.subr.msk.bf16.mxu1 %vm5462_vm1, %v9061_v57  ;;  %v10616_v56 = vld [vmem:[%s11879_s14 + $0x35c] ss:$292 sps:$4 sm:$0xff]   ;;  %v10647_v57 = vld [vmem:[%s11879_s14 + $0x1348] ss:$292 sps:$4 sm:$0xff]  }
 0x3c0   : > { %v9233_v48 = vpack.c.bf16 %v7239_v45, %v7238_v41  ;;  %6933 = vmatpush1.bf16.msra.mxu0 %v5644_v43  ;;  %v7241_v9 = vmax.f32 %v6580_v2, 0.0  ;;  %v10635_v41 = vld [vmem:[%s11879_s14 + $0xeb8] ss:$292 sps:$4 sm:$0xff]   ;;  %v10653_v0 = vld [vmem:[%s11879_s14 + $0x1590] ss:$292 sps:$4 sm:$0xff]  }
 0x3c1   : > { %6994 = vmatprep.subr.bf16.mxu0 %v10546_v44  ;;  %v10643_v44 = vld [vmem:[%s11879_s14 + $0x1104] ss:$292 sps:$4 sm:$0xff]   ;;  %v1599_v60 = vld [vmem:[%s11879_s14 + $0x17d8] sm:$0x11]  ;;  %v10628_v5 = vld [vmem:[%s11879_s14 + $0x7ec] ss:$292 sps:$4 sm:$0xff]  }
 0x3c2   : > { %7584 = vst [vmem:[%s12200_s12 + $0xa0] sm:$0xff] %v9233_v48  ;;  %v9234_v11 = vpack.c.bf16 %v7241_v9, %v7240_v4  ;;  %6974 = vmatpush1.bf16.msra.mxu1 %v5650_v6  ;;  %v9065_v1 = vcombine.high %v1599_v60, %v1599_v60  ;;  %v9064_v2 = vcombine.low %v1599_v60, %v1599_v60  ;;  %v10620_v3 = vld [vmem:[%s11879_s14 + $0x5a0] ss:$292 sps:$4 sm:$0xff]  }
 0x3c3   : > { %6945 = vmatmul.mubr.bf16.vlgmr.msra.gmra.mrb[60].mxu0 %v11924_v40  ;;  %7035 = vmatprep.subr.bf16.mxu1 %v10603_v7  ;;  %v10672_v60 = vld [vmem:[%s11879_s14 + $0x120] ss:$292 sps:$4 sm:$0xff]  }
 0x3c4   : > { %6995 = vmatpush1.bf16.msra.mxu0 %v10544_v49  ;;  %9136 = vmatprep.mubr.msk.bf16.mxu0 %vm5458_vm0, %v11873_v61  ;;  %7585 = vst [vmem:[%s12200_s12 + $0xa8] sm:$0xff] %v9234_v11  ;;  %v5656_v49 = vsel %vm5462_vm1, %v9062_v38, 0  ;;  %v10662_v38 = vld [vmem:[%s11879_s14 + $0x159c] ss:$292 sps:$4 sm:$0xff]  }
 0x3c5   : > { %6996 = vmatprep.subr.bf16.mxu0 %v10552_v50  ;;  %6986 = vmatmul.mubr.bf16.vlgmr.msra.gmra.mrb[60].mxu1 %v11924_v40  ;;  %v10610_v50 = vld [vmem:[%s11879_s14 + $0x114] ss:$292 sps:$4 sm:$0xff]  }
 0x3c6   : > { %7036 = vmatpush1.bf16.msra.mxu1 %v10601_v12  ;;  %9138 = vmatprep.mubr.msk.bf16.mxu1 %vm5458_vm0, %v11873_v61  ;;  %v5662_v12 = vsel %vm5462_vm1, %v9064_v2, 0  ;;  %v1601_v2 = vld [vmem:[%s11879_s14 + $0x17e8] sm:$0x11] }
 0x3c7   : > { %7037 = vmatprep.subr.bf16.mxu1 %v10607_v13  ;;  %v10667_v13 = vld [vmem:[%s11879_s14 + $0x11c] ss:$292 sps:$4 sm:$0xff]  }
 0x3c8   : > { %6997 = vmatpush1.bf16.msra.mxu0 %v10550_v53  ;;  %v10649_v53 = vld [vmem:[%s11879_s14 + $0x134c] ss:$292 sps:$4 sm:$0xff]  }
 0x3c9   : > { %6998 = vmatprep.subr.bf16.mxu0 %v10558_v55  ;;  %v10608_v55 = vld [vmem:[%s11879_s14 + $0x110] ss:$292 sps:$4 sm:$0xff]  }
 0x3ca   : > { %7038 = vmatpush1.bf16.msra.mxu1 %v10605_v16  ;;  %v10634_v16 = vld [vmem:[%s11879_s14 + $0xa34] ss:$292 sps:$4 sm:$0xff]  }
 0x3cb   : > { %7039 = vmatprep.subr.bf16.mxu1 %v10613_v17 }
 0x3cc   : > { %6999 = vmatpush1.bf16.msra.mxu0 %v10556_v59  ;;  %v10614_v59 = vld [vmem:[%s11879_s14 + $0x358] ss:$292 sps:$4 sm:$0xff]  }
 0x3cd   : > { %7000 = vmatprep.subr.bf16.mxu0 %v10564_v62  ;;  %v10622_v62 = vld [vmem:[%s11879_s14 + $0x5a4] ss:$292 sps:$4 sm:$0xff]  }
 0x3ce   : > { %7040 = vmatpush1.bf16.msra.mxu1 %v10611_v20  ;;  %v10632_v20 = vld [vmem:[%s11879_s14 + $0xa30] ss:$292 sps:$4 sm:$0xff]  }
 0x3cf   : > { %7041 = vmatprep.subr.bf16.mxu1 %v10619_v21  ;;  %v10640_v21 = vld [vmem:[%s11879_s14 + $0xc7c] ss:$292 sps:$4 sm:$0xff]  }
 0x3d0   : > { %7001 = vmatpush1.bf16.msra.mxu0 %v10562_v8 }
 0x3d1   : > { %7002 = vmatprep.subr.bf16.mxu0 %v10570_v10 }
 0x3d2   : > { %7042 = vmatpush1.bf16.msra.mxu1 %v10617_v24  ;;  %v10638_v24 = vld [vmem:[%s11879_s14 + $0xc78] ss:$292 sps:$4 sm:$0xff]  }
 0x3d3   : > { %7043 = vmatprep.subr.bf16.mxu1 %v10625_v25  ;;  %v10646_v25 = vld [vmem:[%s11879_s14 + $0xec4] ss:$292 sps:$4 sm:$0xff]  }
 0x3d4   : > { %7003 = vmatpush1.bf16.msra.mxu0 %v10568_v14  ;;  %v10626_v14 = vld [vmem:[%s11879_s14 + $0x7e8] ss:$292 sps:$4 sm:$0xff]  }
 0x3d5   : > { %7004 = vmatprep.subr.bf16.mxu0 %v10576_v15 }
 0x3d6   : > { %7044 = vmatpush1.bf16.msra.mxu1 %v10623_v28  ;;  %v10644_v28 = vld [vmem:[%s11879_s14 + $0xec0] ss:$292 sps:$4 sm:$0xff]  }
 0x3d7   : > { %7045 = vmatprep.subr.bf16.mxu1 %v10631_v30  ;;  %v10652_v30 = vld [vmem:[%s11879_s14 + $0x110c] ss:$292 sps:$4 sm:$0xff]  }
 0x3d8   : > { %7005 = vmatpush1.bf16.msra.mxu0 %v10574_v18  ;;  %v10665_v18 = vld [vmem:[%s11879_s14 + $0x118] ss:$292 sps:$4 sm:$0xff]  }
 0x3d9   : > { %7006 = vmatprep.subr.bf16.mxu0 %v10582_v19  ;;  %v10671_v19 = vld [vmem:[%s11879_s14 + $0x364] ss:$292 sps:$4 sm:$0xff]  }
 0x3da   : > { %7046 = vmatpush1.bf16.msra.mxu1 %v10629_v34  ;;  %v10658_v34 = vld [vmem:[%s11879_s14 + $0x1354] ss:$292 sps:$4 sm:$0xff]  }
 0x3db   : > { %7047 = vmatprep.subr.bf16.mxu1 %v10637_v35  ;;  %v10681_v35 = vld [vmem:[%s11879_s14 + $0xa38] ss:$292 sps:$4 sm:$0xff]  }
 0x3dc   : > { %7007 = vmatpush1.bf16.msra.mxu0 %v10580_v22  ;;  %v10669_v22 = vld [vmem:[%s11879_s14 + $0x360] ss:$292 sps:$4 sm:$0xff]  }
 0x3dd   : > { %7008 = vmatprep.subr.bf16.mxu0 %v10588_v23  ;;  %v10675_v23 = vld [vmem:[%s11879_s14 + $0x5ac] ss:$292 sps:$4 sm:$0xff]  }
 0x3de   : > { %7048 = vmatpush1.bf16.msra.mxu1 %v10635_v41  ;;  %v10685_v41 = vld [vmem:[%s11879_s14 + $0xc80] ss:$292 sps:$4 sm:$0xff]  }
 0x3df   : > { %7049 = vmatprep.subr.bf16.mxu1 %v10643_v44 }
 0x3e0   : > { %7009 = vmatpush1.bf16.msra.mxu0 %v10586_v26  ;;  %v10673_v26 = vld [vmem:[%s11879_s14 + $0x5a8] ss:$292 sps:$4 sm:$0xff]  }
 0x3e1   : > { %7010 = vmatprep.subr.bf16.mxu0 %v10594_v27  ;;  %v10679_v27 = vld [vmem:[%s11879_s14 + $0x7f4] ss:$292 sps:$4 sm:$0xff]  }
 0x3e2   : > { %7050 = vmatpush1.bf16.msra.mxu1 %v10641_v52 }
 0x3e3   : > { %7051 = vmatprep.subr.bf16.mxu1 %v10649_v53 }
 0x3e4   : > { %7011 = vmatpush1.bf16.msra.mxu0 %v10592_v31  ;;  %v10677_v31 = vld [vmem:[%s11879_s14 + $0x7f0] ss:$292 sps:$4 sm:$0xff]  }
 0x3e5   : > { %7012 = vmatprep.subr.bf16.mxu0 %v10598_v32  ;;  %v10683_v32 = vld [vmem:[%s11879_s14 + $0xa3c] ss:$292 sps:$4 sm:$0xff]  }
 0x3e6   : > { %v6618_v39 = vpop.f32.mrb[44].mxu0  ;;  %7052 = vmatpush1.bf16.msra.mxu1 %v10647_v57  ;;  %v10693_v57 = vld [vmem:[%s11879_s14 + $0x1110] ss:$292 sps:$4 sm:$0xff]  }
 0x3e7   : > { %v6619_v42 = vadd.f32 %v6618_v39, %v12182_v29  ;;  %v6620_v43 = vpop.f32.mrb[45].mxu0  ;;  %7053 = vmatprep.subr.bf16.mxu1 %v10655_v58  ;;  %v1600_v39 = vld [vmem:[%s11879_s14 + $0x17e0] sm:$0x11] }
 0x3e8   : > { %v6621_v45 = vadd.f32 %v6620_v43, %v12182_v29  ;;  %v6622_v46 = vpop.f32.mrb[46].mxu0  ;;  %7013 = vmatpush1.bf16.msra.mxu0 %v10596_v36  ;;  %v6659_v4 = vpop.f32.mrb[44].mxu1  ;;  %v10687_v36 = vld [vmem:[%s11879_s14 + $0xc84] ss:$292 sps:$4 sm:$0xff]   ;;  %v10660_v43 = vld [vmem:[%s11879_s14 + $0x1598] ss:$292 sps:$4 sm:$0xff]   ;;  %v9067_v44 = vcombine.high %v1600_v39, %v1600_v39 }
 0x3e9   : > { %v7242_v47 = vmax.f32 %v6619_v42, 0.0  ;;  %v6623_v48 = vpop.f32.mrb[47].mxu0  ;;  %9135 = vmatprep.subr.msk.bf16.mxu0 %vm5462_vm1, %v9063_v37  ;;  %v6660_v6 = vadd.f32 %v6659_v4, %v12182_v29  ;;  %v6661_v7 = vpop.f32.mrb[45].mxu1  ;;  %v10656_v37 = vld [vmem:[%s11879_s14 + $0x1350] ss:$292 sps:$4 sm:$0xff]   ;;  %v9069_v4 = vcombine.high %v1601_v2, %v1601_v2 }
 0x3ea   : > { %v7243_v51 = vmax.f32 %v6621_v45, 0.0  ;;  %v6662_v8 = vadd.f32 %v6661_v7, %v12182_v29  ;;  %7054 = vmatpush1.bf16.msra.mxu1 %v10653_v0  ;;  %v6663_v9 = vpop.f32.mrb[46].mxu1  ;;  %v10691_v42 = vld [vmem:[%s11879_s14 + $0xecc] ss:$292 sps:$4 sm:$0xff]   ;;  %v9066_v45 = vcombine.low %v1600_v39, %v1600_v39  ;;  %v10699_v58 = vld [vmem:[%s11879_s14 + $0x135c] ss:$292 sps:$4 sm:$0xff]  }
 0x3eb   : > { %v7244_v10 = vmax.f32 %v6660_v6, 0.0  ;;  %v6664_v11 = vpop.f32.mrb[47].mxu1  ;;  %9137 = vmatprep.subr.msk.bf16.mxu1 %vm5462_vm1, %v9065_v1  ;;  %v10703_v0 = vld [vmem:[%s11879_s14 + $0x15a4] ss:$292 sps:$4 sm:$0xff]   ;;  %v10680_v6 = vld [vmem:[%s11879_s14 + $0x5b0] ss:$292 sps:$4 sm:$0xff]  }
 0x3ec   : > { %v9235_v54 = vpack.c.bf16 %v7243_v51, %v7242_v47  ;;  %7015 = vmatpush1.bf16.msra.mxu0 %v5656_v49  ;;  %v7245_v15 = vmax.f32 %v6662_v8, 0.0  ;;  %v10689_v47 = vld [vmem:[%s11879_s14 + $0xec8] ss:$292 sps:$4 sm:$0xff]  }
 0x3ed   : > { %7076 = vmatprep.subr.bf16.mxu0 %v10610_v50  ;;  %v10695_v50 = vld [vmem:[%s11879_s14 + $0x1114] ss:$292 sps:$4 sm:$0xff]   ;;  %v10676_v1 = vld [vmem:[%s11879_s14 + $0x368] ss:$292 sps:$4 sm:$0xff]  }
 0x3ee   : > { %7586 = vst [vmem:[%s12200_s12 + $0xb0] sm:$0xff] %v9235_v54  ;;  %v9236_v17 = vpack.c.bf16 %v7245_v15, %v7244_v10  ;;  %7056 = vmatpush1.bf16.msra.mxu1 %v5662_v12 }
 0x3ef   : > { %7027 = vmatmul.mubr.bf16.vlgmr.msra.gmra.mrb[64].mxu0 %v11924_v40  ;;  %7117 = vmatprep.subr.bf16.mxu1 %v10667_v13 }
 0x3f0   : > { %7077 = vmatpush1.bf16.msra.mxu0 %v10608_v55  ;;  %9140 = vmatprep.mubr.msk.bf16.mxu0 %vm5458_vm0, %v11873_v61  ;;  %7587 = vst [vmem:[%s12200_s12 + $0xb8] sm:$0xff] %v9236_v17  ;;  %v5668_v55 = vsel %vm5462_vm1, %v9066_v45, 0  ;;  %v10688_v17 = vld [vmem:[%s11879_s14 + $0xa40] ss:$292 sps:$4 sm:$0xff]  }
 0x3f1   : > { %7078 = vmatprep.subr.bf16.mxu0 %v10616_v56  ;;  %7068 = vmatmul.mubr.bf16.vlgmr.msra.gmra.mrb[64].mxu1 %v11924_v40 }
 0x3f2   : > { %7118 = vmatpush1.bf16.msra.mxu1 %v10665_v18  ;;  %9142 = vmatprep.mubr.msk.bf16.mxu1 %vm5458_vm0, %v11873_v61  ;;  %v10692_v18 = vld [vmem:[%s11879_s14 + $0xc88] ss:$292 sps:$4 sm:$0xff]  }
 0x3f3   : > { %7119 = vmatprep.subr.bf16.mxu1 %v10671_v19  ;;  %v10696_v19 = vld [vmem:[%s11879_s14 + $0xed0] ss:$292 sps:$4 sm:$0xff]  }
 0x3f4   : > { %7079 = vmatpush1.bf16.msra.mxu0 %v10614_v59 }
 0x3f5   : > { %7080 = vmatprep.subr.bf16.mxu0 %v10622_v62  ;;  %v10697_v62 = vld [vmem:[%s11879_s14 + $0x1358] ss:$292 sps:$4 sm:$0xff]  }
 0x3f6   : > { %7120 = vmatpush1.bf16.msra.mxu1 %v10669_v22  ;;  %v10707_v22 = vld [vmem:[%s11879_s14 + $0x15a8] ss:$292 sps:$4 sm:$0xff]  }
 0x3f7   : > { %7121 = vmatprep.subr.bf16.mxu1 %v10675_v23  ;;  %v10708_v23 = vld [vmem:[%s11879_s14 + $0x17f0] ss:$0 sps:$4 sm:$0x11]  }
 0x3f8   : > { %7081 = vmatpush1.bf16.msra.mxu0 %v10620_v3  ;;  %v10701_v3 = vld [vmem:[%s11879_s14 + $0x15a0] ss:$292 sps:$4 sm:$0xff]  }
 0x3f9   : > { %7082 = vmatprep.subr.bf16.mxu0 %v10628_v5  ;;  %v9068_v5 = vcombine.low %v1601_v2, %v1601_v2 }
 0x3fa   : > { %7122 = vmatpush1.bf16.msra.mxu1 %v10673_v26 }
 0x3fb   : > { %7123 = vmatprep.subr.bf16.mxu1 %v10679_v27  ;;  %v5674_v13 = vsel %vm5462_vm1, %v9068_v5, 0 }
 0x3fc   : > { %7083 = vmatpush1.bf16.msra.mxu0 %v10626_v14  ;;  %v10684_v14 = vld [vmem:[%s11879_s14 + $0x7f8] ss:$292 sps:$4 sm:$0xff]  }
 0x3fd   : > { %7084 = vmatprep.subr.bf16.mxu0 %v10634_v16 }
 0x3fe   : > { %7124 = vmatpush1.bf16.msra.mxu1 %v10677_v31 }
 0x3ff   : > { %7125 = vmatprep.subr.bf16.mxu1 %v10683_v32  ;;  %v5680_v32 = vsel %vm5462_vm1, %v10708_v23, 0 }
 0x400   : > { %7085 = vmatpush1.bf16.msra.mxu0 %v10632_v20  ;;  %v10700_v20 = vld [vmem:[%s11879_s14 + $0x1118] ss:$292 sps:$4 sm:$0xff]  }
 0x401   : > { %7086 = vmatprep.subr.bf16.mxu0 %v10640_v21  ;;  %v10704_v21 = vld [vmem:[%s11879_s14 + $0x1360] ss:$292 sps:$4 sm:$0xff]  }
 0x402   : > { %7126 = vmatpush1.bf16.msra.mxu1 %v10681_v35 }
 0x403   : > { %7127 = vmatprep.subr.bf16.mxu1 %v10687_v36 }
 0x404   : > { %7087 = vmatpush1.bf16.msra.mxu0 %v10638_v24 }
 0x405   : > { %7088 = vmatprep.subr.bf16.mxu0 %v10646_v25 }
 0x406   : > { %7128 = vmatpush1.bf16.msra.mxu1 %v10685_v41 }
 0x407   : > { %7129 = vmatprep.subr.bf16.mxu1 %v10691_v42 }
 0x408   : > { %7089 = vmatpush1.bf16.msra.mxu0 %v10644_v28 }
 0x409   : > { %7090 = vmatprep.subr.bf16.mxu0 %v10652_v30 }
 0x40a   : > { %7130 = vmatpush1.bf16.msra.mxu1 %v10689_v47 }
 0x40b   : > { %7131 = vmatprep.subr.bf16.mxu1 %v10695_v50 }
 0x40c   : > { %7091 = vmatpush1.bf16.msra.mxu0 %v10650_v33 }
 0x40d   : > { %7092 = vmatprep.subr.bf16.mxu0 %v10658_v34 }
 0x40e   : > { %7132 = vmatpush1.bf16.msra.mxu1 %v10693_v57 }
 0x40f   : > { %7133 = vmatprep.subr.bf16.mxu1 %v10699_v58 }
 0x410   : > { %7093 = vmatpush1.bf16.msra.mxu0 %v10656_v37 }
 0x411   : > { %7094 = vmatprep.subr.bf16.mxu0 %v10662_v38 }
 0x412   : > { %v6700_v46 = vpop.f32.mrb[48].mxu0  ;;  %7134 = vmatpush1.bf16.msra.mxu1 %v10697_v62 }
 0x413   : > { %v6701_v48 = vadd.f32 %v6700_v46, %v12182_v29  ;;  %v6702_v49 = vpop.f32.mrb[49].mxu0  ;;  %7135 = vmatprep.subr.bf16.mxu1 %v10703_v0 }
 0x414   : > { %v6703_v51 = vadd.f32 %v6702_v49, %v12182_v29  ;;  %v6704_v52 = vpop.f32.mrb[50].mxu0  ;;  %7095 = vmatpush1.bf16.msra.mxu0 %v10660_v43  ;;  %v6741_v7 = vpop.f32.mrb[48].mxu1 }
 0x415   : > { %v7246_v53 = vmax.f32 %v6701_v48, 0.0  ;;  %v6705_v54 = vpop.f32.mrb[51].mxu0  ;;  %9139 = vmatprep.subr.msk.bf16.mxu0 %vm5462_vm1, %v9067_v44  ;;  %v6742_v8 = vadd.f32 %v6741_v7, %v12182_v29  ;;  %v6743_v9 = vpop.f32.mrb[49].mxu1 }
 0x416   : > { %v7247_v56 = vmax.f32 %v6703_v51, 0.0  ;;  %7136 = vmatpush1.bf16.msra.mxu1 %v10701_v3  ;;  %v6745_v10 = vpop.f32.mrb[50].mxu1 }
 0x417   : > { %v7248_v11 = vmax.f32 %v6742_v8, 0.0  ;;  %v6746_v12 = vpop.f32.mrb[51].mxu1  ;;  %9141 = vmatprep.subr.msk.bf16.mxu1 %vm5462_vm1, %v9069_v4 }
 0x418   : > { %v9237_v59 = vpack.c.bf16 %v7247_v56, %v7246_v53  ;;  %7097 = vmatpush1.bf16.msra.mxu0 %v5668_v55 }
 0x419   : > { %7158 = vmatprep.subr.bf16.mxu0 %v10991_v63 }
 0x41a   : > { %7588 = vst [vmem:[%s12200_s12 + $0xc0] sm:$0xff] %v9237_v59  ;;  %7138 = vmatpush1.bf16.msra.mxu1 %v5674_v13 }
 0x41b   : > { %7109 = vmatmul.mubr.bf16.vlgmr.msra.gmra.mrb[68].mxu0 %v11924_v40 }
 0x41c   : > { %7159 = vmatpush1.bf16.msra.mxu0 %v10672_v60  ;;  %9143 = vmatprep.mubr.msk.bf16.mxu0 %vm5458_vm0, %v11873_v61  ;;  %v6744_v61 = vadd.f32 %v6743_v9, %v12182_v29 }
 0x41d   : > { %7160 = vmatprep.subr.bf16.mxu0 %v10991_v63  ;;  %7150 = vmatmul.mubr.bf16.vlgmr.msra.gmra.mrb[68].mxu1 %v11924_v40 }
 0x41e   : > { %v7249_v15 = vmax.f32 %v6744_v61, 0.0 }
 0x420   : > { %7161 = vmatpush1.bf16.msra.mxu0 %v10676_v1  ;;  %v9238_v16 = vpack.c.bf16 %v7249_v15, %v7248_v11 }
 0x421   : > { %7162 = vmatprep.subr.bf16.mxu0 %v10991_v63 }
 0x422   : > { %7589 = vst [vmem:[%s12200_s12 + $0xc8] sm:$0xff] %v9238_v16 }
 0x424   : > { %7163 = vmatpush1.bf16.msra.mxu0 %v10680_v6 }
 0x425   : > { %7164 = vmatprep.subr.bf16.mxu0 %v10991_v63 }
 0x428   : > { %7165 = vmatpush1.bf16.msra.mxu0 %v10684_v14 }
 0x429   : > { %7166 = vmatprep.subr.bf16.mxu0 %v10991_v63 }
 0x42c   : > { %7167 = vmatpush1.bf16.msra.mxu0 %v10688_v17 }
 0x42d   : > { %7168 = vmatprep.subr.bf16.mxu0 %v10991_v63 }
 0x430   : > { %7169 = vmatpush1.bf16.msra.mxu0 %v10692_v18 }
 0x431   : > { %7170 = vmatprep.subr.bf16.mxu0 %v10991_v63 }
 0x434   : > { %7171 = vmatpush1.bf16.msra.mxu0 %v10696_v19 }
 0x435   : > { %7172 = vmatprep.subr.bf16.mxu0 %v10991_v63 }
 0x438   : > { %7173 = vmatpush1.bf16.msra.mxu0 %v10700_v20 }
 0x439   : > { %7174 = vmatprep.subr.bf16.mxu0 %v10991_v63 }
 0x43c   : > { %7175 = vmatpush1.bf16.msra.mxu0 %v10704_v21 }
 0x43d   : > { %7176 = vmatprep.subr.bf16.mxu0 %v10991_v63 }
 0x43e   : > { %v6782_v24 = vpop.f32.mrb[52].mxu0 }
 0x43f   : > { %v6783_v25 = vadd.f32 %v6782_v24, %v12182_v29  ;;  %v6784_v26 = vpop.f32.mrb[53].mxu0 }
 0x440   : > { %v6785_v27 = vadd.f32 %v6784_v26, %v12182_v29  ;;  %v6786_v28 = vpop.f32.mrb[54].mxu0  ;;  %7177 = vmatpush1.bf16.msra.mxu0 %v10707_v22  ;;  %v6823_v35 = vpop.f32.mrb[52].mxu1 }
 0x441   : > { %v7250_v30 = vmax.f32 %v6783_v25, 0.0  ;;  %v6787_v31 = vpop.f32.mrb[55].mxu0  ;;  %7178 = vmatprep.subr.bf16.mxu0 %v10991_v63  ;;  %v6824_v36 = vadd.f32 %v6823_v35, %v12182_v29  ;;  %v6825_v37 = vpop.f32.mrb[53].mxu1 }
 0x442   : > { %v7251_v33 = vmax.f32 %v6785_v27, 0.0  ;;  %v6826_v38 = vadd.f32 %v6825_v37, %v12182_v29  ;;  %v6827_v39 = vpop.f32.mrb[54].mxu1 }
 0x443   : > { %v7252_v41 = vmax.f32 %v6824_v36, 0.0  ;;  %v6828_v42 = vpop.f32.mrb[55].mxu1 }
 0x444   : > { %v9239_v34 = vpack.c.bf16 %v7251_v33, %v7250_v30  ;;  %7179 = vmatpush1.bf16.msra.mxu0 %v5680_v32  ;;  %v7253_v63 = vmax.f32 %v6826_v38, 0.0 }
 0x446   : > { %7590 = vst [vmem:[%s12200_s12 + $0xd0] sm:$0xff] %v9239_v34  ;;  %v9240_v43 = vpack.c.bf16 %v7253_v63, %v7252_v41 }
 0x447   : > { %7191 = vmatmul.mubr.bf16.vlgmr.msra.gmra.mrb[72].mxu0 %v11924_v40 }
 0x448   : > { %7591 = vst [vmem:[%s12200_s12 + $0xd8] sm:$0xff] %v9240_v43 }
 0x46a   : > { %v6864_v44 = vpop.f32.mrb[56].mxu0 }
 0x46b   : > { %v6865_v45 = vadd.f32 %v6864_v44, %v12182_v29  ;;  %v6866_v46 = vpop.f32.mrb[57].mxu0 }
 0x46c   : > { %v6867_v47 = vadd.f32 %v6866_v46, %v12182_v29  ;;  %v6868_v40 = vpop.f32.mrb[58].mxu0  ;;  %v6905_v52 = vpop.f32.mrb[56].mxu1 }
 0x46d   : > { %v7254_v48 = vmax.f32 %v6865_v45, 0.0  ;;  %v6869_v49 = vpop.f32.mrb[59].mxu0  ;;  %v6906_v53 = vadd.f32 %v6905_v52, %v12182_v29  ;;  %v6907_v54 = vpop.f32.mrb[57].mxu1 }
 0x46e   : > { %v7255_v50 = vmax.f32 %v6867_v47, 0.0  ;;  %v6908_v55 = vadd.f32 %v6907_v54, %v12182_v29  ;;  %v6909_v56 = vpop.f32.mrb[58].mxu1 }
 0x46f   : > { %v7256_v57 = vmax.f32 %v6906_v53, 0.0  ;;  %v6910_v58 = vpop.f32.mrb[59].mxu1 }
 0x470   : > { %v9241_v51 = vpack.c.bf16 %v7255_v50, %v7254_v48  ;;  %v7257_v59 = vmax.f32 %v6908_v55, 0.0 }
 0x472   : > { %7592 = vst [vmem:[%s12200_s12 + $0xe0] sm:$0xff] %v9241_v51  ;;  %v9242_v60 = vpack.c.bf16 %v7257_v59, %v7256_v57 }
 0x474   : > { %7593 = vst [vmem:[%s12200_s12 + $0xe8] sm:$0xff] %v9242_v60 }
 0x496   : > { %v6946_v62 = vpop.f32.mrb[60].mxu0 }
 0x497   : > { %v6947_v0 = vadd.f32 %v6946_v62, %v12182_v29  ;;  %v6948_v1 = vpop.f32.mrb[61].mxu0 }
 0x498   : > { %v6949_v2 = vadd.f32 %v6948_v1, %v12182_v29  ;;  %v6950_v3 = vpop.f32.mrb[62].mxu0  ;;  %v6987_v8 = vpop.f32.mrb[60].mxu1 }
 0x499   : > { %v7258_v4 = vmax.f32 %v6947_v0, 0.0  ;;  %v6951_v5 = vpop.f32.mrb[63].mxu0  ;;  %v6988_v9 = vadd.f32 %v6987_v8, %v12182_v29  ;;  %v6989_v61 = vpop.f32.mrb[61].mxu1 }
 0x49a   : > { %v7259_v6 = vmax.f32 %v6949_v2, 0.0  ;;  %v6990_v10 = vadd.f32 %v6989_v61, %v12182_v29  ;;  %v6991_v11 = vpop.f32.mrb[62].mxu1 }
 0x49b   : > { %v7260_v12 = vmax.f32 %v6988_v9, 0.0  ;;  %v6992_v13 = vpop.f32.mrb[63].mxu1 }
 0x49c   : > { %v9243_v7 = vpack.c.bf16 %v7259_v6, %v7258_v4  ;;  %v7261_v14 = vmax.f32 %v6990_v10, 0.0 }
 0x49e   : > { %7594 = vst [vmem:[%s12200_s12 + $0xf0] sm:$0xff] %v9243_v7  ;;  %v9244_v15 = vpack.c.bf16 %v7261_v14, %v7260_v12 }
 0x4a0   : > { %7595 = vst [vmem:[%s12200_s12 + $0xf8] sm:$0xff] %v9244_v15 }
 0x4c2   : > { %v7028_v16 = vpop.f32.mrb[64].mxu0 }
 0x4c3   : > { %v7029_v17 = vadd.f32 %v7028_v16, %v12182_v29  ;;  %v7030_v18 = vpop.f32.mrb[65].mxu0 }
 0x4c4   : > { %v7031_v19 = vadd.f32 %v7030_v18, %v12182_v29  ;;  %v7032_v20 = vpop.f32.mrb[66].mxu0  ;;  %v7069_v25 = vpop.f32.mrb[64].mxu1 }
 0x4c5   : > { %v7262_v21 = vmax.f32 %v7029_v17, 0.0  ;;  %v7033_v22 = vpop.f32.mrb[67].mxu0  ;;  %v7070_v26 = vadd.f32 %v7069_v25, %v12182_v29  ;;  %v7071_v27 = vpop.f32.mrb[65].mxu1 }
 0x4c6   : > { %v7263_v23 = vmax.f32 %v7031_v19, 0.0  ;;  %v7072_v28 = vadd.f32 %v7071_v27, %v12182_v29  ;;  %v7073_v30 = vpop.f32.mrb[66].mxu1 }
 0x4c7   : > { %v7264_v31 = vmax.f32 %v7070_v26, 0.0  ;;  %v7074_v32 = vpop.f32.mrb[67].mxu1 }
 0x4c8   : > { %v9245_v24 = vpack.c.bf16 %v7263_v23, %v7262_v21  ;;  %v7265_v33 = vmax.f32 %v7072_v28, 0.0 }
 0x4ca   : > { %7596 = vst [vmem:[%s12200_s12 + $0x100] sm:$0xff] %v9245_v24  ;;  %v9246_v34 = vpack.c.bf16 %v7265_v33, %v7264_v31 }
 0x4cc   : > { %7597 = vst [vmem:[%s12200_s12 + $0x108] sm:$0xff] %v9246_v34 }
 0x4ee   : > { %v7110_v35 = vpop.f32.mrb[68].mxu0 }
 0x4ef   : > { %v7111_v36 = vadd.f32 %v7110_v35, %v12182_v29  ;;  %v7112_v37 = vpop.f32.mrb[69].mxu0 }
 0x4f0   : > { %v7113_v38 = vadd.f32 %v7112_v37, %v12182_v29  ;;  %v7114_v39 = vpop.f32.mrb[70].mxu0  ;;  %v7151_v44 = vpop.f32.mrb[68].mxu1 }
 0x4f1   : > { %v7266_v41 = vmax.f32 %v7111_v36, 0.0  ;;  %v7115_v42 = vpop.f32.mrb[71].mxu0  ;;  %v7152_v45 = vadd.f32 %v7151_v44, %v12182_v29  ;;  %v7153_v46 = vpop.f32.mrb[69].mxu1 }
 0x4f2   : > { %v7267_v63 = vmax.f32 %v7113_v38, 0.0  ;;  %v7154_v47 = vadd.f32 %v7153_v46, %v12182_v29  ;;  %v7155_v40 = vpop.f32.mrb[70].mxu1 }
 0x4f3   : > { %v7268_v48 = vmax.f32 %v7152_v45, 0.0  ;;  %v7156_v49 = vpop.f32.mrb[71].mxu1 }
 0x4f4   : > { %v9247_v43 = vpack.c.bf16 %v7267_v63, %v7266_v41  ;;  %v7269_v50 = vmax.f32 %v7154_v47, 0.0 }
 0x4f6   : > { %7598 = vst [vmem:[%s12200_s12 + $0x110] sm:$0xff] %v9247_v43  ;;  %v9248_v51 = vpack.c.bf16 %v7269_v50, %v7268_v48 }
 0x4f8   : > { %7599 = vst [vmem:[%s12200_s12 + $0x118] sm:$0xff] %v9248_v51 }
 0x51a   : > { %v7192_v52 = vpop.f32.mrb[72].mxu0 }
 0x51b   : > { %v7193_v53 = vadd.f32 %v7192_v52, %v12182_v29  ;;  %v7194_v54 = vpop.f32.mrb[73].mxu0  ;;  %7607 = sbr.rel (!%p11045_p5) target bundleno = 1479 (0x5c7), region = 102 }
 0x51c   : > { %v7195_v55 = vpop.f32.mrb[74].mxu0 }
 0x51d   : > { %v7270_v56 = vmax.f32 %v7193_v53, 0.0  ;;  %v7196_v57 = vpop.f32.mrb[75].mxu0 }
 0x51f   : > { %v9249_v58 = vpack.c.bf16 %v7270_v56, %v7270_v56 }
 0x521   : > { %7600 = vst [vmem:[%s12200_s12 + $0x120] sm:$0xf] %v9249_v58 }
 0x522   : > { %s13432_s23 = smov (!%p7610_p1, %s7609_s23), 73 }
 0x523   : > { %s9181_s18 = sshll.u32 %s13432_s23, 6  ;;  %s12972_s24 = sshll.u32 %s13432_s23, 2 }
 0x524   : > { %p9185_p2 = scmp.eq.s32.totalorder %s9181_s18, 0 }
 0x525   : > { %p7620_p3 = scmp.lt.u32.totalorder (!%p9185_p2), %s12972_s24, 8 }
 0x526   : > { %7619 = sbr.rel (%p9185_p2) target bundleno = 1479 (0x5c7), region = 106 }
 0x52d   : > { %7623 = sbr.rel (%p7620_p3) target bundleno = 1470 (0x5be), region = 110  ;;  %s12976_s20 = sand.u32 (!%p7620_p3), 7, %s12972_s24  }
 0x52e   : > { %p7639_p5 = scmp.eq.s32.totalorder (!%p7620_p3), %s12976_s20, 0  ;;  %p9186_p4 = scmp.ne.s32.totalorder (!%p7620_p3), %s12976_s20, 0 }
 0x534   : > { %7642 = sbr.rel (%p9186_p4) target bundleno = 1399 (0x577), region = 125  ;;  %s7643_s15 = sshrl.u32 (!%p9186_p4), %s12972_s24, 3 }
 0x535   : > { %s12983_s29 = sshrl.u32 (!%p9186_p4), %s7643_s15, 6 }
 0x536   : > { %p9187_p6 = scmp.le.s32.totalorder (!%p9186_p4), %s12983_s29, 0 }
 0x53b   : > { %8166 = sbr.rel (%p9187_p6) target bundleno = 1379 (0x563), region = 273  ;;  %s13408_s9 = smov (!%p9187_p6), %s12970_s27 }
 0x53c   : > { %s13409_s10 = smov (!%p9187_p6), %s12200_s12  ;;  %s12992_s5 = smov (!%p9187_p6), 0  }
 0x53d   : > { %s12994_s21 = smov (!%p9187_p6), 0  }
 0x542 LB: >> { %v7656_v29 = vld [vmem:[%s10931_s10] sm:$0xff]  ;;  %v7658_v59 = vld [vmem:[%s10931_s10 + $0x8] sm:$0xff]  ;;  %v7660_v60 = vld [vmem:[%s10931_s10 + $0x10] sm:$0xff]  ;;  %s7784_s30 = sadd.s32 1, %s10935_s5  ;;  %s7650_s21 = sadd.s32 1, %s10939_s21   ;;  %s10939_s21 = sphi %s12994_s21, %s7650_s21   ;;  %s10935_s5 = sphi %s12992_s5, %s13412_s5   ;;  %s10931_s10 = sphi %s13409_s10, %s13411_s10   ;;  %s10927_s9 = sphi %s13408_s9, %s13410_s9  }
 0x543   : >> { %7657 = vst [vmem:[%s10927_s9] sm:$0xff] %v7656_v29  ;;  %7659 = vst [vmem:[%s10927_s9 + $0x8] sm:$0xff] %v7658_v59  ;;  %v7662_v62 = vld [vmem:[%s10931_s10 + $0x18] sm:$0xff]  ;;  %v7664_v0 = vld [vmem:[%s10931_s10 + $0x20] sm:$0xff]  ;;  %p7785_p7 = scmp.ge.s32.totalorder %s7784_s30, %s12983_s29  ;;  %p7649_p8 = scmp.ge.s32.totalorder %s7650_s21, %s12983_s29 }
 0x544   : >> { %7661 = vst [vmem:[%s10927_s9 + $0x10] sm:$0xff] %v7660_v60  ;;  %v7666_v1 = vld [vmem:[%s10931_s10 + $0x28] sm:$0xff]  ;;  %7663 = vst [vmem:[%s10927_s9 + $0x18] sm:$0xff] %v7662_v62  ;;  %v7668_v2 = vld [vmem:[%s10931_s10 + $0x30] sm:$0xff] }
 0x545   : >> { %7665 = vst [vmem:[%s10927_s9 + $0x20] sm:$0xff] %v7664_v0  ;;  %7667 = vst [vmem:[%s10927_s9 + $0x28] sm:$0xff] %v7666_v1  ;;  %v7670_v3 = vld [vmem:[%s10931_s10 + $0x38] sm:$0xff]  ;;  %v7672_v4 = vld [vmem:[%s10931_s10 + $0x40] sm:$0xff]  ;;  %s13434_s30 = smov (%p7785_p7, %s7784_s30), 0 }
 0x546   : >> { %7669 = vst [vmem:[%s10927_s9 + $0x30] sm:$0xff] %v7668_v2  ;;  %7671 = vst [vmem:[%s10927_s9 + $0x38] sm:$0xff] %v7670_v3  ;;  %v7674_v5 = vld [vmem:[%s10931_s10 + $0x48] sm:$0xff]  ;;  %v7676_v6 = vld [vmem:[%s10931_s10 + $0x50] sm:$0xff]  ;;  %s9188_s22 = sshll.u32 %s13434_s30, 9  ;;  %s13412_s5 = smov %s13434_s30 }
 0x547   : >> { %7673 = vst [vmem:[%s10927_s9 + $0x40] sm:$0xff] %v7672_v4  ;;  %v7678_v7 = vld [vmem:[%s10931_s10 + $0x58] sm:$0xff]  ;;  %7675 = vst [vmem:[%s10927_s9 + $0x48] sm:$0xff] %v7674_v5  ;;  %v7680_v8 = vld [vmem:[%s10931_s10 + $0x60] sm:$0xff]  ;;  %s13050_s6 = scalar_lea.vmem %s12200_s12, %s9188_s22 [#allocation3]   ;;  %s13053_s28 = scalar_lea.vmem %s12970_s27, %s9188_s22  }
 0x548   : >> { %7677 = vst [vmem:[%s10927_s9 + $0x50] sm:$0xff] %v7676_v6  ;;  %7679 = vst [vmem:[%s10927_s9 + $0x58] sm:$0xff] %v7678_v7  ;;  %v7682_v9 = vld [vmem:[%s10931_s10 + $0x68] sm:$0xff]  ;;  %v7684_v61 = vld [vmem:[%s10931_s10 + $0x70] sm:$0xff] }
 0x549   : >> { %7681 = vst [vmem:[%s10927_s9 + $0x60] sm:$0xff] %v7680_v8  ;;  %7683 = vst [vmem:[%s10927_s9 + $0x68] sm:$0xff] %v7682_v9  ;;  %v7686_v10 = vld [vmem:[%s10931_s10 + $0x78] sm:$0xff]  ;;  %v7688_v11 = vld [vmem:[%s10931_s10 + $0x80] sm:$0xff] }
 0x54a   : >> { %7685 = vst [vmem:[%s10927_s9 + $0x70] sm:$0xff] %v7684_v61  ;;  %v7690_v12 = vld [vmem:[%s10931_s10 + $0x88] sm:$0xff]  ;;  %7687 = vst [vmem:[%s10927_s9 + $0x78] sm:$0xff] %v7686_v10  ;;  %v7692_v13 = vld [vmem:[%s10931_s10 + $0x90] sm:$0xff] }
 0x54b   : >> { %7689 = vst [vmem:[%s10927_s9 + $0x80] sm:$0xff] %v7688_v11  ;;  %7691 = vst [vmem:[%s10927_s9 + $0x88] sm:$0xff] %v7690_v12  ;;  %v7694_v14 = vld [vmem:[%s10931_s10 + $0x98] sm:$0xff]  ;;  %v7696_v15 = vld [vmem:[%s10931_s10 + $0xa0] sm:$0xff] }
 0x54c   : >> { %7693 = vst [vmem:[%s10927_s9 + $0x90] sm:$0xff] %v7692_v13  ;;  %7695 = vst [vmem:[%s10927_s9 + $0x98] sm:$0xff] %v7694_v14  ;;  %v7698_v16 = vld [vmem:[%s10931_s10 + $0xa8] sm:$0xff]  ;;  %v7700_v17 = vld [vmem:[%s10931_s10 + $0xb0] sm:$0xff] }
 0x54d   : >> { %7697 = vst [vmem:[%s10927_s9 + $0xa0] sm:$0xff] %v7696_v15  ;;  %v7702_v18 = vld [vmem:[%s10931_s10 + $0xb8] sm:$0xff]  ;;  %7699 = vst [vmem:[%s10927_s9 + $0xa8] sm:$0xff] %v7698_v16  ;;  %v7704_v19 = vld [vmem:[%s10931_s10 + $0xc0] sm:$0xff] }
 0x54e   : >> { %7701 = vst [vmem:[%s10927_s9 + $0xb0] sm:$0xff] %v7700_v17  ;;  %7703 = vst [vmem:[%s10927_s9 + $0xb8] sm:$0xff] %v7702_v18  ;;  %v7706_v20 = vld [vmem:[%s10931_s10 + $0xc8] sm:$0xff]  ;;  %v7708_v21 = vld [vmem:[%s10931_s10 + $0xd0] sm:$0xff] }
 0x54f   : >> { %7705 = vst [vmem:[%s10927_s9 + $0xc0] sm:$0xff] %v7704_v19  ;;  %7707 = vst [vmem:[%s10927_s9 + $0xc8] sm:$0xff] %v7706_v20  ;;  %v7710_v22 = vld [vmem:[%s10931_s10 + $0xd8] sm:$0xff]  ;;  %v7712_v23 = vld [vmem:[%s10931_s10 + $0xe0] sm:$0xff] }
 0x550   : >> { %7709 = vst [vmem:[%s10927_s9 + $0xd0] sm:$0xff] %v7708_v21  ;;  %v7714_v24 = vld [vmem:[%s10931_s10 + $0xe8] sm:$0xff]  ;;  %7711 = vst [vmem:[%s10927_s9 + $0xd8] sm:$0xff] %v7710_v22  ;;  %v7716_v25 = vld [vmem:[%s10931_s10 + $0xf0] sm:$0xff] }
 0x551   : >> { %7713 = vst [vmem:[%s10927_s9 + $0xe0] sm:$0xff] %v7712_v23  ;;  %7715 = vst [vmem:[%s10927_s9 + $0xe8] sm:$0xff] %v7714_v24  ;;  %v7718_v26 = vld [vmem:[%s10931_s10 + $0xf8] sm:$0xff]  ;;  %v7720_v27 = vld [vmem:[%s10931_s10 + $0x100] sm:$0xff] }
 0x552   : >> { %7717 = vst [vmem:[%s10927_s9 + $0xf0] sm:$0xff] %v7716_v25  ;;  %7719 = vst [vmem:[%s10927_s9 + $0xf8] sm:$0xff] %v7718_v26  ;;  %v7722_v28 = vld [vmem:[%s10931_s10 + $0x108] sm:$0xff]  ;;  %v7724_v30 = vld [vmem:[%s10931_s10 + $0x110] sm:$0xff] }
 0x553   : >> { %7721 = vst [vmem:[%s10927_s9 + $0x100] sm:$0xff] %v7720_v27  ;;  %v7726_v31 = vld [vmem:[%s10931_s10 + $0x118] sm:$0xff]  ;;  %7723 = vst [vmem:[%s10927_s9 + $0x108] sm:$0xff] %v7722_v28  ;;  %v7728_v32 = vld [vmem:[%s10931_s10 + $0x120] sm:$0xff] }
 0x554   : >> { %7725 = vst [vmem:[%s10927_s9 + $0x110] sm:$0xff] %v7724_v30  ;;  %7727 = vst [vmem:[%s10927_s9 + $0x118] sm:$0xff] %v7726_v31  ;;  %v7730_v33 = vld [vmem:[%s10931_s10 + $0x128] sm:$0xff]  ;;  %v7732_v34 = vld [vmem:[%s10931_s10 + $0x130] sm:$0xff] }
 0x555   : >> { %7729 = vst [vmem:[%s10927_s9 + $0x120] sm:$0xff] %v7728_v32  ;;  %7731 = vst [vmem:[%s10927_s9 + $0x128] sm:$0xff] %v7730_v33  ;;  %v7734_v35 = vld [vmem:[%s10931_s10 + $0x138] sm:$0xff]  ;;  %v7736_v36 = vld [vmem:[%s10931_s10 + $0x140] sm:$0xff] }
 0x556   : >> { %7733 = vst [vmem:[%s10927_s9 + $0x130] sm:$0xff] %v7732_v34  ;;  %v7738_v37 = vld [vmem:[%s10931_s10 + $0x148] sm:$0xff]  ;;  %7735 = vst [vmem:[%s10927_s9 + $0x138] sm:$0xff] %v7734_v35  ;;  %v7740_v38 = vld [vmem:[%s10931_s10 + $0x150] sm:$0xff] }
 0x557   : >> { %7737 = vst [vmem:[%s10927_s9 + $0x140] sm:$0xff] %v7736_v36  ;;  %7739 = vst [vmem:[%s10927_s9 + $0x148] sm:$0xff] %v7738_v37  ;;  %v7742_v39 = vld [vmem:[%s10931_s10 + $0x158] sm:$0xff]  ;;  %v7744_v41 = vld [vmem:[%s10931_s10 + $0x160] sm:$0xff] }
 0x558   : >> { %7741 = vst [vmem:[%s10927_s9 + $0x150] sm:$0xff] %v7740_v38  ;;  %7743 = vst [vmem:[%s10927_s9 + $0x158] sm:$0xff] %v7742_v39  ;;  %v7746_v42 = vld [vmem:[%s10931_s10 + $0x168] sm:$0xff]  ;;  %v7748_v63 = vld [vmem:[%s10931_s10 + $0x170] sm:$0xff] }
 0x559   : >> { %7745 = vst [vmem:[%s10927_s9 + $0x160] sm:$0xff] %v7744_v41  ;;  %v7750_v43 = vld [vmem:[%s10931_s10 + $0x178] sm:$0xff]  ;;  %7747 = vst [vmem:[%s10927_s9 + $0x168] sm:$0xff] %v7746_v42  ;;  %v7752_v44 = vld [vmem:[%s10931_s10 + $0x180] sm:$0xff] }
 0x55a   : >> { %7749 = vst [vmem:[%s10927_s9 + $0x170] sm:$0xff] %v7748_v63  ;;  %7751 = vst [vmem:[%s10927_s9 + $0x178] sm:$0xff] %v7750_v43  ;;  %v7754_v45 = vld [vmem:[%s10931_s10 + $0x188] sm:$0xff]  ;;  %v7756_v46 = vld [vmem:[%s10931_s10 + $0x190] sm:$0xff] }
 0x55b   : >> { %7753 = vst [vmem:[%s10927_s9 + $0x180] sm:$0xff] %v7752_v44  ;;  %7755 = vst [vmem:[%s10927_s9 + $0x188] sm:$0xff] %v7754_v45  ;;  %v7758_v47 = vld [vmem:[%s10931_s10 + $0x198] sm:$0xff]  ;;  %v7760_v40 = vld [vmem:[%s10931_s10 + $0x1a0] sm:$0xff] }
 0x55c   : >> { %7757 = vst [vmem:[%s10927_s9 + $0x190] sm:$0xff] %v7756_v46  ;;  %v7762_v48 = vld [vmem:[%s10931_s10 + $0x1a8] sm:$0xff]  ;;  %7759 = vst [vmem:[%s10927_s9 + $0x198] sm:$0xff] %v7758_v47  ;;  %v7764_v49 = vld [vmem:[%s10931_s10 + $0x1b0] sm:$0xff]  ;;  %7652 = sbr.rel (!%p7649_p8) target bundleno = 1346 (0x542), region = 279 }
 0x55d   : >> { %7761 = vst [vmem:[%s10927_s9 + $0x1a0] sm:$0xff] %v7760_v40  ;;  %7763 = vst [vmem:[%s10927_s9 + $0x1a8] sm:$0xff] %v7762_v48  ;;  %v7766_v50 = vld [vmem:[%s10931_s10 + $0x1b8] sm:$0xff]  ;;  %v7768_v51 = vld [vmem:[%s10931_s10 + $0x1c0] sm:$0xff] }
 0x55e   : >> { %7765 = vst [vmem:[%s10927_s9 + $0x1b0] sm:$0xff] %v7764_v49  ;;  %7767 = vst [vmem:[%s10927_s9 + $0x1b8] sm:$0xff] %v7766_v50  ;;  %v7770_v52 = vld [vmem:[%s10931_s10 + $0x1c8] sm:$0xff]  ;;  %v7772_v53 = vld [vmem:[%s10931_s10 + $0x1d0] sm:$0xff] }
 0x55f   : >> { %7769 = vst [vmem:[%s10927_s9 + $0x1c0] sm:$0xff] %v7768_v51  ;;  %v7774_v54 = vld [vmem:[%s10931_s10 + $0x1d8] sm:$0xff]  ;;  %7771 = vst [vmem:[%s10927_s9 + $0x1c8] sm:$0xff] %v7770_v52  ;;  %v7776_v55 = vld [vmem:[%s10931_s10 + $0x1e0] sm:$0xff] }
 0x560   : >> { %7773 = vst [vmem:[%s10927_s9 + $0x1d0] sm:$0xff] %v7772_v53  ;;  %7775 = vst [vmem:[%s10927_s9 + $0x1d8] sm:$0xff] %v7774_v54  ;;  %v7778_v56 = vld [vmem:[%s10931_s10 + $0x1e8] sm:$0xff]  ;;  %v7780_v57 = vld [vmem:[%s10931_s10 + $0x1f0] sm:$0xff] }
 0x561   : >> { %7777 = vst [vmem:[%s10927_s9 + $0x1e0] sm:$0xff] %v7776_v55  ;;  %7779 = vst [vmem:[%s10927_s9 + $0x1e8] sm:$0xff] %v7778_v56  ;;  %v7782_v58 = vld [vmem:[%s10931_s10 + $0x1f8] sm:$0xff]  ;;  %s13411_s10 = smov %s13050_s6 }
 0x562   : >> { %7781 = vst [vmem:[%s10927_s9 + $0x1f0] sm:$0xff] %v7780_v57  ;;  %7783 = vst [vmem:[%s10927_s9 + $0x1f8] sm:$0xff] %v7782_v58  ;;  %s13410_s9 = smov %s13053_s28 }
 0x563 PF: > { %s13159_s14 = sand.u32 63, %s7643_s15   ;;  %s9251_s4 = sshll.u32 %s12983_s29, 13 }
 0x564   : > { %s7795_s7 = sshra.s32 %s9251_s4, 4  ;;  %p9193_p9 = scmp.le.s32.totalorder %s13159_s14, 0 }
 0x565   : > { %s7796_s11 = scalar_lea.vmem %s12200_s12, %s7795_s7 [#allocation3]   ;;  %s7799_s17 = scalar_lea.vmem %s12970_s27, %s7795_s7  }
 0x566   : > { %8180 = sbr.rel (%p9193_p9) target bundleno = 1399 (0x577), region = 284  ;;  %s10941_s8 = smov (!%p9193_p9), %s7799_s17  }
 0x567   : > { %s10945_s23 = smov (!%p9193_p9), %s7796_s11   ;;  %s10949_s25 = smov (!%p9193_p9), 0  }
 0x568   : > { %s10953_s26 = smov (!%p9193_p9), 0  }
 0x56d LB: >> { %v7811_v29 = vld [vmem:[%s10947_s23] sm:$0xff]  ;;  %s7813_s18 = sadd.s32 1, %s10951_s25  ;;  %s7805_s26 = sadd.s32 1, %s10955_s26   ;;  %s10955_s26 = sphi %s10953_s26, %s7805_s26   ;;  %s10951_s25 = sphi %s10949_s25, %s10950_s25   ;;  %s10947_s23 = sphi %s10945_s23, %s7818_s23   ;;  %s10943_s8 = sphi %s10941_s8, %s7819_s8  }
 0x56e   : >> { %7812 = vst [vmem:[%s10943_s8] sm:$0xff] %v7811_v29  ;;  %p7814_p10 = scmp.ge.s32.totalorder %s7813_s18, %s13159_s14  ;;  %p7804_p11 = scmp.ge.s32.totalorder %s7805_s26, %s13159_s14 }
 0x570   : >> { %s13436_s18 = smov (%p7814_p10, %s7813_s18), 0  ;;  %7807 = sbr.rel (!%p7804_p11) target bundleno = 1389 (0x56d), region = 290 }
 0x571   : >> { %s9194_s15 = sshll.u32 %s13436_s18, 3  ;;  %s10950_s25 = smov %s13436_s18  }
 0x572   : >> { %s7818_s23 = scalar_lea.vmem %s7796_s11, %s9194_s15 [#allocation3]   ;;  %s7819_s8 = scalar_lea.vmem %s7799_s17, %s9194_s15  }
 0x577 PF: > { %7822 = sbr.rel (%p7639_p5) target bundleno = 1470 (0x5be), region = 143  ;;  %s13171_s29 = ssub.s32 (!%p7639_p5), %s12972_s24, %s12976_s20 }
 0x578   : > { %s7828_s9 = sshrl.u32 (!%p7639_p5), %s12972_s24, 3  ;;  %s7825_s10 = scalar_lea.vmem (!%p7639_p5), %s12200_s12, %s13171_s29 [#allocation3] }
 0x579   : > { %s7827_s5 = scalar_lea.vmem (!%p7639_p5), %s12970_s27, %s13171_s29  ;;  %s13180_s21 = sshrl.u32 (!%p7639_p5), %s7828_s9, 6 }
 0x57a   : > { %p9196_p12 = scmp.le.s32.totalorder (!%p7639_p5), %s13180_s21, 0 }
 0x57e   : > { %8194 = sbr.rel (%p9196_p12) target bundleno = 1446 (0x5a6), region = 295  ;;  %s13413_s30 = smov (!%p9196_p12), %s12970_s27 }
 0x57f   : > { %s13414_s22 = smov (!%p9196_p12), %s12200_s12  ;;  %s13189_s6 = smov (!%p9196_p12), 0  }
 0x580   : > { %s13191_s28 = smov (!%p9196_p12), 0  }
 0x585 LB: >> { %v7841_v59 = vld [vmem:[%s10963_s22] sm:$0xff]  ;;  %v7843_v60 = vld [vmem:[%s10963_s22 + $0x8] sm:$0xff]  ;;  %v7845_v62 = vld [vmem:[%s10963_s22 + $0x10] sm:$0xff]  ;;  %s7969_s14 = sadd.s32 1, %s10967_s6  ;;  %s7835_s28 = sadd.s32 1, %s10971_s28   ;;  %s10971_s28 = sphi %s13191_s28, %s7835_s28   ;;  %s10967_s6 = sphi %s13189_s6, %s13417_s6   ;;  %s10963_s22 = sphi %s13414_s22, %s13416_s22   ;;  %s10959_s30 = sphi %s13413_s30, %s13415_s30  }
 0x586   : >> { %7842 = vst [vmem:[%s10959_s30] sm:$0xff] %v7841_v59  ;;  %7844 = vst [vmem:[%s10959_s30 + $0x8] sm:$0xff] %v7843_v60  ;;  %v7847_v0 = vld [vmem:[%s10963_s22 + $0x18] sm:$0xff]  ;;  %v7849_v1 = vld [vmem:[%s10963_s22 + $0x20] sm:$0xff]  ;;  %p7970_p13 = scmp.ge.s32.totalorder %s7969_s14, %s13180_s21  ;;  %p7834_p0 = scmp.ge.s32.totalorder %s7835_s28, %s13180_s21 }
 0x587   : >> { %7846 = vst [vmem:[%s10959_s30 + $0x10] sm:$0xff] %v7845_v62  ;;  %v7851_v2 = vld [vmem:[%s10963_s22 + $0x28] sm:$0xff]  ;;  %7848 = vst [vmem:[%s10959_s30 + $0x18] sm:$0xff] %v7847_v0  ;;  %v7853_v3 = vld [vmem:[%s10963_s22 + $0x30] sm:$0xff] }
 0x588   : >> { %7850 = vst [vmem:[%s10959_s30 + $0x20] sm:$0xff] %v7849_v1  ;;  %7852 = vst [vmem:[%s10959_s30 + $0x28] sm:$0xff] %v7851_v2  ;;  %v7855_v4 = vld [vmem:[%s10963_s22 + $0x38] sm:$0xff]  ;;  %v7857_v5 = vld [vmem:[%s10963_s22 + $0x40] sm:$0xff]  ;;  %s13438_s14 = smov (%p7970_p13, %s7969_s14), 0 }
 0x589   : >> { %7854 = vst [vmem:[%s10959_s30 + $0x30] sm:$0xff] %v7853_v3  ;;  %7856 = vst [vmem:[%s10959_s30 + $0x38] sm:$0xff] %v7855_v4  ;;  %v7859_v6 = vld [vmem:[%s10963_s22 + $0x48] sm:$0xff]  ;;  %v7861_v7 = vld [vmem:[%s10963_s22 + $0x50] sm:$0xff]  ;;  %s9197_s4 = sshll.u32 %s13438_s14, 9  ;;  %s13417_s6 = smov %s13438_s14 }
 0x58a   : >> { %7858 = vst [vmem:[%s10959_s30 + $0x40] sm:$0xff] %v7857_v5  ;;  %v7863_v8 = vld [vmem:[%s10963_s22 + $0x58] sm:$0xff]  ;;  %7860 = vst [vmem:[%s10959_s30 + $0x48] sm:$0xff] %v7859_v6  ;;  %v7865_v9 = vld [vmem:[%s10963_s22 + $0x60] sm:$0xff]  ;;  %s13247_s7 = scalar_lea.vmem %s12200_s12, %s9197_s4 [#allocation3]   ;;  %s13250_s11 = scalar_lea.vmem %s12970_s27, %s9197_s4  }
 0x58b   : >> { %7862 = vst [vmem:[%s10959_s30 + $0x50] sm:$0xff] %v7861_v7  ;;  %7864 = vst [vmem:[%s10959_s30 + $0x58] sm:$0xff] %v7863_v8  ;;  %v7867_v61 = vld [vmem:[%s10963_s22 + $0x68] sm:$0xff]  ;;  %v7869_v10 = vld [vmem:[%s10963_s22 + $0x70] sm:$0xff] }
 0x58c   : >> { %7866 = vst [vmem:[%s10959_s30 + $0x60] sm:$0xff] %v7865_v9  ;;  %7868 = vst [vmem:[%s10959_s30 + $0x68] sm:$0xff] %v7867_v61  ;;  %v7871_v11 = vld [vmem:[%s10963_s22 + $0x78] sm:$0xff]  ;;  %v7873_v12 = vld [vmem:[%s10963_s22 + $0x80] sm:$0xff] }
 0x58d   : >> { %7870 = vst [vmem:[%s10959_s30 + $0x70] sm:$0xff] %v7869_v10  ;;  %v7875_v13 = vld [vmem:[%s10963_s22 + $0x88] sm:$0xff]  ;;  %7872 = vst [vmem:[%s10959_s30 + $0x78] sm:$0xff] %v7871_v11  ;;  %v7877_v14 = vld [vmem:[%s10963_s22 + $0x90] sm:$0xff] }
 0x58e   : >> { %7874 = vst [vmem:[%s10959_s30 + $0x80] sm:$0xff] %v7873_v12  ;;  %7876 = vst [vmem:[%s10959_s30 + $0x88] sm:$0xff] %v7875_v13  ;;  %v7879_v15 = vld [vmem:[%s10963_s22 + $0x98] sm:$0xff]  ;;  %v7881_v16 = vld [vmem:[%s10963_s22 + $0xa0] sm:$0xff] }
 0x58f   : >> { %7878 = vst [vmem:[%s10959_s30 + $0x90] sm:$0xff] %v7877_v14  ;;  %7880 = vst [vmem:[%s10959_s30 + $0x98] sm:$0xff] %v7879_v15  ;;  %v7883_v17 = vld [vmem:[%s10963_s22 + $0xa8] sm:$0xff]  ;;  %v7885_v18 = vld [vmem:[%s10963_s22 + $0xb0] sm:$0xff] }
 0x590   : >> { %7882 = vst [vmem:[%s10959_s30 + $0xa0] sm:$0xff] %v7881_v16  ;;  %v7887_v19 = vld [vmem:[%s10963_s22 + $0xb8] sm:$0xff]  ;;  %7884 = vst [vmem:[%s10959_s30 + $0xa8] sm:$0xff] %v7883_v17  ;;  %v7889_v20 = vld [vmem:[%s10963_s22 + $0xc0] sm:$0xff] }
 0x591   : >> { %7886 = vst [vmem:[%s10959_s30 + $0xb0] sm:$0xff] %v7885_v18  ;;  %7888 = vst [vmem:[%s10959_s30 + $0xb8] sm:$0xff] %v7887_v19  ;;  %v7891_v21 = vld [vmem:[%s10963_s22 + $0xc8] sm:$0xff]  ;;  %v7893_v22 = vld [vmem:[%s10963_s22 + $0xd0] sm:$0xff] }
 0x592   : >> { %7890 = vst [vmem:[%s10959_s30 + $0xc0] sm:$0xff] %v7889_v20  ;;  %7892 = vst [vmem:[%s10959_s30 + $0xc8] sm:$0xff] %v7891_v21  ;;  %v7895_v23 = vld [vmem:[%s10963_s22 + $0xd8] sm:$0xff]  ;;  %v7897_v24 = vld [vmem:[%s10963_s22 + $0xe0] sm:$0xff] }
 0x593   : >> { %7894 = vst [vmem:[%s10959_s30 + $0xd0] sm:$0xff] %v7893_v22  ;;  %v7899_v25 = vld [vmem:[%s10963_s22 + $0xe8] sm:$0xff]  ;;  %7896 = vst [vmem:[%s10959_s30 + $0xd8] sm:$0xff] %v7895_v23  ;;  %v7901_v26 = vld [vmem:[%s10963_s22 + $0xf0] sm:$0xff] }
 0x594   : >> { %7898 = vst [vmem:[%s10959_s30 + $0xe0] sm:$0xff] %v7897_v24  ;;  %7900 = vst [vmem:[%s10959_s30 + $0xe8] sm:$0xff] %v7899_v25  ;;  %v7903_v27 = vld [vmem:[%s10963_s22 + $0xf8] sm:$0xff]  ;;  %v7905_v28 = vld [vmem:[%s10963_s22 + $0x100] sm:$0xff] }
 0x595   : >> { %7902 = vst [vmem:[%s10959_s30 + $0xf0] sm:$0xff] %v7901_v26  ;;  %7904 = vst [vmem:[%s10959_s30 + $0xf8] sm:$0xff] %v7903_v27  ;;  %v7907_v30 = vld [vmem:[%s10963_s22 + $0x108] sm:$0xff]  ;;  %v7909_v31 = vld [vmem:[%s10963_s22 + $0x110] sm:$0xff] }
 0x596   : >> { %7906 = vst [vmem:[%s10959_s30 + $0x100] sm:$0xff] %v7905_v28  ;;  %v7911_v32 = vld [vmem:[%s10963_s22 + $0x118] sm:$0xff]  ;;  %7908 = vst [vmem:[%s10959_s30 + $0x108] sm:$0xff] %v7907_v30  ;;  %v7913_v33 = vld [vmem:[%s10963_s22 + $0x120] sm:$0xff] }
 0x597   : >> { %7910 = vst [vmem:[%s10959_s30 + $0x110] sm:$0xff] %v7909_v31  ;;  %7912 = vst [vmem:[%s10959_s30 + $0x118] sm:$0xff] %v7911_v32  ;;  %v7915_v34 = vld [vmem:[%s10963_s22 + $0x128] sm:$0xff]  ;;  %v7917_v35 = vld [vmem:[%s10963_s22 + $0x130] sm:$0xff] }
 0x598   : >> { %7914 = vst [vmem:[%s10959_s30 + $0x120] sm:$0xff] %v7913_v33  ;;  %7916 = vst [vmem:[%s10959_s30 + $0x128] sm:$0xff] %v7915_v34  ;;  %v7919_v36 = vld [vmem:[%s10963_s22 + $0x138] sm:$0xff]  ;;  %v7921_v37 = vld [vmem:[%s10963_s22 + $0x140] sm:$0xff] }
 0x599   : >> { %7918 = vst [vmem:[%s10959_s30 + $0x130] sm:$0xff] %v7917_v35  ;;  %v7923_v38 = vld [vmem:[%s10963_s22 + $0x148] sm:$0xff]  ;;  %7920 = vst [vmem:[%s10959_s30 + $0x138] sm:$0xff] %v7919_v36  ;;  %v7925_v39 = vld [vmem:[%s10963_s22 + $0x150] sm:$0xff] }
 0x59a   : >> { %7922 = vst [vmem:[%s10959_s30 + $0x140] sm:$0xff] %v7921_v37  ;;  %7924 = vst [vmem:[%s10959_s30 + $0x148] sm:$0xff] %v7923_v38  ;;  %v7927_v41 = vld [vmem:[%s10963_s22 + $0x158] sm:$0xff]  ;;  %v7929_v42 = vld [vmem:[%s10963_s22 + $0x160] sm:$0xff] }
 0x59b   : >> { %7926 = vst [vmem:[%s10959_s30 + $0x150] sm:$0xff] %v7925_v39  ;;  %7928 = vst [vmem:[%s10959_s30 + $0x158] sm:$0xff] %v7927_v41  ;;  %v7931_v63 = vld [vmem:[%s10963_s22 + $0x168] sm:$0xff]  ;;  %v7933_v43 = vld [vmem:[%s10963_s22 + $0x170] sm:$0xff] }
 0x59c   : >> { %7930 = vst [vmem:[%s10959_s30 + $0x160] sm:$0xff] %v7929_v42  ;;  %v7935_v44 = vld [vmem:[%s10963_s22 + $0x178] sm:$0xff]  ;;  %7932 = vst [vmem:[%s10959_s30 + $0x168] sm:$0xff] %v7931_v63  ;;  %v7937_v45 = vld [vmem:[%s10963_s22 + $0x180] sm:$0xff] }
 0x59d   : >> { %7934 = vst [vmem:[%s10959_s30 + $0x170] sm:$0xff] %v7933_v43  ;;  %7936 = vst [vmem:[%s10959_s30 + $0x178] sm:$0xff] %v7935_v44  ;;  %v7939_v46 = vld [vmem:[%s10963_s22 + $0x188] sm:$0xff]  ;;  %v7941_v47 = vld [vmem:[%s10963_s22 + $0x190] sm:$0xff] }
 0x59e   : >> { %7938 = vst [vmem:[%s10959_s30 + $0x180] sm:$0xff] %v7937_v45  ;;  %7940 = vst [vmem:[%s10959_s30 + $0x188] sm:$0xff] %v7939_v46  ;;  %v7943_v40 = vld [vmem:[%s10963_s22 + $0x198] sm:$0xff]  ;;  %v7945_v48 = vld [vmem:[%s10963_s22 + $0x1a0] sm:$0xff] }
 0x59f   : >> { %7942 = vst [vmem:[%s10959_s30 + $0x190] sm:$0xff] %v7941_v47  ;;  %v7947_v49 = vld [vmem:[%s10963_s22 + $0x1a8] sm:$0xff]  ;;  %7944 = vst [vmem:[%s10959_s30 + $0x198] sm:$0xff] %v7943_v40  ;;  %v7949_v50 = vld [vmem:[%s10963_s22 + $0x1b0] sm:$0xff]  ;;  %7837 = sbr.rel (!%p7834_p0) target bundleno = 1413 (0x585), region = 301 }
 0x5a0   : >> { %7946 = vst [vmem:[%s10959_s30 + $0x1a0] sm:$0xff] %v7945_v48  ;;  %7948 = vst [vmem:[%s10959_s30 + $0x1a8] sm:$0xff] %v7947_v49  ;;  %v7951_v51 = vld [vmem:[%s10963_s22 + $0x1b8] sm:$0xff]  ;;  %v7953_v52 = vld [vmem:[%s10963_s22 + $0x1c0] sm:$0xff] }
 0x5a1   : >> { %7950 = vst [vmem:[%s10959_s30 + $0x1b0] sm:$0xff] %v7949_v50  ;;  %7952 = vst [vmem:[%s10959_s30 + $0x1b8] sm:$0xff] %v7951_v51  ;;  %v7955_v53 = vld [vmem:[%s10963_s22 + $0x1c8] sm:$0xff]  ;;  %v7957_v54 = vld [vmem:[%s10963_s22 + $0x1d0] sm:$0xff] }
 0x5a2   : >> { %7954 = vst [vmem:[%s10959_s30 + $0x1c0] sm:$0xff] %v7953_v52  ;;  %v7959_v55 = vld [vmem:[%s10963_s22 + $0x1d8] sm:$0xff]  ;;  %7956 = vst [vmem:[%s10959_s30 + $0x1c8] sm:$0xff] %v7955_v53  ;;  %v7961_v56 = vld [vmem:[%s10963_s22 + $0x1e0] sm:$0xff] }
 0x5a3   : >> { %7958 = vst [vmem:[%s10959_s30 + $0x1d0] sm:$0xff] %v7957_v54  ;;  %7960 = vst [vmem:[%s10959_s30 + $0x1d8] sm:$0xff] %v7959_v55  ;;  %v7963_v57 = vld [vmem:[%s10963_s22 + $0x1e8] sm:$0xff]  ;;  %v7965_v58 = vld [vmem:[%s10963_s22 + $0x1f0] sm:$0xff] }
 0x5a4   : >> { %7962 = vst [vmem:[%s10959_s30 + $0x1e0] sm:$0xff] %v7961_v56  ;;  %7964 = vst [vmem:[%s10959_s30 + $0x1e8] sm:$0xff] %v7963_v57  ;;  %v7967_v29 = vld [vmem:[%s10963_s22 + $0x1f8] sm:$0xff]  ;;  %s13416_s22 = smov %s13247_s7 }
 0x5a5   : >> { %7966 = vst [vmem:[%s10959_s30 + $0x1f0] sm:$0xff] %v7965_v58  ;;  %7968 = vst [vmem:[%s10959_s30 + $0x1f8] sm:$0xff] %v7967_v29  ;;  %s13415_s30 = smov %s13250_s11 }
 0x5a6 PF: > { %s13356_s17 = sand.u32 63, %s7828_s9   ;;  %s9253_s8 = sshll.u32 %s13180_s21, 13 }
 0x5a7   : > { %s7980_s23 = sshra.s32 %s9253_s8, 4  ;;  %p9202_p1 = scmp.le.s32.totalorder %s13356_s17, 0 }
 0x5a8   : > { %s7981_s25 = scalar_lea.vmem %s12200_s12, %s7980_s23 [#allocation3]   ;;  %s7984_s26 = scalar_lea.vmem %s12970_s27, %s7980_s23  }
 0x5a9   : > { %8208 = sbr.rel (%p9202_p1) target bundleno = 1466 (0x5ba), region = 306  ;;  %s10973_s18 = smov (!%p9202_p1), %s7984_s26  }
 0x5aa   : > { %s10977_s15 = smov (!%p9202_p1), %s7981_s25   ;;  %s10981_s14 = smov (!%p9202_p1), 0  }
 0x5ab   : > { %s10985_s28 = smov (!%p9202_p1), 0  }
 0x5b0 LB: >> { %v7996_v59 = vld [vmem:[%s10979_s15] sm:$0xff]  ;;  %s7998_s9 = sadd.s32 1, %s10983_s14  ;;  %s7990_s28 = sadd.s32 1, %s10987_s28   ;;  %s10987_s28 = sphi %s10985_s28, %s7990_s28   ;;  %s10983_s14 = sphi %s10981_s14, %s10982_s14   ;;  %s10979_s15 = sphi %s10977_s15, %s8003_s15   ;;  %s10975_s18 = sphi %s10973_s18, %s8004_s18  }
 0x5b1   : >> { %7997 = vst [vmem:[%s10975_s18] sm:$0xff] %v7996_v59  ;;  %p7999_p2 = scmp.ge.s32.totalorder %s7998_s9, %s13356_s17  ;;  %p7989_p3 = scmp.ge.s32.totalorder %s7990_s28, %s13356_s17 }
 0x5b3   : >> { %s13440_s9 = smov (%p7999_p2, %s7998_s9), 0  ;;  %7992 = sbr.rel (!%p7989_p3) target bundleno = 1456 (0x5b0), region = 312 }
 0x5b4   : >> { %s9203_s21 = sshll.u32 %s13440_s9, 3  ;;  %s10982_s14 = smov %s13440_s9  }
 0x5b5   : >> { %s8003_s15 = scalar_lea.vmem %s7981_s25, %s9203_s21 [#allocation3]   ;;  %s8004_s18 = scalar_lea.vmem %s7984_s26, %s9203_s21  }
 0x5ba PF: > { %s10992_s30 = smov 0  }
 0x5bb   : > { %s8005_s22 = sshllo.u32 %s10992_s30, %s12976_s20 }
 0x5bc   : > { %v8014_v60 = vld [vmem:[%s7825_s10] sm:%s8005_s22] }
 0x5bd   : > { %8015 = vst [vmem:[%s7827_s5] sm:%s8005_s22] %v8014_v60 }
 0x5be PF: > { %p9205_p5 = scmp.ge.u32.totalorder %s12972_s24, 8 }
 0x5bf   : > { %s10993_s6 = smov (!%p9205_p5), 0  }
 0x5c0   : > { %7626 = sbr.rel (%p9205_p5) target bundleno = 1479 (0x5c7), region = 114  ;;  %s7627_s4 = sshllo.u32 (!%p9205_p5), %s10993_s6, %s12972_s24 }
 0x5c1   : > { %v7636_v62 = vld [vmem:[%s12200_s12] sm:%s7627_s4] (!%p9205_p5) }
 0x5c2   : > { %7637 = vst [vmem:[%s12970_s27] sm:%s7627_s4] (!%p9205_p5), %v7636_v62 }
 0x5c7 PF: > { %p10_p4 = scmp.ge.s32.totalorder %s11033_s16, 4   ;;  %s13418_s12 = smov %s10855_s13 }
 0x5c8   : > { %s13419_s13 = smov %s11043_s19  ;;  %s13420_s14 = smov %s11033_s16 }
 0x5c9   :  { %12 = sbr.rel (!%p10_p4) target bundleno = 2 (0x2), region = 323 }

// kernel: net_forward.3
= control target key start
LH: loop header
LB: loop body
LE: loop exit
PB: predicated region body
PF: predicated region fallthrough
CT: control target
= control target key end

     0   :  { %s11756_s0 = inlined_call_operand.vmem [shape: bf16[27,162,250], index: 0, kind: input, shape index: {}]   ;;  %s11757_s1 = inlined_call_operand.vmem [shape: bf16[8,162], index: 1, kind: input, shape index: {}]   ;;  %s11758_s2 = inlined_call_operand.vmem [shape: f32[8,1], index: 2, kind: input, shape index: {}]   ;;  %s11759_s3 = inlined_call_operand.vmem [shape: f32[27,1,8], index: 3, kind: input, shape index: {}]   ;;  %s11760_s4 = inlined_call_operand.<no memory space> [shape: f32[1,1], index: 4, kind: input, shape index: {}]   ;;  %s11761_s5 = inlined_call_operand.vmem [shape: f32[125,50], index: 5, kind: input, shape index: {}]   ;;  %s11762_s6 = inlined_call_operand.vmem [shape: f32[1,50], index: 6, kind: input, shape index: {}]   ;;  %s11763_s7 = inlined_call_operand.vmem [shape: f32[50,4], index: 7, kind: input, shape index: {}]   ;;  %s11764_s8 = inlined_call_operand.vmem [shape: f32[1,4], index: 8, kind: input, shape index: {}]   ;;  %s11765_s9 = inlined_call_operand.hbm [shape: f32[2,4], index: 9, kind: output, shape index: {}]  }
   0x1   :  { %v14_v0 = vstv %s11760_s4 }
   0x2   :  { %15 = vst [vmem:[#allocation2] sm:$0x1] %v14_v0 }
   0x3   :  { %v8582_v1 = vld [vmem:[%s11756_s0 + $0xac] ss:$8 sps:$4 sm:$0xff]   ;;  %v8584_v2 = vld [vmem:[%s11756_s0 + $0xa8] ss:$8 sps:$4 sm:$0xff]   ;;  %v8585_v3 = vld [vmem:[%s11756_s0 + $0xbc] ss:$8 sps:$4 sm:$0xff]  }
   0x4   :  { %363 = vmatprep.subr.bf16.mxu1 %v8582_v1  ;;  %v9476_v4 = vmov 0   ;;  %v8587_v5 = vld [vmem:[%s11756_s0 + $0xb8] ss:$8 sps:$4 sm:$0xff]   ;;  %v8588_v6 = vld [vmem:[%s11756_s0 + $0xcc] ss:$8 sps:$4 sm:$0xff]   ;;  %vm175_vm0 = vcmask 277504  }
   0x5   :  { %8581 = vset.pattern.permute.xlu0 %v9476_v4  ;;  %364 = vmatpush1.bf16.msra.mxu1 %v8584_v2  ;;  %v8590_v7 = vld [vmem:[%s11756_s0 + $0xc8] ss:$8 sps:$4 sm:$0xff]   ;;  %v8591_v8 = vld [vmem:[%s11756_s0 + $0xdc] ss:$8 sps:$4 sm:$0xff]   ;;  %v8593_v10 = vld [vmem:[%s11756_s0 + $0xd8] ss:$8 sps:$4 sm:$0xff]  }
   0x6   :  { %365 = vmatprep.subr.bf16.mxu1 %v8585_v3  ;;  %v8603_v9 = vld [vmem:[%s11756_s0 + $0x4] ss:$8 sps:$4 sm:$0xff]   ;;  %v8607_v12 = vld [vmem:[%s11756_s0] ss:$8 sps:$4 sm:$0xff]   ;;  %v8609_v13 = vld [vmem:[%s11756_s0 + $0x14] ss:$8 sps:$4 sm:$0xff]  }
   0x7   :  { %v8594_v11 = vld [vmem:[%s11756_s0 + $0xec] ss:$8 sps:$4 sm:$0xff]   ;;  %186 = vmatprep.subr.bf16.mxu0 %v8603_v9  ;;  %v8596_v14 = vld [vmem:[%s11756_s0 + $0xe8] ss:$8 sps:$4 sm:$0xff]   ;;  %v8597_v17 = vld [vmem:[%s11756_s0 + $0xfc] ss:$8 sps:$4 sm:$0xff]  }
   0x8   :  { %187 = vmatpush1.bf16.msra.mxu0 %v8607_v12  ;;  %v8613_v15 = vld [vmem:[%s11756_s0 + $0x10] ss:$8 sps:$4 sm:$0xff]   ;;  %v8615_v16 = vld [vmem:[%s11756_s0 + $0x24] ss:$8 sps:$4 sm:$0xff]   ;;  %v8619_v18 = vld [vmem:[%s11756_s0 + $0x20] ss:$8 sps:$4 sm:$0xff]  }
   0x9   :  { %366 = vmatpush1.bf16.msra.mxu1 %v8587_v5  ;;  %188 = vmatprep.subr.bf16.mxu0 %v8609_v13  ;;  %v8599_v19 = vld [vmem:[%s11756_s0 + $0xf8] ss:$8 sps:$4 sm:$0xff]   ;;  %v8621_v20 = vld [vmem:[%s11756_s0 + $0x34] ss:$8 sps:$4 sm:$0xff]   ;;  %v8627_v25 = vld [vmem:[%s11756_s0 + $0x44] ss:$8 sps:$4 sm:$0xff]  }
   0xa   :  { %367 = vmatprep.subr.bf16.mxu1 %v8588_v6  ;;  %v57_v21 = vld [vmem:[%s11757_s1] sm:$0xff]  ;;  %v8600_v22 = vld [vmem:[%s11756_s0 + $0x10c] ss:$8 sps:$4 sm:$0xff]   ;;  %v8624_v24 = vld [vmem:[%s11756_s0 + $0x30] ss:$8 sps:$4 sm:$0xff]   ;;  %vm179_vm1 = vcmask 1040384  }
   0xb   :  { %v9599_v23 = vcombine.high %v57_v21, %v57_v21  ;;  %v8602_v26 = vld [vmem:[%s11756_s0 + $0x108] ss:$8 sps:$4 sm:$0xff]   ;;  %v8605_v27 = vld [vmem:[%s11756_s0 + $0x11c] ss:$8 sps:$4 sm:$0xff]   ;;  %v8608_v30 = vld [vmem:[%s11756_s0 + $0x118] ss:$8 sps:$4 sm:$0xff]   ;;  %v9667_v47 = vcombine.low %v57_v21, %v57_v21 }
   0xc   :  { %189 = vmatpush1.bf16.msra.mxu0 %v8613_v15  ;;  %v8633_v28 = vld [vmem:[%s11756_s0 + $0x40] ss:$8 sps:$4 sm:$0xff]   ;;  %v8634_v29 = vld [vmem:[%s11756_s0 + $0x54] ss:$8 sps:$4 sm:$0xff]   ;;  %v8639_v32 = vld [vmem:[%s11756_s0 + $0x50] ss:$8 sps:$4 sm:$0xff]  }
   0xd   :  { %368 = vmatpush1.bf16.msra.mxu1 %v8590_v7  ;;  %190 = vmatprep.subr.bf16.mxu0 %v8615_v16  ;;  %v8611_v31 = vld [vmem:[%s11756_s0 + $0x12c] ss:$8 sps:$4 sm:$0xff]   ;;  %v8614_v34 = vld [vmem:[%s11756_s0 + $0x128] ss:$8 sps:$4 sm:$0xff]   ;;  %v8617_v35 = vld [vmem:[%s11756_s0 + $0x13c] ss:$8 sps:$4 sm:$0xff]  }
   0xe   :  { %369 = vmatprep.subr.bf16.mxu1 %v8591_v8  ;;  %7226 = vmatprep.mubr.msk.bf16.mxu1 %vm175_vm0, %v9599_v23  ;;  %v8640_v33 = vld [vmem:[%s11756_s0 + $0x64] ss:$8 sps:$4 sm:$0xff]   ;;  %v8645_v37 = vld [vmem:[%s11756_s0 + $0x60] ss:$8 sps:$4 sm:$0xff]   ;;  %v8646_v38 = vld [vmem:[%s11756_s0 + $0x74] ss:$8 sps:$4 sm:$0xff]  }
   0xf   :  { %7181 = vmatprep.mubr.msk.bf16.mxu0 %vm175_vm0, %v9599_v23  ;;  %v7202_v36 = vld [vmem:[%s11756_s0 + $0x148] sm:$0x11]  ;;  %v8620_v39 = vld [vmem:[%s11756_s0 + $0x138] ss:$8 sps:$4 sm:$0xff]   ;;  %v8632_v45 = vld [vmem:[%s11756_s0 + $0x154] ss:$8 sps:$4 sm:$0xff]  }
  0x10   :  { %191 = vmatpush1.bf16.msra.mxu0 %v8619_v18  ;;  %v7224_v40 = vcombine.high %v7202_v36, %v7202_v36  ;;  %v7223_v41 = vcombine.low %v7202_v36, %v7202_v36  ;;  %v8651_v42 = vld [vmem:[%s11756_s0 + $0x70] ss:$8 sps:$4 sm:$0xff]   ;;  %v8652_v43 = vld [vmem:[%s11756_s0 + $0x84] ss:$8 sps:$4 sm:$0xff]   ;;  %v8657_v46 = vld [vmem:[%s11756_s0 + $0x80] ss:$8 sps:$4 sm:$0xff]  }
  0x11   :  { %370 = vmatpush1.bf16.msra.mxu1 %v8593_v10  ;;  %192 = vmatprep.subr.bf16.mxu0 %v8621_v20  ;;  %v8658_v48 = vld [vmem:[%s11756_s0 + $0x94] ss:$8 sps:$4 sm:$0xff]   ;;  %v8630_v49 = vld [vmem:[%s11756_s0 + $0x150] ss:$8 sps:$4 sm:$0xff]   ;;  %v56_v50 = vld [vmem:[%s11756_s0 + $0xa0] sm:$0x11] }
  0x12   :  { %371 = vmatprep.subr.bf16.mxu1 %v8594_v11  ;;  %v358_v44 = vsel %vm179_vm1, %v7223_v41, 0  ;;  %v8638_v51 = vld [vmem:[%s11756_s0 + $0x164] ss:$8 sps:$4 sm:$0xff]   ;;  %v8663_v52 = vld [vmem:[%s11756_s0 + $0x90] ss:$8 sps:$4 sm:$0xff]   ;;  %v7179_v53 = vcombine.high %v56_v50, %v56_v50  ;;  %v7178_v54 = vcombine.low %v56_v50, %v56_v50 }
  0x13   :  { %v8636_v55 = vld [vmem:[%s11756_s0 + $0x160] ss:$8 sps:$4 sm:$0xff]   ;;  %v8644_v56 = vld [vmem:[%s11756_s0 + $0x174] ss:$8 sps:$4 sm:$0xff]   ;;  %v8642_v58 = vld [vmem:[%s11756_s0 + $0x170] ss:$8 sps:$4 sm:$0xff]  }
  0x14   :  { %193 = vmatpush1.bf16.msra.mxu0 %v8624_v24  ;;  %v181_v57 = vsel %vm179_vm1, %v7178_v54, 0  ;;  %v8650_v59 = vld [vmem:[%s11756_s0 + $0x184] ss:$8 sps:$4 sm:$0xff]   ;;  %v8648_v60 = vld [vmem:[%s11756_s0 + $0x180] ss:$8 sps:$4 sm:$0xff]  }
  0x15   :  { %372 = vmatpush1.bf16.msra.mxu1 %v8596_v14  ;;  %194 = vmatprep.subr.bf16.mxu0 %v8627_v25  ;;  %v58_v61 = vld [vmem:[%s11758_s2] sm:$0xff]  ;;  %v8656_v62 = vld [vmem:[%s11756_s0 + $0x194] ss:$8 sps:$4 sm:$0xff]   ;;  %v8654_v63 = vld [vmem:[%s11756_s0 + $0x190] ss:$8 sps:$4 sm:$0xff]  }
  0x16   :  { %373 = vmatprep.subr.bf16.mxu1 %v8597_v17  ;;  %61 = vperm.xlu0 %8581, %v58_v61   ;;  %v8662_v0 = vld [vmem:[%s11756_s0 + $0x1a4] ss:$8 sps:$4 sm:$0xff]   ;;  %v8660_v1 = vld [vmem:[%s11756_s0 + $0x1a0] ss:$8 sps:$4 sm:$0xff]   ;;  %v8667_v2 = vld [vmem:[%s11756_s0 + $0x1b4] ss:$8 sps:$4 sm:$0xff]  }
  0x17   :  { %v6907_v3 = vld [vmem:[#allocation2] sm:$0x1]  ;;  %v8665_v4 = vld [vmem:[%s11756_s0 + $0x1b0] ss:$8 sps:$4 sm:$0xff]   ;;  %v8671_v5 = vld [vmem:[%s11756_s0 + $0x1c4] ss:$8 sps:$4 sm:$0xff]  }
  0x18   :  { %195 = vmatpush1.bf16.msra.mxu0 %v8633_v28  ;;  %v8669_v6 = vld [vmem:[%s11756_s0 + $0x1c0] ss:$8 sps:$4 sm:$0xff]   ;;  %v8674_v7 = vld [vmem:[%s11756_s0 + $0x1d4] ss:$8 sps:$4 sm:$0xff]   ;;  %v8672_v8 = vld [vmem:[%s11756_s0 + $0x1d0] ss:$8 sps:$4 sm:$0xff]  }
  0x19   :  { %374 = vmatpush1.bf16.msra.mxu1 %v8599_v19  ;;  %196 = vmatprep.subr.bf16.mxu0 %v8634_v29  ;;  %v8677_v9 = vld [vmem:[%s11756_s0 + $0x1e4] ss:$8 sps:$4 sm:$0xff]   ;;  %v7250_v10 = vld [vmem:[%s11756_s0 + $0x1f0] sm:$0x11]  ;;  %v8675_v11 = vld [vmem:[%s11756_s0 + $0x1e0] ss:$8 sps:$4 sm:$0xff]  }
  0x1a   :  { %375 = vmatprep.subr.bf16.mxu1 %v8600_v22  ;;  %6910 = vperm.xlu0 %8581, %v6907_v3   ;;  %v7272_v12 = vcombine.high %v7250_v10, %v7250_v10  ;;  %v7271_v13 = vcombine.low %v7250_v10, %v7250_v10  ;;  %v8682_v14 = vld [vmem:[%s11756_s0 + $0x2a4] ss:$8 sps:$4 sm:$0xff]   ;;  %v8680_v16 = vld [vmem:[%s11756_s0 + $0x2a0] ss:$8 sps:$4 sm:$0xff]   ;;  %v8685_v17 = vld [vmem:[%s11756_s0 + $0x2b4] ss:$8 sps:$4 sm:$0xff]  }
  0x1b   :  { %v8683_v18 = vld [vmem:[%s11756_s0 + $0x2b0] ss:$8 sps:$4 sm:$0xff]   ;;  %v8688_v19 = vld [vmem:[%s11756_s0 + $0x2c4] ss:$8 sps:$4 sm:$0xff]   ;;  %v8686_v20 = vld [vmem:[%s11756_s0 + $0x2c0] ss:$8 sps:$4 sm:$0xff]  }
  0x1c   :  { %197 = vmatpush1.bf16.msra.mxu0 %v8639_v32  ;;  %v685_v15 = vsel %vm179_vm1, %v7271_v13, 0  ;;  %v8691_v21 = vld [vmem:[%s11756_s0 + $0x2d4] ss:$8 sps:$4 sm:$0xff]   ;;  %v8689_v22 = vld [vmem:[%s11756_s0 + $0x2d0] ss:$8 sps:$4 sm:$0xff]  }
  0x1d   :  { %376 = vmatpush1.bf16.msra.mxu1 %v8602_v26  ;;  %198 = vmatprep.subr.bf16.mxu0 %v8640_v33  ;;  %v8694_v24 = vld [vmem:[%s11756_s0 + $0x2e4] ss:$8 sps:$4 sm:$0xff]   ;;  %v8692_v25 = vld [vmem:[%s11756_s0 + $0x2e0] ss:$8 sps:$4 sm:$0xff]   ;;  %v8697_v26 = vld [vmem:[%s11756_s0 + $0x2f4] ss:$8 sps:$4 sm:$0xff]  }
  0x1e   :  { %377 = vmatprep.subr.bf16.mxu1 %v8605_v27  ;;  %v8695_v27 = vld [vmem:[%s11756_s0 + $0x2f0] ss:$8 sps:$4 sm:$0xff]   ;;  %v8700_v28 = vld [vmem:[%s11756_s0 + $0x304] ss:$8 sps:$4 sm:$0xff]   ;;  %v8698_v29 = vld [vmem:[%s11756_s0 + $0x300] ss:$8 sps:$4 sm:$0xff]  }
  0x1f   :  { %v8706_v32 = vld [vmem:[%s11756_s0 + $0x324] ss:$8 sps:$4 sm:$0xff]   ;;  %v8704_v33 = vld [vmem:[%s11756_s0 + $0x320] ss:$8 sps:$4 sm:$0xff]   ;;  %v8707_v36 = vld [vmem:[%s11756_s0 + $0x330] ss:$8 sps:$4 sm:$0xff]  }
  0x20   :  { %199 = vmatpush1.bf16.msra.mxu0 %v8645_v37  ;;  %v8712_v41 = vld [vmem:[%s11756_s0 + $0x3f0] ss:$8 sps:$4 sm:$0xff]   ;;  %v8744_v3 = vld [vmem:[%s11756_s0 + $0x540] ss:$8 sps:$4 sm:$0xff]   ;;  %v8758_v10 = vld [vmem:[%s11756_s0 + $0x584] ss:$8 sps:$4 sm:$0xff]  }
  0x21   :  { %378 = vmatpush1.bf16.msra.mxu1 %v8608_v30  ;;  %200 = vmatprep.subr.bf16.mxu0 %v8646_v38  ;;  %v8703_v30 = vld [vmem:[%s11756_s0 + $0x314] ss:$8 sps:$4 sm:$0xff]   ;;  %v8724_v50 = vld [vmem:[%s11756_s0 + $0x430] ss:$8 sps:$4 sm:$0xff]  }
  0x22   :  { %379 = vmatprep.subr.bf16.mxu1 %v8611_v31  ;;  %v8701_v31 = vld [vmem:[%s11756_s0 + $0x310] ss:$8 sps:$4 sm:$0xff]  }
  0x23   :  { %v8730_v54 = vld [vmem:[%s11756_s0 + $0x450] ss:$8 sps:$4 sm:$0xff]  }
  0x24   :  { %201 = vmatpush1.bf16.msra.mxu0 %v8651_v42  ;;  %v8717_v42 = vld [vmem:[%s11756_s0 + $0x404] ss:$8 sps:$4 sm:$0xff]   ;;  %v7438_v61 = vld [vmem:[%s11756_s0 + $0x490] sm:$0x11] }
  0x25   :  { %380 = vmatpush1.bf16.msra.mxu1 %v8614_v34  ;;  %202 = vmatprep.subr.bf16.mxu0 %v8652_v43  ;;  %v8709_v34 = vld [vmem:[%s11756_s0 + $0x334] ss:$8 sps:$4 sm:$0xff]   ;;  %v8715_v43 = vld [vmem:[%s11756_s0 + $0x400] ss:$8 sps:$4 sm:$0xff]   ;;  %v8759_v13 = vld [vmem:[%s11756_s0 + $0x590] ss:$8 sps:$4 sm:$0xff]  }
  0x26   :  { %381 = vmatprep.subr.bf16.mxu1 %v8617_v35  ;;  %v7344_v35 = vld [vmem:[%s11756_s0 + $0x340] sm:$0x11] }
  0x27   :  { %v7366_v37 = vcombine.high %v7344_v35, %v7344_v35  ;;  %v7365_v38 = vcombine.low %v7344_v35, %v7344_v35  ;;  %v8790_v35 = vld [vmem:[%s11756_s0 + $0x62c] ss:$8 sps:$4 sm:$0xff]  }
  0x28   :  { %203 = vmatpush1.bf16.msra.mxu0 %v8657_v46  ;;  %v8723_v46 = vld [vmem:[%s11756_s0 + $0x424] ss:$8 sps:$4 sm:$0xff]  }
  0x29   :  { %382 = vmatpush1.bf16.msra.mxu1 %v8620_v39  ;;  %204 = vmatprep.subr.bf16.mxu0 %v8658_v48  ;;  %v1193_v39 = vsel %vm179_vm1, %v7365_v38, 0  ;;  %v8721_v48 = vld [vmem:[%s11756_s0 + $0x420] ss:$8 sps:$4 sm:$0xff]  }
  0x2a   :  { %7225 = vmatprep.subr.msk.bf16.mxu1 %vm179_vm1, %v7224_v40  ;;  %v8714_v40 = vld [vmem:[%s11756_s0 + $0x3f4] ss:$8 sps:$4 sm:$0xff]   ;;  %v8791_v38 = vld [vmem:[%s11756_s0 + $0x638] ss:$8 sps:$4 sm:$0xff]  }
  0x2c   :  { %205 = vmatpush1.bf16.msra.mxu0 %v8663_v52  ;;  %v8727_v52 = vld [vmem:[%s11756_s0 + $0x440] ss:$8 sps:$4 sm:$0xff]  }
  0x2d   :  { %384 = vmatpush1.bf16.msra.mxu1 %v358_v44  ;;  %7180 = vmatprep.subr.msk.bf16.mxu0 %vm179_vm1, %v7179_v53  ;;  %v8720_v44 = vld [vmem:[%s11756_s0 + $0x414] ss:$8 sps:$4 sm:$0xff]  }
  0x2e   :  { %690 = vmatprep.subr.bf16.mxu1 %v8632_v45  ;;  %v8718_v45 = vld [vmem:[%s11756_s0 + $0x410] ss:$8 sps:$4 sm:$0xff]   ;;  %v8732_v53 = vld [vmem:[%s11756_s0 + $0x454] ss:$8 sps:$4 sm:$0xff]  }
  0x30   :  { %396 = vmatmul.mubr.bf16.vlgmr.msra.gmra.mrb[0].mxu1 %v9667_v47  ;;  %207 = vmatpush1.bf16.msra.mxu0 %v181_v57  ;;  %v8738_v57 = vld [vmem:[%s11756_s0 + $0x474] ss:$8 sps:$4 sm:$0xff]  }
  0x31   :  { %691 = vmatpush1.bf16.msra.mxu1 %v8630_v49  ;;  %7274 = vmatprep.mubr.msk.bf16.mxu1 %vm175_vm0, %v9599_v23  ;;  %v8726_v49 = vld [vmem:[%s11756_s0 + $0x434] ss:$8 sps:$4 sm:$0xff]  }
  0x32   :  { %692 = vmatprep.subr.bf16.mxu1 %v8638_v51  ;;  %v8729_v51 = vld [vmem:[%s11756_s0 + $0x444] ss:$8 sps:$4 sm:$0xff]  }
  0x33   :  { %219 = vmatmul.mubr.bf16.vlgmr.msra.gmra.mrb[0].mxu0 %v9667_v47 }
  0x35   :  { %693 = vmatpush1.bf16.msra.mxu1 %v8636_v55  ;;  %v8735_v55 = vld [vmem:[%s11756_s0 + $0x464] ss:$8 sps:$4 sm:$0xff]  }
  0x36   :  { %694 = vmatprep.subr.bf16.mxu1 %v8644_v56  ;;  %v8733_v56 = vld [vmem:[%s11756_s0 + $0x460] ss:$8 sps:$4 sm:$0xff]  }
  0x39   :  { %695 = vmatpush1.bf16.msra.mxu1 %v8642_v58  ;;  %v9477_v58 = vmov 0.0  }
  0x3a   :  { %696 = vmatprep.subr.bf16.mxu1 %v8650_v59  ;;  %476 = vmatprep.mubr.f32.mxu0 %v9477_v58  ;;  %v8736_v59 = vld [vmem:[%s11756_s0 + $0x470] ss:$8 sps:$4 sm:$0xff]  }
  0x3d   :  { %697 = vmatpush1.bf16.msra.mxu1 %v8648_v60  ;;  %v8741_v60 = vld [vmem:[%s11756_s0 + $0x484] ss:$8 sps:$4 sm:$0xff]  }
  0x3e   :  { %698 = vmatprep.subr.bf16.mxu1 %v8656_v62  ;;  %v8739_v62 = vld [vmem:[%s11756_s0 + $0x480] ss:$8 sps:$4 sm:$0xff]  }
  0x41   :  { %699 = vmatpush1.bf16.msra.mxu1 %v8654_v63  ;;  %v7460_v63 = vcombine.high %v7438_v61, %v7438_v61 }
  0x42   :  { %700 = vmatprep.subr.bf16.mxu1 %v8662_v0  ;;  %v7459_v0 = vcombine.low %v7438_v61, %v7438_v61 }
  0x45   :  { %701 = vmatpush1.bf16.msra.mxu1 %v8660_v1  ;;  %v1701_v1 = vsel %vm179_vm1, %v7459_v0, 0 }
  0x46   :  { %702 = vmatprep.subr.bf16.mxu1 %v8667_v2  ;;  %v8746_v2 = vld [vmem:[%s11756_s0 + $0x544] ss:$8 sps:$4 sm:$0xff]  }
  0x49   :  { %703 = vmatpush1.bf16.msra.mxu1 %v8665_v4  ;;  %v8749_v4 = vld [vmem:[%s11756_s0 + $0x554] ss:$8 sps:$4 sm:$0xff]  }
  0x4a   :  { %704 = vmatprep.subr.bf16.mxu1 %v8671_v5  ;;  %v8747_v5 = vld [vmem:[%s11756_s0 + $0x550] ss:$8 sps:$4 sm:$0xff]  }
  0x4d   :  { %705 = vmatpush1.bf16.msra.mxu1 %v8669_v6  ;;  %v8752_v6 = vld [vmem:[%s11756_s0 + $0x564] ss:$8 sps:$4 sm:$0xff]  }
  0x4e   :  { %706 = vmatprep.subr.bf16.mxu1 %v8674_v7  ;;  %v8750_v7 = vld [vmem:[%s11756_s0 + $0x560] ss:$8 sps:$4 sm:$0xff]  }
  0x51   :  { %707 = vmatpush1.bf16.msra.mxu1 %v8672_v8  ;;  %v8755_v8 = vld [vmem:[%s11756_s0 + $0x574] ss:$8 sps:$4 sm:$0xff]  }
  0x52   :  { %708 = vmatprep.subr.bf16.mxu1 %v8677_v9  ;;  %v8753_v9 = vld [vmem:[%s11756_s0 + $0x570] ss:$8 sps:$4 sm:$0xff]  }
  0x55   :  { %709 = vmatpush1.bf16.msra.mxu1 %v8675_v11  ;;  %v8756_v11 = vld [vmem:[%s11756_s0 + $0x580] ss:$8 sps:$4 sm:$0xff]  }
  0x56   :  { %7273 = vmatprep.subr.msk.bf16.mxu1 %vm179_vm1, %v7272_v12  ;;  %v8761_v12 = vld [vmem:[%s11756_s0 + $0x594] ss:$8 sps:$4 sm:$0xff]  }
  0x59   :  { %711 = vmatpush1.bf16.msra.mxu1 %v685_v15  ;;  %v8762_v15 = vld [vmem:[%s11756_s0 + $0x5a0] ss:$8 sps:$4 sm:$0xff]  }
  0x5a   :  { %1198 = vmatprep.subr.bf16.mxu1 %v8682_v14  ;;  %v8764_v14 = vld [vmem:[%s11756_s0 + $0x5a4] ss:$8 sps:$4 sm:$0xff]  }
  0x5c   :  { %723 = vmatmul.mubr.bf16.vlgmr.msra.gmra.mrb[4].mxu1 %v9667_v47 }
  0x5d   :  { %1199 = vmatpush1.bf16.msra.mxu1 %v8680_v16  ;;  %7368 = vmatprep.mubr.msk.bf16.mxu1 %vm175_vm0, %v9599_v23  ;;  %v8767_v16 = vld [vmem:[%s11756_s0 + $0x5b4] ss:$8 sps:$4 sm:$0xff]  }
  0x5e   :  { %1200 = vmatprep.subr.bf16.mxu1 %v8685_v17  ;;  %v8765_v17 = vld [vmem:[%s11756_s0 + $0x5b0] ss:$8 sps:$4 sm:$0xff]  }
  0x61   :  { %1201 = vmatpush1.bf16.msra.mxu1 %v8683_v18  ;;  %v8770_v18 = vld [vmem:[%s11756_s0 + $0x5c4] ss:$8 sps:$4 sm:$0xff]  }
  0x62   :  { %1202 = vmatprep.subr.bf16.mxu1 %v8688_v19  ;;  %v8768_v19 = vld [vmem:[%s11756_s0 + $0x5c0] ss:$8 sps:$4 sm:$0xff]  }
  0x65   :  { %1203 = vmatpush1.bf16.msra.mxu1 %v8686_v20  ;;  %v8773_v20 = vld [vmem:[%s11756_s0 + $0x5d4] ss:$8 sps:$4 sm:$0xff]  }
  0x66   :  { %1204 = vmatprep.subr.bf16.mxu1 %v8691_v21  ;;  %v7532_v21 = vld [vmem:[%s11756_s0 + $0x5e0] sm:$0x11] }
  0x69   :  { %1205 = vmatpush1.bf16.msra.mxu1 %v8689_v22  ;;  %v8771_v22 = vld [vmem:[%s11756_s0 + $0x5d0] ss:$8 sps:$4 sm:$0xff]  }
  0x6a   :  { %1206 = vmatprep.subr.bf16.mxu1 %v8694_v24  ;;  %v7554_v24 = vcombine.high %v7532_v21, %v7532_v21 }
  0x6d   :  { %1207 = vmatpush1.bf16.msra.mxu1 %v8692_v25  ;;  %v7553_v25 = vcombine.low %v7532_v21, %v7532_v21 }
  0x6e   :  { %1208 = vmatprep.subr.bf16.mxu1 %v8697_v26 }
  0x6f   :  { %v2209_v26 = vsel %vm179_vm1, %v7553_v25, 0 }
  0x71   :  { %1209 = vmatpush1.bf16.msra.mxu1 %v8695_v27  ;;  %v8778_v27 = vld [vmem:[%s11756_s0 + $0x5ec] ss:$8 sps:$4 sm:$0xff]  }
  0x72   :  { %1210 = vmatprep.subr.bf16.mxu1 %v8700_v28  ;;  %v8776_v28 = vld [vmem:[%s11756_s0 + $0x5e8] ss:$8 sps:$4 sm:$0xff]  }
  0x75   :  { %1211 = vmatpush1.bf16.msra.mxu1 %v8698_v29  ;;  %v8781_v29 = vld [vmem:[%s11756_s0 + $0x5fc] ss:$8 sps:$4 sm:$0xff]  }
  0x76   :  { %1212 = vmatprep.subr.bf16.mxu1 %v8703_v30  ;;  %v8779_v30 = vld [vmem:[%s11756_s0 + $0x5f8] ss:$8 sps:$4 sm:$0xff]  }
  0x79   :  { %1213 = vmatpush1.bf16.msra.mxu1 %v8701_v31  ;;  %v8784_v31 = vld [vmem:[%s11756_s0 + $0x60c] ss:$8 sps:$4 sm:$0xff]  }
  0x7a   :  { %1214 = vmatprep.subr.bf16.mxu1 %v8706_v32  ;;  %v8782_v32 = vld [vmem:[%s11756_s0 + $0x608] ss:$8 sps:$4 sm:$0xff]  }
  0x7d   :  { %1215 = vmatpush1.bf16.msra.mxu1 %v8704_v33  ;;  %v8787_v33 = vld [vmem:[%s11756_s0 + $0x61c] ss:$8 sps:$4 sm:$0xff]  }
  0x7e   :  { %1216 = vmatprep.subr.bf16.mxu1 %v8709_v34  ;;  %v8785_v34 = vld [vmem:[%s11756_s0 + $0x618] ss:$8 sps:$4 sm:$0xff]  }
  0x81   :  { %1217 = vmatpush1.bf16.msra.mxu1 %v8707_v36  ;;  %v8788_v36 = vld [vmem:[%s11756_s0 + $0x628] ss:$8 sps:$4 sm:$0xff]  }
  0x82   :  { %7367 = vmatprep.subr.msk.bf16.mxu1 %vm179_vm1, %v7366_v37  ;;  %v8793_v37 = vld [vmem:[%s11756_s0 + $0x63c] ss:$8 sps:$4 sm:$0xff]  }
  0x85   :  { %1219 = vmatpush1.bf16.msra.mxu1 %v1193_v39  ;;  %v8796_v39 = vld [vmem:[%s11756_s0 + $0x64c] ss:$8 sps:$4 sm:$0xff]  }
  0x86   :  { %1706 = vmatprep.subr.bf16.mxu1 %v8714_v40  ;;  %v8794_v40 = vld [vmem:[%s11756_s0 + $0x648] ss:$8 sps:$4 sm:$0xff]  }
  0x88   :  { %1231 = vmatmul.mubr.bf16.vlgmr.msra.gmra.mrb[8].mxu1 %v9667_v47 }
  0x89   :  { %1707 = vmatpush1.bf16.msra.mxu1 %v8712_v41  ;;  %7462 = vmatprep.mubr.msk.bf16.mxu1 %vm175_vm0, %v9599_v23  ;;  %v8799_v41 = vld [vmem:[%s11756_s0 + $0x65c] ss:$8 sps:$4 sm:$0xff]  }
  0x8a   :  { %1708 = vmatprep.subr.bf16.mxu1 %v8717_v42  ;;  %v8797_v42 = vld [vmem:[%s11756_s0 + $0x658] ss:$8 sps:$4 sm:$0xff]  }
  0x8d   :  { %1709 = vmatpush1.bf16.msra.mxu1 %v8715_v43  ;;  %v8802_v43 = vld [vmem:[%s11756_s0 + $0x66c] ss:$8 sps:$4 sm:$0xff]  }
  0x8e   :  { %1710 = vmatprep.subr.bf16.mxu1 %v8720_v44  ;;  %v8800_v44 = vld [vmem:[%s11756_s0 + $0x668] ss:$8 sps:$4 sm:$0xff]  }
  0x91   :  { %1711 = vmatpush1.bf16.msra.mxu1 %v8718_v45  ;;  %v8805_v45 = vld [vmem:[%s11756_s0 + $0x67c] ss:$8 sps:$4 sm:$0xff]  }
  0x92   :  { %1712 = vmatprep.subr.bf16.mxu1 %v8723_v46  ;;  %v7579_v46 = vld [vmem:[%s11756_s0 + $0x688] sm:$0x11] }
  0x95   :  { %1713 = vmatpush1.bf16.msra.mxu1 %v8721_v48  ;;  %v10017_v48 = vpop.permute.xlu0 %61 }
  0x96   :  { %1714 = vmatprep.subr.bf16.mxu1 %v8726_v49  ;;  %v8803_v49 = vld [vmem:[%s11756_s0 + $0x678] ss:$8 sps:$4 sm:$0xff]  }
  0x99   :  { %1715 = vmatpush1.bf16.msra.mxu1 %v8724_v50  ;;  %v7601_v50 = vcombine.high %v7579_v46, %v7579_v46 }
  0x9a   :  { %1716 = vmatprep.subr.bf16.mxu1 %v8729_v51  ;;  %v7600_v51 = vcombine.low %v7579_v46, %v7579_v46 }
  0x9d   :  { %1717 = vmatpush1.bf16.msra.mxu1 %v8727_v52 }
  0x9e   :  { %1718 = vmatprep.subr.bf16.mxu1 %v8732_v53 }
  0xa1   :  { %1719 = vmatpush1.bf16.msra.mxu1 %v8730_v54 }
  0xa2   :  { %1720 = vmatprep.subr.bf16.mxu1 %v8735_v55 }
  0xa5   :  { %1721 = vmatpush1.bf16.msra.mxu1 %v8733_v56 }
  0xa6   :  { %1722 = vmatprep.subr.bf16.mxu1 %v8738_v57 }
  0xa9   :  { %1723 = vmatpush1.bf16.msra.mxu1 %v8736_v59 }
  0xaa   :  { %1724 = vmatprep.subr.bf16.mxu1 %v8741_v60 }
  0xad   :  { %1725 = vmatpush1.bf16.msra.mxu1 %v8739_v62 }
  0xae   :  { %7461 = vmatprep.subr.msk.bf16.mxu1 %vm179_vm1, %v7460_v63 }
  0xb1   :  { %1727 = vmatpush1.bf16.msra.mxu1 %v1701_v1 }
  0xb2   :  { %2214 = vmatprep.subr.bf16.mxu1 %v8746_v2 }
  0xb4   :  { %1739 = vmatmul.mubr.bf16.vlgmr.msra.gmra.mrb[12].mxu1 %v9667_v47 }
  0xb5   :  { %2215 = vmatpush1.bf16.msra.mxu1 %v8744_v3  ;;  %7556 = vmatprep.mubr.msk.bf16.mxu1 %vm175_vm0, %v9599_v23 }
  0xb6   :  { %2216 = vmatprep.subr.bf16.mxu1 %v8749_v4 }
  0xb9   :  { %2217 = vmatpush1.bf16.msra.mxu1 %v8747_v5 }
  0xba   :  { %2218 = vmatprep.subr.bf16.mxu1 %v8752_v6 }
  0xbd   :  { %2219 = vmatpush1.bf16.msra.mxu1 %v8750_v7 }
  0xbe   :  { %2220 = vmatprep.subr.bf16.mxu1 %v8755_v8 }
  0xc1   :  { %2221 = vmatpush1.bf16.msra.mxu1 %v8753_v9 }
  0xc2   :  { %2222 = vmatprep.subr.bf16.mxu1 %v8758_v10 }
  0xc5   :  { %2223 = vmatpush1.bf16.msra.mxu1 %v8756_v11 }
  0xc6   :  { %2224 = vmatprep.subr.bf16.mxu1 %v8761_v12 }
  0xc9   :  { %2225 = vmatpush1.bf16.msra.mxu1 %v8759_v13 }
  0xca   :  { %2226 = vmatprep.subr.bf16.mxu1 %v8764_v14 }
  0xcd   :  { %2227 = vmatpush1.bf16.msra.mxu1 %v8762_v15 }
  0xce   :  { %2228 = vmatprep.subr.bf16.mxu1 %v8767_v16 }
  0xd1   :  { %2229 = vmatpush1.bf16.msra.mxu1 %v8765_v17 }
  0xd2   :  { %2230 = vmatprep.subr.bf16.mxu1 %v8770_v18 }
  0xd5   :  { %2231 = vmatpush1.bf16.msra.mxu1 %v8768_v19 }
  0xd6   :  { %2232 = vmatprep.subr.bf16.mxu1 %v8773_v20 }
  0xd9   :  { %2233 = vmatpush1.bf16.msra.mxu1 %v8771_v22 }
  0xda   :  { %7555 = vmatprep.subr.msk.bf16.mxu1 %vm179_vm1, %v7554_v24 }
  0xdd   :  { %2235 = vmatpush1.bf16.msra.mxu1 %v2209_v26 }
  0xde   :  { %2468 = vmatprep.subr.bf16.mxu1 %v8778_v27 }
  0xe0   :  { %2247 = vmatmul.mubr.bf16.vlgmr.msra.gmra.mrb[16].mxu1 %v9667_v47 }
  0xe1   :  { %2469 = vmatpush1.bf16.msra.mxu1 %v8776_v28  ;;  %7603 = vmatprep.mubr.msk.bf16.mxu1 %vm175_vm0, %v9599_v23 }
  0xe2   :  { %2470 = vmatprep.subr.bf16.mxu1 %v8781_v29 }
  0xe5   :  { %2471 = vmatpush1.bf16.msra.mxu1 %v8779_v30 }
  0xe6   :  { %2472 = vmatprep.subr.bf16.mxu1 %v8784_v31 }
  0xe9   :  { %2473 = vmatpush1.bf16.msra.mxu1 %v8782_v32 }
  0xea   :  { %2474 = vmatprep.subr.bf16.mxu1 %v8787_v33 }
  0xed   :  { %2475 = vmatpush1.bf16.msra.mxu1 %v8785_v34 }
  0xee   :  { %2476 = vmatprep.subr.bf16.mxu1 %v8790_v35 }
  0xf1   :  { %2477 = vmatpush1.bf16.msra.mxu1 %v8788_v36 }
  0xf2   :  { %2478 = vmatprep.subr.bf16.mxu1 %v8793_v37 }
  0xf5   :  { %2479 = vmatpush1.bf16.msra.mxu1 %v8791_v38 }
  0xf6   :  { %2480 = vmatprep.subr.bf16.mxu1 %v8796_v39 }
  0xf9   :  { %2481 = vmatpush1.bf16.msra.mxu1 %v8794_v40 }
  0xfa   :  { %2482 = vmatprep.subr.bf16.mxu1 %v8799_v41 }
  0xfd   :  { %2483 = vmatpush1.bf16.msra.mxu1 %v8797_v42 }
  0xfe   :  { %2484 = vmatprep.subr.bf16.mxu1 %v8802_v43 }
 0x101   :  { %2485 = vmatpush1.bf16.msra.mxu1 %v8800_v44 }
 0x102   :  { %2486 = vmatprep.subr.bf16.mxu1 %v8805_v45 }
 0x103   :  { %v397_v52 = vpop.f32.mrb[0].mxu1 }
 0x104   :  { %v399_v53 = vpop.f32.mrb[1].mxu1  ;;  %v398_v54 = vadd.f32 %v397_v52, %v10017_v48 }
 0x105   :  { %16 = vsyncpa [#allocation4], 0  ;;  %v400_v55 = vadd.f32 %v399_v53, %v10017_v48  ;;  %v401_v56 = vpop.f32.mrb[2].mxu1  ;;  %2487 = vmatpush1.bf16.msra.mxu1 %v8803_v49  ;;  %v2463_v59 = vsel %vm179_vm1, %v7600_v51, 0  ;;  %v8810_v61 = vld [vmem:[%s11756_s0 + $0x73c] ss:$8 sps:$4 sm:$0xff]  }
 0x106   :  { %v402_v57 = vpop.f32.mrb[3].mxu1  ;;  %7602 = vmatprep.subr.msk.bf16.mxu1 %vm179_vm1, %v7601_v50  ;;  %v404_v60 = vmax.f32 %v398_v54, 0.0  ;;  %v7227_v63 = vld [vmem:[%s11759_s3 + $0x1] sm:$0x1]  ;;  %vm408_vm2 = vcmask 64512   ;;  %v220_v3 = vpop.f32.mrb[0].mxu0 }
 0x107   :  { %v405_v62 = vmax.f32 %v400_v55, 0.0  ;;  %v8808_v0 = vld [vmem:[%s11756_s0 + $0x738] ss:$8 sps:$4 sm:$0xff]   ;;  %v8813_v1 = vld [vmem:[%s11756_s0 + $0x74c] ss:$8 sps:$4 sm:$0xff]   ;;  %v221_v5 = vadd.f32 %v220_v3, %v10017_v48  ;;  %v222_v6 = vpop.f32.mrb[1].mxu0 }
 0x108   :  { %v8811_v2 = vld [vmem:[%s11756_s0 + $0x748] ss:$8 sps:$4 sm:$0xff]   ;;  %v8816_v4 = vld [vmem:[%s11756_s0 + $0x75c] ss:$8 sps:$4 sm:$0xff]   ;;  %v223_v7 = vadd.f32 %v222_v6, %v10017_v48  ;;  %v224_v8 = vpop.f32.mrb[2].mxu0  ;;  %vm6960_vm3 = vcmask 1044480  }
 0x109   :  { %412 = vmatprep.subr.mxu0 %v405_v62  ;;  %2489 = vmatpush1.bf16.msra.mxu1 %v2463_v59  ;;  %v227_v9 = vmax.f32 %v221_v5, 0.0  ;;  %v225_v10 = vpop.f32.mrb[3].mxu0  ;;  %v8814_v11 = vld [vmem:[%s11756_s0 + $0x758] ss:$8 sps:$4 sm:$0xff]   ;;  %v8819_v13 = vld [vmem:[%s11756_s0 + $0x76c] ss:$8 sps:$4 sm:$0xff]  }
 0x10a   :  { %413 = vmatpush1.msra.mxu0 %v404_v60  ;;  %2976 = vmatprep.subr.bf16.mxu1 %v8810_v61  ;;  %v228_v12 = vmax.f32 %v223_v7, 0.0  ;;  %v229_v14 = vld [vmem:[%s11759_s3] sm:$0x1]  ;;  %v8817_v15 = vld [vmem:[%s11756_s0 + $0x768] ss:$8 sps:$4 sm:$0xff]   ;;  %vm9479_vm4 = vmmov 1  }
 0x10b   :  { %7228 = vmatmul.mubr.msk.f32.vlgmr.msra.gmra.mrb[4].mxu0 %vm408_vm2, %v7227_v63  ;;  %v8822_v16 = vld [vmem:[%s11756_s0 + $0x77c] ss:$8 sps:$4 sm:$0xff]   ;;  %v8820_v17 = vld [vmem:[%s11756_s0 + $0x778] ss:$8 sps:$4 sm:$0xff]   ;;  %v8825_v18 = vld [vmem:[%s11756_s0 + $0x78c] ss:$8 sps:$4 sm:$0xff]  }
 0x10c   :  { %2501 = vmatmul.mubr.bf16.vlgmr.msra.gmra.mrb[20].mxu1 %v9667_v47  ;;  %550 = vmatprep.mubr.f32.mxu0 %v9477_v58  ;;  %v8823_v19 = vld [vmem:[%s11756_s0 + $0x788] ss:$8 sps:$4 sm:$0xff]   ;;  %v8828_v20 = vld [vmem:[%s11756_s0 + $0x79c] ss:$8 sps:$4 sm:$0xff]   ;;  %v8826_v21 = vld [vmem:[%s11756_s0 + $0x798] ss:$8 sps:$4 sm:$0xff]  }
 0x10d   :  { %2977 = vmatpush1.bf16.msra.mxu1 %v8808_v0  ;;  %7697 = vmatprep.mubr.msk.bf16.mxu1 %vm175_vm0, %v9599_v23  ;;  %v8831_v22 = vld [vmem:[%s11756_s0 + $0x7ac] ss:$8 sps:$4 sm:$0xff]   ;;  %v8829_v24 = vld [vmem:[%s11756_s0 + $0x7a8] ss:$8 sps:$4 sm:$0xff]   ;;  %v8834_v25 = vld [vmem:[%s11756_s0 + $0x7bc] ss:$8 sps:$4 sm:$0xff]  }
 0x10e   :  { %2978 = vmatprep.subr.bf16.mxu1 %v8813_v1  ;;  %486 = vmatprep.subr.mxu0 %v228_v12  ;;  %v8832_v26 = vld [vmem:[%s11756_s0 + $0x7b8] ss:$8 sps:$4 sm:$0xff]   ;;  %v8837_v27 = vld [vmem:[%s11756_s0 + $0x7cc] ss:$8 sps:$4 sm:$0xff]   ;;  %v8835_v29 = vld [vmem:[%s11756_s0 + $0x7c8] ss:$8 sps:$4 sm:$0xff]  }
 0x10f   :  { %487 = vmatpush1.msra.mxu0 %v227_v9  ;;  %v7673_v28 = vld [vmem:[%s11756_s0 + $0x7d8] sm:$0x11]  ;;  %v8845_v39 = vld [vmem:[%s11756_s0 + $0x88c] ss:$8 sps:$4 sm:$0xff]   ;;  %v7275_v44 = vld [vmem:[%s11759_s3 + $0x2] sm:$0x1] }
 0x110   :  { %v7695_v30 = vcombine.high %v7673_v28, %v7673_v28  ;;  %v7694_v31 = vcombine.low %v7673_v28, %v7673_v28  ;;  %v8842_v41 = vld [vmem:[%s11756_s0 + $0x1fc] ss:$8 sps:$4 sm:$0xff]   ;;  %v8840_v43 = vld [vmem:[%s11756_s0 + $0x1f8] ss:$8 sps:$4 sm:$0xff]   ;;  %v8843_v45 = vld [vmem:[%s11756_s0 + $0x888] ss:$8 sps:$4 sm:$0xff]  }
 0x111   :  { %2979 = vmatpush1.bf16.msra.mxu1 %v8811_v2  ;;  %v8848_v46 = vld [vmem:[%s11756_s0 + $0x20c] ss:$8 sps:$4 sm:$0xff]   ;;  %v8851_v49 = vld [vmem:[%s11756_s0 + $0x89c] ss:$8 sps:$4 sm:$0xff]   ;;  %v8846_v50 = vld [vmem:[%s11756_s0 + $0x208] ss:$8 sps:$4 sm:$0xff]  }
 0x112   :  { %2980 = vmatprep.subr.bf16.mxu1 %v8816_v4  ;;  %v2971_v38 = vsel %vm179_vm1, %v7694_v31, 0  ;;  %v8849_v51 = vld [vmem:[%s11756_s0 + $0x898] ss:$8 sps:$4 sm:$0xff]   ;;  %v8854_v52 = vld [vmem:[%s11756_s0 + $0x21c] ss:$8 sps:$4 sm:$0xff]   ;;  %vm8511_vm5 = vmpackc.low %vm6960_vm3, %vm9479_vm4  ;;  %vm9480_vm6 = vmmov 0  }
 0x113   :  { %7229 = vmatmul.mubr.msk.f32.vlgmr.msra.gmra.mrb[4].mxu0 %vm408_vm2, %v229_v14  ;;  %v8857_v53 = vld [vmem:[%s11756_s0 + $0x8ac] ss:$8 sps:$4 sm:$0xff]   ;;  %v8852_v54 = vld [vmem:[%s11756_s0 + $0x218] ss:$8 sps:$4 sm:$0xff]   ;;  %v8855_v55 = vld [vmem:[%s11756_s0 + $0x8a8] ss:$8 sps:$4 sm:$0xff]  }
 0x114   :  { %802 = vmatprep.mubr.f32.mxu0 %v9477_v58  ;;  %v8860_v56 = vld [vmem:[%s11756_s0 + $0x22c] ss:$8 sps:$4 sm:$0xff]   ;;  %v8863_v57 = vld [vmem:[%s11756_s0 + $0x8bc] ss:$8 sps:$4 sm:$0xff]   ;;  %v8858_v59 = vld [vmem:[%s11756_s0 + $0x228] ss:$8 sps:$4 sm:$0xff]  }
 0x115   :  { %2981 = vmatpush1.bf16.msra.mxu1 %v8814_v11  ;;  %v8861_v60 = vld [vmem:[%s11756_s0 + $0x8b8] ss:$8 sps:$4 sm:$0xff]   ;;  %v8866_v61 = vld [vmem:[%s11756_s0 + $0x23c] ss:$8 sps:$4 sm:$0xff]   ;;  %v8869_v62 = vld [vmem:[%s11756_s0 + $0x8cc] ss:$8 sps:$4 sm:$0xff]  }
 0x116   :  { %2982 = vmatprep.subr.bf16.mxu1 %v8819_v13  ;;  %v8864_v63 = vld [vmem:[%s11756_s0 + $0x238] ss:$8 sps:$4 sm:$0xff]   ;;  %v8867_v0 = vld [vmem:[%s11756_s0 + $0x8c8] ss:$8 sps:$4 sm:$0xff]   ;;  %v8872_v1 = vld [vmem:[%s11756_s0 + $0x24c] ss:$8 sps:$4 sm:$0xff]  }
 0x117   :  { %v8875_v2 = vld [vmem:[%s11756_s0 + $0x8dc] ss:$8 sps:$4 sm:$0xff]   ;;  %v8870_v3 = vld [vmem:[%s11756_s0 + $0x248] ss:$8 sps:$4 sm:$0xff]   ;;  %v8873_v4 = vld [vmem:[%s11756_s0 + $0x8d8] ss:$8 sps:$4 sm:$0xff]  }
 0x118   :  { %v8878_v5 = vld [vmem:[%s11756_s0 + $0x25c] ss:$8 sps:$4 sm:$0xff]   ;;  %v8881_v6 = vld [vmem:[%s11756_s0 + $0x8ec] ss:$8 sps:$4 sm:$0xff]   ;;  %v8876_v7 = vld [vmem:[%s11756_s0 + $0x258] ss:$8 sps:$4 sm:$0xff]  }
 0x119   :  { %2983 = vmatpush1.bf16.msra.mxu1 %v8817_v15  ;;  %v8879_v8 = vld [vmem:[%s11756_s0 + $0x8e8] ss:$8 sps:$4 sm:$0xff]   ;;  %v8884_v9 = vld [vmem:[%s11756_s0 + $0x26c] ss:$8 sps:$4 sm:$0xff]   ;;  %v8887_v10 = vld [vmem:[%s11756_s0 + $0x8fc] ss:$8 sps:$4 sm:$0xff]  }
 0x11a   :  { %2984 = vmatprep.subr.bf16.mxu1 %v8822_v16  ;;  %v8882_v11 = vld [vmem:[%s11756_s0 + $0x268] ss:$8 sps:$4 sm:$0xff]   ;;  %v8885_v12 = vld [vmem:[%s11756_s0 + $0x8f8] ss:$8 sps:$4 sm:$0xff]   ;;  %v8890_v13 = vld [vmem:[%s11756_s0 + $0x27c] ss:$8 sps:$4 sm:$0xff]  }
 0x11b   :  { %v8893_v14 = vld [vmem:[%s11756_s0 + $0x90c] ss:$8 sps:$4 sm:$0xff]   ;;  %v8888_v15 = vld [vmem:[%s11756_s0 + $0x278] ss:$8 sps:$4 sm:$0xff]   ;;  %v8891_v16 = vld [vmem:[%s11756_s0 + $0x908] ss:$8 sps:$4 sm:$0xff]  }
 0x11c   :  { %s9481_s4 = smov 3   ;;  %vm6929_vm7 = vcmask 23552   ;;  %vm6956_vm8 = vcmask 1022976   ;;  %vm7053_vm9 = vcmask 1041408   ;;  %vm7049_vm10 = vcmask 408576  }
 0x11d   :  { %2985 = vmatpush1.bf16.msra.mxu1 %v8820_v17  ;;  %v8896_v17 = vld [vmem:[%s11756_s0 + $0x28c] ss:$8 sps:$4 sm:$0xff]   ;;  %vm7127_vm11 = vcmask 25600  }
 0x11e   :  { %2986 = vmatprep.subr.bf16.mxu1 %v8825_v18  ;;  %v8899_v18 = vld [vmem:[%s11756_s0 + $0x91c] ss:$8 sps:$4 sm:$0xff]  }
 0x121   :  { %2987 = vmatpush1.bf16.msra.mxu1 %v8823_v19  ;;  %v7297_v19 = vld [vmem:[%s11756_s0 + $0x298] sm:$0x11] }
 0x122   :  { %2988 = vmatprep.subr.bf16.mxu1 %v8828_v20  ;;  %v7767_v20 = vld [vmem:[%s11756_s0 + $0x928] sm:$0x11] }
 0x125   :  { %2989 = vmatpush1.bf16.msra.mxu1 %v8826_v21  ;;  %v8894_v21 = vld [vmem:[%s11756_s0 + $0x288] ss:$8 sps:$4 sm:$0xff]  }
 0x126   :  { %2990 = vmatprep.subr.bf16.mxu1 %v8831_v22  ;;  %v8897_v22 = vld [vmem:[%s11756_s0 + $0x918] ss:$8 sps:$4 sm:$0xff]  }
 0x129   :  { %2991 = vmatpush1.bf16.msra.mxu1 %v8829_v24  ;;  %v7319_v24 = vcombine.high %v7297_v19, %v7297_v19 }
 0x12a   :  { %2992 = vmatprep.subr.bf16.mxu1 %v8834_v25  ;;  %v7318_v25 = vcombine.low %v7297_v19, %v7297_v19  ;;  %v8965_v19 = vld [vmem:[%s11756_s0 + $0xb14] ss:$8 sps:$4 sm:$0xff]  }
 0x12d   :  { %2993 = vmatpush1.bf16.msra.mxu1 %v8832_v26  ;;  %v7789_v26 = vcombine.high %v7767_v20, %v7767_v20 }
 0x12e   :  { %2994 = vmatprep.subr.bf16.mxu1 %v8837_v27  ;;  %v7788_v27 = vcombine.low %v7767_v20, %v7767_v20  ;;  %v7908_v20 = vld [vmem:[%s11756_s0 + $0xb20] sm:$0x11] }
 0x12f   :  { %v724_v32 = vpop.f32.mrb[4].mxu1 }
 0x130   :  { %v725_v33 = vadd.f32 %v724_v32, %v10017_v48  ;;  %v726_v34 = vpop.f32.mrb[5].mxu1  ;;  %v3479_v32 = vsel %vm179_vm1, %v7788_v27, 0 }
 0x131   :  { %v727_v35 = vadd.f32 %v726_v34, %v10017_v48  ;;  %v728_v36 = vpop.f32.mrb[6].mxu1  ;;  %2995 = vmatpush1.bf16.msra.mxu1 %v8835_v29 }
 0x132   :  { %v729_v37 = vpop.f32.mrb[7].mxu1  ;;  %7696 = vmatprep.subr.msk.bf16.mxu1 %vm179_vm1, %v7695_v30  ;;  %v731_v42 = vmax.f32 %v725_v33, 0.0  ;;  %v939_v30 = vsel %vm179_vm1, %v7318_v25, 0  ;;  %v8906_v33 = vld [vmem:[%s11756_s0 + $0x9dc] ss:$8 sps:$4 sm:$0xff]  }
 0x133   :  { %v732_v40 = vmax.f32 %v727_v35, 0.0  ;;  %v8904_v35 = vld [vmem:[%s11756_s0 + $0x9d8] ss:$8 sps:$4 sm:$0xff]   ;;  %v8909_v36 = vld [vmem:[%s11756_s0 + $0x9ec] ss:$8 sps:$4 sm:$0xff]  }
 0x134   :  { %v8907_v37 = vld [vmem:[%s11756_s0 + $0x9e8] ss:$8 sps:$4 sm:$0xff]  }
 0x135   :  { %738 = vmatprep.subr.mxu0 %v732_v40  ;;  %2997 = vmatpush1.bf16.msra.mxu1 %v2971_v38  ;;  %v8912_v38 = vld [vmem:[%s11756_s0 + $0x9fc] ss:$8 sps:$4 sm:$0xff]   ;;  %v8915_v40 = vld [vmem:[%s11756_s0 + $0xa0c] ss:$8 sps:$4 sm:$0xff]  }
 0x136   :  { %739 = vmatpush1.msra.mxu0 %v731_v42  ;;  %3484 = vmatprep.subr.bf16.mxu1 %v8845_v39  ;;  %v8910_v39 = vld [vmem:[%s11756_s0 + $0x9f8] ss:$8 sps:$4 sm:$0xff]   ;;  %v8918_v42 = vld [vmem:[%s11756_s0 + $0xa1c] ss:$8 sps:$4 sm:$0xff]  }
 0x137   :  { %944 = vmatprep.subr.bf16.mxu0 %v8842_v41  ;;  %7276 = vmatmul.mubr.msk.f32.vlgmr.msra.gmra.mrb[4].mxu0 %vm408_vm2, %v7275_v44  ;;  %v8913_v41 = vld [vmem:[%s11756_s0 + $0xa08] ss:$8 sps:$4 sm:$0xff]   ;;  %v8921_v44 = vld [vmem:[%s11756_s0 + $0xa2c] ss:$8 sps:$4 sm:$0xff]  }
 0x138   :  { %945 = vmatpush1.bf16.msra.mxu0 %v8840_v43  ;;  %3009 = vmatmul.mubr.bf16.vlgmr.msra.gmra.mrb[24].mxu1 %v9667_v47  ;;  %v8916_v43 = vld [vmem:[%s11756_s0 + $0xa18] ss:$8 sps:$4 sm:$0xff]  }
 0x139   :  { %3485 = vmatpush1.bf16.msra.mxu1 %v8843_v45  ;;  %946 = vmatprep.subr.bf16.mxu0 %v8848_v46  ;;  %v8919_v45 = vld [vmem:[%s11756_s0 + $0xa28] ss:$8 sps:$4 sm:$0xff]   ;;  %v8924_v46 = vld [vmem:[%s11756_s0 + $0xa3c] ss:$8 sps:$4 sm:$0xff]  }
 0x13a   :  { %3486 = vmatprep.subr.bf16.mxu1 %v8851_v49  ;;  %7321 = vmatprep.mubr.msk.bf16.mxu0 %vm175_vm0, %v9599_v23  ;;  %v8922_v49 = vld [vmem:[%s11756_s0 + $0xa38] ss:$8 sps:$4 sm:$0xff]  }
 0x13b   :  { %7791 = vmatprep.mubr.msk.bf16.mxu1 %vm175_vm0, %v9599_v23 }
 0x13c   :  { %947 = vmatpush1.bf16.msra.mxu0 %v8846_v50  ;;  %v8927_v50 = vld [vmem:[%s11756_s0 + $0xa4c] ss:$8 sps:$4 sm:$0xff]  }
 0x13d   :  { %3487 = vmatpush1.bf16.msra.mxu1 %v8849_v51  ;;  %948 = vmatprep.subr.bf16.mxu0 %v8854_v52  ;;  %v8925_v51 = vld [vmem:[%s11756_s0 + $0xa48] ss:$8 sps:$4 sm:$0xff]   ;;  %v8930_v52 = vld [vmem:[%s11756_s0 + $0xa5c] ss:$8 sps:$4 sm:$0xff]  }
 0x13e   :  { %3488 = vmatprep.subr.bf16.mxu1 %v8857_v53  ;;  %v8928_v53 = vld [vmem:[%s11756_s0 + $0xa58] ss:$8 sps:$4 sm:$0xff]  }
 0x140   :  { %949 = vmatpush1.bf16.msra.mxu0 %v8852_v54  ;;  %v8933_v54 = vld [vmem:[%s11756_s0 + $0xa6c] ss:$8 sps:$4 sm:$0xff]  }
 0x141   :  { %3489 = vmatpush1.bf16.msra.mxu1 %v8855_v55  ;;  %950 = vmatprep.subr.bf16.mxu0 %v8860_v56  ;;  %v7861_v55 = vld [vmem:[%s11756_s0 + $0xa78] sm:$0x11]  ;;  %v8931_v56 = vld [vmem:[%s11756_s0 + $0xa68] ss:$8 sps:$4 sm:$0xff]  }
 0x142   :  { %3490 = vmatprep.subr.bf16.mxu1 %v8863_v57  ;;  %v7883_v57 = vcombine.high %v7861_v55, %v7861_v55 }
 0x144   :  { %951 = vmatpush1.bf16.msra.mxu0 %v8858_v59  ;;  %v7882_v59 = vcombine.low %v7861_v55, %v7861_v55 }
 0x145   :  { %3491 = vmatpush1.bf16.msra.mxu1 %v8861_v60  ;;  %952 = vmatprep.subr.bf16.mxu0 %v8866_v61 }
 0x146   :  { %3492 = vmatprep.subr.bf16.mxu1 %v8869_v62 }
 0x148   :  { %953 = vmatpush1.bf16.msra.mxu0 %v8864_v63  ;;  %v3987_v63 = vsel %vm179_vm1, %v7882_v59, 0 }
 0x149   :  { %3493 = vmatpush1.bf16.msra.mxu1 %v8867_v0  ;;  %954 = vmatprep.subr.bf16.mxu0 %v8872_v1  ;;  %v8938_v0 = vld [vmem:[%s11756_s0 + $0xa84] ss:$8 sps:$4 sm:$0xff]  }
 0x14a   :  { %3494 = vmatprep.subr.bf16.mxu1 %v8875_v2  ;;  %v8936_v2 = vld [vmem:[%s11756_s0 + $0xa80] ss:$8 sps:$4 sm:$0xff]  }
 0x14c   :  { %955 = vmatpush1.bf16.msra.mxu0 %v8870_v3  ;;  %v8941_v3 = vld [vmem:[%s11756_s0 + $0xa94] ss:$8 sps:$4 sm:$0xff]  }
 0x14d   :  { %3495 = vmatpush1.bf16.msra.mxu1 %v8873_v4  ;;  %956 = vmatprep.subr.bf16.mxu0 %v8878_v5  ;;  %v8939_v4 = vld [vmem:[%s11756_s0 + $0xa90] ss:$8 sps:$4 sm:$0xff]   ;;  %v8944_v5 = vld [vmem:[%s11756_s0 + $0xaa4] ss:$8 sps:$4 sm:$0xff]  }
 0x14e   :  { %3496 = vmatprep.subr.bf16.mxu1 %v8881_v6  ;;  %v8942_v6 = vld [vmem:[%s11756_s0 + $0xaa0] ss:$8 sps:$4 sm:$0xff]  }
 0x150   :  { %957 = vmatpush1.bf16.msra.mxu0 %v8876_v7  ;;  %v8947_v7 = vld [vmem:[%s11756_s0 + $0xab4] ss:$8 sps:$4 sm:$0xff]  }
 0x151   :  { %3497 = vmatpush1.bf16.msra.mxu1 %v8879_v8  ;;  %958 = vmatprep.subr.bf16.mxu0 %v8884_v9  ;;  %v8945_v8 = vld [vmem:[%s11756_s0 + $0xab0] ss:$8 sps:$4 sm:$0xff]   ;;  %v8950_v9 = vld [vmem:[%s11756_s0 + $0xac4] ss:$8 sps:$4 sm:$0xff]  }
 0x152   :  { %3498 = vmatprep.subr.bf16.mxu1 %v8887_v10  ;;  %v8948_v10 = vld [vmem:[%s11756_s0 + $0xac0] ss:$8 sps:$4 sm:$0xff]  }
 0x154   :  { %959 = vmatpush1.bf16.msra.mxu0 %v8882_v11  ;;  %v8953_v11 = vld [vmem:[%s11756_s0 + $0xad4] ss:$8 sps:$4 sm:$0xff]  }
 0x155   :  { %3499 = vmatpush1.bf16.msra.mxu1 %v8885_v12  ;;  %960 = vmatprep.subr.bf16.mxu0 %v8890_v13  ;;  %v8951_v12 = vld [vmem:[%s11756_s0 + $0xad0] ss:$8 sps:$4 sm:$0xff]   ;;  %v8956_v13 = vld [vmem:[%s11756_s0 + $0xae4] ss:$8 sps:$4 sm:$0xff]  }
 0x156   :  { %3500 = vmatprep.subr.bf16.mxu1 %v8893_v14  ;;  %v8954_v14 = vld [vmem:[%s11756_s0 + $0xae0] ss:$8 sps:$4 sm:$0xff]  }
 0x158   :  { %961 = vmatpush1.bf16.msra.mxu0 %v8888_v15  ;;  %v8959_v15 = vld [vmem:[%s11756_s0 + $0xaf4] ss:$8 sps:$4 sm:$0xff]  }
 0x159   :  { %3501 = vmatpush1.bf16.msra.mxu1 %v8891_v16  ;;  %962 = vmatprep.subr.bf16.mxu0 %v8896_v17  ;;  %v8957_v16 = vld [vmem:[%s11756_s0 + $0xaf0] ss:$8 sps:$4 sm:$0xff]   ;;  %v8962_v17 = vld [vmem:[%s11756_s0 + $0xb04] ss:$8 sps:$4 sm:$0xff]  }
 0x15a   :  { %3502 = vmatprep.subr.bf16.mxu1 %v8899_v18  ;;  %v8960_v18 = vld [vmem:[%s11756_s0 + $0xb00] ss:$8 sps:$4 sm:$0xff]  }
 0x15b   :  { %v10243_v28 = vpop.f32.mrb[8].mxu1 }
 0x15c   :  { %963 = vmatpush1.bf16.msra.mxu0 %v8894_v21  ;;  %v10245_v29 = vpop.f32.mrb[9].mxu1  ;;  %v8963_v21 = vld [vmem:[%s11756_s0 + $0xb10] ss:$8 sps:$4 sm:$0xff]  }
 0x15d   :  { %3503 = vmatpush1.bf16.msra.mxu1 %v8897_v22  ;;  %7320 = vmatprep.subr.msk.bf16.mxu0 %vm179_vm1, %v7319_v24  ;;  %v1236_v31 = vpop.f32.mrb[10].mxu1  ;;  %v7930_v22 = vcombine.high %v7908_v20, %v7908_v20  ;;  %v7929_v24 = vcombine.low %v7908_v20, %v7908_v20  ;;  %v8096_v20 = vld [vmem:[%s11756_s0 + $0xdc0] sm:$0x11] }
 0x15e   :  { %7790 = vmatprep.subr.msk.bf16.mxu1 %vm179_vm1, %v7789_v26  ;;  %v1237_v34 = vpop.f32.mrb[11].mxu1  ;;  %v8970_v31 = vld [vmem:[%s11756_s0 + $0xbd4] ss:$8 sps:$4 sm:$0xff]  }
 0x15f   :  { %v8973_v34 = vld [vmem:[%s11756_s0 + $0xbe4] ss:$8 sps:$4 sm:$0xff]  }
 0x160   :  { %965 = vmatpush1.bf16.msra.mxu0 %v939_v30  ;;  %v4241_v30 = vsel %vm179_vm1, %v7929_v24, 0  ;;  %v8117_v24 = vcombine.low %v8096_v20, %v8096_v20 }
 0x161   :  { %3505 = vmatpush1.bf16.msra.mxu1 %v3479_v32 }
 0x162   :  { %3992 = vmatprep.subr.bf16.mxu1 %v8906_v33  ;;  %v8968_v33 = vld [vmem:[%s11756_s0 + $0xbd0] ss:$8 sps:$4 sm:$0xff]  }
 0x163   :  { %977 = vmatmul.mubr.bf16.vlgmr.msra.gmra.mrb[8].mxu0 %v9667_v47 }
 0x164   :  { %3517 = vmatmul.mubr.bf16.vlgmr.msra.gmra.mrb[28].mxu1 %v9667_v47  ;;  %1056 = vmatprep.mubr.f32.mxu0 %v9477_v58 }
 0x165   :  { %3993 = vmatpush1.bf16.msra.mxu1 %v8904_v35  ;;  %7885 = vmatprep.mubr.msk.bf16.mxu1 %vm175_vm0, %v9599_v23  ;;  %v8971_v35 = vld [vmem:[%s11756_s0 + $0xbe0] ss:$8 sps:$4 sm:$0xff]  }
 0x166   :  { %3994 = vmatprep.subr.bf16.mxu1 %v8909_v36  ;;  %v8976_v36 = vld [vmem:[%s11756_s0 + $0xbf4] ss:$8 sps:$4 sm:$0xff]  }
 0x169   :  { %3995 = vmatpush1.bf16.msra.mxu1 %v8907_v37  ;;  %v8974_v37 = vld [vmem:[%s11756_s0 + $0xbf0] ss:$8 sps:$4 sm:$0xff]  }
 0x16a   :  { %3996 = vmatprep.subr.bf16.mxu1 %v8912_v38  ;;  %v8979_v38 = vld [vmem:[%s11756_s0 + $0xc04] ss:$8 sps:$4 sm:$0xff]  }
 0x16d   :  { %3997 = vmatpush1.bf16.msra.mxu1 %v8910_v39  ;;  %v8977_v39 = vld [vmem:[%s11756_s0 + $0xc00] ss:$8 sps:$4 sm:$0xff]  }
 0x16e   :  { %3998 = vmatprep.subr.bf16.mxu1 %v8915_v40  ;;  %v8982_v40 = vld [vmem:[%s11756_s0 + $0xc14] ss:$8 sps:$4 sm:$0xff]  }
 0x171   :  { %3999 = vmatpush1.bf16.msra.mxu1 %v8913_v41  ;;  %v8980_v41 = vld [vmem:[%s11756_s0 + $0xc10] ss:$8 sps:$4 sm:$0xff]  }
 0x172   :  { %4000 = vmatprep.subr.bf16.mxu1 %v8918_v42  ;;  %v8985_v42 = vld [vmem:[%s11756_s0 + $0xc24] ss:$8 sps:$4 sm:$0xff]  }
 0x175   :  { %4001 = vmatpush1.bf16.msra.mxu1 %v8916_v43  ;;  %v8983_v43 = vld [vmem:[%s11756_s0 + $0xc20] ss:$8 sps:$4 sm:$0xff]  }
 0x176   :  { %4002 = vmatprep.subr.bf16.mxu1 %v8921_v44  ;;  %v8988_v44 = vld [vmem:[%s11756_s0 + $0xc34] ss:$8 sps:$4 sm:$0xff]  }
 0x179   :  { %4003 = vmatpush1.bf16.msra.mxu1 %v8919_v45  ;;  %v8986_v45 = vld [vmem:[%s11756_s0 + $0xc30] ss:$8 sps:$4 sm:$0xff]  }
 0x17a   :  { %4004 = vmatprep.subr.bf16.mxu1 %v8924_v46  ;;  %v8991_v46 = vld [vmem:[%s11756_s0 + $0xc44] ss:$8 sps:$4 sm:$0xff]  }
 0x17d   :  { %4005 = vmatpush1.bf16.msra.mxu1 %v8922_v49  ;;  %v8989_v49 = vld [vmem:[%s11756_s0 + $0xc40] ss:$8 sps:$4 sm:$0xff]  }
 0x17e   :  { %4006 = vmatprep.subr.bf16.mxu1 %v8927_v50  ;;  %v8994_v50 = vld [vmem:[%s11756_s0 + $0xc54] ss:$8 sps:$4 sm:$0xff]  }
 0x181   :  { %4007 = vmatpush1.bf16.msra.mxu1 %v8925_v51  ;;  %v8992_v51 = vld [vmem:[%s11756_s0 + $0xc50] ss:$8 sps:$4 sm:$0xff]  }
 0x182   :  { %4008 = vmatprep.subr.bf16.mxu1 %v8930_v52  ;;  %v8997_v52 = vld [vmem:[%s11756_s0 + $0xc64] ss:$8 sps:$4 sm:$0xff]  }
 0x185   :  { %4009 = vmatpush1.bf16.msra.mxu1 %v8928_v53  ;;  %v8002_v53 = vld [vmem:[%s11756_s0 + $0xc70] sm:$0x11] }
 0x186   :  { %4010 = vmatprep.subr.bf16.mxu1 %v8933_v54  ;;  %v8995_v54 = vld [vmem:[%s11756_s0 + $0xc60] ss:$8 sps:$4 sm:$0xff]   ;;  %v8024_v55 = vcombine.high %v8002_v53, %v8002_v53 }
 0x187   :  { %v10319_v60 = vpop.f32.mrb[12].mxu1 }
 0x188   :  { %v10321_v61 = vpop.f32.mrb[13].mxu1 }
 0x189   :  { %4011 = vmatpush1.bf16.msra.mxu1 %v8931_v56  ;;  %v1744_v62 = vpop.f32.mrb[14].mxu1  ;;  %v8023_v56 = vcombine.low %v8002_v53, %v8002_v53  ;;  %v9056_v53 = vld [vmem:[%s11756_s0 + $0xef0] ss:$8 sps:$4 sm:$0xff]  }
 0x18a   :  { %7884 = vmatprep.subr.msk.bf16.mxu1 %vm179_vm1, %v7883_v57  ;;  %v1745_v1 = vpop.f32.mrb[15].mxu1 }
 0x18d   :  { %4013 = vmatpush1.bf16.msra.mxu1 %v3987_v63  ;;  %v4749_v63 = vsel %vm179_vm1, %v8023_v56, 0  ;;  %v9059_v56 = vld [vmem:[%s11756_s0 + $0xf00] ss:$8 sps:$4 sm:$0xff]  }
 0x18e   :  { %4246 = vmatprep.subr.bf16.mxu1 %v8938_v0  ;;  %v9002_v0 = vld [vmem:[%s11756_s0 + $0xd24] ss:$8 sps:$4 sm:$0xff]  }
 0x190   :  { %4025 = vmatmul.mubr.bf16.vlgmr.msra.gmra.mrb[32].mxu1 %v9667_v47 }
 0x191   :  { %4247 = vmatpush1.bf16.msra.mxu1 %v8936_v2  ;;  %7932 = vmatprep.mubr.msk.bf16.mxu1 %vm175_vm0, %v9599_v23  ;;  %v9000_v2 = vld [vmem:[%s11756_s0 + $0xd20] ss:$8 sps:$4 sm:$0xff]  }
 0x192   :  { %4248 = vmatprep.subr.bf16.mxu1 %v8941_v3  ;;  %v9005_v3 = vld [vmem:[%s11756_s0 + $0xd34] ss:$8 sps:$4 sm:$0xff]  }
 0x195   :  { %4249 = vmatpush1.bf16.msra.mxu1 %v8939_v4  ;;  %v9003_v4 = vld [vmem:[%s11756_s0 + $0xd30] ss:$8 sps:$4 sm:$0xff]  }
 0x196   :  { %4250 = vmatprep.subr.bf16.mxu1 %v8944_v5  ;;  %v9008_v5 = vld [vmem:[%s11756_s0 + $0xd44] ss:$8 sps:$4 sm:$0xff]  }
 0x199   :  { %4251 = vmatpush1.bf16.msra.mxu1 %v8942_v6  ;;  %v9006_v6 = vld [vmem:[%s11756_s0 + $0xd40] ss:$8 sps:$4 sm:$0xff]  }
 0x19a   :  { %4252 = vmatprep.subr.bf16.mxu1 %v8947_v7  ;;  %v9011_v7 = vld [vmem:[%s11756_s0 + $0xd54] ss:$8 sps:$4 sm:$0xff]  }
 0x19d   :  { %4253 = vmatpush1.bf16.msra.mxu1 %v8945_v8  ;;  %v9009_v8 = vld [vmem:[%s11756_s0 + $0xd50] ss:$8 sps:$4 sm:$0xff]  }
 0x19e   :  { %4254 = vmatprep.subr.bf16.mxu1 %v8950_v9  ;;  %v9014_v9 = vld [vmem:[%s11756_s0 + $0xd64] ss:$8 sps:$4 sm:$0xff]  }
 0x1a1   :  { %4255 = vmatpush1.bf16.msra.mxu1 %v8948_v10  ;;  %v9012_v10 = vld [vmem:[%s11756_s0 + $0xd60] ss:$8 sps:$4 sm:$0xff]  }
 0x1a2   :  { %4256 = vmatprep.subr.bf16.mxu1 %v8953_v11  ;;  %v9017_v11 = vld [vmem:[%s11756_s0 + $0xd74] ss:$8 sps:$4 sm:$0xff]  }
 0x1a5   :  { %4257 = vmatpush1.bf16.msra.mxu1 %v8951_v12  ;;  %v9015_v12 = vld [vmem:[%s11756_s0 + $0xd70] ss:$8 sps:$4 sm:$0xff]  }
 0x1a6   :  { %4258 = vmatprep.subr.bf16.mxu1 %v8956_v13  ;;  %v9020_v13 = vld [vmem:[%s11756_s0 + $0xd84] ss:$8 sps:$4 sm:$0xff]  }
 0x1a9   :  { %4259 = vmatpush1.bf16.msra.mxu1 %v8954_v14  ;;  %v9018_v14 = vld [vmem:[%s11756_s0 + $0xd80] ss:$8 sps:$4 sm:$0xff]  }
 0x1aa   :  { %4260 = vmatprep.subr.bf16.mxu1 %v8959_v15  ;;  %v9023_v15 = vld [vmem:[%s11756_s0 + $0xd94] ss:$8 sps:$4 sm:$0xff]  }
 0x1ad   :  { %4261 = vmatpush1.bf16.msra.mxu1 %v8957_v16  ;;  %v9021_v16 = vld [vmem:[%s11756_s0 + $0xd90] ss:$8 sps:$4 sm:$0xff]  }
 0x1ae   :  { %4262 = vmatprep.subr.bf16.mxu1 %v8962_v17  ;;  %v9026_v17 = vld [vmem:[%s11756_s0 + $0xda4] ss:$8 sps:$4 sm:$0xff]  }
 0x1b1   :  { %4263 = vmatpush1.bf16.msra.mxu1 %v8960_v18  ;;  %v9024_v18 = vld [vmem:[%s11756_s0 + $0xda0] ss:$8 sps:$4 sm:$0xff]  }
 0x1b2   :  { %4264 = vmatprep.subr.bf16.mxu1 %v8965_v19  ;;  %v9029_v19 = vld [vmem:[%s11756_s0 + $0xdb4] ss:$8 sps:$4 sm:$0xff]  }
 0x1b3   :  { %v10391_v25 = vpop.f32.mrb[16].mxu1 }
 0x1b4   :  { %v10393_v26 = vpop.f32.mrb[17].mxu1 }
 0x1b5   :  { %4265 = vmatpush1.bf16.msra.mxu1 %v8963_v21  ;;  %v2252_v27 = vpop.f32.mrb[18].mxu1  ;;  %v9027_v21 = vld [vmem:[%s11756_s0 + $0xdb0] ss:$8 sps:$4 sm:$0xff]  }
 0x1b6   :  { %7931 = vmatprep.subr.msk.bf16.mxu1 %vm179_vm1, %v7930_v22  ;;  %v2253_v32 = vpop.f32.mrb[19].mxu1  ;;  %v8118_v22 = vcombine.high %v8096_v20, %v8096_v20  ;;  %v9067_v20 = vld [vmem:[%s11756_s0 + $0xfd0] ss:$8 sps:$4 sm:$0xff]  }
 0x1b7   :  { %v5257_v32 = vsel %vm179_vm1, %v8117_v24, 0  ;;  %v7369_v24 = vld [vmem:[%s11759_s3 + $0x4] sm:$0x1] }
 0x1b9   :  { %4267 = vmatpush1.bf16.msra.mxu1 %v4241_v30 }
 0x1ba   :  { %4754 = vmatprep.subr.bf16.mxu1 %v8970_v31 }
 0x1bc   :  { %4279 = vmatmul.mubr.bf16.vlgmr.msra.gmra.mrb[36].mxu1 %v9667_v47 }
 0x1bd   :  { %4755 = vmatpush1.bf16.msra.mxu1 %v8968_v33  ;;  %8026 = vmatprep.mubr.msk.bf16.mxu1 %vm175_vm0, %v9599_v23  ;;  %v9034_v33 = vld [vmem:[%s11756_s0 + $0xe74] ss:$8 sps:$4 sm:$0xff]  }
 0x1be   :  { %4756 = vmatprep.subr.bf16.mxu1 %v8973_v34 }
 0x1c1   :  { %4757 = vmatpush1.bf16.msra.mxu1 %v8971_v35  ;;  %v9032_v35 = vld [vmem:[%s11756_s0 + $0xe70] ss:$8 sps:$4 sm:$0xff]  }
 0x1c2   :  { %4758 = vmatprep.subr.bf16.mxu1 %v8976_v36  ;;  %v9037_v36 = vld [vmem:[%s11756_s0 + $0xe84] ss:$8 sps:$4 sm:$0xff]  }
 0x1c5   :  { %4759 = vmatpush1.bf16.msra.mxu1 %v8974_v37  ;;  %v9035_v37 = vld [vmem:[%s11756_s0 + $0xe80] ss:$8 sps:$4 sm:$0xff]  }
 0x1c6   :  { %4760 = vmatprep.subr.bf16.mxu1 %v8979_v38  ;;  %v9040_v38 = vld [vmem:[%s11756_s0 + $0xe94] ss:$8 sps:$4 sm:$0xff]  }
 0x1c9   :  { %4761 = vmatpush1.bf16.msra.mxu1 %v8977_v39  ;;  %v9038_v39 = vld [vmem:[%s11756_s0 + $0xe90] ss:$8 sps:$4 sm:$0xff]  }
 0x1ca   :  { %4762 = vmatprep.subr.bf16.mxu1 %v8982_v40  ;;  %v9043_v40 = vld [vmem:[%s11756_s0 + $0xea4] ss:$8 sps:$4 sm:$0xff]  }
 0x1cd   :  { %4763 = vmatpush1.bf16.msra.mxu1 %v8980_v41  ;;  %v9041_v41 = vld [vmem:[%s11756_s0 + $0xea0] ss:$8 sps:$4 sm:$0xff]  }
 0x1ce   :  { %4764 = vmatprep.subr.bf16.mxu1 %v8985_v42  ;;  %v9046_v42 = vld [vmem:[%s11756_s0 + $0xeb4] ss:$8 sps:$4 sm:$0xff]  }
 0x1d1   :  { %4765 = vmatpush1.bf16.msra.mxu1 %v8983_v43  ;;  %v9044_v43 = vld [vmem:[%s11756_s0 + $0xeb0] ss:$8 sps:$4 sm:$0xff]  }
 0x1d2   :  { %4766 = vmatprep.subr.bf16.mxu1 %v8988_v44  ;;  %v9049_v44 = vld [vmem:[%s11756_s0 + $0xec4] ss:$8 sps:$4 sm:$0xff]  }
 0x1d5   :  { %4767 = vmatpush1.bf16.msra.mxu1 %v8986_v45  ;;  %v9047_v45 = vld [vmem:[%s11756_s0 + $0xec0] ss:$8 sps:$4 sm:$0xff]  }
 0x1d6   :  { %4768 = vmatprep.subr.bf16.mxu1 %v8991_v46  ;;  %v9052_v46 = vld [vmem:[%s11756_s0 + $0xed4] ss:$8 sps:$4 sm:$0xff]  }
 0x1d9   :  { %4769 = vmatpush1.bf16.msra.mxu1 %v8989_v49  ;;  %v9050_v49 = vld [vmem:[%s11756_s0 + $0xed0] ss:$8 sps:$4 sm:$0xff]  }
 0x1da   :  { %4770 = vmatprep.subr.bf16.mxu1 %v8994_v50  ;;  %v9055_v50 = vld [vmem:[%s11756_s0 + $0xee4] ss:$8 sps:$4 sm:$0xff]  }
 0x1dd   :  { %4771 = vmatpush1.bf16.msra.mxu1 %v8992_v51  ;;  %v9053_v51 = vld [vmem:[%s11756_s0 + $0xee0] ss:$8 sps:$4 sm:$0xff]  }
 0x1de   :  { %4772 = vmatprep.subr.bf16.mxu1 %v8997_v52  ;;  %v9058_v52 = vld [vmem:[%s11756_s0 + $0xef4] ss:$8 sps:$4 sm:$0xff]  }
 0x1df   :  { %v10463_v57 = vpop.f32.mrb[20].mxu1 }
 0x1e0   :  { %v10465_v59 = vpop.f32.mrb[21].mxu1 }
 0x1e1   :  { %4773 = vmatpush1.bf16.msra.mxu1 %v8995_v54  ;;  %v2506_v62 = vpop.f32.mrb[22].mxu1  ;;  %v9061_v54 = vld [vmem:[%s11756_s0 + $0xf04] ss:$8 sps:$4 sm:$0xff]  }
 0x1e2   :  { %8025 = vmatprep.subr.msk.bf16.mxu1 %vm179_vm1, %v8024_v55  ;;  %v2507_v1 = vpop.f32.mrb[23].mxu1  ;;  %v8190_v55 = vld [vmem:[%s11756_s0 + $0xf10] sm:$0x11] }
 0x1e5   :  { %4775 = vmatpush1.bf16.msra.mxu1 %v4749_v63  ;;  %v8212_v63 = vcombine.high %v8190_v55, %v8190_v55 }
 0x1e6   :  { %5262 = vmatprep.subr.bf16.mxu1 %v9002_v0  ;;  %v8211_v0 = vcombine.low %v8190_v55, %v8190_v55  ;;  %v9111_v55 = vld [vmem:[%s11756_s0 + $0x1044] ss:$8 sps:$4 sm:$0xff]  }
 0x1e8   :  { %4787 = vmatmul.mubr.bf16.vlgmr.msra.gmra.mrb[40].mxu1 %v9667_v47 }
 0x1e9   :  { %5263 = vmatpush1.bf16.msra.mxu1 %v9000_v2  ;;  %8120 = vmatprep.mubr.msk.bf16.mxu1 %vm175_vm0, %v9599_v23 }
 0x1ea   :  { %5264 = vmatprep.subr.bf16.mxu1 %v9005_v3 }
 0x1ed   :  { %5265 = vmatpush1.bf16.msra.mxu1 %v9003_v4  ;;  %v1235_v4 = vadd.f32 %v10245_v29, %v10017_v48  ;;  %v7322_v29 = vld [vmem:[%s11759_s3 + $0x3] sm:$0x1] }
 0x1ee   :  { %5266 = vmatprep.subr.bf16.mxu1 %v9008_v5 }
 0x1f1   :  { %5267 = vmatpush1.bf16.msra.mxu1 %v9006_v6 }
 0x1f2   :  { %5268 = vmatprep.subr.bf16.mxu1 %v9011_v7 }
 0x1f5   :  { %5269 = vmatpush1.bf16.msra.mxu1 %v9009_v8  ;;  %v1233_v8 = vadd.f32 %v10243_v28, %v10017_v48 }
 0x1f6   :  { %5270 = vmatprep.subr.bf16.mxu1 %v9014_v9 }
 0x1f7   :  { %v1239_v28 = vmax.f32 %v1233_v8, 0.0 }
 0x1f9   :  { %5271 = vmatpush1.bf16.msra.mxu1 %v9012_v10 }
 0x1fa   :  { %5272 = vmatprep.subr.bf16.mxu1 %v9017_v11 }
 0x1fd   :  { %5273 = vmatpush1.bf16.msra.mxu1 %v9015_v12  ;;  %v5765_v12 = vsel %vm179_vm1, %v8211_v0, 0  ;;  %v9117_v0 = vld [vmem:[%s11756_s0 + $0x1054] ss:$8 sps:$4 sm:$0xff]  }
 0x1fe   :  { %5274 = vmatprep.subr.bf16.mxu1 %v9020_v13 }
 0x201   :  { %5275 = vmatpush1.bf16.msra.mxu1 %v9018_v14 }
 0x202   :  { %5276 = vmatprep.subr.bf16.mxu1 %v9023_v15  ;;  %v9066_v15 = vld [vmem:[%s11756_s0 + $0xfc4] ss:$8 sps:$4 sm:$0xff]  }
 0x205   :  { %5277 = vmatpush1.bf16.msra.mxu1 %v9021_v16  ;;  %v1240_v16 = vmax.f32 %v1235_v4, 0.0  ;;  %v9120_v4 = vld [vmem:[%s11756_s0 + $0x3cc] ss:$8 sps:$4 sm:$0xff]  }
 0x206   :  { %5278 = vmatprep.subr.bf16.mxu1 %v9026_v17  ;;  %v9064_v17 = vld [vmem:[%s11756_s0 + $0xfc0] ss:$8 sps:$4 sm:$0xff]  }
 0x209   :  { %5279 = vmatpush1.bf16.msra.mxu1 %v9024_v18  ;;  %v9072_v18 = vld [vmem:[%s11756_s0 + $0x34c] ss:$8 sps:$4 sm:$0xff]  }
 0x20a   :  { %5280 = vmatprep.subr.bf16.mxu1 %v9029_v19  ;;  %v9069_v19 = vld [vmem:[%s11756_s0 + $0xfd4] ss:$8 sps:$4 sm:$0xff]  }
 0x20b   :  { %v10535_v27 = vpop.f32.mrb[24].mxu1 }
 0x20c   :  { %v10537_v30 = vpop.f32.mrb[25].mxu1 }
 0x20d   :  { %5281 = vmatpush1.bf16.msra.mxu1 %v9027_v21  ;;  %v3014_v31 = vpop.f32.mrb[26].mxu1  ;;  %v9075_v21 = vld [vmem:[%s11756_s0 + $0xfe4] ss:$8 sps:$4 sm:$0xff]  }
 0x20e   :  { %8119 = vmatprep.subr.msk.bf16.mxu1 %vm179_vm1, %v8118_v22  ;;  %v3015_v34 = vpop.f32.mrb[27].mxu1  ;;  %v9070_v22 = vld [vmem:[%s11756_s0 + $0x348] ss:$8 sps:$4 sm:$0xff]   ;;  %v9078_v31 = vld [vmem:[%s11756_s0 + $0x35c] ss:$8 sps:$4 sm:$0xff]  }
 0x20f   :  { %v9076_v34 = vld [vmem:[%s11756_s0 + $0x358] ss:$8 sps:$4 sm:$0xff]  }
 0x211   :  { %5283 = vmatpush1.bf16.msra.mxu1 %v5257_v32  ;;  %v9073_v32 = vld [vmem:[%s11756_s0 + $0xfe0] ss:$8 sps:$4 sm:$0xff]  }
 0x212   :  { %5770 = vmatprep.subr.bf16.mxu1 %v9034_v33  ;;  %v9081_v33 = vld [vmem:[%s11756_s0 + $0xff4] ss:$8 sps:$4 sm:$0xff]  }
 0x214   :  { %5295 = vmatmul.mubr.bf16.vlgmr.msra.gmra.mrb[44].mxu1 %v9667_v47 }
 0x215   :  { %5771 = vmatpush1.bf16.msra.mxu1 %v9032_v35  ;;  %8214 = vmatprep.mubr.msk.bf16.mxu1 %vm175_vm0, %v9599_v23  ;;  %v9084_v35 = vld [vmem:[%s11756_s0 + $0x36c] ss:$8 sps:$4 sm:$0xff]  }
 0x216   :  { %5772 = vmatprep.subr.bf16.mxu1 %v9037_v36  ;;  %v9079_v36 = vld [vmem:[%s11756_s0 + $0xff0] ss:$8 sps:$4 sm:$0xff]  }
 0x219   :  { %5773 = vmatpush1.bf16.msra.mxu1 %v9035_v37  ;;  %v9087_v37 = vld [vmem:[%s11756_s0 + $0x1004] ss:$8 sps:$4 sm:$0xff]  }
 0x21a   :  { %5774 = vmatprep.subr.bf16.mxu1 %v9040_v38  ;;  %v9082_v38 = vld [vmem:[%s11756_s0 + $0x368] ss:$8 sps:$4 sm:$0xff]  }
 0x21d   :  { %5775 = vmatpush1.bf16.msra.mxu1 %v9038_v39  ;;  %v9090_v39 = vld [vmem:[%s11756_s0 + $0x37c] ss:$8 sps:$4 sm:$0xff]  }
 0x21e   :  { %5776 = vmatprep.subr.bf16.mxu1 %v9043_v40  ;;  %v9085_v40 = vld [vmem:[%s11756_s0 + $0x1000] ss:$8 sps:$4 sm:$0xff]  }
 0x221   :  { %5777 = vmatpush1.bf16.msra.mxu1 %v9041_v41  ;;  %v9093_v41 = vld [vmem:[%s11756_s0 + $0x1014] ss:$8 sps:$4 sm:$0xff]  }
 0x222   :  { %5778 = vmatprep.subr.bf16.mxu1 %v9046_v42  ;;  %v9088_v42 = vld [vmem:[%s11756_s0 + $0x378] ss:$8 sps:$4 sm:$0xff]  }
 0x225   :  { %5779 = vmatpush1.bf16.msra.mxu1 %v9044_v43  ;;  %v9096_v43 = vld [vmem:[%s11756_s0 + $0x38c] ss:$8 sps:$4 sm:$0xff]  }
 0x226   :  { %5780 = vmatprep.subr.bf16.mxu1 %v9049_v44  ;;  %v9091_v44 = vld [vmem:[%s11756_s0 + $0x1010] ss:$8 sps:$4 sm:$0xff]  }
 0x229   :  { %5781 = vmatpush1.bf16.msra.mxu1 %v9047_v45  ;;  %v9099_v45 = vld [vmem:[%s11756_s0 + $0x1024] ss:$8 sps:$4 sm:$0xff]  }
 0x22a   :  { %5782 = vmatprep.subr.bf16.mxu1 %v9052_v46  ;;  %v9094_v46 = vld [vmem:[%s11756_s0 + $0x388] ss:$8 sps:$4 sm:$0xff]  }
 0x22d   :  { %5783 = vmatpush1.bf16.msra.mxu1 %v9050_v49  ;;  %v9102_v49 = vld [vmem:[%s11756_s0 + $0x39c] ss:$8 sps:$4 sm:$0xff]  }
 0x22e   :  { %5784 = vmatprep.subr.bf16.mxu1 %v9055_v50  ;;  %v9097_v50 = vld [vmem:[%s11756_s0 + $0x1020] ss:$8 sps:$4 sm:$0xff]  }
 0x231   :  { %5785 = vmatpush1.bf16.msra.mxu1 %v9053_v51  ;;  %v9105_v51 = vld [vmem:[%s11756_s0 + $0x1034] ss:$8 sps:$4 sm:$0xff]  }
 0x232   :  { %5786 = vmatprep.subr.bf16.mxu1 %v9058_v52  ;;  %v9100_v52 = vld [vmem:[%s11756_s0 + $0x398] ss:$8 sps:$4 sm:$0xff]  }
 0x235   :  { %5787 = vmatpush1.bf16.msra.mxu1 %v9056_v53  ;;  %v9108_v53 = vld [vmem:[%s11756_s0 + $0x3ac] ss:$8 sps:$4 sm:$0xff]  }
 0x236   :  { %v978_v62 = vpop.f32.mrb[8].mxu0  ;;  %5788 = vmatprep.subr.bf16.mxu1 %v9061_v54  ;;  %v9103_v54 = vld [vmem:[%s11756_s0 + $0x1030] ss:$8 sps:$4 sm:$0xff]  }
 0x237   :  { %v979_v1 = vadd.f32 %v978_v62, %v10017_v48  ;;  %v980_v2 = vpop.f32.mrb[9].mxu0  ;;  %v10608_v3 = vpop.f32.mrb[28].mxu1  ;;  %v9114_v62 = vld [vmem:[%s11756_s0 + $0x3bc] ss:$8 sps:$4 sm:$0xff]  }
 0x238   :  { %v981_v5 = vadd.f32 %v980_v2, %v10017_v48  ;;  %v982_v6 = vpop.f32.mrb[10].mxu0  ;;  %v10613_v7 = vpop.f32.mrb[29].mxu1  ;;  %v8284_v2 = vld [vmem:[%s11756_s0 + $0x1060] sm:$0x11] }
 0x239   :  { %v983_v9 = vpop.f32.mrb[11].mxu0  ;;  %5789 = vmatpush1.bf16.msra.mxu1 %v9059_v56  ;;  %v3522_v10 = vpop.f32.mrb[30].mxu1  ;;  %v985_v14 = vmax.f32 %v979_v1, 0.0  ;;  %v9106_v56 = vld [vmem:[%s11756_s0 + $0x3a8] ss:$8 sps:$4 sm:$0xff]   ;;  %v8306_v6 = vcombine.high %v8284_v2, %v8284_v2  ;;  %v8305_v8 = vcombine.low %v8284_v2, %v8284_v2 }
 0x23a   :  { %v986_v11 = vmax.f32 %v981_v5, 0.0  ;;  %8213 = vmatprep.subr.msk.bf16.mxu1 %vm179_vm1, %v8212_v63  ;;  %v3523_v13 = vpop.f32.mrb[31].mxu1  ;;  %v9109_v63 = vld [vmem:[%s11756_s0 + $0x1040] ss:$8 sps:$4 sm:$0xff]   ;;  %v9115_v5 = vld [vmem:[%s11756_s0 + $0x1050] ss:$8 sps:$4 sm:$0xff]  }
 0x23b   :  { %v9112_v1 = vld [vmem:[%s11756_s0 + $0x3b8] ss:$8 sps:$4 sm:$0xff]   ;;  %v9118_v10 = vld [vmem:[%s11756_s0 + $0x3c8] ss:$8 sps:$4 sm:$0xff]  }
 0x23c   :  { %992 = vmatprep.subr.mxu0 %v986_v11  ;;  %v7391_v13 = vld [vmem:[%s11756_s0 + $0x3e8] sm:$0x11] }
 0x23d   :  { %993 = vmatpush1.msra.mxu0 %v985_v14  ;;  %5791 = vmatpush1.bf16.msra.mxu1 %v5765_v12  ;;  %v9124_v12 = vld [vmem:[%s11756_s0 + $0x3dc] ss:$8 sps:$4 sm:$0xff]  }
 0x23e   :  { %7323 = vmatmul.mubr.msk.f32.vlgmr.msra.gmra.mrb[4].mxu0 %vm408_vm2, %v7322_v29  ;;  %1246 = vmatprep.subr.mxu0 %v1240_v16  ;;  %v6273_v29 = vsel %vm179_vm1, %v8305_v8, 0 }
 0x23f   :  { %1247 = vmatpush1.msra.mxu0 %v1239_v28  ;;  %6278 = vmatprep.subr.bf16.mxu1 %v9066_v15  ;;  %v9128_v15 = vld [vmem:[%s11756_s0 + $0x106c] ss:$8 sps:$4 sm:$0xff]   ;;  %v9122_v28 = vld [vmem:[%s11756_s0 + $0x3d8] ss:$8 sps:$4 sm:$0xff]  }
 0x240   :  { %5803 = vmatmul.mubr.bf16.vlgmr.msra.gmra.mrb[48].mxu1 %v9667_v47  ;;  %1310 = vmatprep.mubr.f32.mxu0 %v9477_v58 }
 0x241   :  { %6279 = vmatpush1.bf16.msra.mxu1 %v9064_v17  ;;  %1452 = vmatprep.subr.bf16.mxu0 %v9072_v18  ;;  %v7413_v17 = vcombine.high %v7391_v13, %v7391_v13  ;;  %v7412_v18 = vcombine.low %v7391_v13, %v7391_v13 }
 0x242   :  { %6280 = vmatprep.subr.bf16.mxu1 %v9069_v19  ;;  %8308 = vmatprep.mubr.msk.bf16.mxu1 %vm175_vm0, %v9599_v23  ;;  %v9126_v19 = vld [vmem:[%s11756_s0 + $0x1068] ss:$8 sps:$4 sm:$0xff]  }
 0x245   :  { %6281 = vmatpush1.bf16.msra.mxu1 %v9067_v20  ;;  %v9133_v20 = vld [vmem:[%s11756_s0 + $0x107c] ss:$8 sps:$4 sm:$0xff]  }
 0x246   :  { %7370 = vmatmul.mubr.msk.f32.vlgmr.msra.gmra.mrb[4].mxu0 %vm408_vm2, %v7369_v24  ;;  %6282 = vmatprep.subr.bf16.mxu1 %v9075_v21  ;;  %v1447_v21 = vsel %vm179_vm1, %v7412_v18, 0  ;;  %v9136_v24 = vld [vmem:[%s11756_s0 + $0x108c] ss:$8 sps:$4 sm:$0xff]   ;;  %v1743_v18 = vadd.f32 %v10321_v61, %v10017_v48 }
 0x247   :  { %1453 = vmatpush1.bf16.msra.mxu0 %v9070_v22  ;;  %7415 = vmatprep.mubr.msk.bf16.mxu0 %vm175_vm0, %v9599_v23  ;;  %v9131_v22 = vld [vmem:[%s11756_s0 + $0x1078] ss:$8 sps:$4 sm:$0xff]  }
 0x248   :  { %1454 = vmatprep.subr.bf16.mxu0 %v9078_v31  ;;  %v9134_v31 = vld [vmem:[%s11756_s0 + $0x1088] ss:$8 sps:$4 sm:$0xff]  }
 0x249   :  { %6283 = vmatpush1.bf16.msra.mxu1 %v9073_v32  ;;  %v9139_v32 = vld [vmem:[%s11756_s0 + $0x109c] ss:$8 sps:$4 sm:$0xff]  }
 0x24a   :  { %6284 = vmatprep.subr.bf16.mxu1 %v9081_v33  ;;  %v9137_v33 = vld [vmem:[%s11756_s0 + $0x1098] ss:$8 sps:$4 sm:$0xff]  }
 0x24b   :  { %1455 = vmatpush1.bf16.msra.mxu0 %v9076_v34  ;;  %v9142_v34 = vld [vmem:[%s11756_s0 + $0x10ac] ss:$8 sps:$4 sm:$0xff]  }
 0x24c   :  { %1456 = vmatprep.subr.bf16.mxu0 %v9084_v35  ;;  %v9140_v35 = vld [vmem:[%s11756_s0 + $0x10a8] ss:$8 sps:$4 sm:$0xff]  }
 0x24d   :  { %6285 = vmatpush1.bf16.msra.mxu1 %v9079_v36  ;;  %v9145_v36 = vld [vmem:[%s11756_s0 + $0x10bc] ss:$8 sps:$4 sm:$0xff]  }
 0x24e   :  { %6286 = vmatprep.subr.bf16.mxu1 %v9087_v37  ;;  %v9143_v37 = vld [vmem:[%s11756_s0 + $0x10b8] ss:$8 sps:$4 sm:$0xff]  }
 0x24f   :  { %1457 = vmatpush1.bf16.msra.mxu0 %v9082_v38  ;;  %v9148_v38 = vld [vmem:[%s11756_s0 + $0x10cc] ss:$8 sps:$4 sm:$0xff]  }
 0x250   :  { %1458 = vmatprep.subr.bf16.mxu0 %v9090_v39  ;;  %v9146_v39 = vld [vmem:[%s11756_s0 + $0x10c8] ss:$8 sps:$4 sm:$0xff]  }
 0x251   :  { %6287 = vmatpush1.bf16.msra.mxu1 %v9085_v40  ;;  %v9151_v40 = vld [vmem:[%s11756_s0 + $0x10dc] ss:$8 sps:$4 sm:$0xff]  }
 0x252   :  { %6288 = vmatprep.subr.bf16.mxu1 %v9093_v41  ;;  %v9149_v41 = vld [vmem:[%s11756_s0 + $0x10d8] ss:$8 sps:$4 sm:$0xff]  }
 0x253   :  { %1459 = vmatpush1.bf16.msra.mxu0 %v9088_v42  ;;  %v9154_v42 = vld [vmem:[%s11756_s0 + $0x10ec] ss:$8 sps:$4 sm:$0xff]  }
 0x254   :  { %1460 = vmatprep.subr.bf16.mxu0 %v9096_v43  ;;  %v9152_v43 = vld [vmem:[%s11756_s0 + $0x10e8] ss:$8 sps:$4 sm:$0xff]  }
 0x255   :  { %6289 = vmatpush1.bf16.msra.mxu1 %v9091_v44  ;;  %v9157_v44 = vld [vmem:[%s11756_s0 + $0x10fc] ss:$8 sps:$4 sm:$0xff]  }
 0x256   :  { %6290 = vmatprep.subr.bf16.mxu1 %v9099_v45  ;;  %v8331_v45 = vld [vmem:[%s11756_s0 + $0x1108] sm:$0x11] }
 0x257   :  { %1461 = vmatpush1.bf16.msra.mxu0 %v9094_v46  ;;  %v9155_v46 = vld [vmem:[%s11756_s0 + $0x10f8] ss:$8 sps:$4 sm:$0xff]  }
 0x258   :  { %1462 = vmatprep.subr.bf16.mxu0 %v9102_v49  ;;  %v8353_v49 = vcombine.high %v8331_v45, %v8331_v45 }
 0x259   :  { %6291 = vmatpush1.bf16.msra.mxu1 %v9097_v50  ;;  %v8352_v50 = vcombine.low %v8331_v45, %v8331_v45  ;;  %v9175_v45 = vld [vmem:[%s11756_s0 + $0x4e8] ss:$8 sps:$4 sm:$0xff]  }
 0x25a   :  { %6292 = vmatprep.subr.bf16.mxu1 %v9105_v51 }
 0x25b   :  { %1463 = vmatpush1.bf16.msra.mxu0 %v9100_v52 }
 0x25c   :  { %1464 = vmatprep.subr.bf16.mxu0 %v9108_v53 }
 0x25d   :  { %6293 = vmatpush1.bf16.msra.mxu1 %v9103_v54  ;;  %v6527_v54 = vsel %vm179_vm1, %v8352_v50, 0 }
 0x25e   :  { %6294 = vmatprep.subr.bf16.mxu1 %v9111_v55 }
 0x25f   :  { %1465 = vmatpush1.bf16.msra.mxu0 %v9106_v56 }
 0x260   :  { %1466 = vmatprep.subr.bf16.mxu0 %v9114_v62 }
 0x261   :  { %6295 = vmatpush1.bf16.msra.mxu1 %v9109_v63 }
 0x262   :  { %6296 = vmatprep.subr.bf16.mxu1 %v9117_v0 }
 0x263   :  { %1467 = vmatpush1.bf16.msra.mxu0 %v9112_v1  ;;  %v10747_v9 = vpop.f32.mrb[32].mxu1 }
 0x264   :  { %v10752_v11 = vpop.f32.mrb[33].mxu1  ;;  %1468 = vmatprep.subr.bf16.mxu0 %v9120_v4 }
 0x265   :  { %6297 = vmatpush1.bf16.msra.mxu1 %v9115_v5  ;;  %v4030_v14 = vpop.f32.mrb[34].mxu1 }
 0x266   :  { %8307 = vmatprep.subr.msk.bf16.mxu1 %vm179_vm1, %v8306_v6  ;;  %v4031_v16 = vpop.f32.mrb[35].mxu1 }
 0x267   :  { %1469 = vmatpush1.bf16.msra.mxu0 %v9118_v10 }
 0x268   :  { %1470 = vmatprep.subr.bf16.mxu0 %v9124_v12 }
 0x269   :  { %6299 = vmatpush1.bf16.msra.mxu1 %v6273_v29 }
 0x26a   :  { %6532 = vmatprep.subr.bf16.mxu1 %v9128_v15 }
 0x26b   :  { %1471 = vmatpush1.bf16.msra.mxu0 %v9122_v28 }
 0x26c   :  { %6311 = vmatmul.mubr.bf16.vlgmr.msra.gmra.mrb[52].mxu1 %v9667_v47  ;;  %7414 = vmatprep.subr.msk.bf16.mxu0 %vm179_vm1, %v7413_v17 }
 0x26d   :  { %6533 = vmatpush1.bf16.msra.mxu1 %v9126_v19  ;;  %8355 = vmatprep.mubr.msk.bf16.mxu1 %vm175_vm0, %v9599_v23 }
 0x26e   :  { %6534 = vmatprep.subr.bf16.mxu1 %v9133_v20 }
 0x26f   :  { %1473 = vmatpush1.bf16.msra.mxu0 %v1447_v21  ;;  %v1741_v21 = vadd.f32 %v10319_v60, %v10017_v48  ;;  %v9160_v60 = vld [vmem:[%s11756_s0 + $0x498] ss:$8 sps:$4 sm:$0xff]  }
 0x271   :  { %6535 = vmatpush1.bf16.msra.mxu1 %v9131_v22  ;;  %v1747_v61 = vmax.f32 %v1741_v21, 0.0 }
 0x272   :  { %1485 = vmatmul.mubr.bf16.vlgmr.msra.gmra.mrb[12].mxu0 %v9667_v47  ;;  %6536 = vmatprep.subr.bf16.mxu1 %v9136_v24 }
 0x273   :  { %1564 = vmatprep.mubr.f32.mxu0 %v9477_v58 }
 0x275   :  { %6537 = vmatpush1.bf16.msra.mxu1 %v9134_v31 }
 0x276   :  { %6538 = vmatprep.subr.bf16.mxu1 %v9139_v32  ;;  %v7416_v32 = vld [vmem:[%s11759_s3 + $0x5] sm:$0x1] }
 0x279   :  { %6539 = vmatpush1.bf16.msra.mxu1 %v9137_v33  ;;  %v1748_v33 = vmax.f32 %v1743_v18, 0.0 }
 0x27a   :  { %6540 = vmatprep.subr.bf16.mxu1 %v9142_v34  ;;  %v9162_v34 = vld [vmem:[%s11756_s0 + $0x49c] ss:$8 sps:$4 sm:$0xff]  }
 0x27d   :  { %6541 = vmatpush1.bf16.msra.mxu1 %v9140_v35  ;;  %v7463_v35 = vld [vmem:[%s11759_s3 + $0x6] sm:$0x1] }
 0x27e   :  { %6542 = vmatprep.subr.bf16.mxu1 %v9145_v36  ;;  %v9165_v36 = vld [vmem:[%s11756_s0 + $0x4ac] ss:$8 sps:$4 sm:$0xff]  }
 0x281   :  { %6543 = vmatpush1.bf16.msra.mxu1 %v9143_v37  ;;  %v9163_v37 = vld [vmem:[%s11756_s0 + $0x4a8] ss:$8 sps:$4 sm:$0xff]  }
 0x282   :  { %6544 = vmatprep.subr.bf16.mxu1 %v9148_v38  ;;  %v9168_v38 = vld [vmem:[%s11756_s0 + $0x4bc] ss:$8 sps:$4 sm:$0xff]  }
 0x285   :  { %6545 = vmatpush1.bf16.msra.mxu1 %v9146_v39  ;;  %v9166_v39 = vld [vmem:[%s11756_s0 + $0x4b8] ss:$8 sps:$4 sm:$0xff]  }
 0x286   :  { %6546 = vmatprep.subr.bf16.mxu1 %v9151_v40  ;;  %v9171_v40 = vld [vmem:[%s11756_s0 + $0x4cc] ss:$8 sps:$4 sm:$0xff]  }
 0x289   :  { %6547 = vmatpush1.bf16.msra.mxu1 %v9149_v41  ;;  %v9169_v41 = vld [vmem:[%s11756_s0 + $0x4c8] ss:$8 sps:$4 sm:$0xff]  }
 0x28a   :  { %6548 = vmatprep.subr.bf16.mxu1 %v9154_v42  ;;  %v9174_v42 = vld [vmem:[%s11756_s0 + $0x4dc] ss:$8 sps:$4 sm:$0xff]  }
 0x28d   :  { %6549 = vmatpush1.bf16.msra.mxu1 %v9152_v43  ;;  %v9172_v43 = vld [vmem:[%s11756_s0 + $0x4d8] ss:$8 sps:$4 sm:$0xff]  }
 0x28e   :  { %6550 = vmatprep.subr.bf16.mxu1 %v9157_v44  ;;  %v9177_v44 = vld [vmem:[%s11756_s0 + $0x4ec] ss:$8 sps:$4 sm:$0xff]  }
 0x28f   :  { %v10835_v51 = vpop.f32.mrb[36].mxu1 }
 0x290   :  { %v10837_v52 = vpop.f32.mrb[37].mxu1 }
 0x291   :  { %6551 = vmatpush1.bf16.msra.mxu1 %v9155_v46  ;;  %v4284_v53 = vpop.f32.mrb[38].mxu1  ;;  %v9180_v46 = vld [vmem:[%s11756_s0 + $0x4fc] ss:$8 sps:$4 sm:$0xff]  }
 0x292   :  { %8354 = vmatprep.subr.msk.bf16.mxu1 %vm179_vm1, %v8353_v49  ;;  %v4285_v55 = vpop.f32.mrb[39].mxu1  ;;  %v9178_v49 = vld [vmem:[%s11756_s0 + $0x4f8] ss:$8 sps:$4 sm:$0xff]   ;;  %v9183_v53 = vld [vmem:[%s11756_s0 + $0x50c] ss:$8 sps:$4 sm:$0xff]  }
 0x295   :  { %6553 = vmatpush1.bf16.msra.mxu1 %v6527_v54 }
 0x298   :  { %6565 = vmatmul.mubr.bf16.vlgmr.msra.gmra.mrb[56].mxu1 %v9667_v47 }
 0x299   :  { %8468 = vmatprep.mubr.msk.f32.mxu1 %vm9480_vm6, %v9477_v58 }
 0x2bb   :  { %v10842_v56 = vpop.f32.mrb[40].mxu1 }
 0x2bc   :  { %v10844_v62 = vpop.f32.mrb[41].mxu1 }
 0x2bd   :  { %v4792_v63 = vpop.f32.mrb[42].mxu1 }
 0x2be   :  { %v4793_v0 = vpop.f32.mrb[43].mxu1  ;;  %v9181_v63 = vld [vmem:[%s11756_s0 + $0x508] ss:$8 sps:$4 sm:$0xff]  }
 0x2e7   :  { %v10846_v1 = vpop.f32.mrb[44].mxu1 }
 0x2e8   :  { %v10848_v2 = vpop.f32.mrb[45].mxu1 }
 0x2e9   :  { %v5300_v4 = vpop.f32.mrb[46].mxu1 }
 0x2ea   :  { %v5301_v5 = vpop.f32.mrb[47].mxu1  ;;  %v9186_v4 = vld [vmem:[%s11756_s0 + $0x51c] ss:$8 sps:$4 sm:$0xff]  }
 0x2eb   :  { %v9184_v5 = vld [vmem:[%s11756_s0 + $0x518] ss:$8 sps:$4 sm:$0xff]  }
 0x313   :  { %v10850_v6 = vpop.f32.mrb[48].mxu1 }
 0x314   :  { %v10852_v8 = vpop.f32.mrb[49].mxu1 }
 0x315   :  { %v5808_v10 = vpop.f32.mrb[50].mxu1 }
 0x316   :  { %v5809_v12 = vpop.f32.mrb[51].mxu1  ;;  %v9189_v10 = vld [vmem:[%s11756_s0 + $0x52c] ss:$8 sps:$4 sm:$0xff]  }
 0x317   :  { %v7485_v12 = vld [vmem:[%s11756_s0 + $0x538] sm:$0x11] }
 0x33f   :  { %v10854_v13 = vpop.f32.mrb[52].mxu1 }
 0x340   :  { %v10856_v14 = vpop.f32.mrb[53].mxu1 }
 0x341   :  { %v6316_v29 = vpop.f32.mrb[54].mxu1 }
 0x342   :  { %v6317_v15 = vpop.f32.mrb[55].mxu1  ;;  %v9187_v29 = vld [vmem:[%s11756_s0 + $0x528] ss:$8 sps:$4 sm:$0xff]  }
 0x343   :  { %v7507_v15 = vcombine.high %v7485_v12, %v7485_v12 }
 0x345   :  { %v1486_v16 = vpop.f32.mrb[12].mxu0 }
 0x346   :  { %v1487_v28 = vadd.f32 %v1486_v16, %v10017_v48  ;;  %v1488_v17 = vpop.f32.mrb[13].mxu0  ;;  %v7506_v16 = vcombine.low %v7485_v12, %v7485_v12  ;;  %v9221_v12 = vld [vmem:[%s11756_s0 + $0x724] ss:$8 sps:$4 sm:$0xff]  }
 0x347   :  { %v1489_v19 = vadd.f32 %v1488_v17, %v10017_v48  ;;  %v1490_v20 = vpop.f32.mrb[14].mxu0 }
 0x348   :  { %v1491_v22 = vpop.f32.mrb[15].mxu0  ;;  %v1493_v31 = vmax.f32 %v1487_v28, 0.0  ;;  %v1955_v28 = vsel %vm179_vm1, %v7506_v16, 0  ;;  %v2251_v20 = vadd.f32 %v10393_v26, %v10017_v48 }
 0x349   :  { %v1494_v24 = vmax.f32 %v1489_v19, 0.0 }
 0x34b   :  { %1500 = vmatprep.subr.mxu0 %v1494_v24  ;;  %v2249_v24 = vadd.f32 %v10391_v25, %v10017_v48  ;;  %v2503_v25 = vadd.f32 %v10463_v57, %v10017_v48  ;;  %v7604_v57 = vld [vmem:[%s11759_s3 + $0x9] sm:$0x1] }
 0x34c   :  { %1501 = vmatpush1.msra.mxu0 %v1493_v31 }
 0x34d   :  { %7417 = vmatmul.mubr.msk.f32.vlgmr.msra.gmra.mrb[4].mxu0 %vm408_vm2, %v7416_v32  ;;  %1754 = vmatprep.subr.mxu0 %v1748_v33  ;;  %v2505_v32 = vadd.f32 %v10465_v59, %v10017_v48  ;;  %v7557_v59 = vld [vmem:[%s11759_s3 + $0x8] sm:$0x1] }
 0x34e   :  { %1755 = vmatpush1.msra.mxu0 %v1747_v61  ;;  %1818 = vmatprep.mubr.f32.mxu0 %v9477_v58  ;;  %v7510_v61 = vld [vmem:[%s11759_s3 + $0x7] sm:$0x1] }
 0x34f   :  { %1960 = vmatprep.subr.bf16.mxu0 %v9162_v34  ;;  %v2510_v26 = vmax.f32 %v2505_v32, 0.0 }
 0x355   :  { %7464 = vmatmul.mubr.msk.f32.vlgmr.msra.gmra.mrb[4].mxu0 %vm408_vm2, %v7463_v35  ;;  %v2255_v35 = vmax.f32 %v2249_v24, 0.0 }
 0x356   :  { %1961 = vmatpush1.bf16.msra.mxu0 %v9160_v60  ;;  %7509 = vmatprep.mubr.msk.bf16.mxu0 %vm175_vm0, %v9599_v23  ;;  %v2256_v60 = vmax.f32 %v2251_v20, 0.0 }
 0x357   :  { %1962 = vmatprep.subr.bf16.mxu0 %v9165_v36  ;;  %v9194_v36 = vld [vmem:[%s11756_s0 + $0x694] ss:$8 sps:$4 sm:$0xff]  }
 0x35a   :  { %1963 = vmatpush1.bf16.msra.mxu0 %v9163_v37  ;;  %v2509_v37 = vmax.f32 %v2503_v25, 0.0  ;;  %v9229_v25 = vld [vmem:[%s11756_s0 + $0x7f4] ss:$8 sps:$4 sm:$0xff]  }
 0x35b   :  { %1964 = vmatprep.subr.bf16.mxu0 %v9168_v38  ;;  %v9192_v38 = vld [vmem:[%s11756_s0 + $0x690] ss:$8 sps:$4 sm:$0xff]  }
 0x35e   :  { %1965 = vmatpush1.bf16.msra.mxu0 %v9166_v39  ;;  %v9197_v39 = vld [vmem:[%s11756_s0 + $0x6a4] ss:$8 sps:$4 sm:$0xff]  }
 0x35f   :  { %1966 = vmatprep.subr.bf16.mxu0 %v9171_v40  ;;  %v9195_v40 = vld [vmem:[%s11756_s0 + $0x6a0] ss:$8 sps:$4 sm:$0xff]  }
 0x362   :  { %1967 = vmatpush1.bf16.msra.mxu0 %v9169_v41  ;;  %v9200_v41 = vld [vmem:[%s11756_s0 + $0x6b4] ss:$8 sps:$4 sm:$0xff]  }
 0x363   :  { %1968 = vmatprep.subr.bf16.mxu0 %v9174_v42  ;;  %v9198_v42 = vld [vmem:[%s11756_s0 + $0x6b0] ss:$8 sps:$4 sm:$0xff]  }
 0x366   :  { %1969 = vmatpush1.bf16.msra.mxu0 %v9172_v43  ;;  %v9203_v43 = vld [vmem:[%s11756_s0 + $0x6c4] ss:$8 sps:$4 sm:$0xff]  }
 0x367   :  { %1970 = vmatprep.subr.bf16.mxu0 %v9177_v44  ;;  %v9201_v44 = vld [vmem:[%s11756_s0 + $0x6c0] ss:$8 sps:$4 sm:$0xff]  }
 0x36a   :  { %1971 = vmatpush1.bf16.msra.mxu0 %v9175_v45  ;;  %v9206_v45 = vld [vmem:[%s11756_s0 + $0x6d4] ss:$8 sps:$4 sm:$0xff]  }
 0x36b   :  { %1972 = vmatprep.subr.bf16.mxu0 %v9180_v46  ;;  %v10917_v50 = vpop.f32.mrb[56].mxu1  ;;  %v9204_v46 = vld [vmem:[%s11756_s0 + $0x6d0] ss:$8 sps:$4 sm:$0xff]  }
 0x36c   :  { %v10922_v54 = vpop.f32.mrb[57].mxu1 }
 0x36d   :  { %v6570_v55 = vpop.f32.mrb[58].mxu1 }
 0x36e   :  { %1973 = vmatpush1.bf16.msra.mxu0 %v9178_v49  ;;  %v6571_v0 = vpop.f32.mrb[59].mxu1  ;;  %v9209_v49 = vld [vmem:[%s11756_s0 + $0x6e4] ss:$8 sps:$4 sm:$0xff]   ;;  %v9212_v55 = vld [vmem:[%s11756_s0 + $0x6f4] ss:$8 sps:$4 sm:$0xff]  }
 0x36f   :  { %1974 = vmatprep.subr.bf16.mxu0 %v9183_v53  ;;  %v9207_v53 = vld [vmem:[%s11756_s0 + $0x6e0] ss:$8 sps:$4 sm:$0xff]   ;;  %v9215_v0 = vld [vmem:[%s11756_s0 + $0x704] ss:$8 sps:$4 sm:$0xff]  }
 0x372   :  { %1975 = vmatpush1.bf16.msra.mxu0 %v9181_v63  ;;  %v9210_v63 = vld [vmem:[%s11756_s0 + $0x6f0] ss:$8 sps:$4 sm:$0xff]  }
 0x373   :  { %1976 = vmatprep.subr.bf16.mxu0 %v9186_v4  ;;  %v9213_v4 = vld [vmem:[%s11756_s0 + $0x700] ss:$8 sps:$4 sm:$0xff]  }
 0x376   :  { %1977 = vmatpush1.bf16.msra.mxu0 %v9184_v5  ;;  %v9218_v5 = vld [vmem:[%s11756_s0 + $0x714] ss:$8 sps:$4 sm:$0xff]  }
 0x377   :  { %1978 = vmatprep.subr.bf16.mxu0 %v9189_v10  ;;  %v9216_v10 = vld [vmem:[%s11756_s0 + $0x710] ss:$8 sps:$4 sm:$0xff]  }
 0x37a   :  { %1979 = vmatpush1.bf16.msra.mxu0 %v9187_v29  ;;  %v7626_v29 = vld [vmem:[%s11756_s0 + $0x730] sm:$0x11] }
 0x37b   :  { %7508 = vmatprep.subr.msk.bf16.mxu0 %vm179_vm1, %v7507_v15  ;;  %v9219_v15 = vld [vmem:[%s11756_s0 + $0x720] ss:$8 sps:$4 sm:$0xff]   ;;  %v7648_v16 = vcombine.high %v7626_v29, %v7626_v29 }
 0x37e   :  { %1981 = vmatpush1.bf16.msra.mxu0 %v1955_v28  ;;  %v7647_v28 = vcombine.low %v7626_v29, %v7626_v29 }
 0x381   :  { %1993 = vmatmul.mubr.bf16.vlgmr.msra.gmra.mrb[16].mxu0 %v9667_v47 }
 0x382   :  { %2072 = vmatprep.mubr.f32.mxu0 %v9477_v58 }
 0x454   :  { %v1994_v17 = vpop.f32.mrb[16].mxu0 }
 0x455   :  { %v1995_v18 = vadd.f32 %v1994_v17, %v10017_v48  ;;  %v1996_v19 = vpop.f32.mrb[17].mxu0  ;;  %v2717_v17 = vsel %vm179_vm1, %v7647_v28, 0 }
 0x456   :  { %v1997_v21 = vadd.f32 %v1996_v19, %v10017_v48  ;;  %v1998_v22 = vpop.f32.mrb[18].mxu0 }
 0x457   :  { %v1999_v31 = vpop.f32.mrb[19].mxu0  ;;  %v2001_v34 = vmax.f32 %v1995_v18, 0.0 }
 0x458   :  { %v2002_v33 = vmax.f32 %v1997_v21, 0.0  ;;  %v3013_v21 = vadd.f32 %v10537_v30, %v10017_v48  ;;  %v3011_v31 = vadd.f32 %v10535_v27, %v10017_v48  ;;  %v9224_v27 = vld [vmem:[%s11756_s0 + $0x7e0] ss:$8 sps:$4 sm:$0xff]  }
 0x45a   :  { %2008 = vmatprep.subr.mxu0 %v2002_v33  ;;  %v3017_v30 = vmax.f32 %v3011_v31, 0.0  ;;  %v9258_v31 = vld [vmem:[%s11756_s0 + $0x934] ss:$8 sps:$4 sm:$0xff]  }
 0x45b   :  { %2009 = vmatpush1.msra.mxu0 %v2001_v34 }
 0x45c   :  { %7511 = vmatmul.mubr.msk.f32.vlgmr.msra.gmra.mrb[4].mxu0 %vm408_vm2, %v7510_v61  ;;  %2262 = vmatprep.subr.mxu0 %v2256_v60  ;;  %v7651_v61 = vld [vmem:[%s11759_s3 + $0xa] sm:$0x1]  ;;  %v3018_v60 = vmax.f32 %v3013_v21, 0.0 }
 0x45d   :  { %2263 = vmatpush1.msra.mxu0 %v2255_v35  ;;  %2326 = vmatprep.mubr.f32.mxu0 %v9477_v58  ;;  %v9226_v35 = vld [vmem:[%s11756_s0 + $0x7e4] ss:$8 sps:$4 sm:$0xff]  }
 0x45e   :  { %2516 = vmatprep.subr.mxu0 %v2510_v26  ;;  %v7698_v26 = vld [vmem:[%s11759_s3 + $0xb] sm:$0x1] }
 0x464   :  { %7558 = vmatmul.mubr.msk.f32.vlgmr.msra.gmra.mrb[4].mxu0 %vm408_vm2, %v7557_v59  ;;  %v9227_v59 = vld [vmem:[%s11756_s0 + $0x7f0] ss:$8 sps:$4 sm:$0xff]  }
 0x465   :  { %2517 = vmatpush1.msra.mxu0 %v2509_v37  ;;  %2580 = vmatprep.mubr.f32.mxu0 %v9477_v58  ;;  %v9230_v37 = vld [vmem:[%s11756_s0 + $0x800] ss:$8 sps:$4 sm:$0xff]  }
 0x466   :  { %2722 = vmatprep.subr.bf16.mxu0 %v9194_v36  ;;  %v9232_v36 = vld [vmem:[%s11756_s0 + $0x804] ss:$8 sps:$4 sm:$0xff]  }
 0x46c   :  { %7605 = vmatmul.mubr.msk.f32.vlgmr.msra.gmra.mrb[4].mxu0 %vm408_vm2, %v7604_v57  ;;  %v9233_v57 = vld [vmem:[%s11756_s0 + $0x810] ss:$8 sps:$4 sm:$0xff]  }
 0x46d   :  { %2723 = vmatpush1.bf16.msra.mxu0 %v9192_v38  ;;  %7650 = vmatprep.mubr.msk.bf16.mxu0 %vm175_vm0, %v9599_v23  ;;  %v9235_v38 = vld [vmem:[%s11756_s0 + $0x814] ss:$8 sps:$4 sm:$0xff]  }
 0x46e   :  { %2724 = vmatprep.subr.bf16.mxu0 %v9197_v39  ;;  %v9238_v39 = vld [vmem:[%s11756_s0 + $0x824] ss:$8 sps:$4 sm:$0xff]  }
 0x471   :  { %2725 = vmatpush1.bf16.msra.mxu0 %v9195_v40  ;;  %v9236_v40 = vld [vmem:[%s11756_s0 + $0x820] ss:$8 sps:$4 sm:$0xff]  }
 0x472   :  { %2726 = vmatprep.subr.bf16.mxu0 %v9200_v41  ;;  %v9241_v41 = vld [vmem:[%s11756_s0 + $0x834] ss:$8 sps:$4 sm:$0xff]  }
 0x475   :  { %2727 = vmatpush1.bf16.msra.mxu0 %v9198_v42  ;;  %v9239_v42 = vld [vmem:[%s11756_s0 + $0x830] ss:$8 sps:$4 sm:$0xff]  }
 0x476   :  { %2728 = vmatprep.subr.bf16.mxu0 %v9203_v43  ;;  %v9244_v43 = vld [vmem:[%s11756_s0 + $0x844] ss:$8 sps:$4 sm:$0xff]  }
 0x479   :  { %2729 = vmatpush1.bf16.msra.mxu0 %v9201_v44  ;;  %v9242_v44 = vld [vmem:[%s11756_s0 + $0x840] ss:$8 sps:$4 sm:$0xff]  }
 0x47a   :  { %2730 = vmatprep.subr.bf16.mxu0 %v9206_v45  ;;  %v9247_v45 = vld [vmem:[%s11756_s0 + $0x854] ss:$8 sps:$4 sm:$0xff]  }
 0x47d   :  { %2731 = vmatpush1.bf16.msra.mxu0 %v9204_v46  ;;  %v9245_v46 = vld [vmem:[%s11756_s0 + $0x850] ss:$8 sps:$4 sm:$0xff]  }
 0x47e   :  { %2732 = vmatprep.subr.bf16.mxu0 %v9209_v49  ;;  %v9250_v49 = vld [vmem:[%s11756_s0 + $0x864] ss:$8 sps:$4 sm:$0xff]  }
 0x481   :  { %2733 = vmatpush1.bf16.msra.mxu0 %v9207_v53  ;;  %v9248_v53 = vld [vmem:[%s11756_s0 + $0x860] ss:$8 sps:$4 sm:$0xff]  }
 0x482   :  { %2734 = vmatprep.subr.bf16.mxu0 %v9212_v55  ;;  %v9253_v55 = vld [vmem:[%s11756_s0 + $0x874] ss:$8 sps:$4 sm:$0xff]  }
 0x485   :  { %2735 = vmatpush1.bf16.msra.mxu0 %v9210_v63  ;;  %v7720_v63 = vld [vmem:[%s11756_s0 + $0x880] sm:$0x11] }
 0x486   :  { %2736 = vmatprep.subr.bf16.mxu0 %v9215_v0  ;;  %v9251_v0 = vld [vmem:[%s11756_s0 + $0x870] ss:$8 sps:$4 sm:$0xff]  }
 0x489   :  { %2737 = vmatpush1.bf16.msra.mxu0 %v9213_v4  ;;  %v7742_v4 = vcombine.high %v7720_v63, %v7720_v63 }
 0x48a   :  { %2738 = vmatprep.subr.bf16.mxu0 %v9218_v5  ;;  %v7741_v5 = vcombine.low %v7720_v63, %v7720_v63  ;;  %v4029_v63 = vadd.f32 %v10752_v11, %v10017_v48 }
 0x48d   :  { %2739 = vmatpush1.bf16.msra.mxu0 %v9216_v10  ;;  %v3225_v10 = vsel %vm179_vm1, %v7741_v5, 0  ;;  %v4027_v5 = vadd.f32 %v10747_v9, %v10017_v48  ;;  %v4281_v9 = vadd.f32 %v10835_v51, %v10017_v48  ;;  %v7933_v51 = vld [vmem:[%s11759_s3 + $0x10] sm:$0x1] }
 0x48e   :  { %2740 = vmatprep.subr.bf16.mxu0 %v9221_v12 }
 0x491   :  { %2741 = vmatpush1.bf16.msra.mxu0 %v9219_v15 }
 0x492   :  { %7649 = vmatprep.subr.msk.bf16.mxu0 %vm179_vm1, %v7648_v16  ;;  %v3521_v16 = vadd.f32 %v10613_v7, %v10017_v48 }
 0x495   :  { %2743 = vmatpush1.bf16.msra.mxu0 %v2717_v17 }
 0x498   :  { %2755 = vmatmul.mubr.bf16.vlgmr.msra.gmra.mrb[20].mxu0 %v9667_v47 }
 0x499   :  { %2834 = vmatprep.mubr.f32.mxu0 %v9477_v58 }
 0x56b   :  { %v2756_v18 = vpop.f32.mrb[20].mxu0 }
 0x56c   :  { %v2757_v19 = vadd.f32 %v2756_v18, %v10017_v48  ;;  %v2758_v20 = vpop.f32.mrb[21].mxu0  ;;  %v3519_v18 = vadd.f32 %v10608_v3, %v10017_v48  ;;  %v9256_v3 = vld [vmem:[%s11756_s0 + $0x930] ss:$8 sps:$4 sm:$0xff]  }
 0x56d   :  { %v2759_v22 = vadd.f32 %v2758_v20, %v10017_v48  ;;  %v2760_v24 = vpop.f32.mrb[22].mxu0 }
 0x56e   :  { %v2761_v32 = vpop.f32.mrb[23].mxu0  ;;  %v2763_v34 = vmax.f32 %v2757_v19, 0.0  ;;  %v3526_v24 = vmax.f32 %v3521_v16, 0.0  ;;  %v3525_v7 = vmax.f32 %v3519_v18, 0.0  ;;  %v7839_v16 = vld [vmem:[%s11759_s3 + $0xe] sm:$0x1] }
 0x56f   :  { %v2764_v33 = vmax.f32 %v2759_v22, 0.0  ;;  %v7745_v22 = vld [vmem:[%s11759_s3 + $0xc] sm:$0x1]  ;;  %v7792_v32 = vld [vmem:[%s11759_s3 + $0xd] sm:$0x1] }
 0x570   :  { %v9290_v18 = vld [vmem:[%s11756_s0 + $0xb2c] ss:$8 sps:$4 sm:$0xff]  }
 0x571   :  { %2770 = vmatprep.subr.mxu0 %v2764_v33  ;;  %v9261_v33 = vld [vmem:[%s11756_s0 + $0x944] ss:$8 sps:$4 sm:$0xff]  }
 0x572   :  { %2771 = vmatpush1.msra.mxu0 %v2763_v34  ;;  %v9259_v34 = vld [vmem:[%s11756_s0 + $0x940] ss:$8 sps:$4 sm:$0xff]  }
 0x573   :  { %7652 = vmatmul.mubr.msk.f32.vlgmr.msra.gmra.mrb[4].mxu0 %vm408_vm2, %v7651_v61  ;;  %3024 = vmatprep.subr.mxu0 %v3018_v60  ;;  %v9264_v61 = vld [vmem:[%s11756_s0 + $0x954] ss:$8 sps:$4 sm:$0xff]   ;;  %v9262_v60 = vld [vmem:[%s11756_s0 + $0x950] ss:$8 sps:$4 sm:$0xff]  }
 0x574   :  { %3025 = vmatpush1.msra.mxu0 %v3017_v30  ;;  %3088 = vmatprep.mubr.f32.mxu0 %v9477_v58  ;;  %v9265_v30 = vld [vmem:[%s11756_s0 + $0x960] ss:$8 sps:$4 sm:$0xff]  }
 0x575   :  { %3230 = vmatprep.subr.bf16.mxu0 %v9226_v35  ;;  %v9267_v35 = vld [vmem:[%s11756_s0 + $0x964] ss:$8 sps:$4 sm:$0xff]  }
 0x57b   :  { %7699 = vmatmul.mubr.msk.f32.vlgmr.msra.gmra.mrb[4].mxu0 %vm408_vm2, %v7698_v26  ;;  %v9268_v26 = vld [vmem:[%s11756_s0 + $0x970] ss:$8 sps:$4 sm:$0xff]  }
 0x57c   :  { %3231 = vmatpush1.bf16.msra.mxu0 %v9224_v27  ;;  %7744 = vmatprep.mubr.msk.bf16.mxu0 %vm175_vm0, %v9599_v23  ;;  %v9270_v27 = vld [vmem:[%s11756_s0 + $0x974] ss:$8 sps:$4 sm:$0xff]  }
 0x57d   :  { %3232 = vmatprep.subr.bf16.mxu0 %v9229_v25  ;;  %v9273_v25 = vld [vmem:[%s11756_s0 + $0x984] ss:$8 sps:$4 sm:$0xff]  }
 0x580   :  { %3233 = vmatpush1.bf16.msra.mxu0 %v9227_v59  ;;  %v9271_v59 = vld [vmem:[%s11756_s0 + $0x980] ss:$8 sps:$4 sm:$0xff]  }
 0x581   :  { %3234 = vmatprep.subr.bf16.mxu0 %v9232_v36  ;;  %v9276_v36 = vld [vmem:[%s11756_s0 + $0x994] ss:$8 sps:$4 sm:$0xff]  }
 0x584   :  { %3235 = vmatpush1.bf16.msra.mxu0 %v9230_v37  ;;  %v9274_v37 = vld [vmem:[%s11756_s0 + $0x990] ss:$8 sps:$4 sm:$0xff]  }
 0x585   :  { %3236 = vmatprep.subr.bf16.mxu0 %v9235_v38  ;;  %v9279_v38 = vld [vmem:[%s11756_s0 + $0x9a4] ss:$8 sps:$4 sm:$0xff]  }
 0x588   :  { %3237 = vmatpush1.bf16.msra.mxu0 %v9233_v57  ;;  %v9277_v57 = vld [vmem:[%s11756_s0 + $0x9a0] ss:$8 sps:$4 sm:$0xff]  }
 0x589   :  { %3238 = vmatprep.subr.bf16.mxu0 %v9238_v39  ;;  %v9282_v39 = vld [vmem:[%s11756_s0 + $0x9b4] ss:$8 sps:$4 sm:$0xff]  }
 0x58c   :  { %3239 = vmatpush1.bf16.msra.mxu0 %v9236_v40  ;;  %v9280_v40 = vld [vmem:[%s11756_s0 + $0x9b0] ss:$8 sps:$4 sm:$0xff]  }
 0x58d   :  { %3240 = vmatprep.subr.bf16.mxu0 %v9241_v41  ;;  %v9285_v41 = vld [vmem:[%s11756_s0 + $0x9c4] ss:$8 sps:$4 sm:$0xff]  }
 0x590   :  { %3241 = vmatpush1.bf16.msra.mxu0 %v9239_v42  ;;  %v7814_v42 = vld [vmem:[%s11756_s0 + $0x9d0] sm:$0x11] }
 0x591   :  { %3242 = vmatprep.subr.bf16.mxu0 %v9244_v43  ;;  %v9283_v43 = vld [vmem:[%s11756_s0 + $0x9c0] ss:$8 sps:$4 sm:$0xff]  }
 0x594   :  { %3243 = vmatpush1.bf16.msra.mxu0 %v9242_v44  ;;  %v7836_v44 = vcombine.high %v7814_v42, %v7814_v42 }
 0x595   :  { %3244 = vmatprep.subr.bf16.mxu0 %v9247_v45  ;;  %v7835_v45 = vcombine.low %v7814_v42, %v7814_v42 }
 0x598   :  { %3245 = vmatpush1.bf16.msra.mxu0 %v9245_v46  ;;  %v3733_v46 = vsel %vm179_vm1, %v7835_v45, 0 }
 0x599   :  { %3246 = vmatprep.subr.bf16.mxu0 %v9250_v49 }
 0x59c   :  { %3247 = vmatpush1.bf16.msra.mxu0 %v9248_v53 }
 0x59d   :  { %3248 = vmatprep.subr.bf16.mxu0 %v9253_v55 }
 0x5a0   :  { %3249 = vmatpush1.bf16.msra.mxu0 %v9251_v0 }
 0x5a1   :  { %7743 = vmatprep.subr.msk.bf16.mxu0 %vm179_vm1, %v7742_v4 }
 0x5a4   :  { %3251 = vmatpush1.bf16.msra.mxu0 %v3225_v10 }
 0x5a7   :  { %3263 = vmatmul.mubr.bf16.vlgmr.msra.gmra.mrb[24].mxu0 %v9667_v47 }
 0x5a8   :  { %3342 = vmatprep.mubr.f32.mxu0 %v9477_v58 }
 0x67a   :  { %v3264_v12 = vpop.f32.mrb[24].mxu0 }
 0x67b   :  { %v3265_v29 = vadd.f32 %v3264_v12, %v10017_v48  ;;  %v3266_v15 = vpop.f32.mrb[25].mxu0  ;;  %v4283_v12 = vadd.f32 %v10837_v52, %v10017_v48  ;;  %v7886_v52 = vld [vmem:[%s11759_s3 + $0xf] sm:$0x1] }
 0x67c   :  { %v3267_v28 = vadd.f32 %v3266_v15, %v10017_v48  ;;  %v3268_v17 = vpop.f32.mrb[26].mxu0 }
 0x67d   :  { %v3269_v19 = vpop.f32.mrb[27].mxu0  ;;  %v3271_v21 = vmax.f32 %v3265_v29, 0.0  ;;  %v4033_v17 = vmax.f32 %v4027_v5, 0.0  ;;  %v4288_v11 = vmax.f32 %v4283_v12, 0.0  ;;  %v8027_v5 = vld [vmem:[%s11759_s3 + $0x12] sm:$0x1] }
 0x67e   :  { %v3272_v20 = vmax.f32 %v3267_v28, 0.0  ;;  %v4034_v28 = vmax.f32 %v4029_v63, 0.0  ;;  %v4287_v19 = vmax.f32 %v4281_v9, 0.0  ;;  %v7980_v63 = vld [vmem:[%s11759_s3 + $0x11] sm:$0x1] }
 0x67f   :  { %v9323_v12 = vld [vmem:[%s11756_s0 + $0xc88] ss:$8 sps:$4 sm:$0xff]   ;;  %v9337_v9 = vld [vmem:[%s11756_s0 + $0xccc] ss:$8 sps:$4 sm:$0xff]  }
 0x680   :  { %3278 = vmatprep.subr.mxu0 %v3272_v20  ;;  %v9288_v20 = vld [vmem:[%s11756_s0 + $0xb28] ss:$8 sps:$4 sm:$0xff]  }
 0x681   :  { %3279 = vmatpush1.msra.mxu0 %v3271_v21  ;;  %v9293_v21 = vld [vmem:[%s11756_s0 + $0xb3c] ss:$8 sps:$4 sm:$0xff]  }
 0x682   :  { %7746 = vmatmul.mubr.msk.f32.vlgmr.msra.gmra.mrb[4].mxu0 %vm408_vm2, %v7745_v22  ;;  %3532 = vmatprep.subr.mxu0 %v3526_v24  ;;  %v9291_v22 = vld [vmem:[%s11756_s0 + $0xb38] ss:$8 sps:$4 sm:$0xff]   ;;  %v9296_v24 = vld [vmem:[%s11756_s0 + $0xb4c] ss:$8 sps:$4 sm:$0xff]  }
 0x683   :  { %3533 = vmatpush1.msra.mxu0 %v3525_v7  ;;  %3596 = vmatprep.mubr.f32.mxu0 %v9477_v58  ;;  %v9299_v7 = vld [vmem:[%s11756_s0 + $0xb5c] ss:$8 sps:$4 sm:$0xff]  }
 0x684   :  { %3738 = vmatprep.subr.bf16.mxu0 %v9258_v31  ;;  %v9294_v31 = vld [vmem:[%s11756_s0 + $0xb48] ss:$8 sps:$4 sm:$0xff]  }
 0x68a   :  { %7793 = vmatmul.mubr.msk.f32.vlgmr.msra.gmra.mrb[4].mxu0 %vm408_vm2, %v7792_v32  ;;  %v9302_v32 = vld [vmem:[%s11756_s0 + $0xb6c] ss:$8 sps:$4 sm:$0xff]  }
 0x68b   :  { %3739 = vmatpush1.bf16.msra.mxu0 %v9256_v3  ;;  %7838 = vmatprep.mubr.msk.bf16.mxu0 %vm175_vm0, %v9599_v23  ;;  %v9297_v3 = vld [vmem:[%s11756_s0 + $0xb58] ss:$8 sps:$4 sm:$0xff]  }
 0x68c   :  { %3740 = vmatprep.subr.bf16.mxu0 %v9261_v33  ;;  %v9300_v33 = vld [vmem:[%s11756_s0 + $0xb68] ss:$8 sps:$4 sm:$0xff]  }
 0x68f   :  { %3741 = vmatpush1.bf16.msra.mxu0 %v9259_v34  ;;  %v9305_v34 = vld [vmem:[%s11756_s0 + $0xb7c] ss:$8 sps:$4 sm:$0xff]  }
 0x690   :  { %3742 = vmatprep.subr.bf16.mxu0 %v9264_v61  ;;  %v9303_v61 = vld [vmem:[%s11756_s0 + $0xb78] ss:$8 sps:$4 sm:$0xff]  }
 0x693   :  { %3743 = vmatpush1.bf16.msra.mxu0 %v9262_v60  ;;  %v9308_v60 = vld [vmem:[%s11756_s0 + $0xb8c] ss:$8 sps:$4 sm:$0xff]  }
 0x694   :  { %3744 = vmatprep.subr.bf16.mxu0 %v9267_v35  ;;  %v9306_v35 = vld [vmem:[%s11756_s0 + $0xb88] ss:$8 sps:$4 sm:$0xff]  }
 0x697   :  { %3745 = vmatpush1.bf16.msra.mxu0 %v9265_v30  ;;  %v9311_v30 = vld [vmem:[%s11756_s0 + $0xb9c] ss:$8 sps:$4 sm:$0xff]  }
 0x698   :  { %3746 = vmatprep.subr.bf16.mxu0 %v9270_v27  ;;  %v9309_v27 = vld [vmem:[%s11756_s0 + $0xb98] ss:$8 sps:$4 sm:$0xff]  }
 0x69b   :  { %3747 = vmatpush1.bf16.msra.mxu0 %v9268_v26  ;;  %v9314_v26 = vld [vmem:[%s11756_s0 + $0xbac] ss:$8 sps:$4 sm:$0xff]  }
 0x69c   :  { %3748 = vmatprep.subr.bf16.mxu0 %v9273_v25  ;;  %v9312_v25 = vld [vmem:[%s11756_s0 + $0xba8] ss:$8 sps:$4 sm:$0xff]  }
 0x69f   :  { %3749 = vmatpush1.bf16.msra.mxu0 %v9271_v59  ;;  %v9317_v59 = vld [vmem:[%s11756_s0 + $0xbbc] ss:$8 sps:$4 sm:$0xff]  }
 0x6a0   :  { %3750 = vmatprep.subr.bf16.mxu0 %v9276_v36  ;;  %v7955_v36 = vld [vmem:[%s11756_s0 + $0xbc8] sm:$0x11] }
 0x6a3   :  { %3751 = vmatpush1.bf16.msra.mxu0 %v9274_v37  ;;  %v9315_v37 = vld [vmem:[%s11756_s0 + $0xbb8] ss:$8 sps:$4 sm:$0xff]  }
 0x6a4   :  { %3752 = vmatprep.subr.bf16.mxu0 %v9279_v38  ;;  %v7977_v38 = vcombine.high %v7955_v36, %v7955_v36 }
 0x6a7   :  { %3753 = vmatpush1.bf16.msra.mxu0 %v9277_v57  ;;  %v7976_v57 = vcombine.low %v7955_v36, %v7955_v36 }
 0x6a8   :  { %3754 = vmatprep.subr.bf16.mxu0 %v9282_v39 }
 0x6a9   :  { %v4495_v39 = vsel %vm179_vm1, %v7976_v57, 0  ;;  %v9354_v57 = vld [vmem:[%s11756_s0 + $0xdcc] ss:$8 sps:$4 sm:$0xff]  }
 0x6ab   :  { %3755 = vmatpush1.bf16.msra.mxu0 %v9280_v40 }
 0x6ac   :  { %3756 = vmatprep.subr.bf16.mxu0 %v9285_v41 }
 0x6af   :  { %3757 = vmatpush1.bf16.msra.mxu0 %v9283_v43  ;;  %v4791_v43 = vadd.f32 %v10844_v62, %v10017_v48 }
 0x6b0   :  { %7837 = vmatprep.subr.msk.bf16.mxu0 %vm179_vm1, %v7836_v44 }
 0x6b3   :  { %3759 = vmatpush1.bf16.msra.mxu0 %v3733_v46  ;;  %v4789_v46 = vadd.f32 %v10842_v56, %v10017_v48  ;;  %v9320_v56 = vld [vmem:[%s11756_s0 + $0xc78] ss:$8 sps:$4 sm:$0xff]  }
 0x6b5   :  { %v4795_v62 = vmax.f32 %v4789_v46, 0.0  ;;  %v9366_v46 = vld [vmem:[%s11756_s0 + $0xe0c] ss:$8 sps:$4 sm:$0xff]  }
 0x6b6   :  { %3771 = vmatmul.mubr.bf16.vlgmr.msra.gmra.mrb[28].mxu0 %v9667_v47 }
 0x6b7   :  { %3850 = vmatprep.mubr.f32.mxu0 %v9477_v58 }
 0x789   :  { %v3772_v49 = vpop.f32.mrb[28].mxu0 }
 0x78a   :  { %v3773_v53 = vadd.f32 %v3772_v49, %v10017_v48  ;;  %v3774_v55 = vpop.f32.mrb[29].mxu0 }
 0x78b   :  { %v3775_v0 = vadd.f32 %v3774_v55, %v10017_v48  ;;  %v3776_v4 = vpop.f32.mrb[30].mxu0 }
 0x78c   :  { %v3777_v10 = vpop.f32.mrb[31].mxu0  ;;  %v3779_v15 = vmax.f32 %v3773_v53, 0.0  ;;  %v9322_v4 = vld [vmem:[%s11756_s0 + $0xc7c] ss:$8 sps:$4 sm:$0xff]  }
 0x78d   :  { %v3780_v29 = vmax.f32 %v3775_v0, 0.0  ;;  %v4796_v0 = vmax.f32 %v4791_v43, 0.0  ;;  %v9325_v10 = vld [vmem:[%s11756_s0 + $0xc8c] ss:$8 sps:$4 sm:$0xff]   ;;  %v9358_v43 = vld [vmem:[%s11756_s0 + $0xde8] ss:$8 sps:$4 sm:$0xff]  }
 0x78f   :  { %3786 = vmatprep.subr.mxu0 %v3780_v29  ;;  %v9328_v29 = vld [vmem:[%s11756_s0 + $0xc9c] ss:$8 sps:$4 sm:$0xff]  }
 0x790   :  { %3787 = vmatpush1.msra.mxu0 %v3779_v15  ;;  %v9326_v15 = vld [vmem:[%s11756_s0 + $0xc98] ss:$8 sps:$4 sm:$0xff]  }
 0x791   :  { %7840 = vmatmul.mubr.msk.f32.vlgmr.msra.gmra.mrb[4].mxu0 %vm408_vm2, %v7839_v16  ;;  %4040 = vmatprep.subr.mxu0 %v4034_v28  ;;  %v9331_v16 = vld [vmem:[%s11756_s0 + $0xcac] ss:$8 sps:$4 sm:$0xff]   ;;  %v9329_v28 = vld [vmem:[%s11756_s0 + $0xca8] ss:$8 sps:$4 sm:$0xff]  }
 0x792   :  { %4041 = vmatpush1.msra.mxu0 %v4033_v17  ;;  %4104 = vmatprep.mubr.f32.mxu0 %v9477_v58  ;;  %v9334_v17 = vld [vmem:[%s11756_s0 + $0xcbc] ss:$8 sps:$4 sm:$0xff]  }
 0x793   :  { %4294 = vmatprep.subr.mxu0 %v4288_v11  ;;  %v9332_v11 = vld [vmem:[%s11756_s0 + $0xcb8] ss:$8 sps:$4 sm:$0xff]  }
 0x799   :  { %7887 = vmatmul.mubr.msk.f32.vlgmr.msra.gmra.mrb[4].mxu0 %vm408_vm2, %v7886_v52  ;;  %v9335_v52 = vld [vmem:[%s11756_s0 + $0xcc8] ss:$8 sps:$4 sm:$0xff]  }
 0x79a   :  { %4295 = vmatpush1.msra.mxu0 %v4287_v19  ;;  %4358 = vmatprep.mubr.f32.mxu0 %v9477_v58  ;;  %v9338_v19 = vld [vmem:[%s11756_s0 + $0xcd8] ss:$8 sps:$4 sm:$0xff]  }
 0x79b   :  { %4500 = vmatprep.subr.bf16.mxu0 %v9290_v18  ;;  %v9340_v18 = vld [vmem:[%s11756_s0 + $0xcdc] ss:$8 sps:$4 sm:$0xff]  }
 0x7a1   :  { %7934 = vmatmul.mubr.msk.f32.vlgmr.msra.gmra.mrb[4].mxu0 %vm408_vm2, %v7933_v51  ;;  %v9341_v51 = vld [vmem:[%s11756_s0 + $0xce8] ss:$8 sps:$4 sm:$0xff]  }
 0x7a2   :  { %4501 = vmatpush1.bf16.msra.mxu0 %v9288_v20  ;;  %7979 = vmatprep.mubr.msk.bf16.mxu0 %vm175_vm0, %v9599_v23  ;;  %v9343_v20 = vld [vmem:[%s11756_s0 + $0xcec] ss:$8 sps:$4 sm:$0xff]  }
 0x7a3   :  { %4502 = vmatprep.subr.bf16.mxu0 %v9293_v21  ;;  %v9346_v21 = vld [vmem:[%s11756_s0 + $0xcfc] ss:$8 sps:$4 sm:$0xff]  }
 0x7a6   :  { %4503 = vmatpush1.bf16.msra.mxu0 %v9291_v22  ;;  %v9344_v22 = vld [vmem:[%s11756_s0 + $0xcf8] ss:$8 sps:$4 sm:$0xff]  }
 0x7a7   :  { %4504 = vmatprep.subr.bf16.mxu0 %v9296_v24  ;;  %v9349_v24 = vld [vmem:[%s11756_s0 + $0xd0c] ss:$8 sps:$4 sm:$0xff]  }
 0x7aa   :  { %4505 = vmatpush1.bf16.msra.mxu0 %v9294_v31  ;;  %v8049_v31 = vld [vmem:[%s11756_s0 + $0xd18] sm:$0x11] }
 0x7ab   :  { %4506 = vmatprep.subr.bf16.mxu0 %v9299_v7  ;;  %v9347_v7 = vld [vmem:[%s11756_s0 + $0xd08] ss:$8 sps:$4 sm:$0xff]  }
 0x7ae   :  { %4507 = vmatpush1.bf16.msra.mxu0 %v9297_v3  ;;  %v8071_v3 = vcombine.high %v8049_v31, %v8049_v31 }
 0x7af   :  { %4508 = vmatprep.subr.bf16.mxu0 %v9302_v32  ;;  %v8070_v32 = vcombine.low %v8049_v31, %v8049_v31 }
 0x7b2   :  { %4509 = vmatpush1.bf16.msra.mxu0 %v9300_v33  ;;  %v5003_v33 = vsel %vm179_vm1, %v8070_v32, 0  ;;  %v9389_v32 = vld [vmem:[%s11756_s0 + $0xf2c] ss:$8 sps:$4 sm:$0xff]  }
 0x7b3   :  { %4510 = vmatprep.subr.bf16.mxu0 %v9305_v34 }
 0x7b6   :  { %4511 = vmatpush1.bf16.msra.mxu0 %v9303_v61 }
 0x7b7   :  { %4512 = vmatprep.subr.bf16.mxu0 %v9308_v60 }
 0x7ba   :  { %4513 = vmatpush1.bf16.msra.mxu0 %v9306_v35  ;;  %v5299_v35 = vadd.f32 %v10848_v2, %v10017_v48 }
 0x7bb   :  { %4514 = vmatprep.subr.bf16.mxu0 %v9311_v30 }
 0x7be   :  { %4515 = vmatpush1.bf16.msra.mxu0 %v9309_v27 }
 0x7bf   :  { %4516 = vmatprep.subr.bf16.mxu0 %v9314_v26  ;;  %v5297_v26 = vadd.f32 %v10846_v1, %v10017_v48  ;;  %v9352_v1 = vld [vmem:[%s11756_s0 + $0xdc8] ss:$8 sps:$4 sm:$0xff]  }
 0x7c1   :  { %v5303_v2 = vmax.f32 %v5297_v26, 0.0  ;;  %v9401_v26 = vld [vmem:[%s11756_s0 + $0xf6c] ss:$8 sps:$4 sm:$0xff]  }
 0x7c2   :  { %4517 = vmatpush1.bf16.msra.mxu0 %v9312_v25 }
 0x7c3   :  { %4518 = vmatprep.subr.bf16.mxu0 %v9317_v59 }
 0x7c6   :  { %4519 = vmatpush1.bf16.msra.mxu0 %v9315_v37  ;;  %v8074_v37 = vld [vmem:[%s11759_s3 + $0x13] sm:$0x1] }
 0x7c7   :  { %7978 = vmatprep.subr.msk.bf16.mxu0 %vm179_vm1, %v7977_v38  ;;  %v5304_v38 = vmax.f32 %v5299_v35, 0.0  ;;  %v9393_v35 = vld [vmem:[%s11756_s0 + $0xf48] ss:$8 sps:$4 sm:$0xff]  }
 0x7ca   :  { %4521 = vmatpush1.bf16.msra.mxu0 %v4495_v39  ;;  %v8121_v39 = vld [vmem:[%s11759_s3 + $0x14] sm:$0x1] }
 0x7cd   :  { %4533 = vmatmul.mubr.bf16.vlgmr.msra.gmra.mrb[32].mxu0 %v9667_v47 }
 0x7ce   :  { %4612 = vmatprep.mubr.f32.mxu0 %v9477_v58 }
 0x8a0   :  { %v4534_v40 = vpop.f32.mrb[32].mxu0 }
 0x8a1   :  { %v4535_v41 = vadd.f32 %v4534_v40, %v10017_v48  ;;  %v4536_v42 = vpop.f32.mrb[33].mxu0  ;;  %v9357_v40 = vld [vmem:[%s11756_s0 + $0xddc] ss:$8 sps:$4 sm:$0xff]  }
 0x8a2   :  { %v4537_v44 = vadd.f32 %v4536_v42, %v10017_v48  ;;  %v4538_v45 = vpop.f32.mrb[34].mxu0  ;;  %v9360_v42 = vld [vmem:[%s11756_s0 + $0xdec] ss:$8 sps:$4 sm:$0xff]  }
 0x8a3   :  { %v4539_v49 = vpop.f32.mrb[35].mxu0  ;;  %v4541_v55 = vmax.f32 %v4535_v41, 0.0  ;;  %v9355_v41 = vld [vmem:[%s11756_s0 + $0xdd8] ss:$8 sps:$4 sm:$0xff]  }
 0x8a4   :  { %v4542_v53 = vmax.f32 %v4537_v44, 0.0  ;;  %v9363_v44 = vld [vmem:[%s11756_s0 + $0xdfc] ss:$8 sps:$4 sm:$0xff]   ;;  %v9361_v45 = vld [vmem:[%s11756_s0 + $0xdf8] ss:$8 sps:$4 sm:$0xff]  }
 0x8a5   :  { %v9364_v49 = vld [vmem:[%s11756_s0 + $0xe08] ss:$8 sps:$4 sm:$0xff]  }
 0x8a6   :  { %4548 = vmatprep.subr.mxu0 %v4542_v53  ;;  %v9369_v53 = vld [vmem:[%s11756_s0 + $0xe1c] ss:$8 sps:$4 sm:$0xff]  }
 0x8a7   :  { %4549 = vmatpush1.msra.mxu0 %v4541_v55  ;;  %v9367_v55 = vld [vmem:[%s11756_s0 + $0xe18] ss:$8 sps:$4 sm:$0xff]  }
 0x8a8   :  { %7981 = vmatmul.mubr.msk.f32.vlgmr.msra.gmra.mrb[4].mxu0 %vm408_vm2, %v7980_v63  ;;  %4802 = vmatprep.subr.mxu0 %v4796_v0  ;;  %v9372_v63 = vld [vmem:[%s11756_s0 + $0xe2c] ss:$8 sps:$4 sm:$0xff]   ;;  %v9370_v0 = vld [vmem:[%s11756_s0 + $0xe28] ss:$8 sps:$4 sm:$0xff]  }
 0x8a9   :  { %4803 = vmatpush1.msra.mxu0 %v4795_v62  ;;  %4866 = vmatprep.mubr.f32.mxu0 %v9477_v58  ;;  %v9373_v62 = vld [vmem:[%s11756_s0 + $0xe38] ss:$8 sps:$4 sm:$0xff]  }
 0x8aa   :  { %5008 = vmatprep.subr.bf16.mxu0 %v9322_v4  ;;  %v9375_v4 = vld [vmem:[%s11756_s0 + $0xe3c] ss:$8 sps:$4 sm:$0xff]  }
 0x8b0   :  { %8028 = vmatmul.mubr.msk.f32.vlgmr.msra.gmra.mrb[4].mxu0 %vm408_vm2, %v8027_v5  ;;  %v9376_v5 = vld [vmem:[%s11756_s0 + $0xe48] ss:$8 sps:$4 sm:$0xff]  }
 0x8b1   :  { %5009 = vmatpush1.bf16.msra.mxu0 %v9320_v56  ;;  %8073 = vmatprep.mubr.msk.bf16.mxu0 %vm175_vm0, %v9599_v23  ;;  %v9378_v56 = vld [vmem:[%s11756_s0 + $0xe4c] ss:$8 sps:$4 sm:$0xff]  }
 0x8b2   :  { %5010 = vmatprep.subr.bf16.mxu0 %v9325_v10  ;;  %v9381_v10 = vld [vmem:[%s11756_s0 + $0xe5c] ss:$8 sps:$4 sm:$0xff]  }
 0x8b5   :  { %5011 = vmatpush1.bf16.msra.mxu0 %v9323_v12  ;;  %v8143_v12 = vld [vmem:[%s11756_s0 + $0xe68] sm:$0x11] }
 0x8b6   :  { %5012 = vmatprep.subr.bf16.mxu0 %v9328_v29  ;;  %v9379_v29 = vld [vmem:[%s11756_s0 + $0xe58] ss:$8 sps:$4 sm:$0xff]  }
 0x8b9   :  { %5013 = vmatpush1.bf16.msra.mxu0 %v9326_v15  ;;  %v8165_v15 = vcombine.high %v8143_v12, %v8143_v12 }
 0x8ba   :  { %5014 = vmatprep.subr.bf16.mxu0 %v9331_v16  ;;  %v8164_v16 = vcombine.low %v8143_v12, %v8143_v12 }
 0x8bd   :  { %5015 = vmatpush1.bf16.msra.mxu0 %v9329_v28  ;;  %v5511_v28 = vsel %vm179_vm1, %v8164_v16, 0  ;;  %v9416_v16 = vld [vmem:[%s11756_s0 + $0x1110] ss:$8 sps:$4 sm:$0xff]  }
 0x8be   :  { %5016 = vmatprep.subr.bf16.mxu0 %v9334_v17 }
 0x8c1   :  { %5017 = vmatpush1.bf16.msra.mxu0 %v9332_v11 }
 0x8c2   :  { %5018 = vmatprep.subr.bf16.mxu0 %v9337_v9 }
 0x8c5   :  { %5019 = vmatpush1.bf16.msra.mxu0 %v9335_v52  ;;  %v5807_v52 = vadd.f32 %v10852_v8, %v10017_v48 }
 0x8c6   :  { %5020 = vmatprep.subr.bf16.mxu0 %v9340_v18 }
 0x8c7   :  { %v5812_v31 = vmax.f32 %v5807_v52, 0.0  ;;  %v9427_v52 = vld [vmem:[%s11756_s0 + $0x1144] ss:$8 sps:$4 sm:$0xff]  }
 0x8c9   :  { %5021 = vmatpush1.bf16.msra.mxu0 %v9338_v19 }
 0x8ca   :  { %5022 = vmatprep.subr.bf16.mxu0 %v9343_v20  ;;  %v5805_v20 = vadd.f32 %v10850_v6, %v10017_v48  ;;  %v9384_v6 = vld [vmem:[%s11756_s0 + $0xf18] ss:$8 sps:$4 sm:$0xff]  }
 0x8cc   :  { %v5811_v8 = vmax.f32 %v5805_v20, 0.0  ;;  %v9433_v20 = vld [vmem:[%s11756_s0 + $0x1164] ss:$8 sps:$4 sm:$0xff]  }
 0x8cd   :  { %5023 = vmatpush1.bf16.msra.mxu0 %v9341_v51 }
 0x8ce   :  { %5024 = vmatprep.subr.bf16.mxu0 %v9346_v21 }
 0x8d1   :  { %5025 = vmatpush1.bf16.msra.mxu0 %v9344_v22 }
 0x8d2   :  { %5026 = vmatprep.subr.bf16.mxu0 %v9349_v24  ;;  %v8168_v24 = vld [vmem:[%s11759_s3 + $0x15] sm:$0x1] }
 0x8d5   :  { %5027 = vmatpush1.bf16.msra.mxu0 %v9347_v7  ;;  %v9386_v7 = vld [vmem:[%s11756_s0 + $0xf1c] ss:$8 sps:$4 sm:$0xff]  }
 0x8d6   :  { %8072 = vmatprep.subr.msk.bf16.mxu0 %vm179_vm1, %v8071_v3  ;;  %v8215_v3 = vld [vmem:[%s11759_s3 + $0x16] sm:$0x1] }
 0x8d9   :  { %5029 = vmatpush1.bf16.msra.mxu0 %v5003_v33  ;;  %v9387_v33 = vld [vmem:[%s11756_s0 + $0xf28] ss:$8 sps:$4 sm:$0xff]  }
 0x8dc   :  { %5041 = vmatmul.mubr.bf16.vlgmr.msra.gmra.mrb[36].mxu0 %v9667_v47 }
 0x8dd   :  { %5120 = vmatprep.mubr.f32.mxu0 %v9477_v58 }
 0x9af   :  { %v5042_v34 = vpop.f32.mrb[36].mxu0 }
 0x9b0   :  { %v5043_v61 = vadd.f32 %v5042_v34, %v10017_v48  ;;  %v5044_v60 = vpop.f32.mrb[37].mxu0  ;;  %v9392_v34 = vld [vmem:[%s11756_s0 + $0xf3c] ss:$8 sps:$4 sm:$0xff]  }
 0x9b1   :  { %v5045_v30 = vadd.f32 %v5044_v60, %v10017_v48  ;;  %v5046_v27 = vpop.f32.mrb[38].mxu0  ;;  %v9395_v60 = vld [vmem:[%s11756_s0 + $0xf4c] ss:$8 sps:$4 sm:$0xff]  }
 0x9b2   :  { %v5047_v25 = vpop.f32.mrb[39].mxu0  ;;  %v5049_v36 = vmax.f32 %v5043_v61, 0.0  ;;  %v9390_v61 = vld [vmem:[%s11756_s0 + $0xf38] ss:$8 sps:$4 sm:$0xff]  }
 0x9b3   :  { %v5050_v59 = vmax.f32 %v5045_v30, 0.0  ;;  %v9398_v30 = vld [vmem:[%s11756_s0 + $0xf5c] ss:$8 sps:$4 sm:$0xff]   ;;  %v9396_v27 = vld [vmem:[%s11756_s0 + $0xf58] ss:$8 sps:$4 sm:$0xff]  }
 0x9b4   :  { %v9399_v25 = vld [vmem:[%s11756_s0 + $0xf68] ss:$8 sps:$4 sm:$0xff]  }
 0x9b5   :  { %5056 = vmatprep.subr.mxu0 %v5050_v59  ;;  %v9404_v59 = vld [vmem:[%s11756_s0 + $0xf7c] ss:$8 sps:$4 sm:$0xff]  }
 0x9b6   :  { %5057 = vmatpush1.msra.mxu0 %v5049_v36  ;;  %v9402_v36 = vld [vmem:[%s11756_s0 + $0xf78] ss:$8 sps:$4 sm:$0xff]  }
 0x9b7   :  { %8075 = vmatmul.mubr.msk.f32.vlgmr.msra.gmra.mrb[4].mxu0 %vm408_vm2, %v8074_v37  ;;  %5310 = vmatprep.subr.mxu0 %v5304_v38  ;;  %v9407_v37 = vld [vmem:[%s11756_s0 + $0xf8c] ss:$8 sps:$4 sm:$0xff]   ;;  %v9405_v38 = vld [vmem:[%s11756_s0 + $0xf88] ss:$8 sps:$4 sm:$0xff]  }
 0x9b8   :  { %5311 = vmatpush1.msra.mxu0 %v5303_v2  ;;  %5374 = vmatprep.mubr.f32.mxu0 %v9477_v58  ;;  %v9408_v2 = vld [vmem:[%s11756_s0 + $0xf98] ss:$8 sps:$4 sm:$0xff]  }
 0x9b9   :  { %5516 = vmatprep.subr.bf16.mxu0 %v9354_v57  ;;  %v9410_v57 = vld [vmem:[%s11756_s0 + $0xf9c] ss:$8 sps:$4 sm:$0xff]  }
 0x9bf   :  { %8122 = vmatmul.mubr.msk.f32.vlgmr.msra.gmra.mrb[4].mxu0 %vm408_vm2, %v8121_v39  ;;  %v8237_v39 = vld [vmem:[%s11756_s0 + $0xfb8] sm:$0x11] }
 0x9c0   :  { %5517 = vmatpush1.bf16.msra.mxu0 %v9352_v1  ;;  %8167 = vmatprep.mubr.msk.bf16.mxu0 %vm175_vm0, %v9599_v23  ;;  %v9413_v1 = vld [vmem:[%s11756_s0 + $0xfac] ss:$8 sps:$4 sm:$0xff]  }
 0x9c1   :  { %5518 = vmatprep.subr.bf16.mxu0 %v9357_v40  ;;  %v9411_v40 = vld [vmem:[%s11756_s0 + $0xfa8] ss:$8 sps:$4 sm:$0xff]  }
 0x9c4   :  { %5519 = vmatpush1.bf16.msra.mxu0 %v9355_v41  ;;  %v8259_v41 = vcombine.high %v8237_v39, %v8237_v39 }
 0x9c5   :  { %5520 = vmatprep.subr.bf16.mxu0 %v9360_v42  ;;  %v8258_v42 = vcombine.low %v8237_v39, %v8237_v39 }
 0x9c8   :  { %5521 = vmatpush1.bf16.msra.mxu0 %v9358_v43  ;;  %v6019_v43 = vsel %vm179_vm1, %v8258_v42, 0 }
 0x9c9   :  { %5522 = vmatprep.subr.bf16.mxu0 %v9363_v44 }
 0x9cc   :  { %5523 = vmatpush1.bf16.msra.mxu0 %v9361_v45 }
 0x9cd   :  { %5524 = vmatprep.subr.bf16.mxu0 %v9366_v46 }
 0x9d0   :  { %5525 = vmatpush1.bf16.msra.mxu0 %v9364_v49  ;;  %v6315_v49 = vadd.f32 %v10856_v14, %v10017_v48 }
 0x9d1   :  { %5526 = vmatprep.subr.bf16.mxu0 %v9369_v53 }
 0x9d4   :  { %5527 = vmatpush1.bf16.msra.mxu0 %v9367_v55 }
 0x9d5   :  { %5528 = vmatprep.subr.bf16.mxu0 %v9372_v63  ;;  %v6313_v63 = vadd.f32 %v10854_v13, %v10017_v48  ;;  %v6567_v13 = vadd.f32 %v10917_v50, %v10017_v48  ;;  %v8356_v50 = vld [vmem:[%s11759_s3 + $0x19] sm:$0x1] }
 0x9d7   :  { %v6319_v12 = vmax.f32 %v6313_v63, 0.0  ;;  %v6944_v63 = vld [vmem:[%s11761_s5 + $0x58] sm:$0xff] }
 0x9d8   :  { %5529 = vmatpush1.bf16.msra.mxu0 %v9370_v0 }
 0x9d9   :  { %5530 = vmatprep.subr.bf16.mxu0 %v9375_v4  ;;  %v6569_v4 = vadd.f32 %v10922_v54, %v10017_v48  ;;  %v8309_v54 = vld [vmem:[%s11759_s3 + $0x18] sm:$0x1] }
 0x9db   :  { %v6574_v14 = vmax.f32 %v6569_v4, 0.0  ;;  %v6945_v4 = vld [vmem:[%s11761_s5 + $0x60] sm:$0xff] }
 0x9dc   :  { %5531 = vmatpush1.bf16.msra.mxu0 %v9373_v62 }
 0x9dd   :  { %5532 = vmatprep.subr.bf16.mxu0 %v9378_v56 }
 0x9e0   :  { %5533 = vmatpush1.bf16.msra.mxu0 %v9376_v5  ;;  %v8262_v5 = vld [vmem:[%s11759_s3 + $0x17] sm:$0x1] }
 0x9e1   :  { %5534 = vmatprep.subr.bf16.mxu0 %v9381_v10  ;;  %v6320_v10 = vmax.f32 %v6315_v49, 0.0  ;;  %v6942_v49 = vld [vmem:[%s11761_s5 + $0x48] sm:$0xff] }
 0x9e4   :  { %5535 = vmatpush1.bf16.msra.mxu0 %v9379_v29  ;;  %v9418_v29 = vld [vmem:[%s11756_s0 + $0x1114] ss:$8 sps:$4 sm:$0xff]  }
 0x9e5   :  { %8166 = vmatprep.subr.msk.bf16.mxu0 %vm179_vm1, %v8165_v15  ;;  %v6573_v15 = vmax.f32 %v6567_v13, 0.0 }
 0x9e8   :  { %5537 = vmatpush1.bf16.msra.mxu0 %v5511_v28  ;;  %v9421_v28 = vld [vmem:[%s11756_s0 + $0x1124] ss:$8 sps:$4 sm:$0xff]  }
 0x9eb   :  { %5549 = vmatmul.mubr.bf16.vlgmr.msra.gmra.mrb[40].mxu0 %v9667_v47 }
 0x9ec   :  { %5628 = vmatprep.mubr.f32.mxu0 %v9477_v58 }
 0xabe   :  { %v5550_v17 = vpop.f32.mrb[40].mxu0 }
 0xabf   :  { %v5551_v11 = vadd.f32 %v5550_v17, %v10017_v48  ;;  %v5552_v9 = vpop.f32.mrb[41].mxu0  ;;  %v9419_v17 = vld [vmem:[%s11756_s0 + $0x1120] ss:$8 sps:$4 sm:$0xff]  }
 0xac0   :  { %v5553_v18 = vadd.f32 %v5552_v9, %v10017_v48  ;;  %v5554_v19 = vpop.f32.mrb[42].mxu0  ;;  %v9422_v9 = vld [vmem:[%s11756_s0 + $0x1130] ss:$8 sps:$4 sm:$0xff]  }
 0xac1   :  { %v5555_v51 = vpop.f32.mrb[43].mxu0  ;;  %v5557_v22 = vmax.f32 %v5551_v11, 0.0  ;;  %v9424_v11 = vld [vmem:[%s11756_s0 + $0x1134] ss:$8 sps:$4 sm:$0xff]   ;;  %v9428_v19 = vld [vmem:[%s11756_s0 + $0x1150] ss:$8 sps:$4 sm:$0xff]  }
 0xac2   :  { %v5558_v21 = vmax.f32 %v5553_v18, 0.0  ;;  %v9430_v18 = vld [vmem:[%s11756_s0 + $0x1154] ss:$8 sps:$4 sm:$0xff]   ;;  %v9431_v51 = vld [vmem:[%s11756_s0 + $0x1160] ss:$8 sps:$4 sm:$0xff]  }
 0xac4   :  { %5564 = vmatprep.subr.mxu0 %v5558_v21  ;;  %v9436_v21 = vld [vmem:[%s11756_s0 + $0x1174] ss:$8 sps:$4 sm:$0xff]  }
 0xac5   :  { %5565 = vmatpush1.msra.mxu0 %v5557_v22  ;;  %v9434_v22 = vld [vmem:[%s11756_s0 + $0x1170] ss:$8 sps:$4 sm:$0xff]  }
 0xac6   :  { %8169 = vmatmul.mubr.msk.f32.vlgmr.msra.gmra.mrb[4].mxu0 %vm408_vm2, %v8168_v24  ;;  %5818 = vmatprep.subr.mxu0 %v5812_v31  ;;  %v9439_v24 = vld [vmem:[%s11756_s0 + $0x1184] ss:$8 sps:$4 sm:$0xff]   ;;  %v9437_v31 = vld [vmem:[%s11756_s0 + $0x1180] ss:$8 sps:$4 sm:$0xff]  }
 0xac7   :  { %5819 = vmatpush1.msra.mxu0 %v5811_v8  ;;  %5882 = vmatprep.mubr.f32.mxu0 %v9477_v58  ;;  %v9440_v8 = vld [vmem:[%s11756_s0 + $0x1190] ss:$8 sps:$4 sm:$0xff]  }
 0xac8   :  { %6024 = vmatprep.subr.bf16.mxu0 %v9386_v7  ;;  %v9442_v7 = vld [vmem:[%s11756_s0 + $0x1194] ss:$8 sps:$4 sm:$0xff]  }
 0xace   :  { %8216 = vmatmul.mubr.msk.f32.vlgmr.msra.gmra.mrb[4].mxu0 %vm408_vm2, %v8215_v3  ;;  %v8378_v3 = vld [vmem:[%s11756_s0 + $0x11b0] sm:$0x11] }
 0xacf   :  { %6025 = vmatpush1.bf16.msra.mxu0 %v9384_v6  ;;  %8261 = vmatprep.mubr.msk.bf16.mxu0 %vm175_vm0, %v9599_v23  ;;  %v9445_v6 = vld [vmem:[%s11756_s0 + $0x11a4] ss:$8 sps:$4 sm:$0xff]  }
 0xad0   :  { %6026 = vmatprep.subr.bf16.mxu0 %v9389_v32  ;;  %v9443_v32 = vld [vmem:[%s11756_s0 + $0x11a0] ss:$8 sps:$4 sm:$0xff]  }
 0xad3   :  { %6027 = vmatpush1.bf16.msra.mxu0 %v9387_v33  ;;  %v8400_v33 = vcombine.high %v8378_v3, %v8378_v3 }
 0xad4   :  { %6028 = vmatprep.subr.bf16.mxu0 %v9392_v34  ;;  %v8399_v34 = vcombine.low %v8378_v3, %v8378_v3  ;;  %v7040_v3 = vld [vmem:[%s11763_s7 + $0x28] sm:$0xff] }
 0xad7   :  { %6029 = vmatpush1.bf16.msra.mxu0 %v9390_v61  ;;  %v6781_v61 = vsel %vm179_vm1, %v8399_v34, 0  ;;  %v8405_v34 = vld [vmem:[%s11762_s6] ss:$0 sm:$0xff]  ;;  %s9482_s6 = smov [#allocation3]  }
 0xad8   :  { %6030 = vmatprep.subr.bf16.mxu0 %v9395_v60 }
 0xadb   :  { %6031 = vmatpush1.bf16.msra.mxu0 %v9393_v35 }
 0xadc   :  { %6032 = vmatprep.subr.bf16.mxu0 %v9398_v30 }
 0xadf   :  { %6033 = vmatpush1.bf16.msra.mxu0 %v9396_v27 }
 0xae0   :  { %6034 = vmatprep.subr.bf16.mxu0 %v9401_v26 }
 0xae3   :  { %6035 = vmatpush1.bf16.msra.mxu0 %v9399_v25 }
 0xae4   :  { %6036 = vmatprep.subr.bf16.mxu0 %v9404_v59 }
 0xae7   :  { %6037 = vmatpush1.bf16.msra.mxu0 %v9402_v36 }
 0xae8   :  { %6038 = vmatprep.subr.bf16.mxu0 %v9407_v37  ;;  %v8403_v37 = vld [vmem:[%s11759_s3 + $0x1a] sm:$0x1] }
 0xaeb   :  { %6039 = vmatpush1.bf16.msra.mxu0 %v9405_v38  ;;  %v6935_v38 = vld [vmem:[%s11761_s5 + $0x10] sm:$0xff] }
 0xaec   :  { %6040 = vmatprep.subr.bf16.mxu0 %v9410_v57  ;;  %v9478_v57 = vmov 0.0|0.0  }
 0xaed   :  { %8488 = vmatprep.subr.bf16.mxu1 %v9478_v57 }
 0xaef   :  { %6041 = vmatpush1.bf16.msra.mxu0 %v9408_v2 }
 0xaf0   :  { %6042 = vmatprep.subr.bf16.mxu0 %v9413_v1  ;;  %v6936_v1 = vld [vmem:[%s11761_s5 + $0x18] sm:$0xff] }
 0xaf1   :  { %v8492_v39 = vpack.c.bf16 %v6936_v1, %v6935_v38 }
 0xaf3   :  { %6043 = vmatpush1.bf16.msra.mxu0 %v9411_v40  ;;  %v6937_v40 = vld [vmem:[%s11761_s5 + $0x20] sm:$0xff] }
 0xaf4   :  { %8260 = vmatprep.subr.msk.bf16.mxu0 %vm179_vm1, %v8259_v41  ;;  %v6938_v41 = vld [vmem:[%s11761_s5 + $0x28] sm:$0xff] }
 0xaf5   :  { %v8495_v42 = vpack.c.bf16 %v6938_v41, %v6937_v40 }
 0xaf7   :  { %6045 = vmatpush1.bf16.msra.mxu0 %v6019_v43  ;;  %v6939_v43 = vld [vmem:[%s11761_s5 + $0x30] sm:$0xff] }
 0xafa   :  { %6057 = vmatmul.mubr.bf16.vlgmr.msra.gmra.mrb[44].mxu0 %v9667_v47 }
 0xafb   :  { %6136 = vmatprep.mubr.f32.mxu0 %v9477_v58 }
 0xbcd   :  { %v6058_v44 = vpop.f32.mrb[44].mxu0 }
 0xbce   :  { %v6059_v45 = vadd.f32 %v6058_v44, %v10017_v48  ;;  %v6060_v46 = vpop.f32.mrb[45].mxu0  ;;  %v6940_v44 = vld [vmem:[%s11761_s5 + $0x38] sm:$0xff] }
 0xbcf   :  { %v6061_v53 = vadd.f32 %v6060_v46, %v10017_v48  ;;  %v6062_v55 = vpop.f32.mrb[46].mxu0  ;;  %v6941_v46 = vld [vmem:[%s11761_s5 + $0x40] sm:$0xff] }
 0xbd0   :  { %v6063_v0 = vpop.f32.mrb[47].mxu0  ;;  %v6065_v56 = vmax.f32 %v6059_v45, 0.0  ;;  %v8498_v45 = vpack.c.bf16 %v6940_v44, %v6939_v43  ;;  %v6943_v55 = vld [vmem:[%s11761_s5 + $0x50] sm:$0xff] }
 0xbd1   :  { %v6066_v62 = vmax.f32 %v6061_v53, 0.0  ;;  %v8501_v53 = vpack.c.bf16 %v6942_v49, %v6941_v46  ;;  %v8504_v0 = vpack.c.bf16 %v6944_v63, %v6943_v55 }
 0xbd3   :  { %6072 = vmatprep.subr.mxu0 %v6066_v62  ;;  %v6946_v62 = vld [vmem:[%s11761_s5 + $0x68] sm:$0xff] }
 0xbd4   :  { %6073 = vmatpush1.msra.mxu0 %v6065_v56  ;;  %v8507_v56 = vpack.c.bf16 %v6946_v62, %v6945_v4 }
 0xbd5   :  { %8263 = vmatmul.mubr.msk.f32.vlgmr.msra.gmra.mrb[4].mxu0 %vm408_vm2, %v8262_v5  ;;  %6326 = vmatprep.subr.mxu0 %v6320_v10  ;;  %v6913_v5 = vlaneseq }
 0xbd6   :  { %6327 = vmatpush1.msra.mxu0 %v6319_v12  ;;  %6390 = vmatprep.mubr.f32.mxu0 %v9477_v58  ;;  %v6947_v12 = vld [vmem:[%s11761_s5 + $0x70] sm:$0xff] }
 0xbd7   :  { %6580 = vmatprep.subr.mxu0 %v6574_v14  ;;  %v6914_v10 = vshrl.u32 %v6913_v5, 7  ;;  %v6948_v14 = vld [vmem:[%s11761_s5 + $0x78] sm:$0x1f] }
 0xbd8   :  { %v8510_v13 = vpack.c.bf16 %v6948_v14, %v6947_v12 }
 0xbdd   :  { %8310 = vmatmul.mubr.msk.f32.vlgmr.msra.gmra.mrb[4].mxu0 %vm408_vm2, %v8309_v54  ;;  %v6915_v54 = vsub.s32 0, %v6914_v10 }
 0xbde   :  { %6581 = vmatpush1.msra.mxu0 %v6573_v15  ;;  %6644 = vmatprep.mubr.f32.mxu0 %v9477_v58 }
 0xbdf   :  { %6786 = vmatprep.subr.bf16.mxu0 %v9418_v29  ;;  %v6911_v29 = vpop.permute.xlu0 %6910 }
 0xbe0   :  { %v6916_v15 = vrot.slane %v6911_v29, %v6915_v54 }
 0xbe5   :  { %8357 = vmatmul.mubr.msk.f32.vlgmr.msra.gmra.mrb[4].mxu0 %vm408_vm2, %v8356_v50  ;;  %v7035_v50 = vld [vmem:[%s11763_s7] sm:$0xff] }
 0xbe6   :  { %6787 = vmatpush1.bf16.msra.mxu0 %v9416_v16  ;;  %8402 = vmatprep.mubr.msk.bf16.mxu0 %vm175_vm0, %v9599_v23  ;;  %v9425_v23 = vld [vmem:[%s11756_s0 + $0x1140] ss:$8 sps:$4 sm:$0xff]  }
 0xbe7   :  { %6788 = vmatprep.subr.bf16.mxu0 %v9421_v28  ;;  %v7036_v28 = vld [vmem:[%s11763_s7 + $0x8] sm:$0xff] }
 0xbea   :  { %6789 = vmatpush1.bf16.msra.mxu0 %v9419_v17  ;;  %v7037_v17 = vld [vmem:[%s11763_s7 + $0x10] sm:$0xff] }
 0xbeb   :  { %6790 = vmatprep.subr.bf16.mxu0 %v9424_v11 }
 0xbee   :  { %6791 = vmatpush1.bf16.msra.mxu0 %v9422_v9 }
 0xbef   :  { %6792 = vmatprep.subr.bf16.mxu0 %v9427_v52  ;;  %v8514_v52 = vpack.c.bf16 %v7036_v28, %v7035_v50 }
 0xbf2   :  { %6793 = vmatpush1.bf16.msra.mxu0 %v9425_v23  ;;  %v7038_v23 = vld [vmem:[%s11763_s7 + $0x18] sm:$0xff] }
 0xbf3   :  { %6794 = vmatprep.subr.bf16.mxu0 %v9430_v18 }
 0xbf6   :  { %6795 = vmatpush1.bf16.msra.mxu0 %v9428_v19 }
 0xbf7   :  { %6796 = vmatprep.subr.bf16.mxu0 %v9433_v20  ;;  %v8517_v20 = vpack.c.bf16 %v7038_v23, %v7037_v17 }
 0xbfa   :  { %6797 = vmatpush1.bf16.msra.mxu0 %v9431_v51 }
 0xbfb   :  { %6798 = vmatprep.subr.bf16.mxu0 %v9436_v21 }
 0xbfe   :  { %6799 = vmatpush1.bf16.msra.mxu0 %v9434_v22 }
 0xbff   :  { %6800 = vmatprep.subr.bf16.mxu0 %v9439_v24 }
 0xc02   :  { %6801 = vmatpush1.bf16.msra.mxu0 %v9437_v31 }
 0xc03   :  { %6802 = vmatprep.subr.bf16.mxu0 %v9442_v7 }
 0xc06   :  { %6803 = vmatpush1.bf16.msra.mxu0 %v9440_v8 }
 0xc07   :  { %6804 = vmatprep.subr.bf16.mxu0 %v9445_v6  ;;  %v7039_v6 = vld [vmem:[%s11763_s7 + $0x20] sm:$0xff] }
 0xc0a   :  { %6805 = vmatpush1.bf16.msra.mxu0 %v9443_v32  ;;  %v8520_v32 = vpack.c.bf16 %v7040_v3, %v7039_v6 }
 0xc0b   :  { %8401 = vmatprep.subr.msk.bf16.mxu0 %vm179_vm1, %v8400_v33  ;;  %v7041_v33 = vld [vmem:[%s11763_s7 + $0x30] sm:$0x3]  ;;  %s7148_s7 = sshll.u32 %s9482_s6, 4  ;;  %s7149_s7 = int_to_ptr.vmem [resolvable:$true] %s7148_s7 }
 0xc0c   :  { %p9457_p1 = scmp.lt.s32.totalorder %s7149_s7, %s7149_s7 }
 0xc0e   :  { %6807 = vmatpush1.bf16.msra.mxu0 %v6781_v61 }
 0xc11   :  { %6819 = vmatmul.mubr.bf16.vlgmr.msra.gmra.mrb[48].mxu0 %v9667_v47  ;;  %v6933_v47 = vld [vmem:[%s11761_s5] sm:$0xff] }
 0xc12   :  { %6898 = vmatprep.mubr.f32.mxu0 %v9477_v58 }
 0xce4   :  { %v6820_v60 = vpop.f32.mrb[48].mxu0 }
 0xce5   :  { %v6821_v35 = vadd.f32 %v6820_v60, %v10017_v48  ;;  %v6822_v30 = vpop.f32.mrb[49].mxu0 }
 0xce6   :  { %v6823_v27 = vadd.f32 %v6822_v30, %v10017_v48  ;;  %v6824_v26 = vpop.f32.mrb[50].mxu0  ;;  %v6934_v48 = vld [vmem:[%s11761_s5 + $0x8] sm:$0xff] }
 0xce7   :  { %v6825_v25 = vpop.f32.mrb[51].mxu0  ;;  %v6827_v36 = vmax.f32 %v6821_v35, 0.0  ;;  %v8489_v2 = vpack.c.bf16 %v6934_v48, %v6933_v47 }
 0xce8   :  { %v6828_v59 = vmax.f32 %v6823_v27, 0.0 }
 0xce9   :  { %8490 = vmatpush3.bf16.msra.mxu1 %v8489_v2 }
 0xcea   :  { %6834 = vmatprep.subr.mxu0 %v6828_v59  ;;  %8491 = vmatprep.subr.bf16.mxu1 %v9478_v57 }
 0xceb   :  { %6835 = vmatpush1.msra.mxu0 %v6827_v36 }
 0xcec   :  { %8404 = vmatmul.mubr.msk.f32.vlgmr.msra.gmra.mrb[4].mxu0 %vm408_vm2, %v8403_v37  ;;  %8513 = vmatprep.subr.bf16.mxu0 %v9478_v57 }
 0xced   :  { %8493 = vmatpush3.bf16.msra.mxu1 %v8492_v39  ;;  %8485 = vmatprep.mubr.msk.f32.mxu0 %vm9480_vm6, %v9477_v58 }
 0xcee   :  { %8494 = vmatprep.subr.bf16.mxu1 %v9478_v57  ;;  %8515 = vmatpush3.bf16.msra.mxu0 %v8514_v52 }
 0xcef   :  { %8516 = vmatprep.subr.bf16.mxu0 %v9478_v57 }
 0xcf1   :  { %8496 = vmatpush3.bf16.msra.mxu1 %v8495_v42 }
 0xcf2   :  { %8497 = vmatprep.subr.bf16.mxu1 %v9478_v57  ;;  %8518 = vmatpush3.bf16.msra.mxu0 %v8517_v20 }
 0xcf3   :  { %8519 = vmatprep.subr.bf16.mxu0 %v9478_v57 }
 0xcf5   :  { %8499 = vmatpush3.bf16.msra.mxu1 %v8498_v45 }
 0xcf6   :  { %8500 = vmatprep.subr.bf16.mxu1 %v9478_v57  ;;  %8521 = vmatpush3.bf16.msra.mxu0 %v8520_v32 }
 0xcf7   :  { %8483 = vmatprep.subr.mxu0 %v9477_v58  ;;  %v8408_v58 = vld [vmem:[%s11764_s8] ss:$0 sm:$0xff]  ;;  %s9452_s8 = scalar_lea.vmem %s7149_s7, 32 }
 0xcf8   :  { %p9453_p0 = scmp.ne.s32.totalorder %s7149_s7, %s9452_s8  ;;  %p9458_p2 = scmp.lt.s32.totalorder %s9452_s8, %s9452_s8 }
 0xcf9   :  { %8502 = vmatpush3.bf16.msra.mxu1 %v8501_v53 }
 0xcfa   :  { %8503 = vmatprep.subr.bf16.mxu1 %v9478_v57  ;;  %8484 = vmatpush3.msk.msra.mxu0 %vm7053_vm9, %v7041_v33  ;;  %p9459_p3 = por %p9458_p2, %p9457_p1 }
 0xcfc   :  { %p9460_p4 = pnand %p9459_p3, %p9453_p0 }
 0xcfd   :  { %8505 = vmatpush3.bf16.msra.mxu1 %v8504_v0 }
 0xcfe   :  { %8506 = vmatprep.subr.bf16.mxu1 %v9478_v57 }
 0xd01   :  { %8508 = vmatpush3.bf16.msra.mxu1 %v8507_v56 }
 0xd02   :  { %8509 = vmatprep.subr.bf16.mxu1 %v9478_v57 }
 0xd05   :  { %8512 = vmatpush3.bf16.msk.msra.mxu1 %vm8511_vm5, %v8510_v13 }
 0xdbf   :  { %v6900_v16 = vpop.f32.mrb[4].mxu0 }
 0xdc0   :  { %v6917_v11 = vadd.f32 %v6916_v15, %v6900_v16  ;;  %v6902_v9 = vpop.f32.mrb[5].mxu0 }
 0xdc1   :  { %v6918_v18 = vadd.f32 %v6916_v15, %v6902_v9 }
 0xdc2   :  { %v6919_v19 = vmax.f32 %v6917_v11, 0.0 }
 0xdc3   :  { %v6920_v51 = vmax.f32 %v6918_v18, 0.0 }
 0xdc4   :  { %v6923_v21 = vrot.slane %v6919_v19, 7 }
 0xdc5   :  { %v6924_v22 = vrot.slane %v6920_v51, 7 }
 0xdc6   :  { %6925 = vrot.lane.b32.xlu1 %v6923_v21, %s9481_s4 }
 0xdca   :  { %6927 = vrot.lane.b32.xlu1 %v6924_v22, %s9481_s4 }
 0xe38   :  { %v6926_v24 = vpop.permute.xlu1 %6925 }
 0xe3c   :  { %v6928_v31 = vpop.permute.xlu1 %6927 }
 0xe3d   :  { %v6930_v7 = vsel %vm6929_vm7, %v6926_v24, %v6928_v31 }
 0xe3e   :  { %v6932_v8 = vsel %vm179_vm1, %v6919_v19, %v6930_v7 }
 0xe3f   :  { %8469 = vmatmul.mubr.msk.f32.vlgmr.msra.gmra.mrb[60].mxu1 %vm6956_vm8, %v6932_v8 }
 0xf12   :  { %v7030_v61 = vpop.f32.mrb[60].mxu1 }
 0xf13   :  { %v7031_v60 = vadd.f32 %v8405_v34, %v7030_v61  ;;  %v8470_v35 = vpop.f32.mrb[61].mxu1 }
 0xf15   :  { %v7034_v30 = vmax.f32 %v7031_v60, 0.0 }
 0xf17   :  { %8486 = vmatmul.mubr.msk.f32.vlgmr.msra.gmra.mrb[6].mxu0 %vm7049_vm10, %v7034_v30 }
 0xfea   :  { %v7123_v27 = vpop.f32.mrb[6].mxu0 }
 0xfeb   :  { %v7124_v26 = vadd.f32 %v8408_v58, %v7123_v27  ;;  %v8487_v25 = vpop.f32.mrb[7].mxu0 }
 0xfed   :  { %v7128_v59 = vsel %vm7127_vm11, %v7124_v26, -inf }
 0xfee   :  { %7129 = vmax.xlane.f32.xlu0 %v7128_v59 }
0x107b   :  { %v7130_v36 = vpop.xlane.xlu0 %7129 }
0x107c   :  { %v7131_v37 = vsub.f32 %v7124_v26, %v7130_v36 }
0x107e   :  { %v7132_v47 = vmul.f32 1.442695, %v7131_v37 }
0x1080   :  { %9448 = vpow2.f32 %v7132_v47 }
0x108a   :  { %v9449_v48 = vpop.eup %9448 }
0x108b   :  { %v7134_v38 = vsel %vm7127_vm11, %v9449_v48, 0.0 }
0x108c   :  { %7135 = vadd.xlane.f32.xlu1 %v7134_v38 }
0x1119   :  { %v7136_v57 = vpop.xlane.xlu1 %7135 }
0x111a   :  { %9450 = vlog2.f32 %v7136_v57 }
0x1124   :  { %v9451_v2 = vpop.eup %9450 }
0x1125   :  { %v7138_v1 = vmul.f32 0.6931472, %v9451_v2 }
0x1127   :  { %v7139_v39 = vadd.f32 %v7138_v1, %v7130_v36 }
0x1129   :  { %v7140_v40 = vsub.f32 %v7124_v26, %v7139_v39 }
0x112b   :  { %7141 = vst.msk [vmem:[#allocation3] sm:$0x3] %vm7127_vm11, %v7140_v40 }
0x112c   :  { %9463 = shalt.err (!%p9460_p4)
}
0x112d   :  { %s9464_s29 = scalar_lea.hbm %s11765_s9, 32 }
0x112e   :  { %p9465_p5 = scmp.ne.s32.totalorder %s11765_s9, %s9464_s29  ;;  %p9468_p6 = scmp.lt.u32.totalorder %s9464_s29, %s11765_s9 }
0x1130   :  { %p9470_p7 = pnand %p9468_p6, %p9465_p5 }
0x1132   :  { %9473 = shalt.err (!%p9470_p7)
}
0x1133   :  { %7151 = dma.vmem_to_hbm [thread:$0]  %s7149_s7, 32, %s11765_s9, [#allocation4]  }
0x1134   :  { %9474 = dma.done.wait [#allocation4], 32  }
0x1135   :  { %9475 = vsyncadd [#allocation4], 4294967264 }
0x1136   :  { %7155 = vsyncpa [#allocation4], 1 }

</bundles_post_ra>
